<compile_context>
chip_gen: v7x
topology: tpu7x:2x2x1
jax: 0.10.0
libtpu: 0.0.40
codegen_flags: <defaults>
</compile_context>

<pallas_src>
import functools

import numpy as np
import jax
import jax.numpy as jnp
from jax.experimental import pallas as pl
from jax.experimental.pallas import tpu as pltpu


# ----------------------------- fused Pallas kernel --------------------------

def _rk3_kernel(x_ref, a_ref, w_ref, b_ref, o_ref,
                pad_ref, k1_ref, k2_ref,
                *, H, W, C, K, scales):
    """Fused RK3 forward for one batch element.

    x_ref  : (1, H, W, C)        input block
    a_ref  : (3, 1, C)           PReLU slopes, one row per stage
    w_ref  : (3, K*K*C, C)       conv weights per stage (HWIO flattened over (ky,kx,ci))
    b_ref  : (3, 1, C)           conv biases per stage
    o_ref  : (1, H, W, C)        output block
    pad_ref: (H+K-1, W+K-1, C)   VMEM scratch: zero halo + current stage's activations
    k1_ref, k2_ref : (H*W, C)    VMEM scratch for stage outputs that get reused
    """
    pad = K // 2
    HW = H * W
    s0, s1, s2, s3, s4 = scales

    # Zero the halo buffer every grid step (borders are never written again; the interior
    # is fully overwritten by each stage).  Doing it unconditionally keeps the kernel
    # correct when the batch axis is split across TensorCores (v7x megacore).
    pad_ref[...] = jnp.zeros_like(pad_ref)

    def prelu_conv(v, s):
        """v: (H*W, C) f32 pre-activation for stage s -> (H*W, C) f32 conv output."""
        a = a_ref[s]                                           # (1, C)
        y = jnp.where(v > 0, v, a * v)                         # PReLU; prelu(0)=0 so zero halo stays valid
        pad_ref[pl.ds(pad, H), pl.ds(pad, W), :] = (
            y.astype(pad_ref.dtype).reshape(H, W, C))
        yp = pad_ref[...]                                      # (H+K-1, W+K-1, C)
        # im2col: gather the K*K shifted windows once, contract in a single MXU matmul.
        cols = [yp[dy:dy + H, dx:dx + W, :].reshape(HW, C)
                for dy in range(K) for dx in range(K)]
        patches = jnp.concatenate(cols, axis=-1)               # (H*W, K*K*C)
        acc = jnp.dot(patches, w_ref[s], preferred_element_type=jnp.float32)
        return acc + b_ref[s]                                  # (H*W, C) f32

    def load_x():
        return x_ref[0].reshape(HW, C).astype(jnp.float32)

    k1_ref[...] = prelu_conv(load_x(), 0)
    yn1 = s0 * k1_ref[...] + load_x()                          # 0.5*k1 + x
    k2_ref[...] = prelu_conv(yn1, 1)
    yn2 = s1 * k2_ref[...] + s2 * k1_ref[...] + load_x()       # 2*k2 - k1 + x
    k3 = prelu_conv(yn2, 2)
    out = s3 * k2_ref[...] + s4 * (k3 + k1_ref[...]) + load_x()  # (2/3)k2 + (1/6)(k3+k1) + x

    # NOTE: output stays (H, W, C).  A lane-dense (H, W*C) slab would need a minor-dim
    # merging reshape (relayout); negligible win at this size, so it is skipped.
    o_ref[0] = out.reshape(H, W, C).astype(o_ref.dtype)


# ----------------------------- wrapper --------------------------------------

def rk3_forward(x, params, *, mm_dtype=jnp.float32):
    """Fused Pallas implementation of RK3.forward (NHWC).

    x                : (N, H, W, C) activations.
    params["ms"]     : [(alpha (C,), w (K,K,C,C) HWIO, bias (C,))] * 3
    params["scales"] : 5 python floats (0.5, 2, -1, 2/3, 1/6), baked in as constants.
    mm_dtype         : matmul operand dtype (jnp.bfloat16 recommended on v6e/v7x).
    """
    N, H, W, C = x.shape
    K = params["ms"][0][1].shape[0]
    scales = tuple(float(s) for s in params["scales"])

    a_stack = jnp.stack([a.reshape(1, C) for (a, _, _) in params["ms"]])           # (3,1,C)
    w_stack = jnp.stack([w.reshape(K * K * C, C) for (_, w, _) in params["ms"]])   # (3,K*K*C,C)
    b_stack = jnp.stack([b.reshape(1, C) for (_, _, b) in params["ms"]])           # (3,1,C)
    w_stack = w_stack.astype(mm_dtype)

    kernel = functools.partial(_rk3_kernel, H=H, W=W, C=C, K=K, scales=scales)
    return pl.pallas_call(
        kernel,
        out_shape=jax.ShapeDtypeStruct((N, H, W, C), x.dtype),
        grid=(N,),
        in_specs=[
            pl.BlockSpec((1, H, W, C), lambda n: (n, 0, 0, 0)),      # x (per-batch block)
            pl.BlockSpec((3, 1, C), lambda n: (0, 0, 0)),            # PReLU slopes
            pl.BlockSpec((3, K * K * C, C), lambda n: (0, 0, 0)),    # conv weights (im2col layout)
            pl.BlockSpec((3, 1, C), lambda n: (0, 0, 0)),            # conv biases
        ],
        out_specs=pl.BlockSpec((1, H, W, C), lambda n: (n, 0, 0, 0)),
        scratch_shapes=[
            pltpu.VMEM((H + K - 1, W + K - 1, C), mm_dtype),         # zero-halo activation buffer
            pltpu.VMEM((H * W, C), jnp.float32),                     # k1
            pltpu.VMEM((H * W, C), jnp.float32),                     # k2
        ],
        compiler_params=pltpu.CompilerParams(
            dimension_semantics=("parallel",)),                      # 2-way split across TCs on v7x
    )(x, a_stack, w_stack, b_stack)


# ----------------------------- pure-JAX reference ---------------------------

def _prelu_conv_ref(x, alpha, wgt, bias):
    y = jnp.where(x >= 0, x, alpha * x)
    out = jax.lax.conv_general_dilated(
        y, wgt, window_strides=(1, 1), padding="SAME",
        dimension_numbers=("NHWC", "HWIO", "NHWC"))
    return out + bias


def rk3_ref(x, params):
    (a1, w1, b1), (a2, w2, b2), (a3, w3, b3) = params["ms"]
    s0, s1, s2, s3, s4 = params["scales"]
    k1 = _prelu_conv_ref(x, a1, w1, b1)
    yn_1 = s0 * k1 + x
    k2 = _prelu_conv_ref(yn_1, a2, w2, b2)
    yn_2 = s1 * k2 + s2 * k1 + x
    k3 = _prelu_conv_ref(yn_2, a3, w3, b3)
    return s3 * k2 + s4 * (k3 + k1) + x


# ----------------------------- main ------------------------------------------

if __name__ == "__main__":
    N, H, W, C, K = 2, 16, 16, 64, 3   # x_torch would be (2, 64, 16, 16) NCHW

    key = jax.random.PRNGKey(0)
    kx, *kw = jax.random.split(key, 7)

    x = jax.random.normal(kx, (N, H, W, C), dtype=jnp.float32)

    def make_branch(kw_w, kw_b):
        alpha = jnp.full((C,), 0.25, dtype=jnp.float32)              # nn.PReLU(n, 0.25)
        scale = 1.0 / np.sqrt(K * K * C)                             # ~ conv default init scale
        wgt = scale * jax.random.normal(kw_w, (K, K, C, C), dtype=jnp.float32)
        bias = scale * jax.random.normal(kw_b, (C,), dtype=jnp.float32)
        return alpha, wgt, bias

    params = {
        "ms": [make_branch(kw[0], kw[1]),
               make_branch(kw[2], kw[3]),
               make_branch(kw[4], kw[5])],
        "scales": (0.5, 2.0, -1.0, 2.0 / 3.0, 1.0 / 6.0),
    }

    out = jax.block_until_ready(rk3_forward(x, params))             # f32 path (use mm_dtype=bf16 on v6e/v7x)
    ref = jax.block_until_ready(rk3_ref(x, params))

    assert out.shape == (N, H, W, C) and out.dtype == jnp.float32
    np.testing.assert_allclose(np.asarray(out), np.asarray(ref), rtol=1e-3, atol=1e-3)

    print("KERNEL_OK")
</pallas_src>

<mosaic_0001>
module attributes {stable_mosaic.version = 11 : i64} {
  func.func @_rk3_kernel(%arg0: i32, %arg1: memref<1x16x16x64xf32, #tpu.memory_space<vmem>>, %arg2: memref<3x1x64xf32, #tpu.memory_space<vmem>>, %arg3: memref<3x576x64xf32, #tpu.memory_space<vmem>>, %arg4: memref<3x1x64xf32, #tpu.memory_space<vmem>>, %arg5: memref<1x16x16x64xf32, #tpu.memory_space<vmem>>, %arg6: memref<18x18x64xf32, #tpu.memory_space<vmem>>, %arg7: memref<256x64xf32, #tpu.memory_space<vmem>>, %arg8: memref<256x64xf32, #tpu.memory_space<vmem>>) attributes {dimension_semantics = [#tpu.dimension_semantics<parallel>], iteration_bounds = array<i64: 2>, scalar_prefetch = 0 : i64, scratch_operands = 3 : i64, tpu.core_type = #tpu.core_type<tc>, window_params = [{transform_indices = @transform_0, window_bounds = array<i64: 1, 16, 16, 64>}, {pipeline_mode = #tpu.pipeline_mode<synchronous>, transform_indices = @transform_1, window_bounds = array<i64: 3, 1, 64>}, {pipeline_mode = #tpu.pipeline_mode<synchronous>, transform_indices = @transform_2, window_bounds = array<i64: 3, 576, 64>}, {pipeline_mode = #tpu.pipeline_mode<synchronous>, transform_indices = @transform_3, window_bounds = array<i64: 3, 1, 64>}, {transform_indices = @transform_4, window_bounds = array<i64: 1, 16, 16, 64>}]} {
    %cst = arith.constant 0.000000e+00 : f32
    %0 = vector.broadcast %cst : f32 to vector<18x18x64xf32>
    %c0 = arith.constant 0 : index
    %c0_0 = arith.constant 0 : index
    %c0_1 = arith.constant 0 : index
    %1 = vector.load %arg6[%c0, %c0_0, %c0_1] : memref<18x18x64xf32, #tpu.memory_space<vmem>>, vector<18x18x64xf32>
    tpu.vector_store %arg6[%c0, %c0_0, %c0_1], %0 {strides = array<i32>} : memref<18x18x64xf32, #tpu.memory_space<vmem>>, vector<18x18x64xf32>,
    %c0_2 = arith.constant 0 : index
    %c0_3 = arith.constant 0 : index
    %c0_4 = arith.constant 0 : index
    %c0_5 = arith.constant 0 : index
    %2 = vector.load %arg1[%c0_2, %c0_3, %c0_4, %c0_5] : memref<1x16x16x64xf32, #tpu.memory_space<vmem>>, vector<1x16x16x64xf32>
    %3 = vector.shape_cast %2 : vector<1x16x16x64xf32> to vector<16x16x64xf32>
    %4 = vector.shape_cast %3 : vector<16x16x64xf32> to vector<256x64xf32>
    %c0_6 = arith.constant 0 : index
    %c0_7 = arith.constant 0 : index
    %c0_8 = arith.constant 0 : index
    %5 = vector.load %arg2[%c0_6, %c0_7, %c0_8] : memref<3x1x64xf32, #tpu.memory_space<vmem>>, vector<1x1x64xf32>
    %6 = vector.shape_cast %5 : vector<1x1x64xf32> to vector<1x64xf32>
    %cst_9 = arith.constant 0.000000e+00 : f32
    %7 = vector.broadcast %cst_9 : f32 to vector<256x64xf32>
    %8 = arith.cmpf ogt, %4, %7 : vector<256x64xf32>
    %9 = vector.broadcast %6 : vector<1x64xf32> to vector<256x64xf32>
    %10 = arith.mulf %9, %4 : vector<256x64xf32>
    %11 = arith.select %8, %4, %10 : vector<256x64xi1>, vector<256x64xf32>
    %12 = vector.shape_cast %11 : vector<256x64xf32> to vector<16x16x64xf32>
    %c1 = arith.constant 1 : index
    %c1_10 = arith.constant 1 : index
    %c0_11 = arith.constant 0 : index
    %13 = vector.load %arg6[%c1, %c1_10, %c0_11] : memref<18x18x64xf32, #tpu.memory_space<vmem>>, vector<16x16x64xf32>
    tpu.vector_store %arg6[%c1, %c1_10, %c0_11], %12 {strides = array<i32>} : memref<18x18x64xf32, #tpu.memory_space<vmem>>, vector<16x16x64xf32>,
    %c0_12 = arith.constant 0 : index
    %c0_13 = arith.constant 0 : index
    %c0_14 = arith.constant 0 : index
    %14 = vector.load %arg6[%c0_12, %c0_13, %c0_14] : memref<18x18x64xf32, #tpu.memory_space<vmem>>, vector<18x18x64xf32>
    %15 = vector.extract_strided_slice %14 {offsets = [0, 0, 0], sizes = [16, 16, 64], strides = [1, 1, 1]} : vector<18x18x64xf32> to vector<16x16x64xf32>
    %16 = vector.shape_cast %15 : vector<16x16x64xf32> to vector<256x64xf32>
    %17 = vector.extract_strided_slice %14 {offsets = [0, 1, 0], sizes = [16, 16, 64], strides = [1, 1, 1]} : vector<18x18x64xf32> to vector<16x16x64xf32>
    %18 = vector.shape_cast %17 : vector<16x16x64xf32> to vector<256x64xf32>
    %19 = vector.extract_strided_slice %14 {offsets = [0, 2, 0], sizes = [16, 16, 64], strides = [1, 1, 1]} : vector<18x18x64xf32> to vector<16x16x64xf32>
    %20 = vector.shape_cast %19 : vector<16x16x64xf32> to vector<256x64xf32>
    %21 = vector.extract_strided_slice %14 {offsets = [1, 0, 0], sizes = [16, 16, 64], strides = [1, 1, 1]} : vector<18x18x64xf32> to vector<16x16x64xf32>
    %22 = vector.shape_cast %21 : vector<16x16x64xf32> to vector<256x64xf32>
    %23 = vector.extract_strided_slice %14 {offsets = [1, 1, 0], sizes = [16, 16, 64], strides = [1, 1, 1]} : vector<18x18x64xf32> to vector<16x16x64xf32>
    %24 = vector.shape_cast %23 : vector<16x16x64xf32> to vector<256x64xf32>
    %25 = vector.extract_strided_slice %14 {offsets = [1, 2, 0], sizes = [16, 16, 64], strides = [1, 1, 1]} : vector<18x18x64xf32> to vector<16x16x64xf32>
    %26 = vector.shape_cast %25 : vector<16x16x64xf32> to vector<256x64xf32>
    %27 = vector.extract_strided_slice %14 {offsets = [2, 0, 0], sizes = [16, 16, 64], strides = [1, 1, 1]} : vector<18x18x64xf32> to vector<16x16x64xf32>
    %28 = vector.shape_cast %27 : vector<16x16x64xf32> to vector<256x64xf32>
    %29 = vector.extract_strided_slice %14 {offsets = [2, 1, 0], sizes = [16, 16, 64], strides = [1, 1, 1]} : vector<18x18x64xf32> to vector<16x16x64xf32>
    %30 = vector.shape_cast %29 : vector<16x16x64xf32> to vector<256x64xf32>
    %31 = vector.extract_strided_slice %14 {offsets = [2, 2, 0], sizes = [16, 16, 64], strides = [1, 1, 1]} : vector<18x18x64xf32> to vector<16x16x64xf32>
    %32 = vector.shape_cast %31 : vector<16x16x64xf32> to vector<256x64xf32>
    %33 = tpu.concatenate %16, %18, %20, %22, %24, %26, %28, %30, %32 in 1 : vector<256x64xf32>, vector<256x64xf32>, vector<256x64xf32>, vector<256x64xf32>, vector<256x64xf32>, vector<256x64xf32>, vector<256x64xf32>, vector<256x64xf32>, vector<256x64xf32> -> vector<256x576xf32>
    %c0_15 = arith.constant 0 : index
    %c0_16 = arith.constant 0 : index
    %c0_17 = arith.constant 0 : index
    %34 = vector.load %arg3[%c0_15, %c0_16, %c0_17] : memref<3x576x64xf32, #tpu.memory_space<vmem>>, vector<1x576x64xf32>
    %35 = vector.shape_cast %34 : vector<1x576x64xf32> to vector<576x64xf32>
    %cst_18 = arith.constant dense<0.000000e+00> : vector<256x64xf32>
    %36 = tpu.matmul %33, %35, %cst_18 {dimension_numbers = #tpu.dot_dimension_numbers<[1], [0], [0], [1], [0, 0, 1, 1], [], []>} : vector<256x576xf32>, vector<576x64xf32>, vector<256x64xf32> -> vector<256x64xf32>
    %c0_19 = arith.constant 0 : index
    %c0_20 = arith.constant 0 : index
    %c0_21 = arith.constant 0 : index
    %37 = vector.load %arg4[%c0_19, %c0_20, %c0_21] : memref<3x1x64xf32, #tpu.memory_space<vmem>>, vector<1x1x64xf32>
    %38 = vector.shape_cast %37 : vector<1x1x64xf32> to vector<1x64xf32>
    %39 = vector.broadcast %38 : vector<1x64xf32> to vector<256x64xf32>
    %40 = arith.addf %36, %39 : vector<256x64xf32>
    %c0_22 = arith.constant 0 : index
    %c0_23 = arith.constant 0 : index
    %41 = vector.load %arg7[%c0_22, %c0_23] : memref<256x64xf32, #tpu.memory_space<vmem>>, vector<256x64xf32>
    tpu.vector_store %arg7[%c0_22, %c0_23], %40 {strides = array<i32>} : memref<256x64xf32, #tpu.memory_space<vmem>>, vector<256x64xf32>,
    %c0_24 = arith.constant 0 : index
    %c0_25 = arith.constant 0 : index
    %42 = vector.load %arg7[%c0_24, %c0_25] : memref<256x64xf32, #tpu.memory_space<vmem>>, vector<256x64xf32>
    %cst_26 = arith.constant 5.000000e-01 : f32
    %43 = vector.broadcast %cst_26 : f32 to vector<256x64xf32>
    %44 = arith.mulf %43, %42 : vector<256x64xf32>
    %c0_27 = arith.constant 0 : index
    %c0_28 = arith.constant 0 : index
    %c0_29 = arith.constant 0 : index
    %c0_30 = arith.constant 0 : index
    %45 = vector.load %arg1[%c0_27, %c0_28, %c0_29, %c0_30] : memref<1x16x16x64xf32, #tpu.memory_space<vmem>>, vector<1x16x16x64xf32>
    %46 = vector.shape_cast %45 : vector<1x16x16x64xf32> to vector<16x16x64xf32>
    %47 = vector.shape_cast %46 : vector<16x16x64xf32> to vector<256x64xf32>
    %48 = arith.addf %44, %47 : vector<256x64xf32>
    %c1_31 = arith.constant 1 : index
    %c0_32 = arith.constant 0 : index
    %c0_33 = arith.constant 0 : index
    %49 = vector.load %arg2[%c1_31, %c0_32, %c0_33] : memref<3x1x64xf32, #tpu.memory_space<vmem>>, vector<1x1x64xf32>
    %50 = vector.shape_cast %49 : vector<1x1x64xf32> to vector<1x64xf32>
    %cst_34 = arith.constant 0.000000e+00 : f32
    %51 = vector.broadcast %cst_34 : f32 to vector<256x64xf32>
    %52 = arith.cmpf ogt, %48, %51 : vector<256x64xf32>
    %53 = vector.broadcast %50 : vector<1x64xf32> to vector<256x64xf32>
    %54 = arith.mulf %53, %48 : vector<256x64xf32>
    %55 = arith.select %52, %48, %54 : vector<256x64xi1>, vector<256x64xf32>
    %56 = vector.shape_cast %55 : vector<256x64xf32> to vector<16x16x64xf32>
    %c1_35 = arith.constant 1 : index
    %c1_36 = arith.constant 1 : index
    %c0_37 = arith.constant 0 : index
    %57 = vector.load %arg6[%c1_35, %c1_36, %c0_37] : memref<18x18x64xf32, #tpu.memory_space<vmem>>, vector<16x16x64xf32>
    tpu.vector_store %arg6[%c1_35, %c1_36, %c0_37], %56 {strides = array<i32>} : memref<18x18x64xf32, #tpu.memory_space<vmem>>, vector<16x16x64xf32>,
    %c0_38 = arith.constant 0 : index
    %c0_39 = arith.constant 0 : index
    %c0_40 = arith.constant 0 : index
    %58 = vector.load %arg6[%c0_38, %c0_39, %c0_40] : memref<18x18x64xf32, #tpu.memory_space<vmem>>, vector<18x18x64xf32>
    %59 = vector.extract_strided_slice %58 {offsets = [0, 0, 0], sizes = [16, 16, 64], strides = [1, 1, 1]} : vector<18x18x64xf32> to vector<16x16x64xf32>
    %60 = vector.shape_cast %59 : vector<16x16x64xf32> to vector<256x64xf32>
    %61 = vector.extract_strided_slice %58 {offsets = [0, 1, 0], sizes = [16, 16, 64], strides = [1, 1, 1]} : vector<18x18x64xf32> to vector<16x16x64xf32>
    %62 = vector.shape_cast %61 : vector<16x16x64xf32> to vector<256x64xf32>
    %63 = vector.extract_strided_slice %58 {offsets = [0, 2, 0], sizes = [16, 16, 64], strides = [1, 1, 1]} : vector<18x18x64xf32> to vector<16x16x64xf32>
    %64 = vector.shape_cast %63 : vector<16x16x64xf32> to vector<256x64xf32>
    %65 = vector.extract_strided_slice %58 {offsets = [1, 0, 0], sizes = [16, 16, 64], strides = [1, 1, 1]} : vector<18x18x64xf32> to vector<16x16x64xf32>
    %66 = vector.shape_cast %65 : vector<16x16x64xf32> to vector<256x64xf32>
    %67 = vector.extract_strided_slice %58 {offsets = [1, 1, 0], sizes = [16, 16, 64], strides = [1, 1, 1]} : vector<18x18x64xf32> to vector<16x16x64xf32>
    %68 = vector.shape_cast %67 : vector<16x16x64xf32> to vector<256x64xf32>
    %69 = vector.extract_strided_slice %58 {offsets = [1, 2, 0], sizes = [16, 16, 64], strides = [1, 1, 1]} : vector<18x18x64xf32> to vector<16x16x64xf32>
    %70 = vector.shape_cast %69 : vector<16x16x64xf32> to vector<256x64xf32>
    %71 = vector.extract_strided_slice %58 {offsets = [2, 0, 0], sizes = [16, 16, 64], strides = [1, 1, 1]} : vector<18x18x64xf32> to vector<16x16x64xf32>
    %72 = vector.shape_cast %71 : vector<16x16x64xf32> to vector<256x64xf32>
    %73 = vector.extract_strided_slice %58 {offsets = [2, 1, 0], sizes = [16, 16, 64], strides = [1, 1, 1]} : vector<18x18x64xf32> to vector<16x16x64xf32>
    %74 = vector.shape_cast %73 : vector<16x16x64xf32> to vector<256x64xf32>
    %75 = vector.extract_strided_slice %58 {offsets = [2, 2, 0], sizes = [16, 16, 64], strides = [1, 1, 1]} : vector<18x18x64xf32> to vector<16x16x64xf32>
    %76 = vector.shape_cast %75 : vector<16x16x64xf32> to vector<256x64xf32>
    %77 = tpu.concatenate %60, %62, %64, %66, %68, %70, %72, %74, %76 in 1 : vector<256x64xf32>, vector<256x64xf32>, vector<256x64xf32>, vector<256x64xf32>, vector<256x64xf32>, vector<256x64xf32>, vector<256x64xf32>, vector<256x64xf32>, vector<256x64xf32> -> vector<256x576xf32>
    %c1_41 = arith.constant 1 : index
    %c0_42 = arith.constant 0 : index
    %c0_43 = arith.constant 0 : index
    %78 = vector.load %arg3[%c1_41, %c0_42, %c0_43] : memref<3x576x64xf32, #tpu.memory_space<vmem>>, vector<1x576x64xf32>
    %79 = vector.shape_cast %78 : vector<1x576x64xf32> to vector<576x64xf32>
    %cst_44 = arith.constant dense<0.000000e+00> : vector<256x64xf32>
    %80 = tpu.matmul %77, %79, %cst_44 {dimension_numbers = #tpu.dot_dimension_numbers<[1], [0], [0], [1], [0, 0, 1, 1], [], []>} : vector<256x576xf32>, vector<576x64xf32>, vector<256x64xf32> -> vector<256x64xf32>
    %c1_45 = arith.constant 1 : index
    %c0_46 = arith.constant 0 : index
    %c0_47 = arith.constant 0 : index
    %81 = vector.load %arg4[%c1_45, %c0_46, %c0_47] : memref<3x1x64xf32, #tpu.memory_space<vmem>>, vector<1x1x64xf32>
    %82 = vector.shape_cast %81 : vector<1x1x64xf32> to vector<1x64xf32>
    %83 = vector.broadcast %82 : vector<1x64xf32> to vector<256x64xf32>
    %84 = arith.addf %80, %83 : vector<256x64xf32>
    %c0_48 = arith.constant 0 : index
    %c0_49 = arith.constant 0 : index
    %85 = vector.load %arg8[%c0_48, %c0_49] : memref<256x64xf32, #tpu.memory_space<vmem>>, vector<256x64xf32>
    tpu.vector_store %arg8[%c0_48, %c0_49], %84 {strides = array<i32>} : memref<256x64xf32, #tpu.memory_space<vmem>>, vector<256x64xf32>,
    %c0_50 = arith.constant 0 : index
    %c0_51 = arith.constant 0 : index
    %86 = vector.load %arg8[%c0_50, %c0_51] : memref<256x64xf32, #tpu.memory_space<vmem>>, vector<256x64xf32>
    %cst_52 = arith.constant 2.000000e+00 : f32
    %87 = vector.broadcast %cst_52 : f32 to vector<256x64xf32>
    %88 = arith.mulf %87, %86 : vector<256x64xf32>
    %c0_53 = arith.constant 0 : index
    %c0_54 = arith.constant 0 : index
    %89 = vector.load %arg7[%c0_53, %c0_54] : memref<256x64xf32, #tpu.memory_space<vmem>>, vector<256x64xf32>
    %cst_55 = arith.constant -1.000000e+00 : f32
    %90 = vector.broadcast %cst_55 : f32 to vector<256x64xf32>
    %91 = arith.mulf %90, %89 : vector<256x64xf32>
    %92 = arith.addf %88, %91 : vector<256x64xf32>
    %c0_56 = arith.constant 0 : index
    %c0_57 = arith.constant 0 : index
    %c0_58 = arith.constant 0 : index
    %c0_59 = arith.constant 0 : index
    %93 = vector.load %arg1[%c0_56, %c0_57, %c0_58, %c0_59] : memref<1x16x16x64xf32, #tpu.memory_space<vmem>>, vector<1x16x16x64xf32>
    %94 = vector.shape_cast %93 : vector<1x16x16x64xf32> to vector<16x16x64xf32>
    %95 = vector.shape_cast %94 : vector<16x16x64xf32> to vector<256x64xf32>
    %96 = arith.addf %92, %95 : vector<256x64xf32>
    %c2 = arith.constant 2 : index
    %c0_60 = arith.constant 0 : index
    %c0_61 = arith.constant 0 : index
    %97 = vector.load %arg2[%c2, %c0_60, %c0_61] : memref<3x1x64xf32, #tpu.memory_space<vmem>>, vector<1x1x64xf32>
    %98 = vector.shape_cast %97 : vector<1x1x64xf32> to vector<1x64xf32>
    %cst_62 = arith.constant 0.000000e+00 : f32
    %99 = vector.broadcast %cst_62 : f32 to vector<256x64xf32>
    %100 = arith.cmpf ogt, %96, %99 : vector<256x64xf32>
    %101 = vector.broadcast %98 : vector<1x64xf32> to vector<256x64xf32>
    %102 = arith.mulf %101, %96 : vector<256x64xf32>
    %103 = arith.select %100, %96, %102 : vector<256x64xi1>, vector<256x64xf32>
    %104 = vector.shape_cast %103 : vector<256x64xf32> to vector<16x16x64xf32>
    %c1_63 = arith.constant 1 : index
    %c1_64 = arith.constant 1 : index
    %c0_65 = arith.constant 0 : index
    %105 = vector.load %arg6[%c1_63, %c1_64, %c0_65] : memref<18x18x64xf32, #tpu.memory_space<vmem>>, vector<16x16x64xf32>
    tpu.vector_store %arg6[%c1_63, %c1_64, %c0_65], %104 {strides = array<i32>} : memref<18x18x64xf32, #tpu.memory_space<vmem>>, vector<16x16x64xf32>,
    %c0_66 = arith.constant 0 : index
    %c0_67 = arith.constant 0 : index
    %c0_68 = arith.constant 0 : index
    %106 = vector.load %arg6[%c0_66, %c0_67, %c0_68] : memref<18x18x64xf32, #tpu.memory_space<vmem>>, vector<18x18x64xf32>
    %107 = vector.extract_strided_slice %106 {offsets = [0, 0, 0], sizes = [16, 16, 64], strides = [1, 1, 1]} : vector<18x18x64xf32> to vector<16x16x64xf32>
    %108 = vector.shape_cast %107 : vector<16x16x64xf32> to vector<256x64xf32>
    %109 = vector.extract_strided_slice %106 {offsets = [0, 1, 0], sizes = [16, 16, 64], strides = [1, 1, 1]} : vector<18x18x64xf32> to vector<16x16x64xf32>
    %110 = vector.shape_cast %109 : vector<16x16x64xf32> to vector<256x64xf32>
    %111 = vector.extract_strided_slice %106 {offsets = [0, 2, 0], sizes = [16, 16, 64], strides = [1, 1, 1]} : vector<18x18x64xf32> to vector<16x16x64xf32>
    %112 = vector.shape_cast %111 : vector<16x16x64xf32> to vector<256x64xf32>
    %113 = vector.extract_strided_slice %106 {offsets = [1, 0, 0], sizes = [16, 16, 64], strides = [1, 1, 1]} : vector<18x18x64xf32> to vector<16x16x64xf32>
    %114 = vector.shape_cast %113 : vector<16x16x64xf32> to vector<256x64xf32>
    %115 = vector.extract_strided_slice %106 {offsets = [1, 1, 0], sizes = [16, 16, 64], strides = [1, 1, 1]} : vector<18x18x64xf32> to vector<16x16x64xf32>
    %116 = vector.shape_cast %115 : vector<16x16x64xf32> to vector<256x64xf32>
    %117 = vector.extract_strided_slice %106 {offsets = [1, 2, 0], sizes = [16, 16, 64], strides = [1, 1, 1]} : vector<18x18x64xf32> to vector<16x16x64xf32>
    %118 = vector.shape_cast %117 : vector<16x16x64xf32> to vector<256x64xf32>
    %119 = vector.extract_strided_slice %106 {offsets = [2, 0, 0], sizes = [16, 16, 64], strides = [1, 1, 1]} : vector<18x18x64xf32> to vector<16x16x64xf32>
    %120 = vector.shape_cast %119 : vector<16x16x64xf32> to vector<256x64xf32>
    %121 = vector.extract_strided_slice %106 {offsets = [2, 1, 0], sizes = [16, 16, 64], strides = [1, 1, 1]} : vector<18x18x64xf32> to vector<16x16x64xf32>
    %122 = vector.shape_cast %121 : vector<16x16x64xf32> to vector<256x64xf32>
    %123 = vector.extract_strided_slice %106 {offsets = [2, 2, 0], sizes = [16, 16, 64], strides = [1, 1, 1]} : vector<18x18x64xf32> to vector<16x16x64xf32>
    %124 = vector.shape_cast %123 : vector<16x16x64xf32> to vector<256x64xf32>
    %125 = tpu.concatenate %108, %110, %112, %114, %116, %118, %120, %122, %124 in 1 : vector<256x64xf32>, vector<256x64xf32>, vector<256x64xf32>, vector<256x64xf32>, vector<256x64xf32>, vector<256x64xf32>, vector<256x64xf32>, vector<256x64xf32>, vector<256x64xf32> -> vector<256x576xf32>
    %c2_69 = arith.constant 2 : index
    %c0_70 = arith.constant 0 : index
    %c0_71 = arith.constant 0 : index
    %126 = vector.load %arg3[%c2_69, %c0_70, %c0_71] : memref<3x576x64xf32, #tpu.memory_space<vmem>>, vector<1x576x64xf32>
    %127 = vector.shape_cast %126 : vector<1x576x64xf32> to vector<576x64xf32>
    %cst_72 = arith.constant dense<0.000000e+00> : vector<256x64xf32>
    %128 = tpu.matmul %125, %127, %cst_72 {dimension_numbers = #tpu.dot_dimension_numbers<[1], [0], [0], [1], [0, 0, 1, 1], [], []>} : vector<256x576xf32>, vector<576x64xf32>, vector<256x64xf32> -> vector<256x64xf32>
    %c2_73 = arith.constant 2 : index
    %c0_74 = arith.constant 0 : index
    %c0_75 = arith.constant 0 : index
    %129 = vector.load %arg4[%c2_73, %c0_74, %c0_75] : memref<3x1x64xf32, #tpu.memory_space<vmem>>, vector<1x1x64xf32>
    %130 = vector.shape_cast %129 : vector<1x1x64xf32> to vector<1x64xf32>
    %131 = vector.broadcast %130 : vector<1x64xf32> to vector<256x64xf32>
    %132 = arith.addf %128, %131 : vector<256x64xf32>
    %c0_76 = arith.constant 0 : index
    %c0_77 = arith.constant 0 : index
    %133 = vector.load %arg8[%c0_76, %c0_77] : memref<256x64xf32, #tpu.memory_space<vmem>>, vector<256x64xf32>
    %cst_78 = arith.constant 0.666666686 : f32
    %134 = vector.broadcast %cst_78 : f32 to vector<256x64xf32>
    %135 = arith.mulf %134, %133 : vector<256x64xf32>
    %c0_79 = arith.constant 0 : index
    %c0_80 = arith.constant 0 : index
    %136 = vector.load %arg7[%c0_79, %c0_80] : memref<256x64xf32, #tpu.memory_space<vmem>>, vector<256x64xf32>
    %137 = arith.addf %132, %136 : vector<256x64xf32>
    %cst_81 = arith.constant 0.166666672 : f32
    %138 = vector.broadcast %cst_81 : f32 to vector<256x64xf32>
    %139 = arith.mulf %138, %137 : vector<256x64xf32>
    %140 = arith.addf %135, %139 : vector<256x64xf32>
    %c0_82 = arith.constant 0 : index
    %c0_83 = arith.constant 0 : index
    %c0_84 = arith.constant 0 : index
    %c0_85 = arith.constant 0 : index
    %141 = vector.load %arg1[%c0_82, %c0_83, %c0_84, %c0_85] : memref<1x16x16x64xf32, #tpu.memory_space<vmem>>, vector<1x16x16x64xf32>
    %142 = vector.shape_cast %141 : vector<1x16x16x64xf32> to vector<16x16x64xf32>
    %143 = vector.shape_cast %142 : vector<16x16x64xf32> to vector<256x64xf32>
    %144 = arith.addf %140, %143 : vector<256x64xf32>
    %145 = vector.shape_cast %144 : vector<256x64xf32> to vector<16x16x64xf32>
    %c0_86 = arith.constant 0 : index
    %c0_87 = arith.constant 0 : index
    %c0_88 = arith.constant 0 : index
    %c0_89 = arith.constant 0 : index
    %146 = vector.load %arg5[%c0_86, %c0_87, %c0_88, %c0_89] : memref<1x16x16x64xf32, #tpu.memory_space<vmem>>, vector<1x16x16x64xf32>
    %147 = vector.shape_cast %146 : vector<1x16x16x64xf32> to vector<16x16x64xf32>
    %148 = vector.shape_cast %145 : vector<16x16x64xf32> to vector<1x16x16x64xf32>
    tpu.vector_store %arg5[%c0_86, %c0_87, %c0_88, %c0_89], %148 {strides = array<i32>} : memref<1x16x16x64xf32, #tpu.memory_space<vmem>>, vector<1x16x16x64xf32>,
    return
  }
  func.func @transform_0(%arg0: i32) -> (i32, i32, i32, i32) {
    %c0_i32 = arith.constant 0 : i32
    %c0_i32_0 = arith.constant 0 : i32
    %c0_i32_1 = arith.constant 0 : i32
    %c0_i32_2 = arith.constant 0 : i32
    return %arg0, %c0_i32, %c0_i32_0, %c0_i32_1 : i32, i32, i32, i32
  }
  func.func @transform_1(%arg0: i32) -> (i32, i32, i32) {
    %c0_i32 = arith.constant 0 : i32
    %c0_i32_0 = arith.constant 0 : i32
    %c0_i32_1 = arith.constant 0 : i32
    %c0_i32_2 = arith.constant 0 : i32
    return %c0_i32, %c0_i32_0, %c0_i32_1 : i32, i32, i32
  }
  func.func @transform_2(%arg0: i32) -> (i32, i32, i32) {
    %c0_i32 = arith.constant 0 : i32
    %c0_i32_0 = arith.constant 0 : i32
    %c0_i32_1 = arith.constant 0 : i32
    %c0_i32_2 = arith.constant 0 : i32
    return %c0_i32, %c0_i32_0, %c0_i32_1 : i32, i32, i32
  }
  func.func @transform_3(%arg0: i32) -> (i32, i32, i32) {
    %c0_i32 = arith.constant 0 : i32
    %c0_i32_0 = arith.constant 0 : i32
    %c0_i32_1 = arith.constant 0 : i32
    %c0_i32_2 = arith.constant 0 : i32
    return %c0_i32, %c0_i32_0, %c0_i32_1 : i32, i32, i32
  }
  func.func @transform_4(%arg0: i32) -> (i32, i32, i32, i32) {
    %c0_i32 = arith.constant 0 : i32
    %c0_i32_0 = arith.constant 0 : i32
    %c0_i32_1 = arith.constant 0 : i32
    %c0_i32_2 = arith.constant 0 : i32
    return %arg0, %c0_i32, %c0_i32_0, %c0_i32_1 : i32, i32, i32, i32
  }
}

</mosaic_0001>

<bundles_post_ra>
// kernel: tpu_custom_call.1
= control target key start
LH: loop header
LB: loop body
LE: loop exit
PB: predicated region body
PF: predicated region fallthrough
CT: control target
= control target key end

     0   :  { %9 = vsyncpa [#allocation6], 0  ;;  %s12755_s0 = inlined_call_operand.vmem [shape: f32[2,16,16,64], index: 0, kind: input, shape index: {}]   ;;  %s12756_s1 = inlined_call_operand.vmem [shape: f32[3,1,64], index: 1, kind: input, shape index: {}]   ;;  %s12757_s2 = inlined_call_operand.vmem [shape: f32[3,576,64], index: 2, kind: input, shape index: {}]   ;;  %s12758_s3 = inlined_call_operand.vmem [shape: f32[3,1,64], index: 3, kind: input, shape index: {}]   ;;  %s12759_s4 = inlined_call_operand.hbm [shape: f32[2,16,16,64], index: 4, kind: output, shape index: {}]  }
   0x1   :  { %11 = vsyncpa [#allocation6 + $0x1], 0  ;;  %s8247_s15 = smov 0   ;;  %s8249_s16 = smov 0  }
   0x2   :  { %s8251_s17 = smov 0   ;;  %s8253_s18 = smov 0  }
   0x3 LB: > { %s8268_s19 = sadd.s32 4294967295, %s8214_s18   ;;  %s6188_s20 = sadd.s32 4294967294, %s8214_s18   ;;  %s8214_s18 = sphi %s8253_s18, %s13095_s18   ;;  %s8210_s17 = sphi %s8251_s17, %s13094_s17   ;;  %s8206_s16 = sphi %s8249_s16, %s13093_s16   ;;  %s8202_s15 = sphi %s8247_s15, %s13092_s15  }
   0x4   : > { %s8272_s21 = sadd.s32 1, %s8214_s18   ;;  %s113_s22 = sadd.s32 1, %s8210_s17 }
   0x5   : > { %s110_s23 = ssub.s32 %s8214_s18, %s8272_s21  ;;  %p123_p0 = scmp.ne.s32.totalorder %s8210_s17, %s8206_s16 }
   0x6   : > { %p111_p1 = scmp.eq.s32.totalorder %s110_s23, 0  ;;  %p124_p2 = scmp.eq.s32.totalorder %s8268_s19, 1 }
   0x7   : > { %p129_p3 = scmp.ne.s32.totalorder %s8206_s16, %s8202_s15  ;;  %p130_p4 = scmp.eq.s32.totalorder %s6188_s20, 1 }
   0x8   : > { %s8283_s24 = scalar_select %p111_p1, %s8210_s17, %s113_s22  }
   0x9   : > { %p8285_p5 = por %p124_p2, %p123_p0  ;;  %p8289_p6 = por %p130_p4, %p129_p3 }
   0xa   : > { %p6191_p7 = scmp.ge.s32.totalorder %s8214_s18, 1  ;;  %p165_p8 = scmp.lt.s32.totalorder %s8214_s18, 3 }
   0xc   : > { %p166_p9 = pnand %p6191_p7, %p165_p8 }
   0xe   : > { %169 = sbr.rel (%p166_p9) target bundleno = 1581 (0x62d), region = 36 }
  0x15   : > { %p191_p10 = scmp.lt.s32.totalorder %s8268_s19, 1  ;;  %vm196_vm0 = vcmask 523264   ;;  %vm199_vm1 = vcmask 517120   ;;  %v8216_v0 = vmov 0.0   ;;  %v1174_v1 = vld [vmem:[%s12757_s2] sm:$0xff]  ;;  %v1175_v2 = vld [vmem:[%s12757_s2 + $0x8] sm:$0xff] }
  0x16   : > { %197 = vst.msk [vmem:[#allocation2] sm:$0xff] %vm196_vm0, %v8216_v0  ;;  %198 = vst.msk [vmem:[#allocation2 + $0x8] sm:$0xff] %vm196_vm0, %v8216_v0  ;;  %v1176_v3 = vld [vmem:[%s12757_s2 + $0x10] sm:$0xff]  ;;  %v12760_v4 = vmov 0.0|0.0   ;;  %v6765_v5 = vpack.c.bf16 %v1175_v2, %v1174_v1  ;;  %v1177_v6 = vld [vmem:[%s12757_s2 + $0x18] sm:$0xff]  ;;  %vm522_vm2 = vcmask 1046528  }
  0x17   : > { %201 = vst.msk [vmem:[#allocation2 + $0x18] sm:$0xff] %vm196_vm0, %v8216_v0  ;;  %202 = vst.msk [vmem:[#allocation2 + $0x20] sm:$0xff] %vm196_vm0, %v8216_v0  ;;  %s192_s7 = scalar_select %p191_p10, %s8268_s19, 1  ;;  %6764 = vmatprep.subr.bf16.mxu0 %v12760_v4  ;;  %v1178_v7 = vld [vmem:[%s12757_s2 + $0x20] sm:$0xff]  ;;  %v1179_v8 = vld [vmem:[%s12757_s2 + $0x28] sm:$0xff]  ;;  %v6768_v13 = vpack.c.bf16 %v1177_v6, %v1176_v3 }
  0x18   : > { %203 = vst.msk [vmem:[#allocation2 + $0x28] sm:$0x3] %vm199_vm1, %v8216_v0  ;;  %200 = vst.msk [vmem:[#allocation2 + $0x10] sm:$0x3] %vm199_vm1, %v8216_v0  ;;  %v8375_v9 = vld [vmem:[%s12757_s2 + $0x30] sm:$0xff]  ;;  %v8380_v10 = vld [vmem:[%s12757_s2 + $0x38] sm:$0xff]  ;;  %6766 = vmatpush1.bf16.msra.mxu0 %v6765_v5  ;;  %v6771_v18 = vpack.c.bf16 %v1179_v8, %v1178_v7 }
  0x19   : > { %204 = vst.msk [vmem:[#allocation2 + $0x30] sm:$0xff] %vm196_vm0, %v8216_v0  ;;  %205 = vst.msk [vmem:[#allocation2 + $0x38] sm:$0xff] %vm196_vm0, %v8216_v0  ;;  %v8385_v11 = vld [vmem:[%s12757_s2 + $0x40] sm:$0xff]  ;;  %s6450_s29 = sshll.u32 %s192_s7, 8  ;;  %v8395_v14 = vld [vmem:[%s12757_s2 + $0x48] sm:$0xff]  ;;  %6767 = vmatprep.subr.bf16.mxu0 %v12760_v4  ;;  %v6774_v19 = vpack.c.bf16 %v8380_v10, %v8375_v9  ;;  %s8218_s20 = smov 64  }
  0x1a   : > { %206 = vst.msk [vmem:[#allocation2 + $0x40] sm:$0x3] %vm199_vm1, %v8216_v0  ;;  %209 = vst.msk [vmem:[#allocation2 + $0x58] sm:$0x3] %vm199_vm1, %v8216_v0  ;;  %v8390_v12 = vld [vmem:[%s12756_s1] ss:$0 sm:$0xff]  ;;  %s8400_s11 = scalar_lea.vmem %s12755_s0, %s6450_s29  ;;  %v6777_v20 = vpack.c.bf16 %v8395_v14, %v8385_v11 }
  0x1b   : > { %207 = vst.msk [vmem:[#allocation2 + $0x48] sm:$0xff] %vm196_vm0, %v8216_v0  ;;  %208 = vst.msk [vmem:[#allocation2 + $0x50] sm:$0xff] %vm196_vm0, %v8216_v0  ;;  %v252_v15 = vld [vmem:[%s8400_s11] sm:$0xff]  ;;  %v253_v16 = vld [vmem:[%s8400_s11 + $0x8] sm:$0xff]  ;;  %s188_s30 = sand.u32 1, %s8206_s16   ;;  %s6451_s6 = sshll.u32 %s8268_s19, 12 }
  0x1c   : > { %210 = vst.msk [vmem:[#allocation2 + $0x60] sm:$0xff] %vm196_vm0, %v8216_v0  ;;  %211 = vst.msk [vmem:[#allocation2 + $0x68] sm:$0xff] %vm196_vm0, %v8216_v0  ;;  %v254_v17 = vld [vmem:[%s8400_s11 + $0x10] sm:$0xff]  ;;  %vm285_vm3 = vcmp.gt.f32.partialorder %v252_v15, 0.0  ;;  %vm286_vm4 = vcmp.gt.f32.partialorder %v253_v16, 0.0  ;;  %v323_v21 = vmul.f32 %v8390_v12, %v252_v15  ;;  %v324_v22 = vmul.f32 %v8390_v12, %v253_v16  ;;  %v255_v23 = vld [vmem:[%s8400_s11 + $0x18] sm:$0xff]  ;;  %6769 = vmatpush1.bf16.msra.mxu0 %v6768_v13  ;;  %s12704_s7 = scalar_lea.hbm %s12759_s4, %s6451_s6 }
  0x1d   : > { %212 = vst.msk [vmem:[#allocation2 + $0x70] sm:$0x3] %vm199_vm1, %v8216_v0  ;;  %215 = vst.msk [vmem:[#allocation2 + $0x88] sm:$0x3] %vm199_vm1, %v8216_v0  ;;  %v256_v24 = vld [vmem:[%s8400_s11 + $0x20] sm:$0xff]  ;;  %v257_v25 = vld [vmem:[%s8400_s11 + $0x28] sm:$0xff]  ;;  %v325_v29 = vmul.f32 %v8390_v12, %v254_v17  ;;  %v326_v30 = vmul.f32 %v8390_v12, %v255_v23  ;;  %6770 = vmatprep.subr.bf16.mxu0 %v12760_v4 }
  0x1e   : > { %213 = vst.msk [vmem:[#allocation2 + $0x78] sm:$0xff] %vm196_vm0, %v8216_v0  ;;  %214 = vst.msk [vmem:[#allocation2 + $0x80] sm:$0xff] %vm196_vm0, %v8216_v0  ;;  %v8415_v26 = vld [vmem:[#allocation2] sm:$0xff]  ;;  %v8417_v27 = vld [vmem:[#allocation2 + $0x8] sm:$0xff]  ;;  %vm287_vm5 = vcmp.gt.f32.partialorder %v254_v17, 0.0  ;;  %vm288_vm6 = vcmp.gt.f32.partialorder %v255_v23, 0.0  ;;  %v355_v31 = vsel %vm285_vm3, %v252_v15, %v323_v21  ;;  %v356_v32 = vsel %vm286_vm4, %v253_v16, %v324_v22 }
  0x1f   : > { %216 = vst.msk [vmem:[#allocation2 + $0x90] sm:$0xff] %vm196_vm0, %v8216_v0  ;;  %217 = vst.msk [vmem:[#allocation2 + $0x98] sm:$0xff] %vm196_vm0, %v8216_v0  ;;  %v422_v28 = vld [vmem:[#allocation2 + $0x10] sm:$0x3]  ;;  %v523_v33 = vrot.slane %v8415_v26, 1  ;;  %v524_v34 = vrot.slane %v8417_v27, 1  ;;  %v357_v38 = vsel %vm287_vm5, %v254_v17, %v325_v29  ;;  %v358_v39 = vsel %vm288_vm6, %v255_v23, %v326_v30 }
  0x20   : > { %218 = vst.msk [vmem:[#allocation2 + $0xa0] sm:$0x3] %vm199_vm1, %v8216_v0  ;;  %221 = vst.msk [vmem:[#allocation2 + $0xb8] sm:$0x3] %vm199_vm1, %v8216_v0  ;;  %v258_v35 = vld [vmem:[%s8400_s11 + $0x30] sm:$0xff]  ;;  %v259_v36 = vld [vmem:[%s8400_s11 + $0x38] sm:$0xff]  ;;  %v327_v42 = vmul.f32 %v8390_v12, %v256_v24  ;;  %v328_v43 = vmul.f32 %v8390_v12, %v257_v25  ;;  %6772 = vmatpush1.bf16.msra.mxu0 %v6771_v18 }
  0x21   : > { %219 = vst.msk [vmem:[#allocation2 + $0xa8] sm:$0xff] %vm196_vm0, %v8216_v0  ;;  %220 = vst.msk [vmem:[#allocation2 + $0xb0] sm:$0xff] %vm196_vm0, %v8216_v0  ;;  %v526_v37 = vrot.slane %v422_v28, 1  ;;  %vm289_vm7 = vcmp.gt.f32.partialorder %v256_v24, 0.0  ;;  %v260_v40 = vld [vmem:[%s8400_s11 + $0x40] sm:$0xff]  ;;  %v8430_v41 = vsel %vm522_vm2, %v523_v33, %v524_v34  ;;  %vm290_vm8 = vcmp.gt.f32.partialorder %v257_v25, 0.0  ;;  %6773 = vmatprep.subr.bf16.mxu0 %v12760_v4 }
  0x22   : > { %222 = vst.msk [vmem:[#allocation2 + $0xc0] sm:$0xff] %vm196_vm0, %v8216_v0  ;;  %223 = vst.msk [vmem:[#allocation2 + $0xc8] sm:$0xff] %vm196_vm0, %v8216_v0  ;;  %v261_v44 = vld [vmem:[%s8400_s11 + $0x48] sm:$0xff]  ;;  %vm291_vm9 = vcmp.gt.f32.partialorder %v258_v35, 0.0  ;;  %v329_v46 = vmul.f32 %v8390_v12, %v258_v35  ;;  %vm292_vm10 = vcmp.gt.f32.partialorder %v259_v36, 0.0  ;;  %v262_v47 = vld [vmem:[%s8400_s11 + $0x50] sm:$0xff]  ;;  %v359_v49 = vsel %vm289_vm7, %v256_v24, %v327_v42 }
  0x23   : > { %224 = vst.msk [vmem:[#allocation2 + $0xd0] sm:$0x3] %vm199_vm1, %v8216_v0  ;;  %227 = vst.msk [vmem:[#allocation2 + $0xe8] sm:$0x3] %vm199_vm1, %v8216_v0  ;;  %v8438_v45 = vsel %vm522_vm2, %v524_v34, %v526_v37  ;;  %v263_v48 = vld [vmem:[%s8400_s11 + $0x58] sm:$0xff]  ;;  %v360_v50 = vsel %vm290_vm8, %v257_v25, %v328_v43  ;;  %v330_v51 = vmul.f32 %v8390_v12, %v259_v36  ;;  %vm293_vm11 = vcmp.gt.f32.partialorder %v260_v40, 0.0 }
  0x24   : > { %225 = vst.msk [vmem:[#allocation2 + $0xd8] sm:$0xff] %vm196_vm0, %v8216_v0  ;;  %226 = vst.msk [vmem:[#allocation2 + $0xe0] sm:$0xff] %vm196_vm0, %v8216_v0  ;;  %v264_v52 = vld [vmem:[%s8400_s11 + $0x60] sm:$0xff]  ;;  %v361_v53 = vsel %vm291_vm9, %v258_v35, %v329_v46  ;;  %v331_v54 = vmul.f32 %v8390_v12, %v260_v40  ;;  %vm294_vm12 = vcmp.gt.f32.partialorder %v261_v44, 0.0  ;;  %v332_v55 = vmul.f32 %v8390_v12, %v261_v44  ;;  %v265_v56 = vld [vmem:[%s8400_s11 + $0x68] sm:$0xff]  ;;  %s12542_s5 = sshll.u32 %s188_s30, 8 }
  0x25   : > { %228 = vst.msk [vmem:[#allocation2 + $0xf0] sm:$0xff] %vm196_vm0, %v8216_v0  ;;  %229 = vst.msk [vmem:[#allocation2 + $0xf8] sm:$0xff] %vm196_vm0, %v8216_v0  ;;  %v362_v57 = vsel %vm292_vm10, %v259_v36, %v330_v51  ;;  %vm295_vm13 = vcmp.gt.f32.partialorder %v262_v47, 0.0  ;;  %v333_v58 = vmul.f32 %v8390_v12, %v262_v47  ;;  %vm296_vm14 = vcmp.gt.f32.partialorder %v263_v48, 0.0  ;;  %6775 = vmatpush1.bf16.msra.mxu0 %v6774_v19  ;;  %v8464_v62 = vld [vmem:[%s12757_s2 + $0x50] sm:$0xff]  ;;  %v8469_v63 = vld [vmem:[%s12757_s2 + $0x58] sm:$0xff] }
  0x26   : > { %230 = vst.msk [vmem:[#allocation2 + $0x100] sm:$0x3] %vm199_vm1, %v8216_v0  ;;  %233 = vst.msk [vmem:[#allocation2 + $0x118] sm:$0x3] %vm199_vm1, %v8216_v0  ;;  %v363_v59 = vsel %vm293_vm11, %v260_v40, %v331_v54  ;;  %v364_v60 = vsel %vm294_vm12, %v261_v44, %v332_v55  ;;  %v334_v61 = vmul.f32 %v8390_v12, %v263_v48  ;;  %vm297_vm15 = vcmp.gt.f32.partialorder %v264_v52, 0.0  ;;  %v1186_v28 = vld [vmem:[%s12757_s2 + $0x60] sm:$0xff] }
  0x27   : > { %231 = vst.msk [vmem:[#allocation2 + $0x108] sm:$0xff] %vm196_vm0, %v8216_v0  ;;  %232 = vst.msk [vmem:[#allocation2 + $0x110] sm:$0xff] %vm196_vm0, %v8216_v0  ;;  %v365_v3 = vsel %vm295_vm13, %v262_v47, %v333_v58  ;;  %v335_v5 = vmul.f32 %v8390_v12, %v264_v52  ;;  %v336_v6 = vmul.f32 %v8390_v12, %v265_v56  ;;  %6776 = vmatprep.subr.bf16.mxu0 %v12760_v4  ;;  %v1187_v29 = vld [vmem:[%s12757_s2 + $0x68] sm:$0xff]  ;;  %v266_v40 = vld [vmem:[%s8400_s11 + $0x70] sm:$0xff]  ;;  %s12714_s19 = scalar_lea.sflag [#allocation6], %s188_s30  ;;  %s8219_s12 = smov [#allocation5]  }
  0x28   : > { %234 = vst.msk [vmem:[#allocation2 + $0x120] sm:$0xff] %vm196_vm0, %v8216_v0  ;;  %235 = vst.msk [vmem:[#allocation2 + $0x128] sm:$0xff] %vm196_vm0, %v8216_v0  ;;  %v366_v23 = vsel %vm296_vm14, %v263_v48, %v334_v61  ;;  %v6780_v36 = vpack.c.bf16 %v8469_v63, %v8464_v62  ;;  %v6783_v51 = vpack.c.bf16 %v1187_v29, %v1186_v28  ;;  %v268_v58 = vld [vmem:[%s8400_s11 + $0x80] sm:$0xff]  ;;  %v269_v63 = vld [vmem:[%s8400_s11 + $0x88] sm:$0xff]  ;;  %vm299_vm3 = vcmp.gt.f32.partialorder %v266_v40, 0.0  ;;  %s8156_s13 = sshll.u32 %s8219_s12, 4  ;;  %s8157_s13 = int_to_ptr.vmem [resolvable:$false] %s8156_s13 }
  0x29   : > { %236 = vst.msk [vmem:[#allocation2 + $0x130] sm:$0x3] %vm199_vm1, %v8216_v0  ;;  %239 = vst.msk [vmem:[#allocation2 + $0x148] sm:$0x3] %vm199_vm1, %v8216_v0  ;;  %v367_v24 = vsel %vm297_vm15, %v264_v52, %v335_v5  ;;  %6778 = vmatpush1.bf16.msra.mxu0 %v6777_v20  ;;  %v337_v55 = vmul.f32 %v8390_v12, %v266_v40  ;;  %vm301_vm5 = vcmp.gt.f32.partialorder %v268_v58, 0.0  ;;  %vm302_vm6 = vcmp.gt.f32.partialorder %v269_v63, 0.0 }
  0x2a   : > { %237 = vst.msk [vmem:[#allocation2 + $0x138] sm:$0xff] %vm196_vm0, %v8216_v0  ;;  %238 = vst.msk [vmem:[#allocation2 + $0x140] sm:$0xff] %vm196_vm0, %v8216_v0  ;;  %6779 = vmatprep.subr.bf16.mxu0 %v12760_v4  ;;  %s8158_s14 = scalar_lea.vmem %s8157_s13, 8192 }
  0x2b   : > { %240 = vst.msk [vmem:[#allocation2 + $0x150] sm:$0xff] %vm196_vm0, %v8216_v0  ;;  %241 = vst.msk [vmem:[#allocation2 + $0x158] sm:$0xff] %vm196_vm0, %v8216_v0 }
  0x2c   : > { %242 = vst.msk [vmem:[#allocation2 + $0x160] sm:$0x3] %vm199_vm1, %v8216_v0  ;;  %245 = vst.msk [vmem:[#allocation2 + $0x178] sm:$0x3] %vm199_vm1, %v8216_v0 }
  0x2d   : > { %243 = vst.msk [vmem:[#allocation2 + $0x168] sm:$0xff] %vm196_vm0, %v8216_v0  ;;  %244 = vst.msk [vmem:[#allocation2 + $0x170] sm:$0xff] %vm196_vm0, %v8216_v0  ;;  %6781 = vmatpush1.bf16.msra.mxu0 %v6780_v36 }
  0x2e   : > { %246 = vst.msk [vmem:[#allocation2 + $0x180] sm:$0xff] %vm196_vm0, %v8216_v0  ;;  %247 = vst.msk [vmem:[#allocation2 + $0x188] sm:$0xff] %vm196_vm0, %v8216_v0  ;;  %6782 = vmatprep.subr.bf16.mxu0 %v12760_v4 }
  0x2f   : > { %248 = vst.msk [vmem:[#allocation2 + $0x190] sm:$0x3] %vm199_vm1, %v8216_v0  ;;  %251 = vst.msk [vmem:[#allocation2 + $0x1a8] sm:$0x3] %vm199_vm1, %v8216_v0  ;;  %vm298_vm1 = vcmp.gt.f32.partialorder %v265_v56, 0.0 }
  0x30   : > { %249 = vst.msk [vmem:[#allocation2 + $0x198] sm:$0xff] %vm196_vm0, %v8216_v0  ;;  %250 = vst.msk [vmem:[#allocation2 + $0x1a0] sm:$0xff] %vm196_vm0, %v8216_v0  ;;  %v368_v25 = vsel %vm298_vm1, %v265_v56, %v336_v6 }
  0x31   : > { %388 = vst.msk [vmem:[#allocation2 + $0x19] sm:$0xff] %vm196_vm0, %v355_v31  ;;  %389 = vst.msk [vmem:[#allocation2 + $0x21] sm:$0xff] %vm196_vm0, %v356_v32  ;;  %6784 = vmatpush1.bf16.msra.mxu0 %v6783_v51 }
  0x32   : > { %390 = vst.msk [vmem:[#allocation2 + $0x31] sm:$0xff] %vm196_vm0, %v357_v38  ;;  %391 = vst.msk [vmem:[#allocation2 + $0x39] sm:$0xff] %vm196_vm0, %v358_v39  ;;  %6785 = vmatprep.subr.bf16.mxu0 %v12760_v4 }
  0x33   : > { %392 = vst.msk [vmem:[#allocation2 + $0x49] sm:$0xff] %vm196_vm0, %v359_v49  ;;  %393 = vst.msk [vmem:[#allocation2 + $0x51] sm:$0xff] %vm196_vm0, %v360_v50 }
  0x34   : > { %394 = vst.msk [vmem:[#allocation2 + $0x61] sm:$0xff] %vm196_vm0, %v361_v53  ;;  %395 = vst.msk [vmem:[#allocation2 + $0x69] sm:$0xff] %vm196_vm0, %v362_v57 }
  0x35   : > { %396 = vst.msk [vmem:[#allocation2 + $0x79] sm:$0xff] %vm196_vm0, %v363_v59  ;;  %397 = vst.msk [vmem:[#allocation2 + $0x81] sm:$0xff] %vm196_vm0, %v364_v60 }
  0x36   : > { %398 = vst.msk [vmem:[#allocation2 + $0x91] sm:$0xff] %vm196_vm0, %v365_v3  ;;  %399 = vst.msk [vmem:[#allocation2 + $0x99] sm:$0xff] %vm196_vm0, %v366_v23 }
  0x37   : > { %400 = vst.msk [vmem:[#allocation2 + $0xa9] sm:$0xff] %vm196_vm0, %v367_v24  ;;  %401 = vst.msk [vmem:[#allocation2 + $0xb1] sm:$0xff] %vm196_vm0, %v368_v25  ;;  %v340_v24 = vmul.f32 %v8390_v12, %v269_v63  ;;  %v270_v25 = vld [vmem:[%s8400_s11 + $0x90] sm:$0xff] }
  0x38   : > { %v8471_v0 = vld [vmem:[#allocation2 + $0x18] sm:$0xff]  ;;  %v8473_v1 = vld [vmem:[#allocation2 + $0x20] sm:$0xff]  ;;  %v8475_v2 = vld [vmem:[#allocation2 + $0x28] sm:$0x3]  ;;  %vm303_vm7 = vcmp.gt.f32.partialorder %v270_v25, 0.0 }
  0x39   : > { %v7446_v7 = vpack.i.bf16 %v8430_v41, %v8471_v0  ;;  %v7451_v8 = vpack.i.bf16 %v8438_v45, %v8473_v1  ;;  %v8487_v9 = vld [vmem:[#allocation2 + $0x30] sm:$0xff]  ;;  %v528_v10 = vrot.slane %v8471_v0, 1  ;;  %v529_v13 = vrot.slane %v8473_v1, 1  ;;  %v8491_v15 = vld [vmem:[#allocation2 + $0x38] sm:$0xff]  ;;  %v8493_v16 = vld [vmem:[#allocation2 + $0x40] sm:$0x3] }
  0x3a   : > { %v531_v17 = vrot.slane %v8475_v2, 1  ;;  %v533_v18 = vrot.slane %v8487_v9, 1  ;;  %v534_v19 = vrot.slane %v8491_v15, 1  ;;  %v536_v21 = vrot.slane %v8493_v16, 1  ;;  %v8518_v32 = vld [vmem:[#allocation2 + $0x48] sm:$0xff]  ;;  %v8523_v34 = vld [vmem:[#allocation2 + $0x50] sm:$0xff] }
  0x3b   : > { %7447 = vrot.lane.b32.xlu0 %v7446_v7, %s8218_s20  ;;  %v8502_v22 = vsel %vm522_vm2, %v528_v10, %v529_v13  ;;  %v8525_v35 = vld [vmem:[#allocation2 + $0x58] sm:$0x3]  ;;  %v8538_v38 = vld [vmem:[#allocation2 + $0x60] sm:$0xff]  ;;  %v538_v39 = vrot.slane %v8518_v32, 1  ;;  %v539_v14 = vrot.slane %v8523_v34, 1  ;;  %v8548_v20 = vld [vmem:[#allocation2 + $0x68] sm:$0xff] }
  0x3c   : > { %v7456_v30 = vpack.i.bf16 %v8502_v22, %v8487_v9  ;;  %v8516_v31 = vsel %vm522_vm2, %v529_v13, %v531_v17  ;;  %v8521_v33 = vsel %vm522_vm2, %v533_v18, %v534_v19  ;;  %v8536_v37 = vsel %vm522_vm2, %v534_v19, %v536_v21  ;;  %v267_v41 = vld [vmem:[%s8400_s11 + $0x78] sm:$0xff]  ;;  %v8552_v44 = vld [vmem:[#allocation2 + $0x70] sm:$0x3]  ;;  %v8560_v48 = vld [vmem:[#allocation2 + $0x80] sm:$0xff] }
  0x3d   : > { %12874 = vst [vmem:[#allocation8_spill] sm:$0xff] %v8516_v31  ;;  %12875 = vst [vmem:[#allocation9_spill] sm:$0xff] %v8521_v33  ;;  %v7461_v11 = vpack.i.bf16 %v8516_v31, %v8491_v15  ;;  %v541_v42 = vrot.slane %v8525_v35, 1  ;;  %v543_v43 = vrot.slane %v8538_v38, 1  ;;  %v7466_v45 = vpack.i.bf16 %v8521_v33, %v8518_v32  ;;  %v8557_v46 = vld [vmem:[#allocation2 + $0x78] sm:$0xff]  ;;  %v8591_v5 = vld [vmem:[#allocation2 + $0x90] sm:$0xff] }
  0x3e   : > { %12876 = vst [vmem:[#allocation10_spill] sm:$0xff] %v8536_v37  ;;  %7457 = vrot.lane.b32.xlu1 %v7456_v30, %s8218_s20  ;;  %v544_v47 = vrot.slane %v8548_v20, 1  ;;  %v546_v49 = vrot.slane %v8552_v44, 1  ;;  %v8563_v50 = vld [vmem:[#allocation2 + $0x88] sm:$0x3]  ;;  %v8566_v52 = vsel %vm522_vm2, %v538_v39, %v539_v14  ;;  %v548_v53 = vrot.slane %v8557_v46, 1 }
  0x3f   : > { %7452 = vrot.lane.b32.xlu0 %v7451_v8, %s8218_s20  ;;  %12877 = vst [vmem:[#allocation11_spill] sm:$0xff] %v8566_v52  ;;  %v549_v54 = vrot.slane %v8560_v48, 1  ;;  %v7471_v56 = vpack.i.bf16 %v8536_v37, %v8523_v34  ;;  %v8574_v57 = vsel %vm522_vm2, %v539_v14, %v541_v42  ;;  %v551_v61 = vrot.slane %v8563_v50, 1  ;;  %v8596_v7 = vld [vmem:[#allocation2 + $0x98] sm:$0xff]  ;;  %v8603_v13 = vld [vmem:[#allocation2 + $0xa0] sm:$0x3] }
  0x40   : > { %12878 = vst [vmem:[#allocation12_spill] sm:$0xff] %v8574_v57  ;;  %v8580_v59 = vsel %vm522_vm2, %v543_v43, %v544_v47  ;;  %v8583_v60 = vsel %vm522_vm2, %v544_v47, %v546_v49  ;;  %v338_v62 = vmul.f32 %v8390_v12, %v267_v41  ;;  %v7476_v3 = vpack.i.bf16 %v8566_v52, %v8538_v38  ;;  %v8610_v23 = vld [vmem:[#allocation2 + $0xb0] sm:$0xff]  ;;  %v8619_v29 = vld [vmem:[#allocation2 + $0xa8] sm:$0xff] }
  0x41   : > { %12879 = vst [vmem:[#allocation13_spill] sm:$0xff] %v8580_v59  ;;  %12880 = vst [vmem:[#allocation14_spill] sm:$0xff] %v8583_v60  ;;  %v8594_v6 = vsel %vm522_vm2, %v548_v53, %v549_v54  ;;  %v7481_v8 = vpack.i.bf16 %v8574_v57, %v8548_v20  ;;  %v8601_v10 = vsel %vm522_vm2, %v549_v54, %v551_v61  ;;  %vm300_vm4 = vcmp.gt.f32.partialorder %v267_v41, 0.0  ;;  %v273_v47 = vld [vmem:[%s8400_s11 + $0xa8] sm:$0xff]  ;;  %v274_v61 = vld [vmem:[%s8400_s11 + $0xb0] sm:$0xff] }
  0x42   : > { %7462 = vrot.lane.b32.xlu1 %v7461_v11, %s8218_s20  ;;  %12881 = vst [vmem:[#allocation15_spill] sm:$0xff] %v8594_v6  ;;  %12882 = vst [vmem:[#allocation16_spill] sm:$0xff] %v8601_v10  ;;  %v369_v17 = vsel %vm299_vm3, %v266_v40, %v337_v55  ;;  %v339_v18 = vmul.f32 %v8390_v12, %v268_v58  ;;  %v7486_v19 = vpack.i.bf16 %v8580_v59, %v8557_v46  ;;  %v271_v40 = vld [vmem:[%s8400_s11 + $0x98] sm:$0xff]  ;;  %v1188_v11 = vld [vmem:[%s12757_s2 + $0x70] sm:$0xff] }
  0x43   : > { %7467 = vrot.lane.b32.xlu0 %v7466_v45, %s8218_s20  ;;  %v7491_v21 = vpack.i.bf16 %v8583_v60, %v8560_v48  ;;  %402 = vst.msk [vmem:[#allocation2 + $0xc1] sm:$0xff] %vm196_vm0, %v369_v17  ;;  %v7496_v28 = vpack.i.bf16 %v8594_v6, %v8591_v5  ;;  %v553_v30 = vrot.slane %v8591_v5, 1  ;;  %v554_v36 = vrot.slane %v8596_v7, 1  ;;  %v272_v45 = vld [vmem:[%s8400_s11 + $0xa0] sm:$0xff]  ;;  %v275_v17 = vld [vmem:[%s8400_s11 + $0xb8] sm:$0xff] }
  0x44   : > { %v370_v39 = vsel %vm300_vm4, %v267_v41, %v338_v62  ;;  %v7501_v14 = vpack.i.bf16 %v8601_v10, %v8596_v7  ;;  %v556_v42 = vrot.slane %v8603_v13, 1  ;;  %v558_v43 = vrot.slane %v8619_v29, 1  ;;  %v1189_v41 = vld [vmem:[%s12757_s2 + $0x78] sm:$0xff] }
  0x45   : > { %403 = vst.msk [vmem:[#allocation2 + $0xc9] sm:$0xff] %vm196_vm0, %v370_v39  ;;  %v559_v49 = vrot.slane %v8610_v23, 1  ;;  %v371_v51 = vsel %vm301_vm5, %v268_v58, %v339_v18  ;;  %v372_v53 = vsel %vm302_vm6, %v269_v63, %v340_v24  ;;  %v341_v54 = vmul.f32 %v8390_v12, %v270_v25  ;;  %v1191_v58 = vld [vmem:[%s12757_s2 + $0x88] sm:$0xff]  ;;  %v8650_v62 = vld [vmem:[#allocation2 + $0xb8] sm:$0x3] }
  0x46   : > { %7472 = vrot.lane.b32.xlu1 %v7471_v56, %s8218_s20  ;;  %404 = vst.msk [vmem:[#allocation2 + $0xd9] sm:$0xff] %vm196_vm0, %v371_v51  ;;  %vm304_vm8 = vcmp.gt.f32.partialorder %v271_v40, 0.0  ;;  %v342_v55 = vmul.f32 %v8390_v12, %v271_v40  ;;  %v1190_v56 = vld [vmem:[%s12757_s2 + $0x80] sm:$0xff]  ;;  %405 = vst.msk [vmem:[#allocation2 + $0xe1] sm:$0xff] %vm196_vm0, %v372_v53  ;;  %vm305_vm9 = vcmp.gt.f32.partialorder %v272_v45, 0.0  ;;  %v343_v63 = vmul.f32 %v8390_v12, %v272_v45  ;;  %v1201_v57 = vld [vmem:[%s12757_s2 + $0xd8] sm:$0xff] }
  0x47   : > { %7477 = vrot.lane.b32.xlu0 %v7476_v3, %s8218_s20  ;;  %v6786_v3 = vpack.c.bf16 %v1189_v41, %v1188_v11  ;;  %vm306_vm10 = vcmp.gt.f32.partialorder %v273_v47, 0.0  ;;  %v8657_v18 = vsel %vm522_vm2, %v553_v30, %v554_v36  ;;  %v373_v24 = vsel %vm303_vm7, %v270_v25, %v341_v54  ;;  %v276_v51 = vld [vmem:[%s8400_s11 + $0xc0] sm:$0xff]  ;;  %v1192_v25 = vld [vmem:[%s12757_s2 + $0x90] sm:$0xff]  ;;  %v1193_v30 = vld [vmem:[%s12757_s2 + $0x98] sm:$0xff] }
  0x48   : > { %12883 = vst [vmem:[#allocation17_spill] sm:$0xff] %v8657_v18  ;;  %v374_v39 = vsel %vm304_vm8, %v271_v40, %v342_v55  ;;  %406 = vst.msk [vmem:[#allocation2 + $0xf1] sm:$0xff] %vm196_vm0, %v373_v24  ;;  %v375_v11 = vsel %vm305_vm9, %v272_v45, %v343_v63  ;;  %v6789_v41 = vpack.c.bf16 %v1191_v58, %v1190_v56  ;;  %vm307_vm11 = vcmp.gt.f32.partialorder %v274_v61, 0.0  ;;  %v277_v54 = vld [vmem:[%s8400_s11 + $0xc8] sm:$0xff] }
  0x49   : > { %407 = vst.msk [vmem:[#allocation2 + $0xf9] sm:$0xff] %vm196_vm0, %v374_v39  ;;  %6787 = vmatpush1.bf16.msra.mxu0 %v6786_v3  ;;  %v8673_v40 = vsel %vm522_vm2, %v554_v36, %v556_v42  ;;  %v561_v53 = vrot.slane %v8650_v62, 1  ;;  %408 = vst.msk [vmem:[#allocation2 + $0x109] sm:$0xff] %vm196_vm0, %v375_v11  ;;  %vm308_vm12 = vcmp.gt.f32.partialorder %v275_v17, 0.0  ;;  %v7506_v55 = vpack.i.bf16 %v8657_v18, %v8619_v29  ;;  %v1194_v11 = vld [vmem:[%s12757_s2 + $0xa0] sm:$0xff] }
  0x4a   : > { %7482 = vrot.lane.b32.xlu1 %v7481_v8, %s8218_s20  ;;  %v344_v8 = vmul.f32 %v8390_v12, %v273_v47  ;;  %12884 = vst [vmem:[#allocation18_spill] sm:$0xff] %v8673_v40  ;;  %6788 = vmatprep.subr.bf16.mxu0 %v12760_v4  ;;  %v8686_v36 = vld [vmem:[#allocation2 + $0xc0] sm:$0xff]  ;;  %v346_v56 = vmul.f32 %v8390_v12, %v275_v17  ;;  %vm309_vm13 = vcmp.gt.f32.partialorder %v276_v51, 0.0  ;;  %vm310_vm14 = vcmp.gt.f32.partialorder %v277_v54, 0.0 }
  0x4b   : > { %7487 = vrot.lane.b32.xlu0 %v7486_v19, %s8218_s20  ;;  %v345_v19 = vmul.f32 %v8390_v12, %v274_v61  ;;  %v563_v58 = vrot.slane %v8686_v36, 1  ;;  %v347_v3 = vmul.f32 %v8390_v12, %v276_v51  ;;  %v12782_v31 = vrot.slane %v8491_v15, 2 }
  0x4c   : > { %v376_v45 = vsel %vm306_vm10, %v273_v47, %v344_v8  ;;  %v8688_v42 = vld [vmem:[#allocation2 + $0xc8] sm:$0xff]  ;;  %v8703_v63 = vld [vmem:[#allocation2 + $0xd0] sm:$0x3]  ;;  %v378_v39 = vsel %vm308_vm12, %v275_v17, %v346_v56  ;;  %vm603_vm7 = vcmask 1045504  }
  0x4d   : > { %409 = vst.msk [vmem:[#allocation2 + $0x111] sm:$0xff] %vm196_vm0, %v376_v45  ;;  %v377_v47 = vsel %vm307_vm11, %v274_v61, %v345_v19  ;;  %v6792_v61 = vpack.c.bf16 %v1193_v30, %v1192_v25  ;;  %v564_v24 = vrot.slane %v8688_v42, 1  ;;  %6790 = vmatpush1.bf16.msra.mxu0 %v6789_v41  ;;  %v278_v8 = vld [vmem:[%s8400_s11 + $0xd0] sm:$0xff]  ;;  %411 = vst.msk [vmem:[#allocation2 + $0x129] sm:$0xff] %vm196_vm0, %v378_v39  ;;  %v1195_v41 = vld [vmem:[%s12757_s2 + $0xa8] sm:$0xff]  ;;  %v566_v30 = vrot.slane %v8703_v63, 1 }
  0x4e   : > { %7492 = vrot.lane.b32.xlu1 %v7491_v21, %s8218_s20  ;;  %v8700_v21 = vsel %vm522_vm2, %v558_v43, %v559_v49  ;;  %410 = vst.msk [vmem:[#allocation2 + $0x121] sm:$0xff] %vm196_vm0, %v377_v47  ;;  %v8711_v43 = vld [vmem:[#allocation2 + $0xe0] sm:$0xff]  ;;  %6791 = vmatprep.subr.bf16.mxu0 %v12760_v4  ;;  %v379_v17 = vsel %vm309_vm13, %v276_v51, %v347_v3  ;;  %v8738_v45 = vld [vmem:[#allocation2 + $0xd8] sm:$0xff]  ;;  %vm311_vm15 = vcmp.gt.f32.partialorder %v278_v8, 0.0 }
  0x4f   : > { %7497 = vrot.lane.b32.xlu0 %v7496_v28, %s8218_s20  ;;  %12885 = vst [vmem:[#allocation19_spill] sm:$0xff] %v8700_v21  ;;  %v348_v28 = vmul.f32 %v8390_v12, %v277_v54  ;;  %v7511_v19 = vpack.i.bf16 %v8673_v40, %v8610_v23  ;;  %v8731_v25 = vsel %vm522_vm2, %v559_v49, %v561_v53  ;;  %412 = vst.msk [vmem:[#allocation2 + $0x139] sm:$0xff] %vm196_vm0, %v379_v17  ;;  %v279_v17 = vld [vmem:[%s8400_s11 + $0xd8] sm:$0xff] }
  0x50   : > { %12886 = vst [vmem:[#allocation20_spill] sm:$0xff] %v8731_v25  ;;  %v7516_v51 = vpack.i.bf16 %v8700_v21, %v8686_v36  ;;  %v349_v56 = vmul.f32 %v8390_v12, %v278_v8  ;;  %v8745_v49 = vsel %vm522_vm2, %v563_v58, %v564_v24  ;;  %v568_v53 = vrot.slane %v8738_v45, 1  ;;  %v8750_v39 = vld [vmem:[#allocation2 + $0xf8] sm:$0xff]  ;;  %v8773_v21 = vld [vmem:[#allocation2 + $0x100] sm:$0x3] }
  0x51   : > { %v380_v47 = vsel %vm310_vm14, %v277_v54, %v348_v28  ;;  %12887 = vst [vmem:[#allocation21_spill] sm:$0xff] %v8745_v49  ;;  %6793 = vmatpush1.bf16.msra.mxu0 %v6792_v61  ;;  %v6795_v3 = vpack.c.bf16 %v1195_v41, %v1194_v11  ;;  %v1196_v54 = vld [vmem:[%s12757_s2 + $0xb0] sm:$0xff]  ;;  %v1197_v58 = vld [vmem:[%s12757_s2 + $0xb8] sm:$0xff]  ;;  %v7521_v61 = vpack.i.bf16 %v8731_v25, %v8688_v42  ;;  %v12890_v25 = vmov 0.0|0.0  }
  0x52   : > { %7502 = vrot.lane.b32.xlu1 %v7501_v14, %s8218_s20  ;;  %v8740_v14 = vld [vmem:[#allocation2 + $0xe8] sm:$0x3]  ;;  %413 = vst.msk [vmem:[#allocation2 + $0x141] sm:$0xff] %vm196_vm0, %v380_v47  ;;  %6794 = vmatprep.subr.bf16.mxu0 %v12760_v4  ;;  %v8763_v28 = vsel %vm522_vm2, %v564_v24, %v566_v30  ;;  %v381_v41 = vsel %vm311_vm15, %v278_v8, %v349_v56  ;;  %v8771_v4 = vld [vmem:[#allocation2 + $0xf0] sm:$0xff]  ;;  %v574_v8 = vrot.slane %v8750_v39, 1  ;;  %vm312_vm1 = vcmp.gt.f32.partialorder %v279_v17, 0.0 }
  0x53   : > { %7507 = vrot.lane.b32.xlu0 %v7506_v55, %s8218_s20  ;;  %v569_v55 = vrot.slane %v8711_v43, 1  ;;  %12888 = vst [vmem:[#allocation22_spill] sm:$0xff] %v8763_v28  ;;  %v571_v11 = vrot.slane %v8740_v14, 1  ;;  %v7526_v47 = vpack.i.bf16 %v8745_v49, %v8738_v45  ;;  %414 = vst.msk [vmem:[#allocation2 + $0x151] sm:$0xff] %vm196_vm0, %v381_v41  ;;  %v573_v30 = vrot.slane %v8771_v4, 1  ;;  %v1198_v41 = vld [vmem:[%s12757_s2 + $0xc0] sm:$0xff] }
  0x54   : > { %v8782_v56 = vld [vmem:[#allocation2 + $0x110] sm:$0xff]  ;;  %v7531_v49 = vpack.i.bf16 %v8763_v28, %v8711_v43  ;;  %v281_v28 = vld [vmem:[%s8400_s11 + $0xe8] sm:$0xff] }
  0x55   : > { %v8778_v24 = vsel %vm522_vm2, %v568_v53, %v569_v55  ;;  %6796 = vmatpush1.bf16.msra.mxu0 %v6795_v3  ;;  %v1199_v53 = vld [vmem:[%s12757_s2 + $0xc8] sm:$0xff]  ;;  %v8795_v40 = vsel %vm522_vm2, %v569_v55, %v571_v11  ;;  %v8807_v55 = vld [vmem:[#allocation2 + $0x118] sm:$0x3]  ;;  %v8811_v6 = vsel %vm522_vm2, %v573_v30, %v574_v8  ;;  %vm314_vm4 = vcmp.gt.f32.partialorder %v281_v28, 0.0 }
  0x56   : > { %7512 = vrot.lane.b32.xlu1 %v7511_v19, %s8218_s20  ;;  %v280_v19 = vld [vmem:[%s8400_s11 + $0xe0] sm:$0xff]  ;;  %12889 = vst [vmem:[#allocation23_spill] sm:$0xff] %v8778_v24  ;;  %6797 = vmatprep.subr.bf16.mxu0 %v12890_v25  ;;  %12891 = vst [vmem:[#allocation24_spill] sm:$0xff] %v8795_v40  ;;  %v8797_v3 = vld [vmem:[#allocation2 + $0x108] sm:$0xff]  ;;  %v7536_v18 = vpack.i.bf16 %v8778_v24, %v8771_v4  ;;  %v6801_v60 = vpack.c.bf16 %v1199_v53, %v1198_v41  ;;  %v581_v52 = vrot.slane %v8807_v55, 1 }
  0x57   : > { %7517 = vrot.lane.b32.xlu0 %v7516_v51, %s8218_s20  ;;  %v6798_v51 = vpack.c.bf16 %v1197_v58, %v1196_v54  ;;  %v576_v54 = vrot.slane %v8773_v21, 1  ;;  %v350_v58 = vmul.f32 %v8390_v12, %v279_v17  ;;  %vm313_vm3 = vcmp.gt.f32.partialorder %v280_v19, 0.0  ;;  %12892 = vst [vmem:[#allocation25_spill] sm:$0xff] %v8811_v6  ;;  %v8817_v59 = vld [vmem:[#allocation2 + $0x128] sm:$0xff]  ;;  %v282_v41 = vld [vmem:[%s8400_s11 + $0xf0] sm:$0xff] }
  0x58   : > { %v578_v10 = vrot.slane %v8797_v3, 1  ;;  %v351_v11 = vmul.f32 %v8390_v12, %v280_v19  ;;  %vm315_vm5 = vcmp.gt.f32.partialorder %v282_v41, 0.0 }
  0x59   : > { %6799 = vmatpush1.bf16.msra.mxu0 %v6798_v51  ;;  %v382_v24 = vsel %vm312_vm1, %v279_v17, %v350_v58  ;;  %v352_v51 = vmul.f32 %v8390_v12, %v281_v28  ;;  %v7541_v17 = vpack.i.bf16 %v8795_v40, %v8750_v39  ;;  %v8831_v53 = vsel %vm522_vm2, %v574_v8, %v576_v54  ;;  %v8833_v58 = vld [vmem:[#allocation2 + $0x120] sm:$0xff]  ;;  %v8845_v40 = vld [vmem:[#allocation2 + $0x130] sm:$0x3] }
  0x5a   : > { %7522 = vrot.lane.b32.xlu1 %v7521_v61, %s8218_s20  ;;  %v579_v61 = vrot.slane %v8782_v56, 1  ;;  %6800 = vmatprep.subr.bf16.mxu0 %v12890_v25  ;;  %415 = vst.msk [vmem:[#allocation2 + $0x159] sm:$0xff] %vm196_vm0, %v382_v24  ;;  %v383_v30 = vsel %vm313_vm3, %v280_v19, %v351_v11  ;;  %12893 = vst [vmem:[#allocation26_spill] sm:$0xff] %v8831_v53  ;;  %v283_v24 = vld [vmem:[%s8400_s11 + $0xf8] sm:$0xff]  ;;  %v7546_v19 = vpack.i.bf16 %v8811_v6, %v8797_v3  ;;  %v8852_v6 = vld [vmem:[#allocation2 + $0x140] sm:$0xff] }
  0x5b   : > { %7527 = vrot.lane.b32.xlu0 %v7526_v47, %s8218_s20  ;;  %v1200_v47 = vld [vmem:[%s12757_s2 + $0xd0] sm:$0xff]  ;;  %416 = vst.msk [vmem:[#allocation2 + $0x169] sm:$0xff] %vm196_vm0, %v383_v30  ;;  %v583_v11 = vrot.slane %v8833_v58, 1  ;;  %v384_v8 = vsel %vm314_vm4, %v281_v28, %v352_v51  ;;  %v584_v54 = vrot.slane %v8817_v59, 1  ;;  %v7551_v30 = vpack.i.bf16 %v8831_v53, %v8782_v56  ;;  %v8868_v51 = vld [vmem:[#allocation2 + $0x138] sm:$0xff] }
  0x5c   : > { %v6804_v37 = vpack.c.bf16 %v1201_v57, %v1200_v47  ;;  %417 = vst.msk [vmem:[#allocation2 + $0x171] sm:$0xff] %vm196_vm0, %v384_v8  ;;  %v1203_v57 = vld [vmem:[%s12757_s2 + $0xe8] sm:$0xff]  ;;  %vm316_vm6 = vcmp.gt.f32.partialorder %v283_v24, 0.0  ;;  %v8866_v47 = vsel %vm522_vm2, %v579_v61, %v581_v52  ;;  %v586_v8 = vrot.slane %v8845_v40, 1 }
  0x5d   : > { %6802 = vmatpush1.bf16.msra.mxu0 %v6801_v60  ;;  %v354_v60 = vmul.f32 %v8390_v12, %v283_v24  ;;  %v588_v33 = vrot.slane %v8868_v51, 1  ;;  %v589_v52 = vrot.slane %v8852_v6, 1 }
  0x5e   : > { %7532 = vrot.lane.b32.xlu1 %v7531_v49, %s8218_s20  ;;  %v8842_v49 = vsel %vm522_vm2, %v578_v10, %v579_v61  ;;  %6803 = vmatprep.subr.bf16.mxu0 %v12890_v25  ;;  %v1202_v10 = vld [vmem:[%s12757_s2 + $0xe0] sm:$0xff]  ;;  %v8880_v61 = vld [vmem:[#allocation2 + $0x148] sm:$0x3] }
  0x5f   : > { %7537 = vrot.lane.b32.xlu0 %v7536_v18, %s8218_s20  ;;  %12894 = vst [vmem:[#allocation27_spill] sm:$0xff] %v8842_v49  ;;  %v353_v18 = vmul.f32 %v8390_v12, %v282_v41  ;;  %v7556_v28 = vpack.i.bf16 %v8842_v49, %v8833_v58  ;;  %v386_v12 = vsel %vm316_vm6, %v283_v24, %v354_v60 }
  0x60   : > { %v8877_v49 = vsel %vm522_vm2, %v583_v11, %v584_v54  ;;  %419 = vst.msk [vmem:[#allocation2 + $0x189] sm:$0xff] %vm196_vm0, %v386_v12  ;;  %v7561_v24 = vpack.i.bf16 %v8866_v47, %v8817_v59 }
  0x61   : > { %v385_v53 = vsel %vm315_vm5, %v282_v41, %v353_v18  ;;  %12895 = vst [vmem:[#allocation28_spill] sm:$0xff] %v8877_v49  ;;  %6805 = vmatpush1.bf16.msra.mxu0 %v6804_v37  ;;  %v6807_v41 = vpack.c.bf16 %v1203_v57, %v1202_v10  ;;  %v7566_v11 = vpack.i.bf16 %v8877_v49, %v8868_v51  ;;  %v8908_v10 = vld [vmem:[#allocation2 + $0x150] sm:$0xff]  ;;  %v591_v57 = vrot.slane %v8880_v61, 1 }
  0x62   : > { %7542 = vrot.lane.b32.xlu1 %v7541_v17, %s8218_s20  ;;  %418 = vst.msk [vmem:[#allocation2 + $0x181] sm:$0xff] %vm196_vm0, %v385_v53  ;;  %v614_v17 = vrot.slane %v8487_v9, 2  ;;  %6806 = vmatprep.subr.bf16.mxu0 %v12890_v25  ;;  %v1204_v9 = vld [vmem:[%s12757_s2 + $0xf0] sm:$0xff]  ;;  %v1205_v53 = vld [vmem:[%s12757_s2 + $0xf8] sm:$0xff]  ;;  %v8906_v18 = vsel %vm522_vm2, %v584_v54, %v586_v8  ;;  %v593_v60 = vrot.slane %v8908_v10, 1 }
  0x63   : > { %7547 = vrot.lane.b32.xlu0 %v7546_v19, %s8218_s20  ;;  %v8883_v19 = vld [vmem:[#allocation2 + $0x158] sm:$0xff]  ;;  %12896 = vst [vmem:[#allocation29_spill] sm:$0xff] %v8906_v18  ;;  %v7571_v54 = vpack.i.bf16 %v8906_v18, %v8852_v6  ;;  %v8928_v8 = vsel %vm522_vm2, %v589_v52, %v591_v57 }
  0x64   : > { %v8895_v37 = vsel %vm603_vm7, %v614_v17, %v12782_v31  ;;  %v594_v12 = vrot.slane %v8883_v19, 1  ;;  %v6810_v17 = vpack.c.bf16 %v1205_v53, %v1204_v9  ;;  %v8919_v31 = vld [vmem:[#allocation2 + $0x170] sm:$0xff]  ;;  %12898 = vst [vmem:[#allocation31_spill] sm:$0xff] %v8928_v8  ;;  %v8938_v49 = vld [vmem:[#allocation2 + $0x178] sm:$0x3] }
  0x65   : > { %6588 = vmatprep.mubr.msk.f32.mxu1 %vm196_vm0, %v8895_v37  ;;  %6808 = vmatpush1.bf16.msra.mxu0 %v6807_v41  ;;  %v8930_v41 = vld [vmem:[#allocation2 + $0x168] sm:$0xff]  ;;  %v599_v18 = vrot.slane %v8919_v31, 1 }
  0x66   : > { %7552 = vrot.lane.b32.xlu1 %v7551_v30, %s8218_s20  ;;  %v8912_v30 = vsel %vm522_vm2, %v588_v33, %v589_v52  ;;  %6809 = vmatprep.subr.bf16.mxu0 %v12890_v25  ;;  %v8934_v53 = vsel %vm522_vm2, %v593_v60, %v594_v12  ;;  %v7581_v52 = vpack.i.bf16 %v8928_v8, %v8883_v19  ;;  %v601_v60 = vrot.slane %v8938_v49, 1 }
  0x67   : > { %7557 = vrot.lane.b32.xlu0 %v7556_v28, %s8218_s20  ;;  %12897 = vst [vmem:[#allocation30_spill] sm:$0xff] %v8912_v30  ;;  %v8916_v28 = vld [vmem:[#allocation2 + $0x160] sm:$0x3]  ;;  %v7576_v33 = vpack.i.bf16 %v8912_v30, %v8908_v10  ;;  %12899 = vst [vmem:[#allocation32_spill] sm:$0xff] %v8934_v53 }
  0x68   : > { %v596_v9 = vrot.slane %v8916_v28, 1 }
  0x69   : > { %6811 = vmatpush1.bf16.msra.mxu0 %v6810_v17  ;;  %v8951_v17 = vld [vmem:[#allocation2 + $0x180] sm:$0xff] }
  0x6a   : > { %7562 = vrot.lane.b32.xlu1 %v7561_v24, %s8218_s20  ;;  %v598_v24 = vrot.slane %v8930_v41, 1  ;;  %6812 = vmatprep.subr.bf16.mxu0 %v12890_v25  ;;  %v8948_v57 = vsel %vm522_vm2, %v594_v12, %v596_v9  ;;  %v8965_v12 = vsel %vm522_vm2, %v599_v18, %v601_v60  ;;  %v617_v60 = vrot.slane %v8493_v16, 2 }
  0x6b   : > { %7567 = vrot.lane.b32.xlu0 %v7566_v11, %s8218_s20  ;;  %v7586_v11 = vpack.i.bf16 %v8934_v53, %v8930_v41  ;;  %12900 = vst [vmem:[#allocation33_spill] sm:$0xff] %v8948_v57  ;;  %v8962_v53 = vld [vmem:[#allocation2 + $0x188] sm:$0xff]  ;;  %12902 = vst [vmem:[#allocation35_spill] sm:$0xff] %v8965_v12  ;;  %v624_v16 = vrot.slane %v8538_v38, 2  ;;  %v630_v38 = vrot.slane %v8560_v48, 2 }
  0x6c   : > { %v8954_v30 = vsel %vm522_vm2, %v598_v24, %v599_v18  ;;  %v7601_v9 = vpack.i.bf16 %v8965_v12, %v8962_v53  ;;  %v609_v24 = vrot.slane %v8471_v0, 2  ;;  %v619_v0 = vrot.slane %v8518_v32, 2  ;;  %v8032_v12 = vld [vmem:[#allocation2] sm:$0xff] }
  0x6d   : > { %12901 = vst [vmem:[#allocation34_spill] sm:$0xff] %v8954_v30  ;;  %v625_v32 = vrot.slane %v8548_v20, 2 }
  0x6e   : > { %7572 = vrot.lane.b32.xlu1 %v7571_v54, %s8218_s20  ;;  %v7591_v54 = vpack.i.bf16 %v8948_v57, %v8919_v31 }
  0x6f   : > { %7577 = vrot.lane.b32.xlu0 %v7576_v33, %s8218_s20  ;;  %v7596_v33 = vpack.i.bf16 %v8954_v30, %v8951_v17 }
  0x72   : > { %7582 = vrot.lane.b32.xlu1 %v7581_v52, %s8218_s20  ;;  %v610_v52 = vrot.slane %v8473_v1, 2  ;;  %v620_v1 = vrot.slane %v8523_v34, 2  ;;  %v627_v34 = vrot.slane %v8552_v44, 2 }
  0x73   : > { %7587 = vrot.lane.b32.xlu0 %v7586_v11, %s8218_s20  ;;  %v612_v11 = vrot.slane %v8475_v2, 2  ;;  %v12903_v2 = vrot.slane %v8491_v15, 2 }
  0x74   : > { %v8976_v30 = vsel %vm603_vm7, %v609_v24, %v610_v52  ;;  %v629_v24 = vrot.slane %v8557_v46, 2  ;;  %v9019_v20 = vsel %vm603_vm7, %v625_v32, %v627_v34  ;;  %v635_v46 = vrot.slane %v8596_v7, 2 }
  0x75   : > { %v8981_v18 = vsel %vm603_vm7, %v610_v52, %v612_v11  ;;  %v632_v52 = vrot.slane %v8563_v50, 2  ;;  %v634_v11 = vrot.slane %v8591_v5, 2  ;;  %v640_v5 = vrot.slane %v8610_v23, 2 }
  0x76   : > { %7592 = vrot.lane.b32.xlu1 %v7591_v54, %s8218_s20  ;;  %v8993_v54 = vsel %vm603_vm7, %v12903_v2, %v617_v60  ;;  %v9023_v44 = vsel %vm603_vm7, %v629_v24, %v630_v38  ;;  %v637_v60 = vrot.slane %v8603_v13, 2  ;;  %v644_v2 = vrot.slane %v8686_v36, 2 }
  0x77   : > { %7597 = vrot.lane.b32.xlu0 %v7596_v33, %s8218_s20  ;;  %v622_v33 = vrot.slane %v8525_v35, 2  ;;  %v9010_v35 = vsel %vm603_vm7, %v624_v16, %v625_v32  ;;  %v9032_v48 = vsel %vm603_vm7, %v630_v38, %v632_v52  ;;  %v9036_v50 = vsel %vm603_vm7, %v634_v11, %v635_v46  ;;  %v1239_v52 = vld [vmem:[%s12757_s2 + $0x208] sm:$0xff] }
  0x78   : > { %v9045_v7 = vsel %vm603_vm7, %v635_v46, %v637_v60  ;;  %v649_v16 = vrot.slane %v8738_v45, 2  ;;  %v650_v36 = vrot.slane %v8711_v43, 2  ;;  %v652_v32 = vrot.slane %v8740_v14, 2 }
  0x79   : > { %v9006_v15 = vsel %vm603_vm7, %v620_v1, %v622_v33  ;;  %v647_v33 = vrot.slane %v8703_v63, 2  ;;  %v654_v34 = vrot.slane %v8771_v4, 2  ;;  %v655_v45 = vrot.slane %v8750_v39, 2 }
  0x7a   : > { %7602 = vrot.lane.b32.xlu1 %v7601_v9, %s8218_s20  ;;  %v8997_v9 = vsel %vm603_vm7, %v619_v0, %v620_v1  ;;  %v639_v0 = vrot.slane %v8619_v29, 2  ;;  %v642_v1 = vrot.slane %v8650_v62, 2  ;;  %v645_v29 = vrot.slane %v8688_v42, 2 }
  0x7b   : > { %966 = vrot.lane.b32.xlu0 %v8976_v30, %s8218_s20  ;;  %v9075_v63 = vsel %vm603_vm7, %v649_v16, %v650_v36  ;;  %v657_v43 = vrot.slane %v8773_v21, 2  ;;  %v9085_v24 = vsel %vm603_vm7, %v650_v36, %v652_v32  ;;  %v9088_v14 = vsel %vm603_vm7, %v654_v34, %v655_v45  ;;  %v1238_v21 = vld [vmem:[%s12757_s2 + $0x200] sm:$0xff] }
  0x7c   : > { %v9049_v13 = vsel %vm603_vm7, %v639_v0, %v640_v5  ;;  %v9058_v23 = vsel %vm603_vm7, %v640_v5, %v642_v1  ;;  %v9062_v62 = vsel %vm603_vm7, %v644_v2, %v645_v29  ;;  %v9071_v42 = vsel %vm603_vm7, %v645_v29, %v647_v33  ;;  %v1240_v0 = vld [vmem:[%s12757_s2 + $0x210] sm:$0xff]  ;;  %v9146_v34 = vld [vmem:[%s12757_s2 + $0x100] sm:$0xff] }
  0x7d   : > { %v659_v38 = vrot.slane %v8797_v3, 2  ;;  %v660_v4 = vrot.slane %v8782_v56, 2  ;;  %v9100_v39 = vsel %vm603_vm7, %v655_v45, %v657_v43  ;;  %v662_v11 = vrot.slane %v8807_v55, 2  ;;  %v1241_v55 = vld [vmem:[%s12757_s2 + $0x218] sm:$0xff]  ;;  %v1243_v45 = vld [vmem:[%s12757_s2 + $0x228] sm:$0xff] }
  0x7e   : > { %968 = vrot.lane.b32.xlu1 %v8981_v18, %s8218_s20  ;;  %v664_v3 = vrot.slane %v8833_v58, 2  ;;  %v665_v56 = vrot.slane %v8817_v59, 2  ;;  %v6860_v46 = vpack.c.bf16 %v1239_v52, %v1238_v21  ;;  %v667_v59 = vrot.slane %v8845_v40, 2  ;;  %v9157_v43 = vld [vmem:[%s12757_s2 + $0x108] sm:$0xff]  ;;  %v9162_v21 = vld [vmem:[#allocation2 + $0x190] sm:$0x3] }
  0x7f   : > { %970 = vrot.lane.b32.xlu0 %v8895_v37, %s8218_s20  ;;  %v9109_v60 = vsel %vm603_vm7, %v659_v38, %v660_v4  ;;  %v6864_v58 = vpack.c.bf16 %v1241_v55, %v1240_v0  ;;  %v9123_v5 = vsel %vm603_vm7, %v660_v4, %v662_v11  ;;  %v669_v2 = vrot.slane %v8868_v51, 2  ;;  %v1242_v51 = vld [vmem:[%s12757_s2 + $0x220] sm:$0xff] }
  0x80   : > { %6861 = vmatprep.subr.bf16.mxu1 %v6860_v46  ;;  %v9126_v1 = vsel %vm603_vm7, %v664_v3, %v665_v56  ;;  %v670_v29 = vrot.slane %v8852_v6, 2  ;;  %v679_v33 = vrot.slane %v8930_v41, 2  ;;  %v680_v40 = vrot.slane %v8919_v31, 2 }
  0x81   : > { %6863 = vmatpush3.bf16.msra.mxu1 %v6860_v46  ;;  %v719_v16 = vrot.slane %v8951_v17, 1  ;;  %v720_v36 = vrot.slane %v8962_v53, 1  ;;  %v604_v6 = vrot.slane %v8415_v26, 2  ;;  %v605_v32 = vrot.slane %v8417_v27, 2 }
  0x82   : > { %972 = vrot.lane.b32.xlu1 %v8993_v54, %s8218_s20  ;;  %6865 = vmatprep.subr.bf16.mxu1 %v6864_v58  ;;  %v9149_v31 = vsel %vm603_vm7, %v665_v56, %v667_v59  ;;  %v672_v26 = vrot.slane %v8880_v61, 2  ;;  %v674_v27 = vrot.slane %v8908_v10, 2  ;;  %v675_v38 = vrot.slane %v8883_v19, 2  ;;  %v1244_v19 = vld [vmem:[%s12757_s2 + $0x230] sm:$0xff]  ;;  %v1245_v56 = vld [vmem:[%s12757_s2 + $0x238] sm:$0xff] }
  0x83   : > { %974 = vrot.lane.b32.xlu0 %v8997_v9, %s8218_s20  ;;  %v6868_v4 = vpack.c.bf16 %v1243_v45, %v1242_v51  ;;  %v9165_v52 = vsel %vm603_vm7, %v669_v2, %v670_v29  ;;  %v9170_v11 = vsel %vm603_vm7, %v679_v33, %v680_v40  ;;  %v9173_v3 = vsel %vm522_vm2, %v719_v16, %v720_v36  ;;  %v8031_v59 = vld [vmem:[#allocation2 + $0x10] sm:$0x3]  ;;  %v9196_v16 = vld [vmem:[%s12757_s2 + $0x118] sm:$0xff] }
  0x84   : > { %12904 = vst [vmem:[#allocation36_spill] sm:$0xff] %v9173_v3  ;;  %v682_v61 = vrot.slane %v8938_v49, 2  ;;  %v722_v46 = vrot.slane %v9162_v21, 1  ;;  %v606_v0 = vsel %vm603_vm7, %v604_v6, %v605_v32  ;;  %v6813_v55 = vpack.c.bf16 %v9157_v43, %v9146_v34  ;;  %v9191_v49 = vld [vmem:[%s12757_s2 + $0x110] sm:$0xff]  ;;  %v9207_v43 = vld [vmem:[#allocation2 + $0x198] sm:$0xff] }
  0x85   : > { %6867 = vmatpush3.bf16.msra.mxu1 %v6864_v58  ;;  %v607_v58 = vrot.slane %v8031_v59, 2  ;;  %v6872_v2 = vpack.c.bf16 %v1245_v56, %v1244_v19  ;;  %v9199_v51 = vsel %vm603_vm7, %v670_v29, %v672_v26  ;;  %v9202_v6 = vsel %vm603_vm7, %v674_v27, %v675_v38 }
  0x86   : > { %976 = vrot.lane.b32.xlu1 %v9006_v15, %s8218_s20  ;;  %6869 = vmatprep.subr.bf16.mxu1 %v6868_v4  ;;  %v677_v34 = vrot.slane %v8916_v28, 2  ;;  %v7606_v45 = vpack.i.bf16 %v9170_v11, %v9173_v3  ;;  %v756_v29 = vrot.slane %v8951_v17, 2  ;;  %v757_v26 = vrot.slane %v8962_v53, 2 }
  0x87   : > { %978 = vrot.lane.b32.xlu0 %v9010_v35, %s8218_s20  ;;  %v9218_v28 = vsel %vm603_vm7, %v680_v40, %v682_v61  ;;  %v9221_v27 = vsel %vm522_vm2, %v720_v36, %v722_v46  ;;  %v764_v59 = vrot.slane %v9207_v43, 1  ;;  %v6816_v53 = vpack.c.bf16 %v9196_v16, %v9191_v49 }
  0x88   : > { %v9230_v40 = vsel %vm603_vm7, %v756_v29, %v757_v26  ;;  %v608_v36 = vsel %vm603_vm7, %v605_v32, %v607_v58  ;;  %v9234_v8 = vsel %vm603_vm7, %v675_v38, %v677_v34  ;;  %v759_v32 = vrot.slane %v9162_v21, 2 }
  0x89   : > { %6871 = vmatpush3.bf16.msra.mxu1 %v6868_v4  ;;  %v9209_v4 = vld [vmem:[#allocation2 + $0x1a0] sm:$0xff] }
  0x8a   : > { %980 = vrot.lane.b32.xlu1 %v9019_v20, %s8218_s20  ;;  %6873 = vmatprep.subr.bf16.mxu1 %v6872_v2  ;;  %v9262_v21 = vsel %vm603_vm7, %v757_v26, %v759_v32 }
  0x8b   : > { %982 = vrot.lane.b32.xlu0 %v9023_v44, %s8218_s20 }
  0x8d   : > { %6875 = vmatpush3.bf16.msra.mxu1 %v6872_v2 }
  0x8e   : > { %984 = vrot.lane.b32.xlu1 %v9032_v48, %s8218_s20  ;;  %6876 = vmatprep.subr.bf16.mxu1 %v12890_v25 }
  0x8f   : > { %986 = vrot.lane.b32.xlu0 %v9036_v50, %s8218_s20 }
  0x90   : > { %6589 = vmatmul.mubr.msk.f32.vlgmr.msra.gmra.mrb[0].mxu1 %vm196_vm0, %v8993_v54 }
  0x91   : > { %6591 = vmatprep.mubr.msk.f32.mxu1 %vm196_vm0, %v8997_v9 }
  0x92   : > { %988 = vrot.lane.b32.xlu1 %v9045_v7, %s8218_s20 }
  0x93   : > { %990 = vrot.lane.b32.xlu0 %v9049_v13, %s8218_s20 }
  0x94   : > { %6592 = vmatmul.mubr.msk.f32.gmra.mrb[2].mxu1 %vm196_vm0, %v9006_v15 }
  0x95   : > { %6594 = vmatprep.mubr.msk.f32.mxu1 %vm196_vm0, %v9010_v35 }
  0x96   : > { %992 = vrot.lane.b32.xlu1 %v9058_v23, %s8218_s20 }
  0x97   : > { %994 = vrot.lane.b32.xlu0 %v9062_v62, %s8218_s20 }
  0x98   : > { %6595 = vmatmul.mubr.msk.f32.gmra.mrb[4].mxu1 %vm196_vm0, %v9019_v20 }
  0x99   : > { %6597 = vmatprep.mubr.msk.f32.mxu1 %vm196_vm0, %v9023_v44 }
  0x9a   : > { %996 = vrot.lane.b32.xlu1 %v9071_v42, %s8218_s20 }
  0x9b   : > { %998 = vrot.lane.b32.xlu0 %v9075_v63, %s8218_s20 }
  0x9c   : > { %6598 = vmatmul.mubr.msk.f32.gmra.mrb[6].mxu1 %vm196_vm0, %v9032_v48 }
  0x9d   : > { %6600 = vmatprep.mubr.msk.f32.mxu1 %vm196_vm0, %v9036_v50 }
  0x9e   : > { %1000 = vrot.lane.b32.xlu1 %v9085_v24, %s8218_s20 }
  0x9f   : > { %1002 = vrot.lane.b32.xlu0 %v9088_v14, %s8218_s20 }
  0xa0   : > { %6601 = vmatmul.mubr.msk.f32.gmra.mrb[8].mxu1 %vm196_vm0, %v9045_v7 }
  0xa1   : > { %6603 = vmatprep.mubr.msk.f32.mxu1 %vm196_vm0, %v9049_v13 }
  0xa2   : > { %1004 = vrot.lane.b32.xlu1 %v9100_v39, %s8218_s20 }
  0xa3   : > { %1006 = vrot.lane.b32.xlu0 %v9109_v60, %s8218_s20 }
  0xa4   : > { %6604 = vmatmul.mubr.msk.f32.gmra.mrb[10].mxu1 %vm196_vm0, %v9058_v23 }
  0xa5   : > { %6606 = vmatprep.mubr.msk.f32.mxu1 %vm196_vm0, %v9062_v62 }
  0xa6   : > { %1008 = vrot.lane.b32.xlu1 %v9123_v5, %s8218_s20 }
  0xa7   : > { %1010 = vrot.lane.b32.xlu0 %v9126_v1, %s8218_s20 }
  0xa8   : > { %6607 = vmatmul.mubr.msk.f32.gmra.mrb[12].mxu1 %vm196_vm0, %v9071_v42 }
  0xa9   : > { %6609 = vmatprep.mubr.msk.f32.mxu1 %vm196_vm0, %v9075_v63 }
  0xaa   : > { %1012 = vrot.lane.b32.xlu1 %v9149_v31, %s8218_s20 }
  0xab   : > { %1014 = vrot.lane.b32.xlu0 %v9165_v52, %s8218_s20 }
  0xac   : > { %6610 = vmatmul.mubr.msk.f32.gmra.mrb[14].mxu1 %vm196_vm0, %v9085_v24 }
  0xad   : > { %v7448_v33 = vpop.permute.xlu0 %7447  ;;  %6612 = vmatprep.mubr.msk.f32.mxu1 %vm196_vm0, %v9088_v14 }
  0xae   : > { %v7450_v19 = vunpack.i.h.bf16 %v7448_v33  ;;  %v7449_v56 = vunpack.i.l.bf16 %v7448_v33  ;;  %1016 = vrot.lane.b32.xlu1 %v9199_v51, %s8218_s20  ;;  %v765_v33 = vrot.slane %v9209_v4, 1 }
  0xaf   : > { %1018 = vrot.lane.b32.xlu0 %v9202_v6, %s8218_s20 }
  0xb0   : > { %v1106_v3 = vsel %vm196_vm0, %v606_v0, %v7449_v56  ;;  %v1074_v17 = vsel %vm196_vm0, %v8032_v12, %v7450_v19  ;;  %v7458_v57 = vpop.permute.xlu1 %7457  ;;  %v766_v0 = vsel %vm522_vm2, %v764_v59, %v765_v33  ;;  %v9237_v56 = vld [vmem:[#allocation2 + $0x1a8] sm:$0x3]  ;;  %6613 = vmatmul.mubr.msk.f32.gmra.mrb[16].mxu1 %vm196_vm0, %v9100_v39 }
  0xb1   : > { %v7453_v61 = vpop.permute.xlu0 %7452  ;;  %1381 = vmatprep.mubr.f32.mxu0 %v1106_v3  ;;  %v7459_v46 = vunpack.i.l.bf16 %v7458_v57  ;;  %v7611_v3 = vpack.i.bf16 %v9218_v28, %v9221_v27  ;;  %v7460_v38 = vunpack.i.h.bf16 %v7458_v57  ;;  %v7616_v2 = vpack.i.bf16 %v9230_v40, %v766_v0  ;;  %v8033_v19 = vld [vmem:[#allocation2 + $0x8] sm:$0xff]  ;;  %v1210_v57 = vld [vmem:[%s12757_s2 + $0x120] sm:$0xff]  ;;  %6615 = vmatprep.mubr.msk.f32.mxu1 %vm196_vm0, %v9109_v60 }
  0xb2   : > { %v7455_v12 = vunpack.i.h.bf16 %v7453_v61  ;;  %v7454_v49 = vunpack.i.l.bf16 %v7453_v61  ;;  %1382 = vmatmul.mubr.f32.vlgmr.msra.gmra.mrb[0].mxu0 %v1074_v17  ;;  %1020 = vrot.lane.b32.xlu1 %v9234_v8, %s8218_s20  ;;  %v767_v16 = vrot.slane %v9237_v56, 1 }
  0xb3   : > { %6814 = vmatpush1.bf16.msra.mxu0 %v6813_v55  ;;  %v1108_v58 = vsel %vm196_vm0, %v8976_v30, %v7459_v46  ;;  %7607 = vrot.lane.b32.xlu0 %v7606_v45, %s8218_s20  ;;  %v1211_v30 = vld [vmem:[%s12757_s2 + $0x128] sm:$0xff]  ;;  %v8034_v46 = vld [vmem:[#allocation2 + $0x18] sm:$0xff] }
  0xb4   : > { %v1107_v34 = vsel %vm196_vm0, %v608_v36, %v7454_v49  ;;  %v1075_v29 = vsel %vm196_vm0, %v8033_v19, %v7455_v12  ;;  %6815 = vmatprep.subr.bf16.mxu0 %v12890_v25  ;;  %v7463_v59 = vpop.permute.xlu1 %7462  ;;  %v768_v17 = vsel %vm522_vm2, %v765_v33, %v767_v16  ;;  %v1076_v0 = vsel %vm196_vm0, %v8034_v46, %v7460_v38  ;;  %v1212_v33 = vld [vmem:[%s12757_s2 + $0x130] sm:$0xff]  ;;  %v1215_v19 = vld [vmem:[%s12757_s2 + $0x148] sm:$0xff]  ;;  %v8037_v46 = vld [vmem:[#allocation2 + $0x38] sm:$0xff] }
  0xb5   : > { %1386 = vmatprep.mubr.f32.mxu0 %v1107_v34  ;;  %v7464_v55 = vunpack.i.l.bf16 %v7463_v59  ;;  %v7468_v45 = vpop.permute.xlu0 %7467  ;;  %v7621_v61 = vpack.i.bf16 %v9262_v21, %v768_v17  ;;  %v7465_v36 = vunpack.i.h.bf16 %v7463_v59  ;;  %v6819_v26 = vpack.c.bf16 %v1211_v30, %v1210_v57  ;;  %v8036_v59 = vld [vmem:[#allocation2 + $0x30] sm:$0xff]  ;;  %6616 = vmatmul.mubr.msk.f32.gmra.mrb[18].mxu1 %vm196_vm0, %v9123_v5 }
  0xb6   : > { %1387 = vmatmul.mubr.f32.gmra.mrb[2].mxu0 %v1075_v29  ;;  %7612 = vrot.lane.b32.xlu1 %v7611_v3, %s8218_s20  ;;  %v7469_v12 = vunpack.i.l.bf16 %v7468_v45  ;;  %v1213_v3 = vld [vmem:[%s12757_s2 + $0x138] sm:$0xff]  ;;  %v1216_v17 = vld [vmem:[%s12757_s2 + $0x150] sm:$0xff] }
  0xb7   : > { %1391 = vmatprep.mubr.f32.mxu0 %v1108_v58  ;;  %6817 = vmatpush1.bf16.msra.mxu0 %v6816_v53  ;;  %v1109_v49 = vsel %vm196_vm0, %v8981_v18, %v7464_v55  ;;  %v7470_v18 = vunpack.i.h.bf16 %v7468_v45  ;;  %v8035_v53 = vld [vmem:[#allocation2 + $0x20] sm:$0xff]  ;;  %v6822_v58 = vpack.c.bf16 %v1213_v3, %v1212_v33  ;;  %v1219_v3 = vld [vmem:[%s12757_s2 + $0x168] sm:$0xff] }
  0xb8   : > { %6818 = vmatprep.subr.bf16.mxu0 %v12890_v25  ;;  %7617 = vrot.lane.b32.xlu0 %v7616_v2, %s8218_s20  ;;  %v7473_v32 = vpop.permute.xlu1 %7472  ;;  %v1077_v38 = vsel %vm196_vm0, %v8035_v53, %v7465_v36  ;;  %v1110_v34 = vsel %vm196_vm0, %v8895_v37, %v7469_v12  ;;  %v1214_v2 = vld [vmem:[%s12757_s2 + $0x140] sm:$0xff] }
  0xb9   : > { %v7474_v16 = vunpack.i.l.bf16 %v7473_v32  ;;  %v7478_v29 = vpop.permute.xlu0 %7477  ;;  %v7475_v37 = vunpack.i.h.bf16 %v7473_v32  ;;  %v9300_v57 = vsel %vm196_vm0, %v8036_v59, %v7470_v18  ;;  %v6825_v30 = vpack.c.bf16 %v1215_v19, %v1214_v2  ;;  %v1218_v33 = vld [vmem:[%s12757_s2 + $0x160] sm:$0xff]  ;;  %v8038_v18 = vld [vmem:[#allocation2 + $0x48] sm:$0xff]  ;;  %v1221_v2 = vld [vmem:[%s12757_s2 + $0x178] sm:$0xff]  ;;  %6618 = vmatprep.mubr.msk.f32.mxu1 %vm196_vm0, %v9126_v1 }
  0xba   : > { %1392 = vmatmul.mubr.f32.gmra.mrb[4].mxu0 %v1076_v0  ;;  %7622 = vrot.lane.b32.xlu1 %v7621_v61, %s8218_s20  ;;  %v7479_v55 = vunpack.i.l.bf16 %v7478_v29  ;;  %v1217_v61 = vld [vmem:[%s12757_s2 + $0x158] sm:$0xff] }
  0xbb   : > { %1396 = vmatprep.mubr.f32.mxu0 %v1109_v49  ;;  %6820 = vmatpush1.bf16.msra.mxu0 %v6819_v26  ;;  %v1111_v45 = vsel %vm196_vm0, %v8993_v54, %v7474_v16  ;;  %v7480_v54 = vunpack.i.h.bf16 %v7478_v29  ;;  %v9317_v0 = vsel %vm196_vm0, %v8037_v46, %v7475_v37  ;;  %v6828_v26 = vpack.c.bf16 %v1217_v61, %v1216_v17  ;;  %v8039_v29 = vld [vmem:[#allocation2 + $0x50] sm:$0xff]  ;;  %v1223_v17 = vld [vmem:[%s12757_s2 + $0x188] sm:$0xff] }
  0xbc   : > { %6821 = vmatprep.subr.bf16.mxu0 %v12890_v25  ;;  %v7483_v36 = vpop.permute.xlu1 %7482  ;;  %v1112_v49 = vsel %vm196_vm0, %v8997_v9, %v7479_v55  ;;  %6619 = vmatmul.mubr.msk.f32.gmra.mrb[20].mxu1 %vm196_vm0, %v9149_v31 }
  0xbd   : > { %v7484_v12 = vunpack.i.l.bf16 %v7483_v36  ;;  %v7488_v32 = vpop.permute.xlu0 %7487  ;;  %v7485_v9 = vunpack.i.h.bf16 %v7483_v36  ;;  %v9334_v53 = vsel %vm196_vm0, %v8038_v18, %v7480_v54  ;;  %v8040_v36 = vld [vmem:[#allocation2 + $0x60] sm:$0xff]  ;;  %6621 = vmatprep.mubr.msk.f32.mxu1 %vm196_vm0, %v9165_v52 }
  0xbe   : > { %1397 = vmatmul.mubr.f32.gmra.mrb[6].mxu0 %v1077_v38  ;;  %v6831_v38 = vpack.c.bf16 %v1219_v3, %v1218_v33  ;;  %v1225_v33 = vld [vmem:[%s12757_s2 + $0x198] sm:$0xff] }
  0xbf   : > { %1401 = vmatprep.mubr.f32.mxu0 %v1110_v34  ;;  %6823 = vmatpush1.bf16.msra.mxu0 %v6822_v58  ;;  %v7489_v58 = vunpack.i.l.bf16 %v7488_v32  ;;  %v1113_v16 = vsel %vm196_vm0, %v9006_v15, %v7484_v12  ;;  %v1220_v34 = vld [vmem:[%s12757_s2 + $0x170] sm:$0xff]  ;;  %v7490_v15 = vunpack.i.h.bf16 %v7488_v32  ;;  %v9351_v37 = vsel %vm196_vm0, %v8039_v29, %v7485_v9  ;;  %v8041_v32 = vld [vmem:[#allocation2 + $0x68] sm:$0xff] }
  0xc0   : > { %6824 = vmatprep.subr.bf16.mxu0 %v12890_v25  ;;  %v7493_v19 = vpop.permute.xlu1 %7492  ;;  %v6834_v59 = vpack.c.bf16 %v1221_v2, %v1220_v34  ;;  %v1227_v34 = vld [vmem:[%s12757_s2 + $0x1a8] sm:$0xff]  ;;  %6622 = vmatmul.mubr.msk.f32.gmra.mrb[22].mxu1 %vm196_vm0, %v9199_v51 }
  0xc1   : > { %v1114_v55 = vsel %vm196_vm0, %v9010_v35, %v7489_v58  ;;  %v7498_v61 = vpop.permute.xlu0 %7497  ;;  %v7495_v35 = vunpack.i.h.bf16 %v7493_v19  ;;  %v9368_v54 = vsel %vm196_vm0, %v8040_v36, %v7490_v15  ;;  %6624 = vmatprep.mubr.msk.f32.mxu1 %vm196_vm0, %v9202_v6 }
  0xc2   : > { %1402 = vmatmul.mubr.f32.gmra.mrb[8].mxu0 %v9300_v57 }
  0xc3   : > { %1406 = vmatprep.mubr.f32.mxu0 %v1111_v45  ;;  %6826 = vmatpush1.bf16.msra.mxu0 %v6825_v30  ;;  %v7494_v30 = vunpack.i.l.bf16 %v7493_v19  ;;  %v1222_v45 = vld [vmem:[%s12757_s2 + $0x180] sm:$0xff]  ;;  %v9385_v9 = vsel %vm196_vm0, %v8041_v32, %v7495_v35  ;;  %v8042_v19 = vld [vmem:[#allocation2 + $0x78] sm:$0xff] }
  0xc4   : > { %6827 = vmatprep.subr.bf16.mxu0 %v12890_v25  ;;  %v6837_v46 = vpack.c.bf16 %v1223_v17, %v1222_v45  ;;  %v7503_v3 = vpop.permute.xlu1 %7502  ;;  %v1229_v45 = vld [vmem:[%s12757_s2 + $0x1b8] sm:$0xff]  ;;  %6625 = vmatmul.mubr.msk.f32.gmra.mrb[24].mxu1 %vm196_vm0, %v9234_v8 }
  0xc5   : > { %v1115_v12 = vsel %vm196_vm0, %v9019_v20, %v7494_v30  ;;  %v7500_v20 = vunpack.i.h.bf16 %v7498_v61  ;;  %v7508_v2 = vpop.permute.xlu0 %7507  ;;  %6627 = vmatprep.mubr.msk.f32.mxu1 %vm196_vm0, %v9170_v11 }
  0xc6   : > { %1407 = vmatmul.mubr.f32.gmra.mrb[10].mxu0 %v9317_v0 }
  0xc7   : > { %1411 = vmatprep.mubr.f32.mxu0 %v1112_v49  ;;  %6829 = vmatpush1.bf16.msra.mxu0 %v6828_v26  ;;  %v7499_v26 = vunpack.i.l.bf16 %v7498_v61  ;;  %v1224_v49 = vld [vmem:[%s12757_s2 + $0x190] sm:$0xff]  ;;  %v9402_v15 = vsel %vm196_vm0, %v8042_v19, %v7500_v20  ;;  %v8043_v61 = vld [vmem:[#allocation2 + $0x80] sm:$0xff] }
  0xc8   : > { %6830 = vmatprep.subr.bf16.mxu0 %v12890_v25  ;;  %v6840_v18 = vpack.c.bf16 %v1225_v33, %v1224_v49  ;;  %v7513_v17 = vpop.permute.xlu1 %7512  ;;  %v1231_v49 = vld [vmem:[%s12757_s2 + $0x1c8] sm:$0xff]  ;;  %6628 = vmatmul.mubr.msk.f32.gmra.mrb[26].mxu1 %vm196_vm0, %v9218_v28 }
  0xc9   : > { %v1116_v58 = vsel %vm196_vm0, %v9023_v44, %v7499_v26  ;;  %v7505_v44 = vunpack.i.h.bf16 %v7503_v3  ;;  %v7518_v33 = vpop.permute.xlu0 %7517  ;;  %6630 = vmatprep.mubr.msk.f32.mxu1 %vm196_vm0, %v9230_v40 }
  0xca   : > { %1412 = vmatmul.mubr.f32.gmra.mrb[12].mxu0 %v9334_v53 }
  0xcb   : > { %1416 = vmatprep.mubr.f32.mxu0 %v1113_v16  ;;  %6832 = vmatpush1.bf16.msra.mxu0 %v6831_v38  ;;  %v7504_v38 = vunpack.i.l.bf16 %v7503_v3  ;;  %v1226_v16 = vld [vmem:[%s12757_s2 + $0x1a0] sm:$0xff]  ;;  %v9419_v35 = vsel %vm196_vm0, %v8043_v61, %v7505_v44  ;;  %v8044_v3 = vld [vmem:[#allocation2 + $0x90] sm:$0xff] }
  0xcc   : > { %6833 = vmatprep.subr.bf16.mxu0 %v12890_v25  ;;  %v6843_v29 = vpack.c.bf16 %v1227_v34, %v1226_v16  ;;  %v1233_v16 = vld [vmem:[%s12757_s2 + $0x1d8] sm:$0xff]  ;;  %v7523_v34 = vpop.permute.xlu1 %7522  ;;  %6631 = vmatmul.mubr.msk.f32.gmra.mrb[28].mxu1 %vm196_vm0, %v9262_v21 }
  0xcd   : > { %v1117_v30 = vsel %vm196_vm0, %v9032_v48, %v7504_v38  ;;  %v7510_v48 = vunpack.i.h.bf16 %v7508_v2 }
  0xce   : > { %1417 = vmatmul.mubr.f32.gmra.mrb[14].mxu0 %v9351_v37 }
  0xcf   : > { %1421 = vmatprep.mubr.f32.mxu0 %v1114_v55  ;;  %6835 = vmatpush1.bf16.msra.mxu0 %v6834_v59  ;;  %v7509_v59 = vunpack.i.l.bf16 %v7508_v2  ;;  %v1228_v55 = vld [vmem:[%s12757_s2 + $0x1b0] sm:$0xff]  ;;  %v9436_v20 = vsel %vm196_vm0, %v8044_v3, %v7510_v48  ;;  %v8045_v2 = vld [vmem:[#allocation2 + $0x98] sm:$0xff] }
  0xd0   : > { %6836 = vmatprep.subr.bf16.mxu0 %v12890_v25  ;;  %v6846_v36 = vpack.c.bf16 %v1229_v45, %v1228_v55  ;;  %v1235_v55 = vld [vmem:[%s12757_s2 + $0x1e8] sm:$0xff]  ;;  %v7528_v45 = vpop.permute.xlu0 %7527 }
  0xd1   : > { %v1118_v26 = vsel %vm196_vm0, %v9036_v50, %v7509_v59  ;;  %v7515_v50 = vunpack.i.h.bf16 %v7513_v17 }
  0xd2   : > { %1422 = vmatmul.mubr.f32.gmra.mrb[16].mxu0 %v9368_v54 }
  0xd3   : > { %1426 = vmatprep.mubr.f32.mxu0 %v1115_v12  ;;  %6838 = vmatpush1.bf16.msra.mxu0 %v6837_v46  ;;  %v7514_v46 = vunpack.i.l.bf16 %v7513_v17  ;;  %v1230_v12 = vld [vmem:[%s12757_s2 + $0x1c0] sm:$0xff]  ;;  %v9453_v44 = vsel %vm196_vm0, %v8045_v2, %v7515_v50  ;;  %v8046_v17 = vld [vmem:[#allocation2 + $0xa8] sm:$0xff] }
  0xd4   : > { %6839 = vmatprep.subr.bf16.mxu0 %v12890_v25  ;;  %v6849_v32 = vpack.c.bf16 %v1231_v49, %v1230_v12  ;;  %v1237_v12 = vld [vmem:[%s12757_s2 + $0x1f8] sm:$0xff]  ;;  %v7533_v49 = vpop.permute.xlu1 %7532 }
  0xd5   : > { %v1119_v38 = vsel %vm196_vm0, %v9045_v7, %v7514_v46  ;;  %v7520_v7 = vunpack.i.h.bf16 %v7518_v33  ;;  %v7535_v40 = vunpack.i.h.bf16 %v7533_v49 }
  0xd6   : > { %1427 = vmatmul.mubr.f32.gmra.mrb[18].mxu0 %v9385_v9 }
  0xd7   : > { %1431 = vmatprep.mubr.f32.mxu0 %v1116_v58  ;;  %6841 = vmatpush1.bf16.msra.mxu0 %v6840_v18  ;;  %v7519_v18 = vunpack.i.l.bf16 %v7518_v33  ;;  %v1232_v58 = vld [vmem:[%s12757_s2 + $0x1d0] sm:$0xff]  ;;  %v9470_v48 = vsel %vm196_vm0, %v8046_v17, %v7520_v7 }
  0xd8   : > { %6842 = vmatprep.subr.bf16.mxu0 %v12890_v25  ;;  %v6852_v19 = vpack.c.bf16 %v1233_v16, %v1232_v58  ;;  %v8047_v33 = vld [vmem:[#allocation2 + $0xb0] sm:$0xff]  ;;  %v8048_v58 = vld [vmem:[#allocation2 + $0xc0] sm:$0xff] }
  0xd9   : > { %v1120_v59 = vsel %vm196_vm0, %v9049_v13, %v7519_v18  ;;  %v7525_v13 = vunpack.i.h.bf16 %v7523_v34 }
  0xda   : > { %1432 = vmatmul.mubr.f32.gmra.mrb[20].mxu0 %v9402_v15 }
  0xdb   : > { %1436 = vmatprep.mubr.f32.mxu0 %v1117_v30  ;;  %6844 = vmatpush1.bf16.msra.mxu0 %v6843_v29  ;;  %v7524_v29 = vunpack.i.l.bf16 %v7523_v34  ;;  %v1234_v30 = vld [vmem:[%s12757_s2 + $0x1e0] sm:$0xff]  ;;  %v9487_v50 = vsel %vm196_vm0, %v8047_v33, %v7525_v13  ;;  %v8052_v33 = vld [vmem:[#allocation2 + $0xf0] sm:$0xff] }
  0xdc   : > { %6845 = vmatprep.subr.bf16.mxu0 %v12890_v25  ;;  %v6855_v61 = vpack.c.bf16 %v1235_v55, %v1234_v30 }
  0xdd   : > { %v1121_v46 = vsel %vm196_vm0, %v9058_v23, %v7524_v29  ;;  %v7530_v23 = vunpack.i.h.bf16 %v7528_v45 }
  0xde   : > { %1437 = vmatmul.mubr.f32.gmra.mrb[22].mxu0 %v9419_v35 }
  0xdf   : > { %1441 = vmatprep.mubr.f32.mxu0 %v1118_v26  ;;  %6847 = vmatpush1.bf16.msra.mxu0 %v6846_v36  ;;  %v7529_v36 = vunpack.i.l.bf16 %v7528_v45  ;;  %v1236_v26 = vld [vmem:[%s12757_s2 + $0x1f0] sm:$0xff]  ;;  %v9496_v16 = vsel %vm196_vm0, %v8048_v58, %v7530_v23  ;;  %v8050_v45 = vld [vmem:[#allocation2 + $0xd8] sm:$0xff] }
  0xe0   : > { %6848 = vmatprep.subr.bf16.mxu0 %v12890_v25  ;;  %v6858_v3 = vpack.c.bf16 %v1237_v12, %v1236_v26 }
  0xe1   : > { %v1122_v18 = vsel %vm196_vm0, %v9062_v62, %v7529_v36  ;;  %v7543_v62 = vpop.permute.xlu1 %7542 }
  0xe2   : > { %1442 = vmatmul.mubr.f32.gmra.mrb[24].mxu0 %v9436_v20  ;;  %v7544_v29 = vunpack.i.l.bf16 %v7543_v62  ;;  %v7545_v55 = vunpack.i.h.bf16 %v7543_v62 }
  0xe3   : > { %1446 = vmatprep.mubr.f32.mxu0 %v1119_v38  ;;  %6850 = vmatpush1.bf16.msra.mxu0 %v6849_v32  ;;  %v7534_v32 = vunpack.i.l.bf16 %v7533_v49  ;;  %v7538_v38 = vpop.permute.xlu0 %7537 }
  0xe4   : > { %6851 = vmatprep.subr.bf16.mxu0 %v12890_v25  ;;  %v7539_v34 = vunpack.i.l.bf16 %v7538_v38  ;;  %v7540_v2 = vunpack.i.h.bf16 %v7538_v38  ;;  %v1125_v17 = vsel %vm196_vm0, %v9085_v24, %v7544_v29 }
  0xe5   : > { %v1123_v7 = vsel %vm196_vm0, %v9071_v42, %v7534_v32 }
  0xe6   : > { %1447 = vmatmul.mubr.f32.gmra.mrb[26].mxu0 %v9453_v44  ;;  %v9508_v42 = vsel %vm196_vm0, %v8050_v45, %v7540_v2  ;;  %v8054_v2 = vld [vmem:[#allocation2 + $0x108] sm:$0xff] }
  0xe7   : > { %1451 = vmatprep.mubr.f32.mxu0 %v1120_v59  ;;  %6853 = vmatpush1.bf16.msra.mxu0 %v6852_v19  ;;  %v8049_v19 = vld [vmem:[#allocation2 + $0xc8] sm:$0xff]  ;;  %v1124_v59 = vsel %vm196_vm0, %v9075_v63, %v7539_v34  ;;  %v7548_v30 = vpop.permute.xlu0 %7547 }
  0xe8   : > { %6854 = vmatprep.subr.bf16.mxu0 %v12890_v25  ;;  %v9502_v21 = vsel %vm196_vm0, %v8049_v19, %v7535_v40  ;;  %v7549_v13 = vunpack.i.l.bf16 %v7548_v30  ;;  %v7550_v36 = vunpack.i.h.bf16 %v7548_v30  ;;  %v8053_v40 = vld [vmem:[#allocation2 + $0xf8] sm:$0xff] }
  0xea   : > { %1452 = vmatmul.mubr.f32.gmra.mrb[28].mxu0 %v9470_v48  ;;  %v1126_v12 = vsel %vm196_vm0, %v9088_v14, %v7549_v13  ;;  %v9520_v24 = vsel %vm196_vm0, %v8052_v33, %v7550_v36  ;;  %v8056_v36 = vld [vmem:[#allocation2 + $0x120] sm:$0xff] }
  0xeb   : > { %1456 = vmatprep.mubr.f32.mxu0 %v1121_v46  ;;  %6856 = vmatpush1.bf16.msra.mxu0 %v6855_v61  ;;  %v7553_v61 = vpop.permute.xlu1 %7552  ;;  %v8051_v46 = vld [vmem:[#allocation2 + $0xe0] sm:$0xff]  ;;  %v7558_v49 = vpop.permute.xlu0 %7557 }
  0xec   : > { %6857 = vmatprep.subr.bf16.mxu0 %v12890_v25  ;;  %v9514_v63 = vsel %vm196_vm0, %v8051_v46, %v7545_v55  ;;  %v7554_v26 = vunpack.i.l.bf16 %v7553_v61  ;;  %v7555_v23 = vunpack.i.h.bf16 %v7553_v61  ;;  %v7560_v38 = vunpack.i.h.bf16 %v7558_v49  ;;  %v8055_v55 = vld [vmem:[#allocation2 + $0x110] sm:$0xff] }
  0xee   : > { %1457 = vmatmul.mubr.f32.gmra.mrb[30].mxu0 %v9487_v50  ;;  %v1127_v32 = vsel %vm196_vm0, %v9100_v39, %v7554_v26  ;;  %v9526_v14 = vsel %vm196_vm0, %v8053_v40, %v7555_v23  ;;  %v9532_v39 = vsel %vm196_vm0, %v8054_v2, %v7560_v38  ;;  %v8057_v23 = vld [vmem:[#allocation2 + $0x128] sm:$0xff]  ;;  %v8058_v38 = vld [vmem:[#allocation2 + $0x138] sm:$0xff] }
  0xef   : > { %1461 = vmatprep.mubr.f32.mxu0 %v1122_v18  ;;  %6859 = vmatpush1.bf16.msra.mxu0 %v6858_v3  ;;  %v7559_v3 = vunpack.i.l.bf16 %v7558_v49  ;;  %v7563_v18 = vpop.permute.xlu1 %7562 }
  0xf0   : > { %v7564_v58 = vunpack.i.l.bf16 %v7563_v18  ;;  %v7565_v62 = vunpack.i.h.bf16 %v7563_v18 }
  0xf1   : > { %v1128_v34 = vsel %vm196_vm0, %v9109_v60, %v7559_v3 }
  0xf2   : > { %1462 = vmatmul.mubr.f32.gmra.mrb[32].mxu0 %v9496_v16  ;;  %v1129_v29 = vsel %vm196_vm0, %v9123_v5, %v7564_v58  ;;  %v9538_v60 = vsel %vm196_vm0, %v8055_v55, %v7565_v62  ;;  %v8059_v62 = vld [vmem:[#allocation2 + $0x140] sm:$0xff] }
  0xf3   : > { %1466 = vmatprep.mubr.f32.mxu0 %v1123_v7  ;;  %v7568_v7 = vpop.permute.xlu0 %7567 }
  0xf4   : > { %v7569_v19 = vunpack.i.l.bf16 %v7568_v7  ;;  %v7570_v30 = vunpack.i.h.bf16 %v7568_v7 }
  0xf6   : > { %1467 = vmatmul.mubr.f32.gmra.mrb[34].mxu0 %v9502_v21  ;;  %v1130_v13 = vsel %vm196_vm0, %v9126_v1, %v7569_v19  ;;  %v9544_v5 = vsel %vm196_vm0, %v8056_v36, %v7570_v30 }
  0xf7   : > { %1471 = vmatprep.mubr.f32.mxu0 %v1124_v59  ;;  %v7573_v59 = vpop.permute.xlu1 %7572 }
  0xf8   : > { %v7574_v45 = vunpack.i.l.bf16 %v7573_v59  ;;  %v7575_v61 = vunpack.i.h.bf16 %v7573_v59 }
  0xfa   : > { %1472 = vmatmul.mubr.f32.gmra.mrb[36].mxu0 %v9508_v42  ;;  %v1131_v26 = vsel %vm196_vm0, %v9149_v31, %v7574_v45  ;;  %v9550_v1 = vsel %vm196_vm0, %v8057_v23, %v7575_v61 }
  0xfb   : > { %1476 = vmatprep.mubr.f32.mxu0 %v1125_v17  ;;  %v7578_v17 = vpop.permute.xlu0 %7577 }
  0xfc   : > { %v7579_v46 = vunpack.i.l.bf16 %v7578_v17  ;;  %v7580_v49 = vunpack.i.h.bf16 %v7578_v17  ;;  %v8060_v17 = vld [vmem:[#allocation2 + $0x158] sm:$0xff] }
  0xfe   : > { %1477 = vmatmul.mubr.f32.gmra.mrb[38].mxu0 %v9514_v63  ;;  %v1132_v3 = vsel %vm196_vm0, %v9165_v52, %v7579_v46  ;;  %v9556_v31 = vsel %vm196_vm0, %v8058_v38, %v7580_v49  ;;  %v770_v46 = vrot.slane %v9209_v4, 2  ;;  %v8061_v4 = vld [vmem:[#allocation2 + $0x170] sm:$0xff]  ;;  %v12906_v38 = vld [vmem:[#allocation9_spill] sm:$0xff] }
  0xff   : > { %1481 = vmatprep.mubr.f32.mxu0 %v1126_v12  ;;  %v7583_v12 = vpop.permute.xlu1 %7582 }
 0x100   : > { %v7584_v33 = vunpack.i.l.bf16 %v7583_v12  ;;  %v7585_v18 = vunpack.i.h.bf16 %v7583_v12  ;;  %v772_v12 = vrot.slane %v9237_v56, 2 }
 0x102   : > { %1482 = vmatmul.mubr.f32.gmra.mrb[40].mxu0 %v9520_v24  ;;  %v1133_v58 = vsel %vm196_vm0, %v9199_v51, %v7584_v33  ;;  %v9562_v52 = vsel %vm196_vm0, %v8059_v62, %v7585_v18 }
 0x103   : > { %1486 = vmatprep.mubr.f32.mxu0 %v1127_v32  ;;  %v7588_v32 = vpop.permute.xlu0 %7587 }
 0x104   : > { %v7589_v40 = vunpack.i.l.bf16 %v7588_v32  ;;  %v7590_v7 = vunpack.i.h.bf16 %v7588_v32 }
 0x106   : > { %1487 = vmatmul.mubr.f32.gmra.mrb[42].mxu0 %v9526_v14  ;;  %v1134_v19 = vsel %vm196_vm0, %v9202_v6, %v7589_v40  ;;  %v9569_v51 = vsel %vm196_vm0, %v8908_v10, %v7590_v7  ;;  %v769_v10 = vrot.slane %v9207_v43, 2 }
 0x107   : > { %1491 = vmatprep.mubr.f32.mxu0 %v1128_v34  ;;  %v7593_v34 = vpop.permute.xlu1 %7592 }
 0x108   : > { %v7594_v2 = vunpack.i.l.bf16 %v7593_v34  ;;  %v7595_v59 = vunpack.i.h.bf16 %v7593_v34  ;;  %v771_v23 = vsel %vm603_vm7, %v769_v10, %v770_v46 }
 0x109   : > { %6633 = vmatprep.mubr.msk.f32.mxu1 %vm196_vm0, %v771_v23 }
 0x10a   : > { %1492 = vmatmul.mubr.f32.gmra.mrb[44].mxu0 %v9532_v39  ;;  %v1135_v55 = vsel %vm196_vm0, %v9234_v8, %v7594_v2  ;;  %v9575_v6 = vsel %vm196_vm0, %v8060_v17, %v7595_v59 }
 0x10b   : > { %1496 = vmatprep.mubr.f32.mxu0 %v1129_v29  ;;  %v7598_v29 = vpop.permute.xlu0 %7597  ;;  %v7603_v45 = vpop.permute.xlu1 %7602 }
 0x10c   : > { %v7599_v30 = vunpack.i.l.bf16 %v7598_v29  ;;  %v7604_v61 = vunpack.i.l.bf16 %v7603_v45  ;;  %v7605_v8 = vunpack.i.h.bf16 %v7603_v45 }
 0x10e   : > { %1497 = vmatmul.mubr.f32.gmra.mrb[46].mxu0 %v9538_v60  ;;  %v1136_v36 = vsel %vm196_vm0, %v9170_v11, %v7599_v30  ;;  %v1137_v49 = vsel %vm196_vm0, %v9218_v28, %v7604_v61  ;;  %v773_v11 = vsel %vm603_vm7, %v770_v46, %v772_v12 }
 0x10f   : > { %1501 = vmatprep.mubr.f32.mxu0 %v1130_v13  ;;  %v7600_v13 = vunpack.i.h.bf16 %v7598_v29  ;;  %6634 = vmatmul.mubr.msk.f32.gmra.mrb[30].mxu1 %vm196_vm0, %v773_v11  ;;  %v967_v33 = vpop.permute.xlu0 %966  ;;  %v969_v56 = vpop.permute.xlu1 %968 }
 0x110   : > { %v1138_v28 = vsel %vm196_vm0, %v8502_v22, %v967_v33 }
 0x112   : > { %1502 = vmatmul.mubr.f32.gmra.mrb[48].mxu0 %v9544_v5 }
 0x113   : > { %1506 = vmatprep.mubr.f32.mxu0 %v1131_v26  ;;  %v9584_v26 = vsel %vm196_vm0, %v8930_v41, %v7600_v13  ;;  %v9595_v41 = vsel %vm196_vm0, %v8061_v4, %v7605_v8  ;;  %v971_v18 = vpop.permute.xlu0 %970 }
 0x114   : > { %v1140_v40 = vsel %vm196_vm0, %v12906_v38, %v971_v18 }
 0x116   : > { %1507 = vmatmul.mubr.f32.gmra.mrb[50].mxu0 %v9550_v1 }
 0x117   : > { %1511 = vmatprep.mubr.f32.mxu0 %v1132_v3  ;;  %v12905_v3 = vld [vmem:[#allocation8_spill] sm:$0xff]  ;;  %v975_v34 = vpop.permute.xlu0 %974 }
 0x118   : > { %v1139_v32 = vsel %vm196_vm0, %v12905_v3, %v969_v56 }
 0x11a   : > { %1512 = vmatmul.mubr.f32.gmra.mrb[52].mxu0 %v9556_v31 }
 0x11b   : > { %1516 = vmatprep.mubr.f32.mxu0 %v1133_v58  ;;  %v973_v58 = vpop.permute.xlu1 %972 }
 0x11e   : > { %1517 = vmatmul.mubr.f32.gmra.mrb[54].mxu0 %v9562_v52 }
 0x11f   : > { %1521 = vmatprep.mubr.f32.mxu0 %v1134_v19  ;;  %v977_v62 = vpop.permute.xlu1 %976  ;;  %v979_v19 = vpop.permute.xlu0 %978 }
 0x122   : > { %1522 = vmatmul.mubr.f32.gmra.mrb[56].mxu0 %v9569_v51 }
 0x123   : > { %1526 = vmatprep.mubr.f32.mxu0 %v1135_v55  ;;  %v981_v59 = vpop.permute.xlu1 %980  ;;  %v983_v55 = vpop.permute.xlu0 %982 }
 0x126   : > { %1527 = vmatmul.mubr.f32.gmra.mrb[58].mxu0 %v9575_v6 }
 0x127   : > { %1531 = vmatprep.mubr.f32.mxu0 %v1136_v36  ;;  %v985_v13 = vpop.permute.xlu1 %984  ;;  %v987_v61 = vpop.permute.xlu0 %986 }
 0x12a   : > { %1532 = vmatmul.mubr.f32.gmra.mrb[60].mxu0 %v9584_v26 }
 0x12b   : > { %1536 = vmatprep.mubr.f32.mxu0 %v1137_v49  ;;  %v989_v10 = vpop.permute.xlu1 %988  ;;  %v991_v8 = vpop.permute.xlu0 %990 }
 0x12e   : > { %1537 = vmatmul.mubr.f32.gmra.mrb[62].mxu0 %v9595_v41 }
 0x12f   : > { %1606 = vmatprep.mubr.f32.mxu0 %v9300_v57  ;;  %v12907_v57 = vld [vmem:[#allocation10_spill] sm:$0xff]  ;;  %v993_v49 = vpop.permute.xlu1 %992  ;;  %v995_v11 = vpop.permute.xlu0 %994 }
 0x130   : > { %v1141_v22 = vsel %vm196_vm0, %v12907_v57, %v973_v58 }
 0x132   : > { %1607 = vmatmul.mubr.f32.vlgmr.msra.gmra.mrb[0].mxu0 %v1138_v28 }
 0x133   : > { %1611 = vmatprep.mubr.f32.mxu0 %v9317_v0  ;;  %v12908_v0 = vld [vmem:[#allocation11_spill] sm:$0xff]  ;;  %v997_v33 = vpop.permute.xlu1 %996  ;;  %v999_v56 = vpop.permute.xlu0 %998 }
 0x134   : > { %v1142_v7 = vsel %vm196_vm0, %v12908_v0, %v975_v34 }
 0x136   : > { %1612 = vmatmul.mubr.f32.gmra.mrb[2].mxu0 %v1139_v32 }
 0x137   : > { %1616 = vmatprep.mubr.f32.mxu0 %v9334_v53  ;;  %v12909_v53 = vld [vmem:[#allocation12_spill] sm:$0xff]  ;;  %v1001_v32 = vpop.permute.xlu1 %1000  ;;  %v1003_v38 = vpop.permute.xlu0 %1002 }
 0x138   : > { %v1143_v2 = vsel %vm196_vm0, %v12909_v53, %v977_v62 }
 0x13a   : > { %1617 = vmatmul.mubr.f32.gmra.mrb[4].mxu0 %v1140_v40 }
 0x13b   : > { %1621 = vmatprep.mubr.f32.mxu0 %v9351_v37  ;;  %v12910_v37 = vld [vmem:[#allocation13_spill] sm:$0xff]  ;;  %v1005_v58 = vpop.permute.xlu1 %1004 }
 0x13c   : > { %v1144_v29 = vsel %vm196_vm0, %v12910_v37, %v979_v19  ;;  %v12926_v19 = vld [vmem:[#allocation29_spill] sm:$0xff] }
 0x13e   : > { %1622 = vmatmul.mubr.f32.gmra.mrb[6].mxu0 %v1141_v22  ;;  %v1007_v22 = vpop.permute.xlu0 %1006 }
 0x13f   : > { %1626 = vmatprep.mubr.f32.mxu0 %v9368_v54  ;;  %v12911_v54 = vld [vmem:[#allocation14_spill] sm:$0xff]  ;;  %v1009_v0 = vpop.permute.xlu1 %1008 }
 0x140   : > { %v1145_v30 = vsel %vm196_vm0, %v12911_v54, %v981_v59 }
 0x142   : > { %1627 = vmatmul.mubr.f32.gmra.mrb[8].mxu0 %v1142_v7  ;;  %v1011_v7 = vpop.permute.xlu0 %1010 }
 0x143   : > { %1631 = vmatprep.mubr.f32.mxu0 %v9385_v9  ;;  %v12912_v9 = vld [vmem:[#allocation15_spill] sm:$0xff] }
 0x144   : > { %v1146_v45 = vsel %vm196_vm0, %v12912_v9, %v983_v55 }
 0x146   : > { %1632 = vmatmul.mubr.f32.gmra.mrb[10].mxu0 %v1143_v2  ;;  %v1015_v37 = vpop.permute.xlu0 %1014 }
 0x147   : > { %1636 = vmatprep.mubr.f32.mxu0 %v9402_v15  ;;  %v12913_v15 = vld [vmem:[#allocation16_spill] sm:$0xff] }
 0x148   : > { %v1147_v17 = vsel %vm196_vm0, %v12913_v15, %v985_v13  ;;  %v12929_v15 = vld [vmem:[#allocation32_spill] sm:$0xff] }
 0x14a   : > { %1637 = vmatmul.mubr.f32.gmra.mrb[12].mxu0 %v1144_v29 }
 0x14b   : > { %1641 = vmatprep.mubr.f32.mxu0 %v9419_v35  ;;  %v12914_v35 = vld [vmem:[#allocation17_spill] sm:$0xff] }
 0x14c   : > { %v1148_v36 = vsel %vm196_vm0, %v12914_v35, %v987_v61 }
 0x14e   : > { %1642 = vmatmul.mubr.f32.gmra.mrb[14].mxu0 %v1145_v30  ;;  %v1019_v30 = vpop.permute.xlu0 %1018 }
 0x14f   : > { %1646 = vmatprep.mubr.f32.mxu0 %v9436_v20  ;;  %v12915_v20 = vld [vmem:[#allocation18_spill] sm:$0xff] }
 0x150   : > { %v1149_v46 = vsel %vm196_vm0, %v12915_v20, %v989_v10 }
 0x152   : > { %1647 = vmatmul.mubr.f32.gmra.mrb[16].mxu0 %v1146_v45  ;;  %v7608_v45 = vpop.permute.xlu0 %7607 }
 0x153   : > { %1651 = vmatprep.mubr.f32.mxu0 %v9453_v44  ;;  %v12916_v44 = vld [vmem:[#allocation19_spill] sm:$0xff]  ;;  %v7609_v61 = vunpack.i.l.bf16 %v7608_v45 }
 0x154   : > { %v1150_v12 = vsel %vm196_vm0, %v12916_v44, %v991_v8 }
 0x156   : > { %1652 = vmatmul.mubr.f32.gmra.mrb[18].mxu0 %v1147_v17  ;;  %v7618_v44 = vpop.permute.xlu0 %7617 }
 0x157   : > { %1656 = vmatprep.mubr.f32.mxu0 %v9470_v48  ;;  %v12917_v48 = vld [vmem:[#allocation20_spill] sm:$0xff] }
 0x158   : > { %v1151_v23 = vsel %vm196_vm0, %v12917_v48, %v993_v49  ;;  %v12931_v49 = vld [vmem:[#allocation34_spill] sm:$0xff] }
 0x15a   : > { %1657 = vmatmul.mubr.f32.gmra.mrb[20].mxu0 %v1148_v36  ;;  %v12930_v36 = vld [vmem:[#allocation33_spill] sm:$0xff] }
 0x15b   : > { %1661 = vmatprep.mubr.f32.mxu0 %v9487_v50  ;;  %v12918_v50 = vld [vmem:[#allocation21_spill] sm:$0xff] }
 0x15c   : > { %v1152_v4 = vsel %vm196_vm0, %v12918_v50, %v995_v11  ;;  %v6296_v11 = vld [vmem:[%s12757_s2 + $0x448] sm:$0xff]  ;;  %v7619_v50 = vunpack.i.l.bf16 %v7618_v44 }
 0x15e   : > { %1662 = vmatmul.mubr.f32.gmra.mrb[22].mxu0 %v1149_v46  ;;  %v8062_v46 = vld [vmem:[#allocation2 + $0x180] sm:$0xff] }
 0x15f   : > { %1666 = vmatprep.mubr.f32.mxu0 %v9496_v16  ;;  %v12919_v16 = vld [vmem:[#allocation22_spill] sm:$0xff]  ;;  %v1170_v8 = vsel %vm196_vm0, %v8062_v46, %v7609_v61 }
 0x160   : > { %v1153_v28 = vsel %vm196_vm0, %v12919_v16, %v997_v33  ;;  %v6235_v46 = vld [vmem:[%s12757_s2 + $0x260] sm:$0xff] }
 0x162   : > { %1667 = vmatmul.mubr.f32.gmra.mrb[24].mxu0 %v1150_v12 }
 0x163   : > { %1671 = vmatprep.mubr.f32.mxu0 %v9502_v21  ;;  %v12920_v21 = vld [vmem:[#allocation23_spill] sm:$0xff]  ;;  %v9667_v53 = vpop.f32.mrb[0].mxu1 }
 0x164   : > { %v1154_v3 = vsel %vm196_vm0, %v12920_v21, %v999_v56  ;;  %v9669_v2 = vpop.f32.mrb[1].mxu1  ;;  %v7620_v56 = vunpack.i.h.bf16 %v7618_v44  ;;  %v12932_v21 = vld [vmem:[#allocation35_spill] sm:$0xff] }
 0x166   : > { %1672 = vmatmul.mubr.f32.gmra.mrb[26].mxu0 %v1151_v23 }
 0x167   : > { %1676 = vmatprep.mubr.f32.mxu0 %v9508_v42  ;;  %v12921_v42 = vld [vmem:[#allocation24_spill] sm:$0xff] }
 0x168   : > { %v1155_v18 = vsel %vm196_vm0, %v12921_v42, %v1001_v32  ;;  %v6297_v32 = vld [vmem:[%s12757_s2 + $0x450] sm:$0xff]  ;;  %v6298_v42 = vld [vmem:[%s12757_s2 + $0x458] sm:$0xff] }
 0x16a   : > { %1677 = vmatmul.mubr.f32.gmra.mrb[28].mxu0 %v1152_v4  ;;  %v8063_v4 = vld [vmem:[#allocation2 + $0x188] sm:$0xff] }
 0x16b   : > { %1681 = vmatprep.mubr.f32.mxu0 %v9514_v63  ;;  %v12922_v63 = vld [vmem:[#allocation25_spill] sm:$0xff] }
 0x16c   : > { %v1156_v40 = vsel %vm196_vm0, %v12922_v63, %v1003_v38  ;;  %v1172_v38 = vsel %vm196_vm0, %v9207_v43, %v7619_v50  ;;  %v6976_v63 = vpack.c.bf16 %v6298_v42, %v6297_v32  ;;  %v6300_v43 = vld [vmem:[%s12757_s2 + $0x468] sm:$0xff]  ;;  %v6239_v50 = vld [vmem:[%s12757_s2 + $0x280] sm:$0xff] }
 0x16d   : > { %v6243_v32 = vld [vmem:[%s12757_s2 + $0x2a0] sm:$0xff]  ;;  %v6244_v42 = vld [vmem:[%s12757_s2 + $0x2a8] sm:$0xff] }
 0x16e   : > { %1682 = vmatmul.mubr.f32.gmra.mrb[30].mxu0 %v1153_v28 }
 0x16f   : > { %1686 = vmatprep.mubr.f32.mxu0 %v9520_v24  ;;  %v12923_v24 = vld [vmem:[#allocation26_spill] sm:$0xff] }
 0x170   : > { %v1157_v57 = vsel %vm196_vm0, %v12923_v24, %v1005_v58  ;;  %v12933_v24 = vld [vmem:[#allocation36_spill] sm:$0xff] }
 0x172   : > { %1687 = vmatmul.mubr.f32.gmra.mrb[32].mxu0 %v1154_v3 }
 0x173   : > { %1691 = vmatprep.mubr.f32.mxu0 %v9526_v14  ;;  %v12924_v14 = vld [vmem:[#allocation27_spill] sm:$0xff] }
 0x174   : > { %v1158_v34 = vsel %vm196_vm0, %v12924_v14, %v1007_v22  ;;  %v6299_v14 = vld [vmem:[%s12757_s2 + $0x460] sm:$0xff] }
 0x176   : > { %1692 = vmatmul.mubr.f32.gmra.mrb[34].mxu0 %v1155_v18 }
 0x177   : > { %1696 = vmatprep.mubr.f32.mxu0 %v9532_v39  ;;  %v1159_v39 = vsel %vm196_vm0, %v8866_v47, %v1009_v0  ;;  %v9674_v47 = vpop.f32.mrb[2].mxu1 }
 0x178   : > { %v9676_v29 = vpop.f32.mrb[3].mxu1 }
 0x179   : > { %v9684_v13 = vpop.f32.mrb[4].mxu1 }
 0x17a   : > { %1697 = vmatmul.mubr.f32.gmra.mrb[36].mxu0 %v1156_v40  ;;  %v9689_v17 = vpop.f32.mrb[5].mxu1 }
 0x17b   : > { %1701 = vmatprep.mubr.f32.mxu0 %v9538_v60  ;;  %v12925_v60 = vld [vmem:[#allocation28_spill] sm:$0xff] }
 0x17c   : > { %v1160_v62 = vsel %vm196_vm0, %v12925_v60, %v1011_v7  ;;  %v6301_v60 = vld [vmem:[%s12757_s2 + $0x470] sm:$0xff] }
 0x17e   : > { %1702 = vmatmul.mubr.f32.gmra.mrb[38].mxu0 %v1157_v57  ;;  %v1168_v57 = vsel %vm196_vm0, %v12933_v24, %v7620_v56 }
 0x17f   : > { %1706 = vmatprep.mubr.f32.mxu0 %v9544_v5  ;;  %v1013_v5 = vpop.permute.xlu1 %1012 }
 0x182   : > { %1707 = vmatmul.mubr.f32.gmra.mrb[40].mxu0 %v1158_v34  ;;  %v8064_v34 = vld [vmem:[#allocation2 + $0x1a0] sm:$0xff] }
 0x183   : > { %1711 = vmatprep.mubr.f32.mxu0 %v9550_v1  ;;  %v1161_v1 = vsel %vm196_vm0, %v12926_v19, %v1013_v5  ;;  %v1017_v54 = vpop.permute.xlu1 %1016 }
 0x186   : > { %1712 = vmatmul.mubr.f32.gmra.mrb[42].mxu0 %v1159_v39  ;;  %v6980_v39 = vpack.c.bf16 %v6300_v43, %v6299_v14  ;;  %v6247_v14 = vld [vmem:[%s12757_s2 + $0x2c0] sm:$0xff]  ;;  %v6248_v43 = vld [vmem:[%s12757_s2 + $0x2c8] sm:$0xff] }
 0x187   : > { %1716 = vmatprep.mubr.f32.mxu0 %v9556_v31  ;;  %v12927_v31 = vld [vmem:[#allocation30_spill] sm:$0xff]  ;;  %v1021_v9 = vpop.permute.xlu1 %1020 }
 0x188   : > { %v1162_v59 = vsel %vm196_vm0, %v12927_v31, %v1015_v37  ;;  %v1165_v10 = vsel %vm196_vm0, %v12930_v36, %v1021_v9 }
 0x18a   : > { %1717 = vmatmul.mubr.f32.gmra.mrb[44].mxu0 %v1160_v62  ;;  %v6302_v62 = vld [vmem:[%s12757_s2 + $0x478] sm:$0xff] }
 0x18b   : > { %1721 = vmatprep.mubr.f32.mxu0 %v9562_v52  ;;  %v12928_v52 = vld [vmem:[#allocation31_spill] sm:$0xff]  ;;  %v7613_v35 = vpop.permute.xlu1 %7612  ;;  %v6984_v5 = vpack.c.bf16 %v6302_v62, %v6301_v60 }
 0x18c   : > { %v1163_v55 = vsel %vm196_vm0, %v12928_v52, %v1017_v54  ;;  %v7614_v20 = vunpack.i.l.bf16 %v7613_v35  ;;  %v7615_v12 = vunpack.i.h.bf16 %v7613_v35  ;;  %v6233_v35 = vld [vmem:[%s12757_s2 + $0x250] sm:$0xff] }
 0x18e   : > { %1722 = vmatmul.mubr.f32.gmra.mrb[46].mxu0 %v1161_v1  ;;  %v1171_v33 = vsel %vm196_vm0, %v8063_v4, %v7614_v20  ;;  %v1167_v3 = vsel %vm196_vm0, %v12932_v21, %v7615_v12  ;;  %v6237_v12 = vld [vmem:[%s12757_s2 + $0x270] sm:$0xff]  ;;  %v6240_v4 = vld [vmem:[%s12757_s2 + $0x288] sm:$0xff] }
 0x18f   : > { %1726 = vmatprep.mubr.f32.mxu0 %v9569_v51  ;;  %v1164_v51 = vsel %vm196_vm0, %v12929_v15, %v1019_v30  ;;  %v7623_v28 = vpop.permute.xlu1 %7622  ;;  %v6231_v15 = vld [vmem:[%s12757_s2 + $0x240] sm:$0xff] }
 0x190   : > { %v7624_v18 = vunpack.i.l.bf16 %v7623_v28  ;;  %v7625_v58 = vunpack.i.h.bf16 %v7623_v28  ;;  %v6242_v28 = vld [vmem:[%s12757_s2 + $0x298] sm:$0xff] }
 0x192   : > { %1727 = vmatmul.mubr.f32.gmra.mrb[48].mxu0 %v1162_v59  ;;  %v1173_v0 = vsel %vm196_vm0, %v8064_v34, %v7624_v18  ;;  %v1169_v7 = vsel %vm196_vm0, %v9221_v27, %v7625_v58  ;;  %v6895_v18 = vpack.c.bf16 %v6244_v42, %v6243_v32  ;;  %v6901_v34 = vpack.c.bf16 %v6248_v43, %v6247_v14  ;;  %v6257_v42 = vld [vmem:[%s12757_s2 + $0x310] sm:$0xff] }
 0x193   : > { %1731 = vmatprep.mubr.f32.mxu0 %v9575_v6  ;;  %v7610_v6 = vunpack.i.h.bf16 %v7608_v45 }
 0x195   : > { %v1166_v48 = vsel %vm196_vm0, %v12931_v49, %v7610_v6  ;;  %v6234_v6 = vld [vmem:[%s12757_s2 + $0x258] sm:$0xff] }
 0x196   : > { %1732 = vmatmul.mubr.f32.gmra.mrb[50].mxu0 %v1163_v55  ;;  %v6238_v49 = vld [vmem:[%s12757_s2 + $0x278] sm:$0xff] }
 0x197   : > { %1736 = vmatprep.mubr.f32.mxu0 %v9584_v26  ;;  %v9695_v26 = vpop.f32.mrb[6].mxu1 }
 0x198   : > { %v9699_v23 = vpop.f32.mrb[7].mxu1 }
 0x199   : > { %v9718_v40 = vpop.f32.mrb[8].mxu1 }
 0x19a   : > { %1737 = vmatmul.mubr.f32.gmra.mrb[52].mxu0 %v1164_v51  ;;  %v9722_v22 = vpop.f32.mrb[9].mxu1  ;;  %v6232_v51 = vld [vmem:[%s12757_s2 + $0x248] sm:$0xff] }
 0x19b   : > { %1741 = vmatprep.mubr.f32.mxu0 %v9595_v41  ;;  %v6295_v41 = vld [vmem:[%s12757_s2 + $0x440] sm:$0xff]  ;;  %v9739_v19 = vpop.f32.mrb[10].mxu1  ;;  %v6877_v61 = vpack.c.bf16 %v6232_v51, %v6231_v15  ;;  %v6252_v51 = vld [vmem:[%s12757_s2 + $0x2e8] sm:$0xff] }
 0x19c   : > { %v6972_v16 = vpack.c.bf16 %v6296_v11, %v6295_v41  ;;  %v9741_v1 = vpop.f32.mrb[11].mxu1  ;;  %v6886_v41 = vpack.c.bf16 %v6238_v49, %v6237_v12  ;;  %v6251_v15 = vld [vmem:[%s12757_s2 + $0x2e0] sm:$0xff] }
 0x19d   : > { %v9744_v27 = vpop.f32.mrb[12].mxu1  ;;  %6878 = vmatpush1.bf16.msra.mxu1 %v6877_v61 }
 0x19e   : > { %1742 = vmatmul.mubr.f32.gmra.mrb[54].mxu0 %v1165_v10  ;;  %6973 = vmatprep.subr.bf16.mxu0 %v6972_v16  ;;  %v9746_v37 = vpop.f32.mrb[13].mxu1  ;;  %v6880_v10 = vpack.c.bf16 %v6234_v6, %v6233_v35  ;;  %v6907_v35 = vpack.c.bf16 %v6252_v51, %v6251_v15  ;;  %v6259_v15 = vld [vmem:[%s12757_s2 + $0x320] sm:$0xff]  ;;  %v6260_v51 = vld [vmem:[%s12757_s2 + $0x328] sm:$0xff] }
 0x19f   : > { %1746 = vmatprep.mubr.f32.mxu0 %v1170_v8  ;;  %6975 = vmatpush3.bf16.msra.mxu0 %v6972_v16  ;;  %v9748_v31 = vpop.f32.mrb[14].mxu1  ;;  %v6236_v8 = vld [vmem:[%s12757_s2 + $0x268] sm:$0xff]  ;;  %v6241_v16 = vld [vmem:[%s12757_s2 + $0x290] sm:$0xff] }
 0x1a0   : > { %6977 = vmatprep.subr.bf16.mxu0 %v6976_v63  ;;  %v9750_v59 = vpop.f32.mrb[15].mxu1  ;;  %6879 = vmatprep.subr.bf16.mxu1 %v12890_v25  ;;  %v6883_v44 = vpack.c.bf16 %v6236_v8, %v6235_v46  ;;  %v6892_v21 = vpack.c.bf16 %v6242_v28, %v6241_v16  ;;  %v6253_v8 = vld [vmem:[%s12757_s2 + $0x2f0] sm:$0xff] }
 0x1a1   : > { %v9752_v54 = vpop.f32.mrb[16].mxu1  ;;  %6881 = vmatpush1.bf16.msra.mxu1 %v6880_v10 }
 0x1a2   : > { %1747 = vmatmul.mubr.f32.gmra.mrb[56].mxu0 %v1166_v48  ;;  %v9754_v30 = vpop.f32.mrb[17].mxu1  ;;  %6882 = vmatprep.subr.bf16.mxu1 %v12890_v25 }
 0x1a3   : > { %1751 = vmatprep.mubr.f32.mxu0 %v1171_v33  ;;  %6979 = vmatpush3.bf16.msra.mxu0 %v6976_v63  ;;  %v9756_v52 = vpop.f32.mrb[18].mxu1  ;;  %v6889_v33 = vpack.c.bf16 %v6240_v4, %v6239_v50  ;;  %v6246_v63 = vld [vmem:[%s12757_s2 + $0x2b8] sm:$0xff]  ;;  %v6255_v4 = vld [vmem:[%s12757_s2 + $0x300] sm:$0xff] }
 0x1a4   : > { %6981 = vmatprep.subr.bf16.mxu0 %v6980_v39  ;;  %v9758_v55 = vpop.f32.mrb[19].mxu1 }
 0x1a5   : > { %v9760_v9 = vpop.f32.mrb[20].mxu1  ;;  %6884 = vmatpush1.bf16.msra.mxu1 %v6883_v44  ;;  %v6254_v44 = vld [vmem:[%s12757_s2 + $0x2f8] sm:$0xff] }
 0x1a6   : > { %1752 = vmatmul.mubr.f32.gmra.mrb[58].mxu0 %v1167_v3  ;;  %v9762_v45 = vpop.f32.mrb[21].mxu1  ;;  %6885 = vmatprep.subr.bf16.mxu1 %v12890_v25  ;;  %v6910_v49 = vpack.c.bf16 %v6254_v44, %v6253_v8 }
 0x1a7   : > { %1756 = vmatprep.mubr.f32.mxu0 %v1172_v38  ;;  %6983 = vmatpush3.bf16.msra.mxu0 %v6980_v39  ;;  %v9777_v36 = vpop.f32.mrb[22].mxu1  ;;  %v6245_v38 = vld [vmem:[%s12757_s2 + $0x2b0] sm:$0xff]  ;;  %v6250_v39 = vld [vmem:[%s12757_s2 + $0x2d8] sm:$0xff] }
 0x1a8   : > { %6985 = vmatprep.subr.bf16.mxu0 %v6984_v5  ;;  %v9779_v20 = vpop.f32.mrb[23].mxu1  ;;  %v6898_v24 = vpack.c.bf16 %v6246_v63, %v6245_v38  ;;  %v2088_v63 = vld [vmem:[%s8400_s11] sm:$0xff] }
 0x1a9   : > { %v9795_v48 = vpop.f32.mrb[24].mxu1  ;;  %6887 = vmatpush1.bf16.msra.mxu1 %v6886_v41 }
 0x1aa   : > { %1757 = vmatmul.mubr.f32.gmra.mrb[60].mxu0 %v1168_v57  ;;  %v9797_v11 = vpop.f32.mrb[25].mxu1  ;;  %6888 = vmatprep.subr.bf16.mxu1 %v12890_v25 }
 0x1ab   : > { %1761 = vmatprep.mubr.f32.mxu0 %v1173_v0  ;;  %6987 = vmatpush3.bf16.msra.mxu0 %v6984_v5  ;;  %v9813_v56 = vpop.f32.mrb[26].mxu1  ;;  %v6249_v0 = vld [vmem:[%s12757_s2 + $0x2d0] sm:$0xff]  ;;  %v9856_v5 = vld [vmem:[%s12758_s3] ss:$0 sm:$0xff] }
 0x1ac   : > { %7036 = vmatprep.subr.bf16.mxu0 %v12890_v25  ;;  %v9815_v3 = vpop.f32.mrb[27].mxu1  ;;  %v6904_v60 = vpack.c.bf16 %v6250_v39, %v6249_v0  ;;  %v9900_v0 = vld [vmem:[%s12756_s1 + $0x1] ss:$0 sm:$0xff] }
 0x1ad   : > { %6890 = vmatpush1.bf16.msra.mxu1 %v6889_v33  ;;  %v9831_v58 = vpop.f32.mrb[28].mxu1  ;;  %v6256_v33 = vld [vmem:[%s12757_s2 + $0x308] sm:$0xff] }
 0x1ae   : > { %1762 = vmatmul.mubr.f32.gmra.mrb[62].mxu0 %v1169_v7  ;;  %6891 = vmatprep.subr.bf16.mxu1 %v12890_v25  ;;  %v9833_v57 = vpop.f32.mrb[29].mxu1  ;;  %v6913_v28 = vpack.c.bf16 %v6256_v33, %v6255_v4 }
 0x1b1   : > { %6893 = vmatpush1.bf16.msra.mxu1 %v6892_v21 }
 0x1b2   : > { %6894 = vmatprep.subr.bf16.mxu1 %v12890_v25 }
 0x1b5   : > { %6896 = vmatpush1.bf16.msra.mxu1 %v6895_v18  ;;  %v6258_v18 = vld [vmem:[%s12757_s2 + $0x318] sm:$0xff] }
 0x1b6   : > { %6897 = vmatprep.subr.bf16.mxu1 %v12890_v25  ;;  %v6916_v14 = vpack.c.bf16 %v6258_v18, %v6257_v42 }
 0x1b9   : > { %6899 = vmatpush1.bf16.msra.mxu1 %v6898_v24 }
 0x1ba   : > { %6900 = vmatprep.subr.bf16.mxu1 %v12890_v25 }
 0x1bd   : > { %6902 = vmatpush1.bf16.msra.mxu1 %v6901_v34 }
 0x1be   : > { %6903 = vmatprep.subr.bf16.mxu1 %v12890_v25 }
 0x1c1   : > { %6905 = vmatpush1.bf16.msra.mxu1 %v6904_v60 }
 0x1c2   : > { %6906 = vmatprep.subr.bf16.mxu1 %v12890_v25 }
 0x1c5   : > { %6908 = vmatpush1.bf16.msra.mxu1 %v6907_v35  ;;  %v2089_v35 = vld [vmem:[%s8400_s11 + $0x8] sm:$0xff] }
 0x1c6   : > { %6909 = vmatprep.subr.bf16.mxu1 %v12890_v25 }
 0x1c9   : > { %6911 = vmatpush1.bf16.msra.mxu1 %v6910_v49  ;;  %v6261_v49 = vld [vmem:[%s12757_s2 + $0x330] sm:$0xff] }
 0x1ca   : > { %6912 = vmatprep.subr.bf16.mxu1 %v12890_v25 }
 0x1cd   : > { %6914 = vmatpush1.bf16.msra.mxu1 %v6913_v28  ;;  %v2090_v28 = vld [vmem:[%s8400_s11 + $0x10] sm:$0xff] }
 0x1ce   : > { %6915 = vmatprep.subr.bf16.mxu1 %v12890_v25 }
 0x1d1   : > { %6917 = vmatpush1.bf16.msra.mxu1 %v6916_v14  ;;  %v2290_v14 = vld [vmem:[#allocation2 + $0x10] sm:$0x3] }
 0x1d2   : > { %6918 = vmatprep.subr.bf16.mxu1 %v12890_v25 }
 0x1e2   : > { %v9849_v7 = vpop.f32.mrb[30].mxu1 }
 0x1e3   : > { %v9851_v62 = vpop.f32.mrb[31].mxu1 }
 0x205   : > { %v1608_v61 = vpop.f32.mrb[0].mxu0 }
 0x206   : > { %v7132_v6 = vadd.f32 %v9856_v5, %v1608_v61  ;;  %v1610_v10 = vpop.f32.mrb[1].mxu0 }
 0x207   : > { %v2288_v10 = vld [vmem:[#allocation2] sm:$0xff] }
 0x208   : > { %v1834_v46 = vadd.f32 %v7132_v6, %v9669_v2 }
 0x209   : > { %v1613_v12 = vpop.f32.mrb[2].mxu0 }
 0x20a   : > { %1992 = vst.msk [vmem:[#allocation3] sm:$0xff] %vm196_vm0, %v1834_v46  ;;  %v7133_v41 = vadd.f32 %v9856_v5, %v1613_v12  ;;  %v1615_v50 = vpop.f32.mrb[3].mxu0  ;;  %v6919_v46 = vpack.c.bf16 %v6260_v51, %v6259_v15  ;;  %v2289_v12 = vld [vmem:[#allocation2 + $0x8] sm:$0xff] }
 0x20b   : > { %v2391_v42 = vrot.slane %v2289_v12, 1 }
 0x20c   : > { %v1839_v2 = vadd.f32 %v7133_v41, %v9667_v53  ;;  %v6262_v41 = vld [vmem:[%s12757_s2 + $0x338] sm:$0xff]  ;;  %6920 = vmatpush1.bf16.msra.mxu1 %v6919_v46 }
 0x20d   : > { %v1618_v16 = vpop.f32.mrb[4].mxu0  ;;  %6921 = vmatprep.subr.bf16.mxu1 %v12890_v25 }
 0x20e   : > { %1993 = vst.msk [vmem:[#allocation3 + $0x8] sm:$0xff] %vm196_vm0, %v1839_v2  ;;  %v7134_v21 = vadd.f32 %v9856_v5, %v1618_v16  ;;  %v1620_v32 = vpop.f32.mrb[5].mxu0  ;;  %v6922_v2 = vpack.c.bf16 %v6262_v41, %v6261_v49 }
 0x210   : > { %v1844_v53 = vadd.f32 %v7134_v21, %v9676_v29  ;;  %6923 = vmatpush1.bf16.msra.mxu1 %v6922_v2 }
 0x211   : > { %v2024_v38 = vld [vmem:[#allocation3] sm:$0xff]  ;;  %v1623_v24 = vpop.f32.mrb[6].mxu0  ;;  %6924 = vmatprep.subr.bf16.mxu1 %v12890_v25 }
 0x212   : > { %v2056_v43 = vmul.f32 0.5, %v2024_v38  ;;  %1994 = vst.msk [vmem:[#allocation3 + $0x10] sm:$0xff] %vm196_vm0, %v1844_v53  ;;  %v7135_v29 = vadd.f32 %v9856_v5, %v1623_v24  ;;  %v1625_v34 = vpop.f32.mrb[7].mxu0  ;;  %v2390_v53 = vrot.slane %v2288_v10, 1 }
 0x213   : > { %v2091_v34 = vld [vmem:[%s8400_s11 + $0x18] sm:$0xff] }
 0x214   : > { %v2120_v39 = vadd.f32 %v2088_v63, %v2056_v43  ;;  %v1849_v60 = vadd.f32 %v7135_v29, %v9674_v47  ;;  %v2392_v15 = vsel %vm522_vm2, %v2390_v53, %v2391_v42 }
 0x215   : > { %v2025_v61 = vld [vmem:[#allocation3 + $0x8] sm:$0xff]  ;;  %v1628_v6 = vpop.f32.mrb[8].mxu0 }
 0x216   : > { %vm2154_vm8 = vcmp.gt.f32.partialorder %v2120_v39, 0.0  ;;  %v2192_v8 = vmul.f32 %v9900_v0, %v2120_v39  ;;  %v2057_v47 = vmul.f32 0.5, %v2025_v61  ;;  %1995 = vst.msk [vmem:[#allocation3 + $0x18] sm:$0xff] %vm196_vm0, %v1849_v60  ;;  %v1630_v44 = vpop.f32.mrb[9].mxu0  ;;  %v7136_v50 = vadd.f32 %v9856_v5, %v1628_v6 }
 0x217   : > { %v2393_v6 = vrot.slane %v2290_v14, 1  ;;  %v2093_v14 = vld [vmem:[%s8400_s11 + $0x28] sm:$0xff] }
 0x218   : > { %v2224_v4 = vsel %vm2154_vm8, %v2120_v39, %v2192_v8  ;;  %v2121_v33 = vadd.f32 %v2089_v35, %v2057_v47  ;;  %v1854_v21 = vadd.f32 %v7136_v50, %v9689_v17  ;;  %v2092_v50 = vld [vmem:[%s8400_s11 + $0x20] sm:$0xff] }
 0x219   : > { %2256 = vst.msk [vmem:[#allocation2 + $0x19] sm:$0xff] %vm196_vm0, %v2224_v4  ;;  %v2026_v16 = vld [vmem:[#allocation3 + $0x10] sm:$0xff]  ;;  %v1633_v32 = vpop.f32.mrb[10].mxu0 }
 0x21a   : > { %vm2155_vm9 = vcmp.gt.f32.partialorder %v2121_v33, 0.0  ;;  %v2193_v18 = vmul.f32 %v9900_v0, %v2121_v33  ;;  %v2058_v38 = vmul.f32 0.5, %v2026_v16  ;;  %v1635_v63 = vpop.f32.mrb[11].mxu0  ;;  %1996 = vst.msk [vmem:[#allocation3 + $0x20] sm:$0xff] %vm196_vm0, %v1854_v21  ;;  %v7137_v24 = vadd.f32 %v9856_v5, %v1633_v32 }
 0x21c   : > { %v2225_v43 = vsel %vm2155_vm9, %v2121_v33, %v2193_v18  ;;  %v2122_v29 = vadd.f32 %v2090_v28, %v2058_v38  ;;  %v1859_v39 = vadd.f32 %v7137_v24, %v9684_v13  ;;  %v2394_v33 = vsel %vm522_vm2, %v2391_v42, %v2393_v6 }
 0x21d   : > { %2257 = vst.msk [vmem:[#allocation2 + $0x21] sm:$0xff] %vm196_vm0, %v2225_v43  ;;  %v2027_v17 = vld [vmem:[#allocation3 + $0x18] sm:$0xff]  ;;  %v1638_v60 = vpop.f32.mrb[12].mxu0 }
 0x21e   : > { %vm2156_vm10 = vcmp.gt.f32.partialorder %v2122_v29, 0.0  ;;  %v2194_v51 = vmul.f32 %v9900_v0, %v2122_v29  ;;  %v2059_v61 = vmul.f32 0.5, %v2027_v17  ;;  %v1640_v35 = vpop.f32.mrb[13].mxu0  ;;  %1997 = vst.msk [vmem:[#allocation3 + $0x28] sm:$0xff] %vm196_vm0, %v1859_v39  ;;  %v7138_v10 = vadd.f32 %v9856_v5, %v1638_v60 }
 0x220   : > { %v2226_v46 = vsel %vm2156_vm10, %v2122_v29, %v2194_v51  ;;  %v2123_v8 = vadd.f32 %v2091_v34, %v2059_v61  ;;  %v2291_v47 = vld [vmem:[#allocation2 + $0x18] sm:$0xff]  ;;  %v1864_v13 = vadd.f32 %v7138_v10, %v9699_v23 }
 0x221   : > { %2258 = vst.msk [vmem:[#allocation2 + $0x31] sm:$0xff] %vm196_vm0, %v2226_v46  ;;  %v1643_v44 = vpop.f32.mrb[14].mxu0  ;;  %v7626_v12 = vpack.i.bf16 %v2392_v15, %v2291_v47  ;;  %v2028_v41 = vld [vmem:[#allocation3 + $0x20] sm:$0xff]  ;;  %v2395_v29 = vrot.slane %v2291_v47, 1 }
 0x222   : > { %vm2157_vm11 = vcmp.gt.f32.partialorder %v2123_v8, 0.0  ;;  %v2195_v49 = vmul.f32 %v9900_v0, %v2123_v8  ;;  %v7139_v2 = vadd.f32 %v9856_v5, %v1643_v44  ;;  %v1645_v4 = vpop.f32.mrb[15].mxu0  ;;  %v2060_v16 = vmul.f32 0.5, %v2028_v41  ;;  %1998 = vst.msk [vmem:[#allocation3 + $0x30] sm:$0xff] %vm196_vm0, %v1864_v13  ;;  %v2094_v46 = vld [vmem:[%s8400_s11 + $0x30] sm:$0xff] }
 0x223   : > { %7627 = vrot.lane.b32.xlu0 %v7626_v12, %s8218_s20 }
 0x224   : > { %v2227_v28 = vsel %vm2157_vm11, %v2123_v8, %v2195_v49  ;;  %v1869_v23 = vadd.f32 %v7139_v2, %v9695_v26  ;;  %v2292_v21 = vld [vmem:[#allocation2 + $0x20] sm:$0xff]  ;;  %v2124_v32 = vadd.f32 %v2092_v50, %v2060_v16  ;;  %v2293_v63 = vld [vmem:[#allocation2 + $0x28] sm:$0x3]  ;;  %v2095_v16 = vld [vmem:[%s8400_s11 + $0x38] sm:$0xff] }
 0x225   : > { %2259 = vst.msk [vmem:[#allocation2 + $0x39] sm:$0xff] %vm196_vm0, %v2227_v28  ;;  %v1648_v53 = vpop.f32.mrb[16].mxu0  ;;  %v7631_v18 = vpack.i.bf16 %v2394_v33, %v2292_v21  ;;  %v2396_v38 = vrot.slane %v2292_v21, 1  ;;  %v2029_v24 = vld [vmem:[#allocation3 + $0x28] sm:$0xff]  ;;  %v2398_v15 = vrot.slane %v2293_v63, 1 }
 0x226   : > { %1999 = vst.msk [vmem:[#allocation3 + $0x38] sm:$0xff] %vm196_vm0, %v1869_v23  ;;  %v7140_v42 = vadd.f32 %v9856_v5, %v1648_v53  ;;  %v1650_v43 = vpop.f32.mrb[17].mxu0  ;;  %vm2158_vm12 = vcmp.gt.f32.partialorder %v2124_v32, 0.0  ;;  %v2196_v26 = vmul.f32 %v9900_v0, %v2124_v32  ;;  %v2061_v17 = vmul.f32 0.5, %v2029_v24 }
 0x227   : > { %7632 = vrot.lane.b32.xlu1 %v7631_v18, %s8218_s20  ;;  %v9952_v60 = vsel %vm522_vm2, %v2395_v29, %v2396_v38  ;;  %v9963_v49 = vsel %vm522_vm2, %v2396_v38, %v2398_v15 }
 0x228   : > { %v1874_v34 = vadd.f32 %v7140_v42, %v9722_v22  ;;  %v2294_v39 = vld [vmem:[#allocation2 + $0x30] sm:$0xff]  ;;  %v2228_v51 = vsel %vm2158_vm12, %v2124_v32, %v2196_v26  ;;  %v2125_v61 = vadd.f32 %v2093_v14, %v2061_v17  ;;  %12934 = vst [vmem:[#allocation8_spill] sm:$0xff] %v9963_v49 }
 0x229   : > { %v1653_v35 = vpop.f32.mrb[18].mxu0  ;;  %v7636_v6 = vpack.i.bf16 %v9952_v60, %v2294_v39  ;;  %2260 = vst.msk [vmem:[#allocation2 + $0x49] sm:$0xff] %vm196_vm0, %v2228_v51  ;;  %v2030_v10 = vld [vmem:[#allocation3 + $0x30] sm:$0xff]  ;;  %v2480_v41 = vrot.slane %v2294_v39, 2  ;;  %v2400_v38 = vrot.slane %v2294_v39, 1 }
 0x22a   : > { %2000 = vst.msk [vmem:[#allocation3 + $0x40] sm:$0xff] %vm196_vm0, %v1874_v34  ;;  %v7141_v8 = vadd.f32 %v9856_v5, %v1653_v35  ;;  %v1655_v22 = vpop.f32.mrb[19].mxu0  ;;  %vm2159_vm13 = vcmp.gt.f32.partialorder %v2125_v61, 0.0  ;;  %v2197_v47 = vmul.f32 %v9900_v0, %v2125_v61  ;;  %v2062_v13 = vmul.f32 0.5, %v2030_v10  ;;  %v2096_v34 = vld [vmem:[%s8400_s11 + $0x40] sm:$0xff] }
 0x22b   : > { %7637 = vrot.lane.b32.xlu0 %v7636_v6, %s8218_s20 }
 0x22c   : > { %v1879_v44 = vadd.f32 %v7141_v8, %v9718_v40  ;;  %v2295_v12 = vld [vmem:[#allocation2 + $0x38] sm:$0xff]  ;;  %v2296_v50 = vld [vmem:[#allocation2 + $0x40] sm:$0x3]  ;;  %v2229_v2 = vsel %vm2159_vm13, %v2125_v61, %v2197_v47  ;;  %v2126_v4 = vadd.f32 %v2094_v46, %v2062_v13  ;;  %v2097_v47 = vld [vmem:[%s8400_s11 + $0x48] sm:$0xff] }
 0x22d   : > { %v2031_v33 = vld [vmem:[#allocation3 + $0x38] sm:$0xff]  ;;  %v1658_v28 = vpop.f32.mrb[20].mxu0  ;;  %v7641_v23 = vpack.i.bf16 %v9963_v49, %v2295_v12  ;;  %v2481_v21 = vrot.slane %v2295_v12, 2  ;;  %2261 = vst.msk [vmem:[#allocation2 + $0x51] sm:$0xff] %vm196_vm0, %v2229_v2  ;;  %v2483_v18 = vrot.slane %v2296_v50, 2  ;;  %v2401_v14 = vrot.slane %v2295_v12, 1 }
 0x22e   : > { %v2063_v32 = vmul.f32 0.5, %v2031_v33  ;;  %2001 = vst.msk [vmem:[#allocation3 + $0x48] sm:$0xff] %vm196_vm0, %v1879_v44  ;;  %v7142_v40 = vadd.f32 %v9856_v5, %v1658_v28  ;;  %v1660_v53 = vpop.f32.mrb[21].mxu0  ;;  %vm2160_vm14 = vcmp.gt.f32.partialorder %v2126_v4, 0.0  ;;  %v2198_v63 = vmul.f32 %v9900_v0, %v2126_v4 }
 0x22f   : > { %7642 = vrot.lane.b32.xlu1 %v7641_v23, %s8218_s20  ;;  %v9973_v24 = vsel %vm603_vm7, %v2480_v41, %v2481_v21  ;;  %v9979_v29 = vsel %vm603_vm7, %v2481_v21, %v2483_v18  ;;  %v9985_v51 = vsel %vm522_vm2, %v2400_v38, %v2401_v14  ;;  %v2403_v61 = vrot.slane %v2296_v50, 1 }
 0x230   : > { %v2127_v42 = vadd.f32 %v2095_v16, %v2063_v32  ;;  %v1884_v43 = vadd.f32 %v7142_v40, %v9741_v1  ;;  %6652 = vmatprep.mubr.msk.f32.mxu0 %vm196_vm0, %v9973_v24  ;;  %v2230_v26 = vsel %vm2160_vm14, %v2126_v4, %v2198_v63  ;;  %v2297_v15 = vld [vmem:[#allocation2 + $0x48] sm:$0xff]  ;;  %12935 = vst [vmem:[#allocation9_spill] sm:$0xff] %v9985_v51 }
 0x231   : > { %v2032_v17 = vld [vmem:[#allocation3 + $0x40] sm:$0xff]  ;;  %v1663_v39 = vpop.f32.mrb[22].mxu0  ;;  %6653 = vmatmul.mubr.msk.f32.vlgmr.msra.gmra.mrb[64].mxu0 %vm196_vm0, %v9979_v29  ;;  %2262 = vst.msk [vmem:[#allocation2 + $0x61] sm:$0xff] %vm196_vm0, %v2230_v26  ;;  %v7646_v46 = vpack.i.bf16 %v9985_v51, %v2297_v15  ;;  %v9997_v50 = vsel %vm522_vm2, %v2401_v14, %v2403_v61  ;;  %v2485_v28 = vrot.slane %v2297_v15, 2 }
 0x232   : > { %vm2161_vm15 = vcmp.gt.f32.partialorder %v2127_v42, 0.0  ;;  %v2199_v1 = vmul.f32 %v9900_v0, %v2127_v42  ;;  %v2064_v35 = vmul.f32 0.5, %v2032_v17  ;;  %2002 = vst.msk [vmem:[#allocation3 + $0x50] sm:$0xff] %vm196_vm0, %v1884_v43  ;;  %v1665_v6 = vpop.f32.mrb[23].mxu0  ;;  %v7143_v10 = vadd.f32 %v9856_v5, %v1663_v39  ;;  %12936 = vst [vmem:[#allocation10_spill] sm:$0xff] %v9997_v50  ;;  %v2098_v14 = vld [vmem:[%s8400_s11 + $0x50] sm:$0xff] }
 0x233   : > { %7647 = vrot.lane.b32.xlu0 %v7646_v46, %s8218_s20  ;;  %v2405_v39 = vrot.slane %v2297_v15, 1 }
 0x234   : > { %v2231_v8 = vsel %vm2161_vm15, %v2127_v42, %v2199_v1  ;;  %v2128_v22 = vadd.f32 %v2096_v34, %v2064_v35  ;;  %v1889_v44 = vadd.f32 %v7143_v10, %v9739_v19  ;;  %v2298_v41 = vld [vmem:[#allocation2 + $0x50] sm:$0xff]  ;;  %v2299_v2 = vld [vmem:[#allocation2 + $0x58] sm:$0x3] }
 0x235   : > { %2263 = vst.msk [vmem:[#allocation2 + $0x69] sm:$0xff] %vm196_vm0, %v2231_v8  ;;  %v2033_v13 = vld [vmem:[#allocation3 + $0x48] sm:$0xff]  ;;  %v1668_v12 = vpop.f32.mrb[24].mxu0  ;;  %v7651_v19 = vpack.i.bf16 %v9997_v50, %v2298_v41  ;;  %v2486_v21 = vrot.slane %v2298_v41, 2  ;;  %v2488_v32 = vrot.slane %v2299_v2, 2  ;;  %v2406_v18 = vrot.slane %v2298_v41, 1 }
 0x236   : > { %vm2162_vm1 = vcmp.gt.f32.partialorder %v2128_v22, 0.0  ;;  %v2200_v4 = vmul.f32 %v9900_v0, %v2128_v22  ;;  %v2065_v33 = vmul.f32 0.5, %v2033_v13  ;;  %v1670_v16 = vpop.f32.mrb[25].mxu0  ;;  %2003 = vst.msk [vmem:[#allocation3 + $0x58] sm:$0xff] %vm196_vm0, %v1889_v44  ;;  %v7144_v23 = vadd.f32 %v9856_v5, %v1668_v12 }
 0x237   : > { %v2408_v38 = vrot.slane %v2299_v2, 1  ;;  %7652 = vrot.lane.b32.xlu1 %v7651_v19, %s8218_s20  ;;  %v10008_v43 = vsel %vm603_vm7, %v2485_v28, %v2486_v21  ;;  %v10011_v17 = vsel %vm603_vm7, %v2486_v21, %v2488_v32  ;;  %v10021_v6 = vsel %vm522_vm2, %v2405_v39, %v2406_v18 }
 0x238   : > { %v2232_v40 = vsel %vm2162_vm1, %v2128_v22, %v2200_v4  ;;  %v2129_v53 = vadd.f32 %v2097_v47, %v2065_v33  ;;  %v1894_v42 = vadd.f32 %v7144_v23, %v9746_v37  ;;  %v2300_v34 = vld [vmem:[#allocation2 + $0x60] sm:$0xff]  ;;  %6655 = vmatprep.mubr.msk.f32.mxu0 %vm196_vm0, %v10008_v43  ;;  %12937 = vst [vmem:[#allocation11_spill] sm:$0xff] %v10021_v6  ;;  %v2099_v23 = vld [vmem:[%s8400_s11 + $0x58] sm:$0xff] }
 0x239   : > { %2264 = vst.msk [vmem:[#allocation2 + $0x79] sm:$0xff] %vm196_vm0, %v2232_v40  ;;  %v2034_v63 = vld [vmem:[#allocation3 + $0x50] sm:$0xff]  ;;  %v1673_v26 = vpop.f32.mrb[26].mxu0  ;;  %6656 = vmatmul.mubr.msk.f32.gmra.mrb[66].mxu0 %vm196_vm0, %v10011_v17  ;;  %v10024_v15 = vsel %vm522_vm2, %v2406_v18, %v2408_v38  ;;  %v2490_v10 = vrot.slane %v2300_v34, 2  ;;  %v7656_v22 = vpack.i.bf16 %v10021_v6, %v2300_v34  ;;  %v2410_v44 = vrot.slane %v2300_v34, 1 }
 0x23a   : > { %vm2163_vm3 = vcmp.gt.f32.partialorder %v2129_v53, 0.0  ;;  %v2201_v61 = vmul.f32 %v9900_v0, %v2129_v53  ;;  %v2066_v1 = vmul.f32 0.5, %v2034_v63  ;;  %v1675_v35 = vpop.f32.mrb[27].mxu0  ;;  %2004 = vst.msk [vmem:[#allocation3 + $0x60] sm:$0xff] %vm196_vm0, %v1894_v42  ;;  %v7145_v37 = vadd.f32 %v9856_v5, %v1673_v26  ;;  %12938 = vst [vmem:[#allocation12_spill] sm:$0xff] %v10024_v15 }
 0x23b   : > { %7657 = vrot.lane.b32.xlu0 %v7656_v22, %s8218_s20 }
 0x23c   : > { %v2233_v46 = vsel %vm2163_vm3, %v2129_v53, %v2201_v61  ;;  %v2130_v8 = vadd.f32 %v2098_v14, %v2066_v1  ;;  %v2301_v47 = vld [vmem:[#allocation2 + $0x68] sm:$0xff]  ;;  %v2302_v13 = vld [vmem:[#allocation2 + $0x70] sm:$0x3]  ;;  %v1899_v12 = vadd.f32 %v7145_v37, %v9744_v27  ;;  %v2100_v1 = vld [vmem:[%s8400_s11 + $0x60] sm:$0xff] }
 0x23d   : > { %2265 = vst.msk [vmem:[#allocation2 + $0x81] sm:$0xff] %vm196_vm0, %v2233_v46  ;;  %v1678_v41 = vpop.f32.mrb[28].mxu0  ;;  %v7661_v2 = vpack.i.bf16 %v10024_v15, %v2301_v47  ;;  %v2491_v4 = vrot.slane %v2301_v47, 2  ;;  %v2493_v33 = vrot.slane %v2302_v13, 2  ;;  %v2035_v28 = vld [vmem:[#allocation3 + $0x58] sm:$0xff]  ;;  %v2411_v32 = vrot.slane %v2301_v47, 1 }
 0x23e   : > { %vm2164_vm4 = vcmp.gt.f32.partialorder %v2130_v8, 0.0  ;;  %v2202_v16 = vmul.f32 %v9900_v0, %v2130_v8  ;;  %v7146_v19 = vadd.f32 %v9856_v5, %v1678_v41  ;;  %v1680_v21 = vpop.f32.mrb[29].mxu0  ;;  %v2067_v40 = vmul.f32 0.5, %v2035_v28  ;;  %2005 = vst.msk [vmem:[#allocation3 + $0x68] sm:$0xff] %vm196_vm0, %v1899_v12 }
 0x23f   : > { %7662 = vrot.lane.b32.xlu1 %v7661_v2, %s8218_s20  ;;  %v10037_v27 = vsel %vm603_vm7, %v2490_v10, %v2491_v4  ;;  %v10040_v53 = vsel %vm603_vm7, %v2491_v4, %v2493_v33  ;;  %v10046_v14 = vsel %vm522_vm2, %v2410_v44, %v2411_v32  ;;  %v2413_v42 = vrot.slane %v2302_v13, 1 }
 0x240   : > { %v2234_v18 = vsel %vm2164_vm4, %v2130_v8, %v2202_v16  ;;  %v1904_v38 = vadd.f32 %v7146_v19, %v9750_v59  ;;  %6658 = vmatprep.mubr.msk.f32.mxu0 %vm196_vm0, %v10037_v27  ;;  %v2303_v63 = vld [vmem:[#allocation2 + $0x78] sm:$0xff]  ;;  %12939 = vst [vmem:[#allocation13_spill] sm:$0xff] %v10046_v14  ;;  %v2131_v26 = vadd.f32 %v2099_v23, %v2067_v40  ;;  %v2101_v16 = vld [vmem:[%s8400_s11 + $0x68] sm:$0xff] }
 0x241   : > { %2266 = vst.msk [vmem:[#allocation2 + $0x91] sm:$0xff] %vm196_vm0, %v2234_v18  ;;  %v1683_v34 = vpop.f32.mrb[30].mxu0  ;;  %6659 = vmatmul.mubr.msk.f32.gmra.mrb[68].mxu0 %vm196_vm0, %v10040_v53  ;;  %v7666_v39 = vpack.i.bf16 %v10046_v14, %v2303_v63  ;;  %v2036_v61 = vld [vmem:[#allocation3 + $0x60] sm:$0xff]  ;;  %v10059_v22 = vsel %vm522_vm2, %v2411_v32, %v2413_v42  ;;  %v2495_v47 = vrot.slane %v2303_v63, 2  ;;  %v2415_v19 = vrot.slane %v2303_v63, 1 }
 0x242   : > { %2006 = vst.msk [vmem:[#allocation3 + $0x70] sm:$0xff] %vm196_vm0, %v1904_v38  ;;  %v7147_v59 = vadd.f32 %v9856_v5, %v1683_v34  ;;  %v1685_v35 = vpop.f32.mrb[31].mxu0  ;;  %vm2165_vm5 = vcmp.gt.f32.partialorder %v2131_v26, 0.0  ;;  %v2203_v37 = vmul.f32 %v9900_v0, %v2131_v26  ;;  %v2068_v10 = vmul.f32 0.5, %v2036_v61  ;;  %12940 = vst [vmem:[#allocation14_spill] sm:$0xff] %v10059_v22 }
 0x243   : > { %7667 = vrot.lane.b32.xlu0 %v7666_v39, %s8218_s20 }
 0x244   : > { %v1909_v46 = vadd.f32 %v7147_v59, %v9748_v31  ;;  %v2304_v8 = vld [vmem:[#allocation2 + $0x80] sm:$0xff]  ;;  %v2305_v13 = vld [vmem:[#allocation2 + $0x88] sm:$0x3]  ;;  %v2235_v44 = vsel %vm2165_vm5, %v2131_v26, %v2203_v37  ;;  %v2132_v12 = vadd.f32 %v2100_v1, %v2068_v10  ;;  %v2102_v1 = vld [vmem:[%s8400_s11 + $0x70] sm:$0xff] }
 0x245   : > { %v1688_v41 = vpop.f32.mrb[32].mxu0  ;;  %v7671_v2 = vpack.i.bf16 %v10059_v22, %v2304_v8  ;;  %v2496_v4 = vrot.slane %v2304_v8, 2  ;;  %2267 = vst.msk [vmem:[#allocation2 + $0x99] sm:$0xff] %vm196_vm0, %v2235_v44  ;;  %v2037_v33 = vld [vmem:[#allocation3 + $0x68] sm:$0xff]  ;;  %v2498_v23 = vrot.slane %v2305_v13, 2  ;;  %v2416_v21 = vrot.slane %v2304_v8, 1 }
 0x246   : > { %2007 = vst.msk [vmem:[#allocation3 + $0x78] sm:$0xff] %vm196_vm0, %v1909_v46  ;;  %v7148_v31 = vadd.f32 %v9856_v5, %v1688_v41  ;;  %v1690_v28 = vpop.f32.mrb[33].mxu0  ;;  %vm2166_vm6 = vcmp.gt.f32.partialorder %v2132_v12, 0.0  ;;  %v2204_v32 = vmul.f32 %v9900_v0, %v2132_v12  ;;  %v2069_v40 = vmul.f32 0.5, %v2037_v33  ;;  %v2103_v44 = vld [vmem:[%s8400_s11 + $0x78] sm:$0xff] }
 0x247   : > { %7672 = vrot.lane.b32.xlu1 %v7671_v2, %s8218_s20  ;;  %v10070_v38 = vsel %vm603_vm7, %v2495_v47, %v2496_v4  ;;  %v10073_v42 = vsel %vm603_vm7, %v2496_v4, %v2498_v23  ;;  %v10078_v34 = vsel %vm522_vm2, %v2415_v19, %v2416_v21  ;;  %v2418_v35 = vrot.slane %v2305_v13, 1 }
 0x248   : > { %v1914_v18 = vadd.f32 %v7148_v31, %v9754_v30  ;;  %v10075_v26 = vld [vmem:[#allocation2 + $0x90] sm:$0xff]  ;;  %12941 = vst [vmem:[#allocation15_spill] sm:$0xff] %v10078_v34  ;;  %v2236_v63 = vsel %vm2166_vm6, %v2132_v12, %v2204_v32  ;;  %v2133_v39 = vadd.f32 %v2101_v16, %v2069_v40  ;;  %6661 = vmatprep.mubr.msk.f32.mxu0 %vm196_vm0, %v10070_v38 }
 0x249   : > { %v2038_v61 = vld [vmem:[#allocation3 + $0x70] sm:$0xff]  ;;  %v1693_v30 = vpop.f32.mrb[34].mxu0  ;;  %v7676_v59 = vpack.i.bf16 %v10078_v34, %v10075_v26  ;;  %2268 = vst.msk [vmem:[#allocation2 + $0xa9] sm:$0xff] %vm196_vm0, %v2236_v63  ;;  %6662 = vmatmul.mubr.msk.f32.gmra.mrb[70].mxu0 %vm196_vm0, %v10073_v42  ;;  %v10095_v33 = vsel %vm522_vm2, %v2416_v21, %v2418_v35 }
 0x24a   : > { %v2070_v37 = vmul.f32 0.5, %v2038_v61  ;;  %2008 = vst.msk [vmem:[#allocation3 + $0x80] sm:$0xff] %vm196_vm0, %v1914_v18  ;;  %v7149_v10 = vadd.f32 %v9856_v5, %v1693_v30  ;;  %v1695_v46 = vpop.f32.mrb[35].mxu0  ;;  %vm2167_vm8 = vcmp.gt.f32.partialorder %v2133_v39, 0.0  ;;  %v2205_v8 = vmul.f32 %v9900_v0, %v2133_v39  ;;  %12942 = vst [vmem:[#allocation16_spill] sm:$0xff] %v10095_v33  ;;  %v2104_v30 = vld [vmem:[%s8400_s11 + $0x80] sm:$0xff] }
 0x24b   : > { %7677 = vrot.lane.b32.xlu0 %v7676_v59, %s8218_s20 }
 0x24c   : > { %v2134_v47 = vadd.f32 %v2102_v1, %v2070_v37  ;;  %v1919_v13 = vadd.f32 %v7149_v10, %v9752_v54  ;;  %v2237_v12 = vsel %vm2167_vm8, %v2133_v39, %v2205_v8  ;;  %v2307_v4 = vld [vmem:[#allocation2 + $0x98] sm:$0xff]  ;;  %v2308_v16 = vld [vmem:[#allocation2 + $0xa0] sm:$0x3]  ;;  %v2500_v54 = vrot.slane %v10075_v26, 2 }
 0x24d   : > { %v2039_v41 = vld [vmem:[#allocation3 + $0x78] sm:$0xff]  ;;  %v1698_v2 = vpop.f32.mrb[36].mxu0  ;;  %2269 = vst.msk [vmem:[#allocation2 + $0xb1] sm:$0xff] %vm196_vm0, %v2237_v12  ;;  %v7681_v32 = vpack.i.bf16 %v10095_v33, %v2307_v4  ;;  %v2501_v40 = vrot.slane %v2307_v4, 2  ;;  %v2503_v21 = vrot.slane %v2308_v16, 2  ;;  %v2420_v39 = vrot.slane %v10075_v26, 1 }
 0x24e   : > { %vm2168_vm9 = vcmp.gt.f32.partialorder %v2134_v47, 0.0  ;;  %v2206_v31 = vmul.f32 %v9900_v0, %v2134_v47  ;;  %v2071_v28 = vmul.f32 0.5, %v2039_v41  ;;  %2009 = vst.msk [vmem:[#allocation3 + $0x88] sm:$0xff] %vm196_vm0, %v1919_v13  ;;  %v1700_v23 = vpop.f32.mrb[37].mxu0  ;;  %v7150_v19 = vadd.f32 %v9856_v5, %v1698_v2  ;;  %v2105_v2 = vld [vmem:[%s8400_s11 + $0x88] sm:$0xff] }
 0x24f   : > { %v2421_v61 = vrot.slane %v2307_v4, 1  ;;  %7682 = vrot.lane.b32.xlu1 %v7681_v32, %s8218_s20  ;;  %v10109_v35 = vsel %vm603_vm7, %v2500_v54, %v2501_v40  ;;  %v10112_v10 = vsel %vm603_vm7, %v2501_v40, %v2503_v21  ;;  %v2423_v8 = vrot.slane %v2308_v16, 1 }
 0x250   : > { %v2238_v18 = vsel %vm2168_vm9, %v2134_v47, %v2206_v31  ;;  %v2135_v63 = vadd.f32 %v2103_v44, %v2071_v28  ;;  %v1924_v59 = vadd.f32 %v7150_v19, %v9758_v55  ;;  %v2309_v46 = vld [vmem:[#allocation2 + $0xa8] sm:$0xff]  ;;  %6664 = vmatprep.mubr.msk.f32.mxu0 %vm196_vm0, %v10109_v35 }
 0x251   : > { %2270 = vst.msk [vmem:[#allocation2 + $0xc1] sm:$0xff] %vm196_vm0, %v2238_v18  ;;  %v2040_v1 = vld [vmem:[#allocation3 + $0x80] sm:$0xff]  ;;  %v1703_v37 = vpop.f32.mrb[38].mxu0  ;;  %6665 = vmatmul.mubr.msk.f32.gmra.mrb[72].mxu0 %vm196_vm0, %v10112_v10  ;;  %v10122_v13 = vsel %vm522_vm2, %v2420_v39, %v2421_v61  ;;  %v10129_v54 = vsel %vm522_vm2, %v2421_v61, %v2423_v8  ;;  %v2505_v19 = vrot.slane %v2309_v46, 2 }
 0x252   : > { %vm2169_vm10 = vcmp.gt.f32.partialorder %v2135_v63, 0.0  ;;  %v2207_v26 = vmul.f32 %v9900_v0, %v2135_v63  ;;  %v2072_v47 = vmul.f32 0.5, %v2040_v1  ;;  %v1705_v55 = vpop.f32.mrb[39].mxu0  ;;  %2010 = vst.msk [vmem:[#allocation3 + $0x90] sm:$0xff] %vm196_vm0, %v1924_v59  ;;  %v7151_v44 = vadd.f32 %v9856_v5, %v1703_v37  ;;  %12943 = vst [vmem:[#allocation17_spill] sm:$0xff] %v10122_v13 }
 0x253   : > { %v7686_v4 = vpack.i.bf16 %v10122_v13, %v2309_v46  ;;  %12944 = vst [vmem:[#allocation18_spill] sm:$0xff] %v10129_v54 }
 0x254   : > { %v2239_v12 = vsel %vm2169_vm10, %v2135_v63, %v2207_v26  ;;  %v2136_v41 = vadd.f32 %v2104_v30, %v2072_v47  ;;  %v1929_v31 = vadd.f32 %v7151_v44, %v9756_v52  ;;  %v2310_v23 = vld [vmem:[#allocation2 + $0xb0] sm:$0xff]  ;;  %v2311_v32 = vld [vmem:[#allocation2 + $0xb8] sm:$0x3]  ;;  %v2425_v63 = vrot.slane %v2309_v46, 1 }
 0x255   : > { %2271 = vst.msk [vmem:[#allocation2 + $0xc9] sm:$0xff] %vm196_vm0, %v2239_v12  ;;  %v2041_v16 = vld [vmem:[#allocation3 + $0x88] sm:$0xff]  ;;  %v1708_v28 = vpop.f32.mrb[40].mxu0  ;;  %7687 = vrot.lane.b32.xlu0 %v7686_v4, %s8218_s20  ;;  %v7691_v52 = vpack.i.bf16 %v10129_v54, %v2310_v23  ;;  %v2506_v1 = vrot.slane %v2310_v23, 2  ;;  %v2508_v61 = vrot.slane %v2311_v32, 2  ;;  %v2426_v8 = vrot.slane %v2310_v23, 1 }
 0x256   : > { %vm2170_vm11 = vcmp.gt.f32.partialorder %v2136_v41, 0.0  ;;  %v2208_v40 = vmul.f32 %v9900_v0, %v2136_v41  ;;  %v2073_v21 = vmul.f32 0.5, %v2041_v16  ;;  %v1710_v18 = vpop.f32.mrb[41].mxu0  ;;  %2011 = vst.msk [vmem:[#allocation3 + $0x98] sm:$0xff] %vm196_vm0, %v1929_v31  ;;  %v7152_v39 = vadd.f32 %v9856_v5, %v1708_v28 }
 0x257   : > { %v2428_v26 = vrot.slane %v2311_v32, 1  ;;  %7692 = vrot.lane.b32.xlu1 %v7691_v52, %s8218_s20  ;;  %v10140_v46 = vsel %vm603_vm7, %v2505_v19, %v2506_v1  ;;  %v10143_v44 = vsel %vm603_vm7, %v2506_v1, %v2508_v61  ;;  %v10151_v16 = vsel %vm522_vm2, %v2425_v63, %v2426_v8 }
 0x258   : > { %v2240_v30 = vsel %vm2170_vm11, %v2136_v41, %v2208_v40  ;;  %v2137_v59 = vadd.f32 %v2105_v2, %v2073_v21  ;;  %v2312_v37 = vld [vmem:[#allocation2 + $0xc0] sm:$0xff]  ;;  %v1934_v47 = vadd.f32 %v7152_v39, %v9762_v45  ;;  %v2106_v2 = vld [vmem:[%s8400_s11 + $0x90] sm:$0xff]  ;;  %6667 = vmatprep.mubr.msk.f32.mxu0 %vm196_vm0, %v10140_v46  ;;  %12945 = vst [vmem:[#allocation19_spill] sm:$0xff] %v10151_v16 }
 0x259   : > { %2272 = vst.msk [vmem:[#allocation2 + $0xd9] sm:$0xff] %vm196_vm0, %v2240_v30  ;;  %v1713_v55 = vpop.f32.mrb[42].mxu0  ;;  %v2042_v41 = vld [vmem:[#allocation3 + $0x90] sm:$0xff]  ;;  %6668 = vmatmul.mubr.msk.f32.gmra.mrb[74].mxu0 %vm196_vm0, %v10143_v44  ;;  %v7696_v28 = vpack.i.bf16 %v10151_v16, %v2312_v37  ;;  %v10159_v40 = vsel %vm522_vm2, %v2426_v8, %v2428_v26  ;;  %v2107_v30 = vld [vmem:[%s8400_s11 + $0x98] sm:$0xff]  ;;  %v2510_v8 = vrot.slane %v2312_v37, 2  ;;  %v2430_v26 = vrot.slane %v2312_v37, 1 }
 0x25a   : > { %vm2171_vm12 = vcmp.gt.f32.partialorder %v2137_v59, 0.0  ;;  %v2209_v12 = vmul.f32 %v9900_v0, %v2137_v59  ;;  %v7153_v4 = vadd.f32 %v9856_v5, %v1713_v55  ;;  %v1715_v45 = vpop.f32.mrb[43].mxu0  ;;  %v2074_v31 = vmul.f32 0.5, %v2042_v41  ;;  %2012 = vst.msk [vmem:[#allocation3 + $0xa0] sm:$0xff] %vm196_vm0, %v1934_v47  ;;  %12946 = vst [vmem:[#allocation20_spill] sm:$0xff] %v10159_v40  ;;  %v10397_v16 = vld [vmem:[#allocation2 + $0x8] sm:$0xff] }
 0x25b   : > { %7697 = vrot.lane.b32.xlu0 %v7696_v28, %s8218_s20 }
 0x25c   : > { %v2241_v23 = vsel %vm2171_vm12, %v2137_v59, %v2209_v12  ;;  %v1939_v19 = vadd.f32 %v7153_v4, %v9760_v9  ;;  %v2313_v32 = vld [vmem:[#allocation2 + $0xc8] sm:$0xff]  ;;  %v2314_v21 = vld [vmem:[#allocation2 + $0xd0] sm:$0x3]  ;;  %v2138_v18 = vadd.f32 %v2106_v2, %v2074_v31 }
 0x25d   : > { %2273 = vst.msk [vmem:[#allocation2 + $0xe1] sm:$0xff] %vm196_vm0, %v2241_v23  ;;  %v1718_v63 = vpop.f32.mrb[44].mxu0  ;;  %v7701_v39 = vpack.i.bf16 %v10159_v40, %v2313_v32  ;;  %v2511_v52 = vrot.slane %v2313_v32, 2  ;;  %v2513_v1 = vrot.slane %v2314_v21, 2  ;;  %v2043_v61 = vld [vmem:[#allocation3 + $0x98] sm:$0xff]  ;;  %v2431_v47 = vrot.slane %v2313_v32, 1 }
 0x25e   : > { %2013 = vst.msk [vmem:[#allocation3 + $0xa8] sm:$0xff] %vm196_vm0, %v1939_v19  ;;  %v7154_v9 = vadd.f32 %v9856_v5, %v1718_v63  ;;  %v1720_v59 = vpop.f32.mrb[45].mxu0  ;;  %vm2172_vm13 = vcmp.gt.f32.partialorder %v2138_v18, 0.0  ;;  %v2210_v55 = vmul.f32 %v9900_v0, %v2138_v18  ;;  %v2075_v12 = vmul.f32 0.5, %v2043_v61 }
 0x25f   : > { %7702 = vrot.lane.b32.xlu1 %v7701_v39, %s8218_s20  ;;  %v2433_v41 = vrot.slane %v2314_v21, 1  ;;  %v10171_v4 = vsel %vm603_vm7, %v2510_v8, %v2511_v52  ;;  %v10174_v45 = vsel %vm603_vm7, %v2511_v52, %v2513_v1  ;;  %v10177_v37 = vsel %vm522_vm2, %v2430_v26, %v2431_v47  ;;  %v2108_v21 = vld [vmem:[%s8400_s11 + $0xa0] sm:$0xff] }
 0x260   : > { %v1944_v2 = vadd.f32 %v7154_v9, %v9779_v20  ;;  %v2315_v31 = vld [vmem:[#allocation2 + $0xd8] sm:$0xff]  ;;  %12947 = vst [vmem:[#allocation21_spill] sm:$0xff] %v10177_v37  ;;  %v2242_v28 = vsel %vm2172_vm13, %v2138_v18, %v2210_v55  ;;  %v2139_v23 = vadd.f32 %v2107_v30, %v2075_v12  ;;  %6670 = vmatprep.mubr.msk.f32.mxu0 %vm196_vm0, %v10171_v4  ;;  %v2109_v12 = vld [vmem:[%s8400_s11 + $0xa8] sm:$0xff] }
 0x261   : > { %v1723_v19 = vpop.f32.mrb[46].mxu0  ;;  %v7706_v32 = vpack.i.bf16 %v10177_v37, %v2315_v31  ;;  %2274 = vst.msk [vmem:[#allocation2 + $0xf1] sm:$0xff] %vm196_vm0, %v2242_v28  ;;  %v2044_v20 = vld [vmem:[#allocation3 + $0xa0] sm:$0xff]  ;;  %6671 = vmatmul.mubr.msk.f32.gmra.mrb[76].mxu0 %vm196_vm0, %v10174_v45  ;;  %v10192_v30 = vsel %vm522_vm2, %v2431_v47, %v2433_v41  ;;  %v2515_v9 = vrot.slane %v2315_v31, 2 }
 0x262   : > { %2014 = vst.msk [vmem:[#allocation3 + $0xb0] sm:$0xff] %vm196_vm0, %v1944_v2  ;;  %v7155_v63 = vadd.f32 %v9856_v5, %v1723_v19  ;;  %v1725_v18 = vpop.f32.mrb[47].mxu0  ;;  %vm2173_vm14 = vcmp.gt.f32.partialorder %v2139_v23, 0.0  ;;  %v2211_v39 = vmul.f32 %v9900_v0, %v2139_v23  ;;  %v2076_v52 = vmul.f32 0.5, %v2044_v20  ;;  %12948 = vst [vmem:[#allocation22_spill] sm:$0xff] %v10192_v30 }
 0x263   : > { %7707 = vrot.lane.b32.xlu0 %v7706_v32, %s8218_s20  ;;  %v2435_v32 = vrot.slane %v2315_v31, 1 }
 0x264   : > { %v1949_v1 = vadd.f32 %v7155_v63, %v9777_v36  ;;  %v2316_v61 = vld [vmem:[#allocation2 + $0xe0] sm:$0xff]  ;;  %v2317_v59 = vld [vmem:[#allocation2 + $0xe8] sm:$0x3]  ;;  %v2243_v8 = vsel %vm2173_vm14, %v2139_v23, %v2211_v39  ;;  %v2140_v26 = vadd.f32 %v2108_v21, %v2076_v52 }
 0x265   : > { %v2045_v55 = vld [vmem:[#allocation3 + $0xa8] sm:$0xff]  ;;  %v1728_v2 = vpop.f32.mrb[48].mxu0  ;;  %v7711_v28 = vpack.i.bf16 %v10192_v30, %v2316_v61  ;;  %v2516_v19 = vrot.slane %v2316_v61, 2  ;;  %2275 = vst.msk [vmem:[#allocation2 + $0xf9] sm:$0xff] %vm196_vm0, %v2243_v8  ;;  %v2518_v41 = vrot.slane %v2317_v59, 2  ;;  %v2436_v63 = vrot.slane %v2316_v61, 1 }
 0x266   : > { %v2077_v20 = vmul.f32 0.5, %v2045_v55  ;;  %2015 = vst.msk [vmem:[#allocation3 + $0xb8] sm:$0xff] %vm196_vm0, %v1949_v1  ;;  %v7156_v36 = vadd.f32 %v9856_v5, %v1728_v2  ;;  %v1730_v47 = vpop.f32.mrb[49].mxu0  ;;  %vm2174_vm15 = vcmp.gt.f32.partialorder %v2140_v26, 0.0  ;;  %v2212_v23 = vmul.f32 %v9900_v0, %v2140_v26  ;;  %v2110_v8 = vld [vmem:[%s8400_s11 + $0xb0] sm:$0xff] }
 0x267   : > { %7712 = vrot.lane.b32.xlu1 %v7711_v28, %s8218_s20  ;;  %v10202_v21 = vsel %vm603_vm7, %v2515_v9, %v2516_v19  ;;  %v10208_v52 = vsel %vm603_vm7, %v2516_v19, %v2518_v41  ;;  %v10214_v61 = vsel %vm522_vm2, %v2435_v32, %v2436_v63  ;;  %v2111_v47 = vld [vmem:[%s8400_s11 + $0xb8] sm:$0xff] }
 0x268   : > { %v2141_v18 = vadd.f32 %v2109_v12, %v2077_v20  ;;  %v1954_v39 = vadd.f32 %v7156_v36, %v9797_v11  ;;  %6673 = vmatprep.mubr.msk.f32.mxu0 %vm196_vm0, %v10202_v21  ;;  %v2244_v1 = vsel %vm2174_vm15, %v2140_v26, %v2212_v23  ;;  %v2318_v9 = vld [vmem:[#allocation2 + $0xf0] sm:$0xff]  ;;  %12949 = vst [vmem:[#allocation23_spill] sm:$0xff] %v10214_v61  ;;  %v2438_v12 = vrot.slane %v2317_v59, 1 }
 0x269   : > { %v2046_v31 = vld [vmem:[#allocation3 + $0xb0] sm:$0xff]  ;;  %v1733_v55 = vpop.f32.mrb[50].mxu0  ;;  %6674 = vmatmul.mubr.msk.f32.gmra.mrb[78].mxu0 %vm196_vm0, %v10208_v52  ;;  %2276 = vst.msk [vmem:[#allocation2 + $0x109] sm:$0xff] %vm196_vm0, %v2244_v1  ;;  %v7716_v19 = vpack.i.bf16 %v10214_v61, %v2318_v9 }
 0x26a   : > { %vm2175_vm1 = vcmp.gt.f32.partialorder %v2141_v18, 0.0  ;;  %v2213_v11 = vmul.f32 %v9900_v0, %v2141_v18  ;;  %v2078_v2 = vmul.f32 0.5, %v2046_v31  ;;  %2016 = vst.msk [vmem:[#allocation3 + $0xc0] sm:$0xff] %vm196_vm0, %v1954_v39  ;;  %v1735_v26 = vpop.f32.mrb[51].mxu0  ;;  %v7157_v28 = vadd.f32 %v9856_v5, %v1733_v55 }
 0x26b   : > { %7717 = vrot.lane.b32.xlu0 %v7716_v19, %s8218_s20  ;;  %v10226_v1 = vsel %vm522_vm2, %v2436_v63, %v2438_v12 }
 0x26c   : > { %v2245_v20 = vsel %vm2175_vm1, %v2141_v18, %v2213_v11  ;;  %v2142_v36 = vadd.f32 %v2110_v8, %v2078_v2  ;;  %v1959_v59 = vadd.f32 %v7157_v28, %v9795_v48  ;;  %v2319_v23 = vld [vmem:[#allocation2 + $0xf8] sm:$0xff]  ;;  %12950 = vst [vmem:[#allocation24_spill] sm:$0xff] %v10226_v1  ;;  %v2320_v39 = vld [vmem:[#allocation2 + $0x100] sm:$0x3]  ;;  %v2520_v8 = vrot.slane %v2318_v9, 2 }
 0x26d   : > { %2277 = vst.msk [vmem:[#allocation2 + $0x111] sm:$0xff] %vm196_vm0, %v2245_v20  ;;  %v2047_v41 = vld [vmem:[#allocation3 + $0xb8] sm:$0xff]  ;;  %v1738_v32 = vpop.f32.mrb[52].mxu0  ;;  %v10233_v48 = vld [vmem:[%s12758_s3] ss:$0 sm:$0xff]  ;;  %v7721_v63 = vpack.i.bf16 %v10226_v1, %v2319_v23  ;;  %v2521_v12 = vrot.slane %v2319_v23, 2 }
 0x26e   : > { %vm2176_vm3 = vcmp.gt.f32.partialorder %v2142_v36, 0.0  ;;  %v2214_v5 = vmul.f32 %v9900_v0, %v2142_v36  ;;  %v2079_v18 = vmul.f32 0.5, %v2047_v41  ;;  %v1740_v31 = vpop.f32.mrb[53].mxu0  ;;  %2017 = vst.msk [vmem:[#allocation3 + $0xc8] sm:$0xff] %vm196_vm0, %v1959_v59  ;;  %v7158_v55 = vadd.f32 %v10233_v48, %v1738_v32  ;;  %v2112_v41 = vld [vmem:[%s8400_s11 + $0xc0] sm:$0xff] }
 0x26f   : > { %v2523_v11 = vrot.slane %v2320_v39, 2  ;;  %v2441_v28 = vrot.slane %v2319_v23, 1  ;;  %v2443_v19 = vrot.slane %v2320_v39, 1  ;;  %7722 = vrot.lane.b32.xlu1 %v7721_v63, %s8218_s20  ;;  %v10242_v31 = vsel %vm603_vm7, %v2520_v8, %v2521_v12 }
 0x270   : > { %v2246_v2 = vsel %vm2176_vm3, %v2142_v36, %v2214_v5  ;;  %v2143_v26 = vadd.f32 %v2111_v47, %v2079_v18  ;;  %v1964_v59 = vadd.f32 %v7158_v55, %v9815_v3  ;;  %v10247_v61 = vld [vmem:[#allocation2 + $0x108] sm:$0xff]  ;;  %v2440_v36 = vrot.slane %v2318_v9, 1  ;;  %6676 = vmatprep.mubr.msk.f32.mxu0 %vm196_vm0, %v10242_v31 }
 0x271   : > { %2278 = vst.msk [vmem:[#allocation2 + $0x121] sm:$0xff] %vm196_vm0, %v2246_v2  ;;  %v2048_v20 = vld [vmem:[#allocation3 + $0xc0] sm:$0xff]  ;;  %v1743_v32 = vpop.f32.mrb[54].mxu0  ;;  %v10245_v1 = vsel %vm603_vm7, %v2521_v12, %v2523_v11  ;;  %v10260_v9 = vsel %vm522_vm2, %v2441_v28, %v2443_v19  ;;  %v2445_v11 = vrot.slane %v10247_v61, 1 }
 0x272   : > { %vm2177_vm4 = vcmp.gt.f32.partialorder %v2143_v26, 0.0  ;;  %v2215_v47 = vmul.f32 %v9900_v0, %v2143_v26  ;;  %v2080_v23 = vmul.f32 0.5, %v2048_v20  ;;  %v1745_v3 = vpop.f32.mrb[55].mxu0  ;;  %2018 = vst.msk [vmem:[#allocation3 + $0xd0] sm:$0xff] %vm196_vm0, %v1964_v59  ;;  %v7159_v39 = vadd.f32 %v10233_v48, %v1743_v32  ;;  %6677 = vmatmul.mubr.msk.f32.gmra.mrb[80].mxu0 %vm196_vm0, %v10245_v1  ;;  %12952 = vst [vmem:[#allocation26_spill] sm:$0xff] %v10260_v9 }
 0x273   : > { %v10257_v5 = vsel %vm522_vm2, %v2440_v36, %v2441_v28  ;;  %v2525_v0 = vrot.slane %v10247_v61, 2  ;;  %v2113_v36 = vld [vmem:[%s8400_s11 + $0xc8] sm:$0xff] }
 0x274   : > { %12951 = vst [vmem:[#allocation25_spill] sm:$0xff] %v10257_v5  ;;  %v2247_v18 = vsel %vm2177_vm4, %v2143_v26, %v2215_v47  ;;  %v2144_v8 = vadd.f32 %v2112_v41, %v2080_v23  ;;  %v7726_v55 = vpack.i.bf16 %v10257_v5, %v10247_v61  ;;  %v10265_v63 = vld [vmem:[#allocation2 + $0x110] sm:$0xff]  ;;  %v2323_v12 = vld [vmem:[#allocation2 + $0x118] sm:$0x3]  ;;  %v1969_v2 = vadd.f32 %v7159_v39, %v9813_v56  ;;  %v10276_v41 = vld [vmem:[%s12756_s1 + $0x1] ss:$0 sm:$0xff] }
 0x275   : > { %2279 = vst.msk [vmem:[#allocation2 + $0x129] sm:$0xff] %vm196_vm0, %v2247_v18  ;;  %v1748_v20 = vpop.f32.mrb[56].mxu0  ;;  %v7731_v28 = vpack.i.bf16 %v10260_v9, %v10265_v63  ;;  %v2526_v26 = vrot.slane %v10265_v63, 2  ;;  %v2528_v19 = vrot.slane %v2323_v12, 2  ;;  %v2049_v32 = vld [vmem:[#allocation3 + $0xc8] sm:$0xff]  ;;  %v2446_v23 = vrot.slane %v10265_v63, 1 }
 0x276   : > { %vm2178_vm5 = vcmp.gt.f32.partialorder %v2144_v8, 0.0  ;;  %v2216_v59 = vmul.f32 %v10276_v41, %v2144_v8  ;;  %7727 = vrot.lane.b32.xlu0 %v7726_v55, %s8218_s20  ;;  %v7160_v56 = vadd.f32 %v10233_v48, %v1748_v20  ;;  %v1750_v47 = vpop.f32.mrb[57].mxu0  ;;  %v2081_v3 = vmul.f32 0.5, %v2049_v32  ;;  %2019 = vst.msk [vmem:[#allocation3 + $0xd8] sm:$0xff] %vm196_vm0, %v1969_v2 }
 0x277   : > { %7732 = vrot.lane.b32.xlu1 %v7731_v28, %s8218_s20  ;;  %v10286_v39 = vsel %vm603_vm7, %v2525_v0, %v2526_v26  ;;  %v10289_v18 = vsel %vm603_vm7, %v2526_v26, %v2528_v19  ;;  %v10297_v32 = vsel %vm522_vm2, %v2445_v11, %v2446_v23  ;;  %v2448_v2 = vrot.slane %v2323_v12, 1  ;;  %v2114_v26 = vld [vmem:[%s8400_s11 + $0xd0] sm:$0xff] }
 0x278   : > { %v2248_v9 = vsel %vm2178_vm5, %v2144_v8, %v2216_v59  ;;  %v1974_v55 = vadd.f32 %v7160_v56, %v9833_v57  ;;  %6679 = vmatprep.mubr.msk.f32.mxu0 %vm196_vm0, %v10286_v39  ;;  %v10294_v20 = vld [vmem:[#allocation2 + $0x120] sm:$0xff]  ;;  %12953 = vst [vmem:[#allocation27_spill] sm:$0xff] %v10297_v32  ;;  %v2145_v28 = vadd.f32 %v2113_v36, %v2081_v3 }
 0x279   : > { %2280 = vst.msk [vmem:[#allocation2 + $0x139] sm:$0xff] %vm196_vm0, %v2248_v9  ;;  %v1753_v0 = vpop.f32.mrb[58].mxu0  ;;  %6680 = vmatmul.mubr.msk.f32.gmra.mrb[82].mxu0 %vm196_vm0, %v10289_v18  ;;  %v7736_v8 = vpack.i.bf16 %v10297_v32, %v10294_v20  ;;  %v2050_v57 = vld [vmem:[#allocation3 + $0xd0] sm:$0xff]  ;;  %v10313_v56 = vsel %vm522_vm2, %v2446_v23, %v2448_v2  ;;  %v2530_v47 = vrot.slane %v10294_v20, 2 }
 0x27a   : > { %2020 = vst.msk [vmem:[#allocation3 + $0xe0] sm:$0xff] %vm196_vm0, %v1974_v55  ;;  %v7161_v19 = vadd.f32 %v10233_v48, %v1753_v0  ;;  %v1755_v59 = vpop.f32.mrb[59].mxu0  ;;  %vm2179_vm6 = vcmp.gt.f32.partialorder %v2145_v28, 0.0  ;;  %v2217_v12 = vmul.f32 %v10276_v41, %v2145_v28  ;;  %v2082_v9 = vmul.f32 0.5, %v2050_v57  ;;  %12954 = vst [vmem:[#allocation28_spill] sm:$0xff] %v10313_v56 }
 0x27b   : > { %7737 = vrot.lane.b32.xlu0 %v7736_v8, %s8218_s20 }
 0x27c   : > { %v1979_v11 = vadd.f32 %v7161_v19, %v9831_v58  ;;  %v10310_v36 = vld [vmem:[#allocation2 + $0x128] sm:$0xff]  ;;  %v2326_v3 = vld [vmem:[#allocation2 + $0x130] sm:$0x3]  ;;  %v2249_v55 = vsel %vm2179_vm6, %v2145_v28, %v2217_v12  ;;  %v2146_v0 = vadd.f32 %v2114_v26, %v2082_v9  ;;  %v2115_v58 = vld [vmem:[%s8400_s11 + $0xd8] sm:$0xff]  ;;  %v2450_v28 = vrot.slane %v10294_v20, 1 }
 0x27d   : > { %v1758_v59 = vpop.f32.mrb[60].mxu0  ;;  %v7741_v32 = vpack.i.bf16 %v10313_v56, %v10310_v36  ;;  %v2531_v57 = vrot.slane %v10310_v36, 2  ;;  %2281 = vst.msk [vmem:[#allocation2 + $0x141] sm:$0xff] %vm196_vm0, %v2249_v55  ;;  %v2051_v8 = vld [vmem:[#allocation3 + $0xd8] sm:$0xff]  ;;  %v2533_v19 = vrot.slane %v2326_v3, 2  ;;  %v2451_v26 = vrot.slane %v10310_v36, 1 }
 0x27e   : > { %2021 = vst.msk [vmem:[#allocation3 + $0xe8] sm:$0xff] %vm196_vm0, %v1979_v11  ;;  %v7162_v23 = vadd.f32 %v10233_v48, %v1758_v59  ;;  %v1760_v2 = vpop.f32.mrb[61].mxu0  ;;  %vm2180_vm8 = vcmp.gt.f32.partialorder %v2146_v0, 0.0  ;;  %v2218_v12 = vmul.f32 %v10276_v41, %v2146_v0  ;;  %v2083_v9 = vmul.f32 0.5, %v2051_v8  ;;  %v2116_v8 = vld [vmem:[%s8400_s11 + $0xe0] sm:$0xff] }
 0x27f   : > { %7742 = vrot.lane.b32.xlu1 %v7741_v32, %s8218_s20  ;;  %v10329_v56 = vsel %vm603_vm7, %v2530_v47, %v2531_v57  ;;  %v10332_v11 = vsel %vm603_vm7, %v2531_v57, %v2533_v19  ;;  %v10337_v2 = vsel %vm522_vm2, %v2450_v28, %v2451_v26  ;;  %v2453_v47 = vrot.slane %v2326_v3, 1  ;;  %v2117_v28 = vld [vmem:[%s8400_s11 + $0xe8] sm:$0xff] }
 0x280   : > { %v1984_v55 = vadd.f32 %v7162_v23, %v9851_v62  ;;  %v10334_v59 = vld [vmem:[#allocation2 + $0x138] sm:$0xff]  ;;  %12955 = vst [vmem:[#allocation29_spill] sm:$0xff] %v10337_v2  ;;  %v2250_v5 = vsel %vm2180_vm8, %v2146_v0, %v2218_v12  ;;  %v2147_v30 = vadd.f32 %v2115_v58, %v2083_v9  ;;  %6682 = vmatprep.mubr.msk.f32.mxu0 %vm196_vm0, %v10329_v56 }
 0x281   : > { %v2052_v37 = vld [vmem:[#allocation3 + $0xe0] sm:$0xff]  ;;  %v1763_v62 = vpop.f32.mrb[62].mxu0  ;;  %v7746_v32 = vpack.i.bf16 %v10337_v2, %v10334_v59  ;;  %2282 = vst.msk [vmem:[#allocation2 + $0x151] sm:$0xff] %vm196_vm0, %v2250_v5  ;;  %6683 = vmatmul.mubr.msk.f32.gmra.mrb[84].mxu0 %vm196_vm0, %v10332_v11  ;;  %v10356_v9 = vsel %vm522_vm2, %v2451_v26, %v2453_v47 }
 0x282   : > { %v2084_v57 = vmul.f32 0.5, %v2052_v37  ;;  %2022 = vst.msk [vmem:[#allocation3 + $0xf0] sm:$0xff] %vm196_vm0, %v1984_v55  ;;  %v7163_v23 = vadd.f32 %v10233_v48, %v1763_v62  ;;  %v1765_v0 = vpop.f32.mrb[63].mxu0  ;;  %vm2181_vm9 = vcmp.gt.f32.partialorder %v2147_v30, 0.0  ;;  %v2219_v58 = vmul.f32 %v10276_v41, %v2147_v30  ;;  %12956 = vst [vmem:[#allocation30_spill] sm:$0xff] %v10356_v9 }
 0x283   : > { %7747 = vrot.lane.b32.xlu0 %v7746_v32, %s8218_s20  ;;  %v2535_v48 = vrot.slane %v10334_v59, 2 }
 0x284   : > { %v2148_v19 = vadd.f32 %v2116_v8, %v2084_v57  ;;  %v1989_v3 = vadd.f32 %v7163_v23, %v9849_v7  ;;  %v2251_v12 = vsel %vm2181_vm9, %v2147_v30, %v2219_v58  ;;  %v10353_v37 = vld [vmem:[#allocation2 + $0x140] sm:$0xff]  ;;  %v2329_v55 = vld [vmem:[#allocation2 + $0x148] sm:$0x3]  ;;  %v2455_v7 = vrot.slane %v10334_v59, 1  ;;  %v2118_v58 = vld [vmem:[%s8400_s11 + $0xf0] sm:$0xff] }
 0x285   : > { %v2053_v5 = vld [vmem:[#allocation3 + $0xe8] sm:$0xff]  ;;  %2283 = vst.msk [vmem:[#allocation2 + $0x159] sm:$0xff] %vm196_vm0, %v2251_v12  ;;  %v7751_v30 = vpack.i.bf16 %v10356_v9, %v10353_v37  ;;  %v2536_v26 = vrot.slane %v10353_v37, 2  ;;  %v2538_v32 = vrot.slane %v2329_v55, 2  ;;  %v2456_v47 = vrot.slane %v10353_v37, 1 }
 0x286   : > { %vm2182_vm10 = vcmp.gt.f32.partialorder %v2148_v19, 0.0  ;;  %v2220_v62 = vmul.f32 %v10276_v41, %v2148_v19  ;;  %v2085_v8 = vmul.f32 0.5, %v2053_v5  ;;  %2023 = vst.msk [vmem:[#allocation3 + $0xf8] sm:$0xff] %vm196_vm0, %v1989_v3 }
 0x287   : > { %7752 = vrot.lane.b32.xlu1 %v7751_v30, %s8218_s20  ;;  %v10371_v3 = vsel %vm603_vm7, %v2535_v48, %v2536_v26  ;;  %v10374_v12 = vsel %vm603_vm7, %v2536_v26, %v2538_v32  ;;  %v10379_v9 = vsel %vm522_vm2, %v2455_v7, %v2456_v47  ;;  %v2119_v26 = vld [vmem:[%s8400_s11 + $0xf8] sm:$0xff]  ;;  %v8067_v32 = vld [vmem:[#allocation2] sm:$0xff] }
 0x288   : > { %v2252_v57 = vsel %vm2182_vm10, %v2148_v19, %v2220_v62  ;;  %v2149_v23 = vadd.f32 %v2117_v28, %v2085_v8  ;;  %v10376_v5 = vld [vmem:[#allocation2 + $0x150] sm:$0xff]  ;;  %12957 = vst [vmem:[#allocation31_spill] sm:$0xff] %v10379_v9  ;;  %v2458_v19 = vrot.slane %v2329_v55, 1  ;;  %6685 = vmatprep.mubr.msk.f32.mxu0 %vm196_vm0, %v10371_v3  ;;  %v2470_v7 = vrot.slane %v8067_v32, 2 }
 0x289   : > { %2284 = vst.msk [vmem:[#allocation2 + $0x169] sm:$0xff] %vm196_vm0, %v2252_v57  ;;  %v2054_v0 = vld [vmem:[#allocation3 + $0xf0] sm:$0xff]  ;;  %6686 = vmatmul.mubr.msk.f32.gmra.mrb[86].mxu0 %vm196_vm0, %v10374_v12  ;;  %v7756_v48 = vpack.i.bf16 %v10379_v9, %v10376_v5  ;;  %v2540_v2 = vrot.slane %v10376_v5, 2 }
 0x28a   : > { %vm2183_vm11 = vcmp.gt.f32.partialorder %v2149_v23, 0.0  ;;  %v2221_v28 = vmul.f32 %v10276_v41, %v2149_v23  ;;  %v2086_v62 = vmul.f32 0.5, %v2054_v0  ;;  %v10394_v0 = vsel %vm522_vm2, %v2456_v47, %v2458_v19 }
 0x28b   : > { %7757 = vrot.lane.b32.xlu0 %v7756_v48, %s8218_s20  ;;  %12958 = vst [vmem:[#allocation32_spill] sm:$0xff] %v10394_v0 }
 0x28c   : > { %v2253_v8 = vsel %vm2183_vm11, %v2149_v23, %v2221_v28  ;;  %v2150_v30 = vadd.f32 %v2118_v58, %v2086_v62  ;;  %v10391_v57 = vld [vmem:[#allocation2 + $0x158] sm:$0xff]  ;;  %v2332_v40 = vld [vmem:[#allocation2 + $0x160] sm:$0x3]  ;;  %v2471_v23 = vrot.slane %v10397_v16, 2  ;;  %v2460_v62 = vrot.slane %v10376_v5, 1 }
 0x28d   : > { %2285 = vst.msk [vmem:[#allocation2 + $0x171] sm:$0xff] %vm196_vm0, %v2253_v8  ;;  %v2055_v55 = vld [vmem:[#allocation3 + $0xf8] sm:$0xff]  ;;  %v7761_v48 = vpack.i.bf16 %v10394_v0, %v10391_v57  ;;  %v2541_v8 = vrot.slane %v10391_v57, 2  ;;  %v2543_v47 = vrot.slane %v2332_v40, 2  ;;  %v2461_v19 = vrot.slane %v10391_v57, 1 }
 0x28e   : > { %vm2184_vm12 = vcmp.gt.f32.partialorder %v2150_v30, 0.0  ;;  %v2222_v58 = vmul.f32 %v10276_v41, %v2150_v30  ;;  %v2087_v28 = vmul.f32 0.5, %v2055_v55  ;;  %v2463_v33 = vrot.slane %v2332_v40, 1 }
 0x28f   : > { %7762 = vrot.lane.b32.xlu1 %v7761_v48, %s8218_s20  ;;  %v10411_v55 = vsel %vm603_vm7, %v2540_v2, %v2541_v8  ;;  %v10414_v34 = vsel %vm603_vm7, %v2541_v8, %v2543_v47  ;;  %v10417_v0 = vsel %vm522_vm2, %v2460_v62, %v2461_v19  ;;  %v2472_v2 = vsel %vm603_vm7, %v2470_v7, %v2471_v23  ;;  %v6264_v7 = vld [vmem:[%s12757_s2 + $0x348] sm:$0xff] }
 0x290   : > { %v2254_v9 = vsel %vm2184_vm12, %v2150_v30, %v2222_v58  ;;  %v2151_v54 = vadd.f32 %v2119_v26, %v2087_v28  ;;  %v10406_v13 = vld [vmem:[#allocation2 + $0x168] sm:$0xff]  ;;  %12959 = vst [vmem:[#allocation33_spill] sm:$0xff] %v10417_v0  ;;  %6688 = vmatprep.mubr.msk.f32.mxu0 %vm196_vm0, %v10411_v55  ;;  %v8069_v26 = vld [vmem:[#allocation2 + $0x10] sm:$0x3]  ;;  %v10434_v62 = vsel %vm522_vm2, %v2461_v19, %v2463_v33 }
 0x291   : > { %2286 = vst.msk [vmem:[#allocation2 + $0x181] sm:$0xff] %vm196_vm0, %v2254_v9  ;;  %v7766_v40 = vpack.i.bf16 %v10417_v0, %v10406_v13  ;;  %6689 = vmatmul.mubr.msk.f32.gmra.mrb[88].mxu0 %vm196_vm0, %v10414_v34  ;;  %v6263_v9 = vld [vmem:[%s12757_s2 + $0x340] sm:$0xff]  ;;  %v2473_v58 = vrot.slane %v8069_v26, 2  ;;  %12960 = vst [vmem:[#allocation34_spill] sm:$0xff] %v10434_v62  ;;  %v2545_v48 = vrot.slane %v10406_v13, 2  ;;  %v2465_v47 = vrot.slane %v10406_v13, 1 }
 0x292   : > { %vm2185_vm13 = vcmp.gt.f32.partialorder %v2151_v54, 0.0  ;;  %v2223_v30 = vmul.f32 %v10276_v41, %v2151_v54 }
 0x293   : > { %7767 = vrot.lane.b32.xlu0 %v7766_v40, %s8218_s20 }
 0x294   : > { %v2255_v28 = vsel %vm2185_vm13, %v2151_v54, %v2223_v30  ;;  %v10431_v41 = vld [vmem:[#allocation2 + $0x170] sm:$0xff]  ;;  %v2335_v8 = vld [vmem:[#allocation2 + $0x178] sm:$0x3] }
 0x295   : > { %2287 = vst.msk [vmem:[#allocation2 + $0x189] sm:$0xff] %vm196_vm0, %v2255_v28  ;;  %v7628_v26 = vpop.permute.xlu0 %7627  ;;  %v7771_v54 = vpack.i.bf16 %v10434_v62, %v10431_v41  ;;  %v2546_v30 = vrot.slane %v10431_v41, 2  ;;  %v2548_v40 = vrot.slane %v2335_v8, 2  ;;  %v2466_v33 = vrot.slane %v10431_v41, 1 }
 0x296   : > { %v7630_v19 = vunpack.i.h.bf16 %v7628_v26  ;;  %v7629_v0 = vunpack.i.l.bf16 %v7628_v26  ;;  %v6925_v28 = vpack.c.bf16 %v6264_v7, %v6263_v9  ;;  %v2474_v7 = vsel %vm603_vm7, %v2471_v23, %v2473_v58 }
 0x297   : > { %7772 = vrot.lane.b32.xlu1 %v7771_v54, %s8218_s20  ;;  %v10448_v22 = vsel %vm603_vm7, %v2545_v48, %v2546_v30  ;;  %v10451_v14 = vsel %vm603_vm7, %v2546_v30, %v2548_v40  ;;  %v10454_v15 = vsel %vm522_vm2, %v2465_v47, %v2466_v33  ;;  %v2468_v54 = vrot.slane %v2335_v8, 1  ;;  %v8070_v47 = vld [vmem:[#allocation2 + $0x20] sm:$0xff]  ;;  %v6265_v40 = vld [vmem:[%s12757_s2 + $0x350] sm:$0xff] }
 0x298   : > { %12961 = vst [vmem:[#allocation35_spill] sm:$0xff] %v10454_v15  ;;  %v10456_v62 = vld [vmem:[#allocation2 + $0x180] sm:$0xff]  ;;  %6691 = vmatprep.mubr.msk.f32.mxu0 %vm196_vm0, %v10448_v22  ;;  %v2972_v6 = vsel %vm196_vm0, %v2472_v2, %v7629_v0  ;;  %v2940_v26 = vsel %vm196_vm0, %v8067_v32, %v7630_v19  ;;  %v2476_v30 = vrot.slane %v8070_v47, 2  ;;  %v6266_v32 = vld [vmem:[%s12757_s2 + $0x358] sm:$0xff] }
 0x299   : > { %6692 = vmatmul.mubr.msk.f32.gmra.mrb[90].mxu0 %vm196_vm0, %v10451_v14  ;;  %v7633_v48 = vpop.permute.xlu1 %7632  ;;  %3249 = vmatprep.mubr.f32.mxu1 %v2972_v6  ;;  %v7776_v9 = vpack.i.bf16 %v10454_v15, %v10456_v62  ;;  %v8071_v6 = vld [vmem:[#allocation2 + $0x18] sm:$0xff]  ;;  %v10482_v50 = vsel %vm522_vm2, %v2466_v33, %v2468_v54  ;;  %v2622_v51 = vrot.slane %v10456_v62, 2  ;;  %v8072_v33 = vld [vmem:[#allocation2 + $0x28] sm:$0x3] }
 0x29a   : > { %v7635_v0 = vunpack.i.h.bf16 %v7633_v48  ;;  %v7634_v2 = vunpack.i.l.bf16 %v7633_v48  ;;  %3250 = vmatmul.mubr.f32.vlgmr.msra.gmra.mrb[32].mxu1 %v2940_v26  ;;  %v2475_v8 = vrot.slane %v8071_v6, 2  ;;  %12962 = vst [vmem:[#allocation36_spill] sm:$0xff] %v10482_v50  ;;  %v6928_v26 = vpack.c.bf16 %v6266_v32, %v6265_v40  ;;  %v6267_v40 = vld [vmem:[%s12757_s2 + $0x360] sm:$0xff]  ;;  %v6268_v32 = vld [vmem:[%s12757_s2 + $0x368] sm:$0xff] }
 0x29b   : > { %6926 = vmatpush1.bf16.msra.mxu1 %v6925_v28  ;;  %7777 = vrot.lane.b32.xlu0 %v7776_v9, %s8218_s20  ;;  %v2478_v54 = vrot.slane %v8072_v33, 2 }
 0x29c   : > { %v10474_v19 = vld [vmem:[#allocation2 + $0x188] sm:$0xff]  ;;  %v10476_v23 = vld [vmem:[#allocation2 + $0x190] sm:$0x3]  ;;  %v2973_v58 = vsel %vm196_vm0, %v2474_v7, %v7634_v2  ;;  %v2941_v15 = vsel %vm196_vm0, %v10397_v16, %v7635_v0  ;;  %6927 = vmatprep.subr.bf16.mxu1 %v12890_v25  ;;  %v2477_v9 = vsel %vm603_vm7, %v2475_v8, %v2476_v30 }
 0x29d   : > { %3254 = vmatprep.mubr.f32.mxu1 %v2973_v58  ;;  %v7638_v28 = vpop.permute.xlu0 %7637  ;;  %v7781_v48 = vpack.i.bf16 %v10482_v50, %v10474_v19  ;;  %v2623_v7 = vrot.slane %v10474_v19, 2  ;;  %v2625_v16 = vrot.slane %v10476_v23, 2 }
 0x29e   : > { %v7640_v2 = vunpack.i.h.bf16 %v7638_v28  ;;  %v7639_v49 = vunpack.i.l.bf16 %v7638_v28  ;;  %3255 = vmatmul.mubr.f32.gmra.mrb[34].mxu1 %v2941_v15 }
 0x29f   : > { %7782 = vrot.lane.b32.xlu1 %v7781_v48, %s8218_s20  ;;  %2832 = vrot.lane.b32.xlu0 %v2477_v9, %s8218_s20  ;;  %v10500_v0 = vsel %vm603_vm7, %v2622_v51, %v2623_v7  ;;  %v10505_v15 = vsel %vm603_vm7, %v2623_v7, %v2625_v16  ;;  %v6931_v48 = vpack.c.bf16 %v6268_v32, %v6267_v40  ;;  %v6269_v7 = vld [vmem:[%s12757_s2 + $0x370] sm:$0xff]  ;;  %v6270_v16 = vld [vmem:[%s12757_s2 + $0x378] sm:$0xff] }
 0x2a0   : > { %6694 = vmatprep.mubr.msk.f32.mxu0 %vm196_vm0, %v10500_v0  ;;  %v2974_v58 = vsel %vm196_vm0, %v2477_v9, %v7639_v49  ;;  %v2942_v28 = vsel %vm196_vm0, %v8071_v6, %v7640_v2  ;;  %6929 = vmatpush1.bf16.msra.mxu1 %v6928_v26  ;;  %v2479_v51 = vsel %vm603_vm7, %v2476_v30, %v2478_v54  ;;  %v6271_v26 = vld [vmem:[%s12757_s2 + $0x380] sm:$0xff]  ;;  %v6272_v9 = vld [vmem:[%s12757_s2 + $0x388] sm:$0xff]  ;;  %v8073_v32 = vld [vmem:[#allocation2 + $0x30] sm:$0xff] }
 0x2a1   : > { %6695 = vmatmul.mubr.msk.f32.gmra.mrb[92].mxu0 %vm196_vm0, %v10505_v15  ;;  %v7643_v8 = vpop.permute.xlu1 %7642  ;;  %3259 = vmatprep.mubr.f32.mxu1 %v2974_v58  ;;  %v6934_v6 = vpack.c.bf16 %v6270_v16, %v6269_v7  ;;  %v6937_v54 = vpack.c.bf16 %v6272_v9, %v6271_v26  ;;  %v6273_v58 = vld [vmem:[%s12757_s2 + $0x390] sm:$0xff]  ;;  %v8074_v16 = vld [vmem:[#allocation2 + $0x38] sm:$0xff] }
 0x2a2   : > { %v7645_v33 = vunpack.i.h.bf16 %v7643_v8  ;;  %v7644_v50 = vunpack.i.l.bf16 %v7643_v8  ;;  %6930 = vmatprep.subr.bf16.mxu1 %v12890_v25  ;;  %3260 = vmatmul.mubr.f32.gmra.mrb[36].mxu1 %v2942_v28  ;;  %v6274_v28 = vld [vmem:[%s12757_s2 + $0x398] sm:$0xff] }
 0x2a3   : > { %2834 = vrot.lane.b32.xlu1 %v2479_v51, %s8218_s20  ;;  %2836 = vrot.lane.b32.xlu0 %v9973_v24, %s8218_s20 }
 0x2a4   : > { %v2975_v49 = vsel %vm196_vm0, %v2479_v51, %v7644_v50  ;;  %v2943_v30 = vsel %vm196_vm0, %v8070_v47, %v7645_v33  ;;  %6932 = vmatpush1.bf16.msra.mxu1 %v6931_v48  ;;  %v6940_v51 = vpack.c.bf16 %v6274_v28, %v6273_v58  ;;  %v6277_v28 = vld [vmem:[%s12757_s2 + $0x3b0] sm:$0xff] }
 0x2a5   : > { %3264 = vmatprep.mubr.f32.mxu1 %v2975_v49  ;;  %6933 = vmatprep.subr.bf16.mxu1 %v12890_v25  ;;  %v7648_v2 = vpop.permute.xlu0 %7647 }
 0x2a6   : > { %3265 = vmatmul.mubr.f32.gmra.mrb[38].mxu1 %v2943_v30  ;;  %v7650_v50 = vunpack.i.h.bf16 %v7648_v2  ;;  %v7649_v47 = vunpack.i.l.bf16 %v7648_v2  ;;  %v6275_v30 = vld [vmem:[%s12757_s2 + $0x3a0] sm:$0xff] }
 0x2a7   : > { %2838 = vrot.lane.b32.xlu1 %v9979_v29, %s8218_s20  ;;  %2840 = vrot.lane.b32.xlu0 %v10008_v43, %s8218_s20 }
 0x2a8   : > { %6935 = vmatpush1.bf16.msra.mxu1 %v6934_v6  ;;  %v2976_v40 = vsel %vm196_vm0, %v9973_v24, %v7649_v47  ;;  %v10538_v8 = vsel %vm196_vm0, %v8073_v32, %v7650_v50  ;;  %v6276_v6 = vld [vmem:[%s12757_s2 + $0x3a8] sm:$0xff] }
 0x2a9   : > { %6936 = vmatprep.subr.bf16.mxu1 %v12890_v25  ;;  %v7653_v48 = vpop.permute.xlu1 %7652  ;;  %3269 = vmatprep.mubr.f32.mxu1 %v2976_v40  ;;  %v8075_v32 = vld [vmem:[#allocation2 + $0x48] sm:$0xff] }
 0x2aa   : > { %v7655_v24 = vunpack.i.h.bf16 %v7653_v48  ;;  %v7654_v33 = vunpack.i.l.bf16 %v7653_v48  ;;  %3270 = vmatmul.mubr.f32.gmra.mrb[40].mxu1 %v10538_v8  ;;  %v6278_v48 = vld [vmem:[%s12757_s2 + $0x3b8] sm:$0xff] }
 0x2ab   : > { %2842 = vrot.lane.b32.xlu1 %v10011_v17, %s8218_s20  ;;  %2844 = vrot.lane.b32.xlu0 %v10037_v27, %s8218_s20 }
 0x2ac   : > { %6938 = vmatpush1.bf16.msra.mxu1 %v6937_v54  ;;  %v2977_v7 = vsel %vm196_vm0, %v9979_v29, %v7654_v33  ;;  %v10555_v49 = vsel %vm196_vm0, %v8074_v16, %v7655_v24  ;;  %v6943_v54 = vpack.c.bf16 %v6276_v6, %v6275_v30  ;;  %v6946_v30 = vpack.c.bf16 %v6278_v48, %v6277_v28  ;;  %v6280_v6 = vld [vmem:[%s12757_s2 + $0x3c8] sm:$0xff] }
 0x2ad   : > { %6939 = vmatprep.subr.bf16.mxu1 %v12890_v25  ;;  %3274 = vmatprep.mubr.f32.mxu1 %v2977_v7  ;;  %v7658_v26 = vpop.permute.xlu0 %7657  ;;  %v8076_v7 = vld [vmem:[#allocation2 + $0x50] sm:$0xff] }
 0x2ae   : > { %3275 = vmatmul.mubr.f32.gmra.mrb[42].mxu1 %v10555_v49  ;;  %v7660_v29 = vunpack.i.h.bf16 %v7658_v26  ;;  %v7659_v9 = vunpack.i.l.bf16 %v7658_v26 }
 0x2af   : > { %2846 = vrot.lane.b32.xlu1 %v10040_v53, %s8218_s20  ;;  %2848 = vrot.lane.b32.xlu0 %v10070_v38, %s8218_s20 }
 0x2b0   : > { %6941 = vmatpush1.bf16.msra.mxu1 %v6940_v51  ;;  %v2978_v40 = vsel %vm196_vm0, %v10008_v43, %v7659_v9  ;;  %v10573_v58 = vsel %vm196_vm0, %v8075_v32, %v7660_v29 }
 0x2b1   : > { %v7663_v2 = vpop.permute.xlu1 %7662  ;;  %6942 = vmatprep.subr.bf16.mxu1 %v12890_v25  ;;  %3279 = vmatprep.mubr.f32.mxu1 %v2978_v40  ;;  %v6282_v40 = vld [vmem:[%s12757_s2 + $0x3d8] sm:$0xff] }
 0x2b2   : > { %v7665_v50 = vunpack.i.h.bf16 %v7663_v2  ;;  %v7664_v47 = vunpack.i.l.bf16 %v7663_v2  ;;  %3280 = vmatmul.mubr.f32.gmra.mrb[44].mxu1 %v10573_v58 }
 0x2b3   : > { %2850 = vrot.lane.b32.xlu1 %v10073_v42, %s8218_s20  ;;  %2852 = vrot.lane.b32.xlu0 %v10109_v35, %s8218_s20 }
 0x2b4   : > { %v2979_v43 = vsel %vm196_vm0, %v10011_v17, %v7664_v47  ;;  %v10589_v16 = vsel %vm196_vm0, %v8076_v7, %v7665_v50  ;;  %6944 = vmatpush1.bf16.msra.mxu1 %v6943_v54  ;;  %v6279_v17 = vld [vmem:[%s12757_s2 + $0x3c0] sm:$0xff]  ;;  %v6284_v7 = vld [vmem:[%s12757_s2 + $0x3e8] sm:$0xff] }
 0x2b5   : > { %v7668_v24 = vpop.permute.xlu0 %7667  ;;  %3284 = vmatprep.mubr.f32.mxu1 %v2979_v43  ;;  %6945 = vmatprep.subr.bf16.mxu1 %v12890_v25  ;;  %v8077_v50 = vld [vmem:[#allocation2 + $0x60] sm:$0xff]  ;;  %v6949_v54 = vpack.c.bf16 %v6280_v6, %v6279_v17  ;;  %v8079_v17 = vld [vmem:[#allocation2 + $0x78] sm:$0xff] }
 0x2b6   : > { %v7670_v33 = vunpack.i.h.bf16 %v7668_v24  ;;  %v7669_v51 = vunpack.i.l.bf16 %v7668_v24  ;;  %3285 = vmatmul.mubr.f32.gmra.mrb[46].mxu1 %v10589_v16  ;;  %v8078_v24 = vld [vmem:[#allocation2 + $0x68] sm:$0xff] }
 0x2b7   : > { %2854 = vrot.lane.b32.xlu1 %v10112_v10, %s8218_s20  ;;  %2856 = vrot.lane.b32.xlu0 %v10140_v46, %s8218_s20 }
 0x2b8   : > { %v2980_v26 = vsel %vm196_vm0, %v10037_v27, %v7669_v51  ;;  %v10606_v47 = vsel %vm196_vm0, %v8077_v50, %v7670_v33  ;;  %6947 = vmatpush1.bf16.msra.mxu1 %v6946_v30  ;;  %v6281_v27 = vld [vmem:[%s12757_s2 + $0x3d0] sm:$0xff] }
 0x2b9   : > { %v7673_v29 = vpop.permute.xlu1 %7672  ;;  %3289 = vmatprep.mubr.f32.mxu1 %v2980_v26  ;;  %6948 = vmatprep.subr.bf16.mxu1 %v12890_v25  ;;  %v6952_v51 = vpack.c.bf16 %v6282_v40, %v6281_v27  ;;  %v8080_v27 = vld [vmem:[#allocation2 + $0x80] sm:$0xff] }
 0x2ba   : > { %v7675_v9 = vunpack.i.h.bf16 %v7673_v29  ;;  %v7674_v2 = vunpack.i.l.bf16 %v7673_v29  ;;  %3290 = vmatmul.mubr.f32.gmra.mrb[48].mxu1 %v10606_v47 }
 0x2bb   : > { %2858 = vrot.lane.b32.xlu1 %v10143_v44, %s8218_s20  ;;  %2860 = vrot.lane.b32.xlu0 %v10171_v4, %s8218_s20 }
 0x2bc   : > { %v2981_v32 = vsel %vm196_vm0, %v10040_v53, %v7674_v2  ;;  %v10623_v33 = vsel %vm196_vm0, %v8078_v24, %v7675_v9  ;;  %6950 = vmatpush1.bf16.msra.mxu1 %v6949_v54  ;;  %v6283_v53 = vld [vmem:[%s12757_s2 + $0x3e0] sm:$0xff]  ;;  %v6285_v9 = vld [vmem:[%s12757_s2 + $0x3f0] sm:$0xff] }
 0x2bd   : > { %v7678_v28 = vpop.permute.xlu0 %7677  ;;  %3294 = vmatprep.mubr.f32.mxu1 %v2981_v32  ;;  %6951 = vmatprep.subr.bf16.mxu1 %v12890_v25  ;;  %v6955_v26 = vpack.c.bf16 %v6284_v7, %v6283_v53 }
 0x2be   : > { %v7680_v48 = vunpack.i.h.bf16 %v7678_v28  ;;  %v7679_v43 = vunpack.i.l.bf16 %v7678_v28  ;;  %3295 = vmatmul.mubr.f32.gmra.mrb[50].mxu1 %v10623_v33  ;;  %v6287_v28 = vld [vmem:[%s12757_s2 + $0x400] sm:$0xff] }
 0x2bf   : > { %2862 = vrot.lane.b32.xlu1 %v10174_v45, %s8218_s20  ;;  %2864 = vrot.lane.b32.xlu0 %v10202_v21, %s8218_s20 }
 0x2c0   : > { %v2982_v30 = vsel %vm196_vm0, %v10070_v38, %v7679_v43  ;;  %v10640_v6 = vsel %vm196_vm0, %v8079_v17, %v7680_v48  ;;  %6953 = vmatpush1.bf16.msra.mxu1 %v6952_v51  ;;  %v6286_v38 = vld [vmem:[%s12757_s2 + $0x3f8] sm:$0xff]  ;;  %v6288_v48 = vld [vmem:[%s12757_s2 + $0x408] sm:$0xff] }
 0x2c1   : > { %3299 = vmatprep.mubr.f32.mxu1 %v2982_v30  ;;  %v7683_v29 = vpop.permute.xlu1 %7682  ;;  %6954 = vmatprep.subr.bf16.mxu1 %v12890_v25  ;;  %v6958_v32 = vpack.c.bf16 %v6286_v38, %v6285_v9  ;;  %v6961_v51 = vpack.c.bf16 %v6288_v48, %v6287_v28  ;;  %v8081_v30 = vld [vmem:[#allocation2 + $0x90] sm:$0xff]  ;;  %v2586_v28 = vrot.slane %v10474_v19, 1  ;;  %v2588_v19 = vrot.slane %v10476_v23, 1  ;;  %v6294_v23 = vld [vmem:[%s12757_s2 + $0x438] sm:$0xff] }
 0x2c2   : > { %v7685_v2 = vunpack.i.h.bf16 %v7683_v29  ;;  %v7684_v50 = vunpack.i.l.bf16 %v7683_v29  ;;  %3300 = vmatmul.mubr.f32.gmra.mrb[52].mxu1 %v10640_v6  ;;  %v6290_v29 = vld [vmem:[%s12757_s2 + $0x418] sm:$0xff] }
 0x2c3   : > { %2866 = vrot.lane.b32.xlu1 %v10208_v52, %s8218_s20  ;;  %2868 = vrot.lane.b32.xlu0 %v10242_v31, %s8218_s20 }
 0x2c4   : > { %v2983_v54 = vsel %vm196_vm0, %v10073_v42, %v7684_v50  ;;  %v10657_v40 = vsel %vm196_vm0, %v8080_v27, %v7685_v2  ;;  %6956 = vmatpush1.bf16.msra.mxu1 %v6955_v26  ;;  %v6289_v26 = vld [vmem:[%s12757_s2 + $0x410] sm:$0xff]  ;;  %v8082_v2 = vld [vmem:[#allocation2 + $0x98] sm:$0xff]  ;;  %v6291_v27 = vld [vmem:[%s12757_s2 + $0x420] sm:$0xff] }
 0x2c5   : > { %3304 = vmatprep.mubr.f32.mxu1 %v2983_v54  ;;  %6957 = vmatprep.subr.bf16.mxu1 %v12890_v25  ;;  %v6964_v54 = vpack.c.bf16 %v6290_v29, %v6289_v26 }
 0x2c6   : > { %3305 = vmatmul.mubr.f32.gmra.mrb[54].mxu1 %v10657_v40 }
 0x2c7   : > { %2870 = vrot.lane.b32.xlu1 %v10245_v1, %s8218_s20  ;;  %v7688_v43 = vpop.permute.xlu0 %7687  ;;  %2872 = vrot.lane.b32.xlu0 %v10286_v39, %s8218_s20 }
 0x2c8   : > { %v7690_v42 = vunpack.i.h.bf16 %v7688_v43  ;;  %v7689_v24 = vunpack.i.l.bf16 %v7688_v43  ;;  %6959 = vmatpush1.bf16.msra.mxu1 %v6958_v32  ;;  %v6292_v32 = vld [vmem:[%s12757_s2 + $0x428] sm:$0xff]  ;;  %v10704_v43 = vld [vmem:[#allocation2 + $0x1a0] sm:$0xff] }
 0x2c9   : > { %v7693_v53 = vpop.permute.xlu1 %7692  ;;  %6960 = vmatprep.subr.bf16.mxu1 %v12890_v25 }
 0x2ca   : > { %v2984_v7 = vsel %vm196_vm0, %v10109_v35, %v7689_v24  ;;  %v10674_v17 = vsel %vm196_vm0, %v8081_v30, %v7690_v42  ;;  %v7695_v9 = vunpack.i.h.bf16 %v7693_v53  ;;  %v7694_v38 = vunpack.i.l.bf16 %v7693_v53  ;;  %v10712_v30 = vld [vmem:[#allocation2 + $0x1a8] sm:$0x3] }
 0x2cb   : > { %2874 = vrot.lane.b32.xlu1 %v10289_v18, %s8218_s20  ;;  %3309 = vmatprep.mubr.f32.mxu1 %v2984_v7  ;;  %v6967_v7 = vpack.c.bf16 %v6292_v32, %v6291_v27  ;;  %v10738_v32 = vsel %vm522_vm2, %v2586_v28, %v2588_v19 }
 0x2cc   : > { %2876 = vrot.lane.b32.xlu0 %v10329_v56, %s8218_s20  ;;  %3310 = vmatmul.mubr.f32.gmra.mrb[56].mxu1 %v10674_v17  ;;  %v2985_v35 = vsel %vm196_vm0, %v10112_v10, %v7694_v38  ;;  %v10691_v50 = vsel %vm196_vm0, %v8082_v2, %v7695_v9  ;;  %v10702_v10 = vld [vmem:[#allocation2 + $0x198] sm:$0xff]  ;;  %v8083_v38 = vld [vmem:[#allocation2 + $0xa8] sm:$0xff] }
 0x2cd   : > { %6962 = vmatpush1.bf16.msra.mxu1 %v6961_v51  ;;  %v7698_v48 = vpop.permute.xlu0 %7697  ;;  %3314 = vmatprep.mubr.f32.mxu1 %v2985_v35  ;;  %v2585_v51 = vrot.slane %v10456_v62, 1  ;;  %v6293_v62 = vld [vmem:[%s12757_s2 + $0x430] sm:$0xff]  ;;  %v2630_v27 = vrot.slane %v10702_v10, 1 }
 0x2ce   : > { %v7700_v42 = vunpack.i.h.bf16 %v7698_v48  ;;  %v7699_v24 = vunpack.i.l.bf16 %v7698_v48  ;;  %6963 = vmatprep.subr.bf16.mxu1 %v12890_v25  ;;  %v2633_v48 = vrot.slane %v10712_v30, 1 }
 0x2cf   : > { %2878 = vrot.lane.b32.xlu1 %v10332_v11, %s8218_s20  ;;  %v10726_v2 = vsel %vm522_vm2, %v2585_v51, %v2586_v28 }
 0x2d0   : > { %2880 = vrot.lane.b32.xlu0 %v10371_v3, %s8218_s20  ;;  %3315 = vmatmul.mubr.f32.gmra.mrb[58].mxu1 %v10691_v50  ;;  %v2986_v9 = vsel %vm196_vm0, %v10140_v46, %v7699_v24  ;;  %v10717_v35 = vsel %vm196_vm0, %v8083_v38, %v7700_v42  ;;  %v2631_v46 = vrot.slane %v10704_v43, 1  ;;  %v6970_v24 = vpack.c.bf16 %v6294_v23, %v6293_v62  ;;  %v8084_v38 = vld [vmem:[#allocation2 + $0xb0] sm:$0xff] }
 0x2d1   : > { %v7703_v53 = vpop.permute.xlu1 %7702  ;;  %6965 = vmatpush1.bf16.msra.mxu1 %v6964_v54  ;;  %3319 = vmatprep.mubr.f32.mxu1 %v2986_v9  ;;  %v7786_v51 = vpack.i.bf16 %v10448_v22, %v10726_v2 }
 0x2d2   : > { %v7705_v26 = vunpack.i.h.bf16 %v7703_v53  ;;  %v7704_v29 = vunpack.i.l.bf16 %v7703_v53  ;;  %6966 = vmatprep.subr.bf16.mxu1 %v12890_v25  ;;  %v2632_v28 = vsel %vm522_vm2, %v2630_v27, %v2631_v46  ;;  %v2634_v62 = vsel %vm522_vm2, %v2631_v46, %v2633_v48 }
 0x2d3   : > { %2882 = vrot.lane.b32.xlu1 %v10374_v12, %s8218_s20  ;;  %v7801_v46 = vpack.i.bf16 %v10505_v15, %v2634_v62  ;;  %v8088_v62 = vld [vmem:[#allocation2 + $0xe0] sm:$0xff] }
 0x2d4   : > { %2884 = vrot.lane.b32.xlu0 %v10411_v55, %s8218_s20  ;;  %v2987_v54 = vsel %vm196_vm0, %v10143_v44, %v7704_v29  ;;  %3320 = vmatmul.mubr.f32.gmra.mrb[60].mxu1 %v10717_v35  ;;  %v10745_v44 = vsel %vm196_vm0, %v8084_v38, %v7705_v26  ;;  %v7791_v29 = vpack.i.bf16 %v10451_v14, %v10738_v32 }
 0x2d5   : > { %v7708_v42 = vpop.permute.xlu0 %7707  ;;  %3324 = vmatprep.mubr.f32.mxu1 %v2987_v54  ;;  %6968 = vmatpush1.bf16.msra.mxu1 %v6967_v7  ;;  %v7796_v26 = vpack.i.bf16 %v10500_v0, %v2632_v28  ;;  %v8085_v54 = vld [vmem:[#allocation2 + $0xc0] sm:$0xff]  ;;  %v8086_v0 = vld [vmem:[#allocation2 + $0xc8] sm:$0xff] }
 0x2d6   : > { %v7710_v53 = vunpack.i.h.bf16 %v7708_v42  ;;  %v7709_v9 = vunpack.i.l.bf16 %v7708_v42  ;;  %6969 = vmatprep.subr.bf16.mxu1 %v12890_v25 }
 0x2d7   : > { %2886 = vrot.lane.b32.xlu1 %v10414_v34, %s8218_s20 }
 0x2d8   : > { %7787 = vrot.lane.b32.xlu0 %v7786_v51, %s8218_s20  ;;  %v2988_v19 = vsel %vm196_vm0, %v10171_v4, %v7709_v9  ;;  %3325 = vmatmul.mubr.f32.gmra.mrb[62].mxu1 %v10745_v44  ;;  %v10760_v42 = vsel %vm196_vm0, %v8085_v54, %v7710_v53 }
 0x2d9   : > { %v7713_v7 = vpop.permute.xlu1 %7712  ;;  %3329 = vmatprep.mubr.f32.mxu1 %v2988_v19  ;;  %6971 = vmatpush1.bf16.msra.mxu1 %v6970_v24 }
 0x2da   : > { %v7715_v23 = vunpack.i.h.bf16 %v7713_v7  ;;  %v7714_v27 = vunpack.i.l.bf16 %v7713_v7  ;;  %6988 = vmatprep.subr.bf16.mxu1 %v12890_v25 }
 0x2db   : > { %7792 = vrot.lane.b32.xlu1 %v7791_v29, %s8218_s20 }
 0x2dc   : > { %7797 = vrot.lane.b32.xlu0 %v7796_v26, %s8218_s20  ;;  %v2989_v4 = vsel %vm196_vm0, %v10174_v45, %v7714_v27  ;;  %3330 = vmatmul.mubr.f32.gmra.mrb[64].mxu1 %v10760_v42  ;;  %v10770_v48 = vsel %vm196_vm0, %v8086_v0, %v7715_v23  ;;  %v8087_v45 = vld [vmem:[#allocation2 + $0xd8] sm:$0xff]  ;;  %v8089_v0 = vld [vmem:[#allocation2 + $0xf0] sm:$0xff] }
 0x2dd   : > { %3334 = vmatprep.mubr.f32.mxu1 %v2989_v4  ;;  %v7718_v51 = vpop.permute.xlu0 %7717 }
 0x2de   : > { %v7720_v24 = vunpack.i.h.bf16 %v7718_v51  ;;  %v7719_v53 = vunpack.i.l.bf16 %v7718_v51 }
 0x2df   : > { %7802 = vrot.lane.b32.xlu1 %v7801_v46, %s8218_s20 }
 0x2e0   : > { %3335 = vmatmul.mubr.f32.gmra.mrb[66].mxu1 %v10770_v48  ;;  %v2990_v9 = vsel %vm196_vm0, %v10202_v21, %v7719_v53  ;;  %v10777_v15 = vsel %vm196_vm0, %v8087_v45, %v7720_v24  ;;  %v8090_v45 = vld [vmem:[#allocation2 + $0xf8] sm:$0xff] }
 0x2e1   : > { %v7723_v38 = vpop.permute.xlu1 %7722  ;;  %3339 = vmatprep.mubr.f32.mxu1 %v2990_v9 }
 0x2e2   : > { %v7725_v28 = vunpack.i.h.bf16 %v7723_v38  ;;  %v7724_v19 = vunpack.i.l.bf16 %v7723_v38 }
 0x2e4   : > { %3340 = vmatmul.mubr.f32.gmra.mrb[68].mxu1 %v10777_v15  ;;  %v2991_v29 = vsel %vm196_vm0, %v10208_v52, %v7724_v19  ;;  %v10783_v7 = vsel %vm196_vm0, %v8088_v62, %v7725_v28 }
 0x2e5   : > { %3344 = vmatprep.mubr.f32.mxu1 %v2991_v29 }
 0x2e8   : > { %v7728_v26 = vpop.permute.xlu0 %7727  ;;  %3345 = vmatmul.mubr.f32.gmra.mrb[70].mxu1 %v10783_v7 }
 0x2e9   : > { %v7730_v21 = vunpack.i.h.bf16 %v7728_v26  ;;  %v7729_v23 = vunpack.i.l.bf16 %v7728_v26  ;;  %v7733_v27 = vpop.permute.xlu1 %7732 }
 0x2ea   : > { %v7735_v54 = vunpack.i.h.bf16 %v7733_v27  ;;  %v7734_v4 = vunpack.i.l.bf16 %v7733_v27 }
 0x2eb   : > { %v2992_v46 = vsel %vm196_vm0, %v10242_v31, %v7729_v23  ;;  %v10789_v51 = vsel %vm196_vm0, %v8089_v0, %v7730_v21 }
 0x2ec   : > { %3349 = vmatprep.mubr.f32.mxu1 %v2992_v46  ;;  %v2993_v52 = vsel %vm196_vm0, %v10245_v1, %v7734_v4  ;;  %v10795_v38 = vsel %vm196_vm0, %v8090_v45, %v7735_v54 }
 0x2ed   : > { %3350 = vmatmul.mubr.f32.gmra.mrb[72].mxu1 %v10789_v51  ;;  %v7738_v24 = vpop.permute.xlu0 %7737 }
 0x2ee   : > { %v7740_v53 = vunpack.i.h.bf16 %v7738_v24  ;;  %v7739_v9 = vunpack.i.l.bf16 %v7738_v24  ;;  %3354 = vmatprep.mubr.f32.mxu1 %v2993_v52 }
 0x2f0   : > { %v2994_v31 = vsel %vm196_vm0, %v10286_v39, %v7739_v9  ;;  %v10802_v1 = vsel %vm196_vm0, %v10247_v61, %v7740_v53 }
 0x2f1   : > { %3355 = vmatmul.mubr.f32.gmra.mrb[74].mxu1 %v10795_v38  ;;  %v7743_v28 = vpop.permute.xlu1 %7742 }
 0x2f2   : > { %v7745_v19 = vunpack.i.h.bf16 %v7743_v28  ;;  %v7744_v29 = vunpack.i.l.bf16 %v7743_v28  ;;  %3359 = vmatprep.mubr.f32.mxu1 %v2994_v31 }
 0x2f4   : > { %v2995_v62 = vsel %vm196_vm0, %v10289_v18, %v7744_v29  ;;  %v10809_v39 = vsel %vm196_vm0, %v10265_v63, %v7745_v19 }
 0x2f5   : > { %3360 = vmatmul.mubr.f32.gmra.mrb[76].mxu1 %v10802_v1  ;;  %v7748_v26 = vpop.permute.xlu0 %7747 }
 0x2f6   : > { %v7750_v21 = vunpack.i.h.bf16 %v7748_v26  ;;  %v7749_v23 = vunpack.i.l.bf16 %v7748_v26  ;;  %3364 = vmatprep.mubr.f32.mxu1 %v2995_v62 }
 0x2f8   : > { %v2996_v27 = vsel %vm196_vm0, %v10329_v56, %v7749_v23  ;;  %v10816_v61 = vsel %vm196_vm0, %v10294_v20, %v7750_v21 }
 0x2f9   : > { %3365 = vmatmul.mubr.f32.gmra.mrb[78].mxu1 %v10809_v39  ;;  %v7753_v18 = vpop.permute.xlu1 %7752 }
 0x2fa   : > { %3369 = vmatprep.mubr.f32.mxu1 %v2996_v27  ;;  %v7755_v54 = vunpack.i.h.bf16 %v7753_v18  ;;  %v7754_v4 = vunpack.i.l.bf16 %v7753_v18 }
 0x2fc   : > { %v2997_v46 = vsel %vm196_vm0, %v10332_v11, %v7754_v4  ;;  %v10823_v63 = vsel %vm196_vm0, %v10310_v36, %v7755_v54 }
 0x2fd   : > { %3370 = vmatmul.mubr.f32.gmra.mrb[80].mxu1 %v10816_v61  ;;  %v7758_v56 = vpop.permute.xlu0 %7757 }
 0x2fe   : > { %3374 = vmatprep.mubr.f32.mxu1 %v2997_v46  ;;  %v7760_v0 = vunpack.i.h.bf16 %v7758_v56  ;;  %v7759_v52 = vunpack.i.l.bf16 %v7758_v56 }
 0x300   : > { %v2998_v20 = vsel %vm196_vm0, %v10371_v3, %v7759_v52  ;;  %v10830_v24 = vsel %vm196_vm0, %v10334_v59, %v7760_v0 }
 0x301   : > { %3375 = vmatmul.mubr.f32.gmra.mrb[82].mxu1 %v10823_v63  ;;  %v7763_v53 = vpop.permute.xlu1 %7762 }
 0x302   : > { %3379 = vmatprep.mubr.f32.mxu1 %v2998_v20  ;;  %v7765_v11 = vunpack.i.h.bf16 %v7763_v53  ;;  %v7764_v9 = vunpack.i.l.bf16 %v7763_v53  ;;  %v2635_v20 = vrot.slane %v10702_v10, 2  ;;  %v2636_v53 = vrot.slane %v10704_v43, 2 }
 0x304   : > { %v10832_v45 = vpop.f32.mrb[64].mxu0  ;;  %v2999_v28 = vsel %vm196_vm0, %v10374_v12, %v7764_v9  ;;  %v10841_v3 = vsel %vm196_vm0, %v10353_v37, %v7765_v11  ;;  %v2638_v11 = vrot.slane %v10712_v30, 2  ;;  %v2637_v9 = vsel %vm603_vm7, %v2635_v20, %v2636_v53  ;;  %v12968_v20 = vld [vmem:[#allocation13_spill] sm:$0xff] }
 0x305   : > { %3380 = vmatmul.mubr.f32.gmra.mrb[84].mxu1 %v10830_v24  ;;  %v10835_v36 = vpop.f32.mrb[65].mxu0  ;;  %v7768_v31 = vpop.permute.xlu0 %7767  ;;  %6697 = vmatprep.mubr.msk.f32.mxu0 %vm196_vm0, %v2637_v9  ;;  %v12969_v9 = vld [vmem:[#allocation14_spill] sm:$0xff] }
 0x306   : > { %v7770_v59 = vunpack.i.h.bf16 %v7768_v31  ;;  %v7769_v19 = vunpack.i.l.bf16 %v7768_v31  ;;  %3384 = vmatprep.mubr.f32.mxu1 %v2999_v28 }
 0x308   : > { %v3000_v62 = vsel %vm196_vm0, %v10411_v55, %v7769_v19  ;;  %v10848_v23 = vsel %vm196_vm0, %v10376_v5, %v7770_v59  ;;  %v12963_v19 = vld [vmem:[#allocation8_spill] sm:$0xff] }
 0x309   : > { %3385 = vmatmul.mubr.f32.gmra.mrb[86].mxu1 %v10841_v3  ;;  %v7773_v29 = vpop.permute.xlu1 %7772 }
 0x30a   : > { %v7775_v26 = vunpack.i.h.bf16 %v7773_v29  ;;  %v7774_v21 = vunpack.i.l.bf16 %v7773_v29  ;;  %3389 = vmatprep.mubr.f32.mxu1 %v3000_v62 }
 0x30c   : > { %v3001_v37 = vsel %vm196_vm0, %v10414_v34, %v7774_v21  ;;  %v10853_v27 = vpop.f32.mrb[66].mxu0  ;;  %v10857_v55 = vsel %vm196_vm0, %v10391_v57, %v7775_v26  ;;  %v12964_v26 = vld [vmem:[#allocation9_spill] sm:$0xff] }
 0x30d   : > { %3390 = vmatmul.mubr.f32.gmra.mrb[88].mxu1 %v10848_v23  ;;  %v7778_v12 = vpop.permute.xlu0 %7777  ;;  %v10859_v4 = vpop.f32.mrb[67].mxu0 }
 0x30e   : > { %v7780_v18 = vunpack.i.h.bf16 %v7778_v12  ;;  %v7779_v54 = vunpack.i.l.bf16 %v7778_v12  ;;  %3394 = vmatprep.mubr.f32.mxu1 %v3001_v37 }
 0x310   : > { %v3002_v5 = vsel %vm196_vm0, %v10448_v22, %v7779_v54  ;;  %v10866_v0 = vsel %vm196_vm0, %v10406_v13, %v7780_v18  ;;  %v12966_v54 = vld [vmem:[#allocation11_spill] sm:$0xff] }
 0x311   : > { %3395 = vmatmul.mubr.f32.gmra.mrb[90].mxu1 %v10857_v55  ;;  %v7783_v34 = vpop.permute.xlu1 %7782  ;;  %v2833_v31 = vpop.permute.xlu0 %2832 }
 0x312   : > { %v7785_v46 = vunpack.i.h.bf16 %v7783_v34  ;;  %v7784_v56 = vunpack.i.l.bf16 %v7783_v34  ;;  %3399 = vmatprep.mubr.f32.mxu1 %v3002_v5  ;;  %v3004_v30 = vsel %vm196_vm0, %v9952_v60, %v2833_v31 }
 0x314   : > { %v10868_v52 = vpop.f32.mrb[68].mxu0  ;;  %v3003_v57 = vsel %vm196_vm0, %v10451_v14, %v7784_v56  ;;  %v10880_v13 = vsel %vm196_vm0, %v10431_v41, %v7785_v46  ;;  %v2639_v14 = vsel %vm603_vm7, %v2636_v53, %v2638_v11  ;;  %v12967_v46 = vld [vmem:[#allocation12_spill] sm:$0xff] }
 0x315   : > { %3400 = vmatmul.mubr.f32.gmra.mrb[92].mxu1 %v10866_v0  ;;  %v10875_v22 = vpop.f32.mrb[69].mxu0  ;;  %6698 = vmatmul.mubr.msk.f32.gmra.mrb[94].mxu0 %vm196_vm0, %v2639_v14  ;;  %v2835_v28 = vpop.permute.xlu1 %2834 }
 0x316   : > { %3404 = vmatprep.mubr.f32.mxu1 %v3003_v57  ;;  %v3005_v29 = vsel %vm196_vm0, %v12963_v19, %v2835_v28  ;;  %v2837_v62 = vpop.permute.xlu0 %2836 }
 0x319   : > { %3405 = vmatmul.mubr.f32.gmra.mrb[94].mxu1 %v10880_v13  ;;  %v2839_v21 = vpop.permute.xlu1 %2838 }
 0x31a   : > { %3474 = vmatprep.mubr.f32.mxu1 %v10538_v8  ;;  %v3006_v8 = vsel %vm196_vm0, %v12964_v26, %v2837_v62  ;;  %v2841_v18 = vpop.permute.xlu0 %2840 }
 0x31c   : > { %v10890_v41 = vpop.f32.mrb[70].mxu0 }
 0x31d   : > { %3475 = vmatmul.mubr.f32.vlgmr.msra.gmra.mrb[32].mxu1 %v3004_v30  ;;  %v10893_v59 = vpop.f32.mrb[71].mxu0  ;;  %v2843_v5 = vpop.permute.xlu1 %2842  ;;  %v12970_v30 = vld [vmem:[#allocation15_spill] sm:$0xff] }
 0x31e   : > { %3479 = vmatprep.mubr.f32.mxu1 %v10555_v49  ;;  %v12965_v49 = vld [vmem:[#allocation10_spill] sm:$0xff]  ;;  %v3009_v56 = vsel %vm196_vm0, %v12967_v46, %v2843_v5  ;;  %v2845_v57 = vpop.permute.xlu0 %2844 }
 0x31f   : > { %v3007_v12 = vsel %vm196_vm0, %v12965_v49, %v2839_v21 }
 0x321   : > { %3480 = vmatmul.mubr.f32.gmra.mrb[34].mxu1 %v3005_v29  ;;  %v2847_v53 = vpop.permute.xlu1 %2846 }
 0x322   : > { %3484 = vmatprep.mubr.f32.mxu1 %v10573_v58  ;;  %v3008_v58 = vsel %vm196_vm0, %v12966_v54, %v2841_v18  ;;  %v3011_v14 = vsel %vm196_vm0, %v12969_v9, %v2847_v53  ;;  %v2849_v31 = vpop.permute.xlu0 %2848  ;;  %v12973_v18 = vld [vmem:[#allocation18_spill] sm:$0xff] }
 0x324   : > { %v10901_v60 = vpop.f32.mrb[72].mxu0 }
 0x325   : > { %3485 = vmatmul.mubr.f32.gmra.mrb[36].mxu1 %v3006_v8  ;;  %v10903_v37 = vpop.f32.mrb[73].mxu0  ;;  %v2851_v19 = vpop.permute.xlu1 %2850  ;;  %v12972_v8 = vld [vmem:[#allocation17_spill] sm:$0xff] }
 0x326   : > { %3489 = vmatprep.mubr.f32.mxu1 %v10589_v16  ;;  %v2853_v26 = vpop.permute.xlu0 %2852 }
 0x329   : > { %3490 = vmatmul.mubr.f32.gmra.mrb[38].mxu1 %v3007_v12  ;;  %v2855_v21 = vpop.permute.xlu1 %2854 }
 0x32a   : > { %3494 = vmatprep.mubr.f32.mxu1 %v10606_v47  ;;  %v3010_v47 = vsel %vm196_vm0, %v12968_v20, %v2845_v57  ;;  %v2857_v54 = vpop.permute.xlu0 %2856 }
 0x32c   : > { %v10911_v34 = vpop.f32.mrb[74].mxu0 }
 0x32d   : > { %3495 = vmatmul.mubr.f32.gmra.mrb[40].mxu1 %v3008_v58  ;;  %v10913_v16 = vpop.f32.mrb[75].mxu0  ;;  %v12974_v58 = vld [vmem:[#allocation19_spill] sm:$0xff]  ;;  %v2859_v46 = vpop.permute.xlu1 %2858 }
 0x32e   : > { %3499 = vmatprep.mubr.f32.mxu1 %v10623_v33  ;;  %v2861_v20 = vpop.permute.xlu0 %2860 }
 0x331   : > { %3500 = vmatmul.mubr.f32.gmra.mrb[42].mxu1 %v3009_v56  ;;  %v2863_v53 = vpop.permute.xlu1 %2862 }
 0x332   : > { %3504 = vmatprep.mubr.f32.mxu1 %v10640_v6  ;;  %v3012_v6 = vsel %vm196_vm0, %v12970_v30, %v2849_v31  ;;  %v12977_v31 = vld [vmem:[#allocation22_spill] sm:$0xff]  ;;  %v2865_v30 = vpop.permute.xlu0 %2864 }
 0x334   : > { %v10920_v11 = vpop.f32.mrb[76].mxu0 }
 0x335   : > { %3505 = vmatmul.mubr.f32.gmra.mrb[44].mxu1 %v3010_v47  ;;  %v10923_v33 = vpop.f32.mrb[77].mxu0  ;;  %v12976_v47 = vld [vmem:[#allocation21_spill] sm:$0xff] }
 0x336   : > { %3509 = vmatprep.mubr.f32.mxu1 %v10657_v40  ;;  %v12971_v40 = vld [vmem:[#allocation16_spill] sm:$0xff] }
 0x337   : > { %v3013_v62 = vsel %vm196_vm0, %v12971_v40, %v2851_v19  ;;  %v2867_v19 = vpop.permute.xlu1 %2866 }
 0x339   : > { %3510 = vmatmul.mubr.f32.gmra.mrb[46].mxu1 %v3011_v14 }
 0x33a   : > { %3514 = vmatprep.mubr.f32.mxu1 %v10674_v17  ;;  %v3014_v17 = vsel %vm196_vm0, %v12972_v8, %v2853_v26  ;;  %v2869_v8 = vpop.permute.xlu0 %2868 }
 0x33c   : > { %v10930_v28 = vpop.f32.mrb[78].mxu0 }
 0x33d   : > { %3515 = vmatmul.mubr.f32.gmra.mrb[48].mxu1 %v3012_v6  ;;  %v10932_v29 = vpop.f32.mrb[79].mxu0  ;;  %v12978_v6 = vld [vmem:[#allocation23_spill] sm:$0xff] }
 0x33e   : > { %3519 = vmatprep.mubr.f32.mxu1 %v10691_v50  ;;  %v3015_v50 = vsel %vm196_vm0, %v12973_v18, %v2855_v21  ;;  %v2871_v21 = vpop.permute.xlu1 %2870 }
 0x341   : > { %3520 = vmatmul.mubr.f32.gmra.mrb[50].mxu1 %v3013_v62 }
 0x342   : > { %3524 = vmatprep.mubr.f32.mxu1 %v10717_v35  ;;  %v3016_v35 = vsel %vm196_vm0, %v12974_v58, %v2857_v54  ;;  %v2873_v58 = vpop.permute.xlu0 %2872 }
 0x345   : > { %3525 = vmatmul.mubr.f32.gmra.mrb[52].mxu1 %v3014_v17  ;;  %v10941_v49 = vpop.f32.mrb[80].mxu0  ;;  %v12980_v17 = vld [vmem:[#allocation25_spill] sm:$0xff] }
 0x346   : > { %3529 = vmatprep.mubr.f32.mxu1 %v10745_v44  ;;  %v10943_v12 = vpop.f32.mrb[81].mxu0  ;;  %v12975_v44 = vld [vmem:[#allocation20_spill] sm:$0xff] }
 0x347   : > { %v3017_v57 = vsel %vm196_vm0, %v12975_v44, %v2859_v46  ;;  %v2875_v44 = vpop.permute.xlu1 %2874 }
 0x349   : > { %3530 = vmatmul.mubr.f32.gmra.mrb[54].mxu1 %v3015_v50  ;;  %v12981_v50 = vld [vmem:[#allocation26_spill] sm:$0xff] }
 0x34a   : > { %3534 = vmatprep.mubr.f32.mxu1 %v10760_v42  ;;  %v3018_v42 = vsel %vm196_vm0, %v12976_v47, %v2861_v20  ;;  %v3023_v54 = vsel %vm196_vm0, %v12981_v50, %v2871_v21  ;;  %v12983_v20 = vld [vmem:[#allocation28_spill] sm:$0xff] }
 0x34b   : > { %v3025_v47 = vsel %vm196_vm0, %v12983_v20, %v2875_v44  ;;  %v12990_v20 = vld [vmem:[#allocation35_spill] sm:$0xff] }
 0x34c   : > { %v10950_v5 = vpop.f32.mrb[82].mxu0 }
 0x34d   : > { %3535 = vmatmul.mubr.f32.gmra.mrb[56].mxu1 %v3016_v35  ;;  %v10952_v56 = vpop.f32.mrb[83].mxu0  ;;  %v12982_v35 = vld [vmem:[#allocation27_spill] sm:$0xff] }
 0x34e   : > { %3539 = vmatprep.mubr.f32.mxu1 %v10770_v48  ;;  %v3019_v48 = vsel %vm196_vm0, %v12977_v31, %v2863_v53 }
 0x351   : > { %3540 = vmatmul.mubr.f32.gmra.mrb[58].mxu1 %v3017_v57 }
 0x352   : > { %3544 = vmatprep.mubr.f32.mxu1 %v10777_v15  ;;  %v3020_v15 = vsel %vm196_vm0, %v12978_v6, %v2865_v30 }
 0x354   : > { %v10960_v9 = vpop.f32.mrb[84].mxu0 }
 0x355   : > { %3545 = vmatmul.mubr.f32.gmra.mrb[60].mxu1 %v3018_v42  ;;  %v10963_v14 = vpop.f32.mrb[85].mxu0  ;;  %v2879_v42 = vpop.permute.xlu1 %2878 }
 0x356   : > { %3549 = vmatprep.mubr.f32.mxu1 %v10783_v7  ;;  %v12979_v7 = vld [vmem:[#allocation24_spill] sm:$0xff] }
 0x357   : > { %v3021_v26 = vsel %vm196_vm0, %v12979_v7, %v2867_v19  ;;  %v12986_v19 = vld [vmem:[#allocation31_spill] sm:$0xff] }
 0x359   : > { %3550 = vmatmul.mubr.f32.gmra.mrb[62].mxu1 %v3019_v48 }
 0x35a   : > { %3554 = vmatprep.mubr.f32.mxu1 %v10789_v51  ;;  %v3022_v51 = vsel %vm196_vm0, %v12980_v17, %v2869_v8  ;;  %v12987_v8 = vld [vmem:[#allocation32_spill] sm:$0xff] }
 0x35c   : > { %v10971_v40 = vpop.f32.mrb[86].mxu0 }
 0x35d   : > { %3555 = vmatmul.mubr.f32.gmra.mrb[64].mxu1 %v3020_v15  ;;  %v10973_v62 = vpop.f32.mrb[87].mxu0  ;;  %v2883_v15 = vpop.permute.xlu1 %2882 }
 0x35e   : > { %3559 = vmatprep.mubr.f32.mxu1 %v10795_v38  ;;  %v3029_v17 = vsel %vm196_vm0, %v12987_v8, %v2883_v15 }
 0x361   : > { %3560 = vmatmul.mubr.f32.gmra.mrb[66].mxu1 %v3021_v26  ;;  %v2887_v26 = vpop.permute.xlu1 %2886 }
 0x362   : > { %3564 = vmatprep.mubr.f32.mxu1 %v10802_v1  ;;  %v3024_v1 = vsel %vm196_vm0, %v12982_v35, %v2873_v58  ;;  %v12989_v58 = vld [vmem:[#allocation34_spill] sm:$0xff] }
 0x364   : > { %v10981_v18 = vpop.f32.mrb[88].mxu0 }
 0x365   : > { %3565 = vmatmul.mubr.f32.gmra.mrb[68].mxu1 %v3022_v51  ;;  %v10983_v38 = vpop.f32.mrb[89].mxu0  ;;  %v12988_v51 = vld [vmem:[#allocation33_spill] sm:$0xff] }
 0x366   : > { %3569 = vmatprep.mubr.f32.mxu1 %v10809_v39  ;;  %v2877_v39 = vpop.permute.xlu0 %2876 }
 0x369   : > { %3570 = vmatmul.mubr.f32.gmra.mrb[70].mxu1 %v3023_v54 }
 0x36a   : > { %3574 = vmatprep.mubr.f32.mxu1 %v10816_v61  ;;  %v12984_v61 = vld [vmem:[#allocation29_spill] sm:$0xff]  ;;  %v2881_v30 = vpop.permute.xlu0 %2880 }
 0x36b   : > { %v3026_v53 = vsel %vm196_vm0, %v12984_v61, %v2877_v39  ;;  %v3028_v7 = vsel %vm196_vm0, %v12986_v19, %v2881_v30  ;;  %v8092_v61 = vld [vmem:[#allocation2 + $0x188] sm:$0xff] }
 0x36c   : > { %v10990_v46 = vpop.f32.mrb[90].mxu0 }
 0x36d   : > { %3575 = vmatmul.mubr.f32.gmra.mrb[72].mxu1 %v3024_v1  ;;  %v10992_v57 = vpop.f32.mrb[91].mxu0  ;;  %v8091_v1 = vld [vmem:[#allocation2 + $0x180] sm:$0xff] }
 0x36e   : > { %3579 = vmatprep.mubr.f32.mxu1 %v10823_v63  ;;  %v12985_v63 = vld [vmem:[#allocation30_spill] sm:$0xff] }
 0x36f   : > { %v3027_v6 = vsel %vm196_vm0, %v12985_v63, %v2879_v42  ;;  %v12991_v63 = vld [vmem:[#allocation36_spill] sm:$0xff] }
 0x371   : > { %3580 = vmatmul.mubr.f32.gmra.mrb[74].mxu1 %v3025_v47 }
 0x372   : > { %3584 = vmatprep.mubr.f32.mxu1 %v10830_v24  ;;  %v2885_v24 = vpop.permute.xlu0 %2884 }
 0x373   : > { %v3030_v21 = vsel %vm196_vm0, %v12988_v51, %v2885_v24  ;;  %v6343_v51 = vld [vmem:[%s12757_s2 + $0x4a0] sm:$0xff] }
 0x374   : > { %v11000_v31 = vpop.f32.mrb[92].mxu0 }
 0x375   : > { %3585 = vmatmul.mubr.f32.gmra.mrb[76].mxu1 %v3026_v53  ;;  %v11002_v48 = vpop.f32.mrb[93].mxu0 }
 0x376   : > { %3589 = vmatprep.mubr.f32.mxu1 %v10841_v3  ;;  %v7788_v3 = vpop.permute.xlu0 %7787 }
 0x377   : > { %v7789_v50 = vunpack.i.l.bf16 %v7788_v3  ;;  %v7790_v54 = vunpack.i.h.bf16 %v7788_v3 }
 0x379   : > { %3590 = vmatmul.mubr.f32.gmra.mrb[78].mxu1 %v3027_v6  ;;  %v3036_v44 = vsel %vm196_vm0, %v8091_v1, %v7789_v50  ;;  %v3032_v47 = vsel %vm196_vm0, %v12990_v20, %v7790_v54  ;;  %v6346_v54 = vld [vmem:[%s12757_s2 + $0x4b8] sm:$0xff]  ;;  %v6351_v20 = vld [vmem:[%s12757_s2 + $0x4e0] sm:$0xff] }
 0x37a   : > { %3594 = vmatprep.mubr.f32.mxu1 %v10848_v23  ;;  %v7793_v23 = vpop.permute.xlu1 %7792  ;;  %v7798_v39 = vpop.permute.xlu0 %7797 }
 0x37b   : > { %v7794_v35 = vunpack.i.l.bf16 %v7793_v23  ;;  %v7799_v42 = vunpack.i.l.bf16 %v7798_v39  ;;  %v7800_v30 = vunpack.i.h.bf16 %v7798_v39  ;;  %v6350_v39 = vld [vmem:[%s12757_s2 + $0x4d8] sm:$0xff] }
 0x37d   : > { %3595 = vmatmul.mubr.f32.gmra.mrb[80].mxu1 %v3028_v7  ;;  %v3038_v24 = vsel %vm196_vm0, %v10702_v10, %v7799_v42  ;;  %v3034_v7 = vsel %vm196_vm0, %v10726_v2, %v7800_v30  ;;  %v6340_v10 = vld [vmem:[%s12757_s2 + $0x488] sm:$0xff]  ;;  %v6342_v2 = vld [vmem:[%s12757_s2 + $0x498] sm:$0xff]  ;;  %v6355_v30 = vld [vmem:[%s12757_s2 + $0x500] sm:$0xff] }
 0x37e   : > { %3599 = vmatprep.mubr.f32.mxu1 %v10857_v55  ;;  %v3031_v55 = vsel %vm196_vm0, %v12989_v58, %v2887_v26  ;;  %v7803_v53 = vpop.permute.xlu1 %7802 }
 0x37f   : > { %v7804_v15 = vunpack.i.l.bf16 %v7803_v53  ;;  %v7805_v19 = vunpack.i.h.bf16 %v7803_v53 }
 0x381   : > { %3600 = vmatmul.mubr.f32.gmra.mrb[82].mxu1 %v3029_v17  ;;  %v3039_v26 = vsel %vm196_vm0, %v10704_v43, %v7804_v15  ;;  %v3035_v8 = vsel %vm196_vm0, %v10738_v32, %v7805_v19  ;;  %v6339_v17 = vld [vmem:[%s12757_s2 + $0x480] sm:$0xff]  ;;  %v6341_v43 = vld [vmem:[%s12757_s2 + $0x490] sm:$0xff] }
 0x382   : > { %3604 = vmatprep.mubr.f32.mxu1 %v10866_v0  ;;  %v7795_v0 = vunpack.i.h.bf16 %v7793_v23  ;;  %v6989_v3 = vpack.c.bf16 %v6340_v10, %v6339_v17  ;;  %v6992_v32 = vpack.c.bf16 %v6342_v2, %v6341_v43  ;;  %v6345_v23 = vld [vmem:[%s12757_s2 + $0x4b0] sm:$0xff]  ;;  %v6359_v17 = vld [vmem:[%s12757_s2 + $0x520] sm:$0xff]  ;;  %v6360_v10 = vld [vmem:[%s12757_s2 + $0x528] sm:$0xff] }
 0x383   : > { %v6998_v58 = vpack.c.bf16 %v6346_v54, %v6345_v23  ;;  %v6357_v15 = vld [vmem:[%s12757_s2 + $0x510] sm:$0xff] }
 0x384   : > { %v3033_v6 = vsel %vm196_vm0, %v12991_v63, %v7795_v0  ;;  %6990 = vmatpush1.bf16.msra.mxu1 %v6989_v3  ;;  %v6356_v63 = vld [vmem:[%s12757_s2 + $0x508] sm:$0xff]  ;;  %v7019_v3 = vpack.c.bf16 %v6360_v10, %v6359_v17  ;;  %v4052_v10 = vld [vmem:[%s8400_s11] sm:$0xff] }
 0x385   : > { %3605 = vmatmul.mubr.f32.gmra.mrb[84].mxu1 %v3030_v21  ;;  %6991 = vmatprep.subr.bf16.mxu1 %v12890_v25  ;;  %v6344_v21 = vld [vmem:[%s12757_s2 + $0x4a8] sm:$0xff] }
 0x386   : > { %3609 = vmatprep.mubr.f32.mxu1 %v10880_v13  ;;  %v3037_v13 = vsel %vm196_vm0, %v8092_v61, %v7794_v35  ;;  %v6995_v50 = vpack.c.bf16 %v6344_v21, %v6343_v51  ;;  %v6348_v35 = vld [vmem:[%s12757_s2 + $0x4c8] sm:$0xff]  ;;  %v6353_v61 = vld [vmem:[%s12757_s2 + $0x4f0] sm:$0xff] }
 0x387   : > { %v6361_v21 = vld [vmem:[%s12757_s2 + $0x530] sm:$0xff] }
 0x388   : > { %6993 = vmatpush1.bf16.msra.mxu1 %v6992_v32 }
 0x389   : > { %3610 = vmatmul.mubr.f32.gmra.mrb[86].mxu1 %v3031_v55  ;;  %6994 = vmatprep.subr.bf16.mxu1 %v12890_v25  ;;  %v6347_v55 = vld [vmem:[%s12757_s2 + $0x4c0] sm:$0xff] }
 0x38a   : > { %3614 = vmatprep.mubr.f32.mxu1 %v3036_v44  ;;  %v7001_v1 = vpack.c.bf16 %v6348_v35, %v6347_v55  ;;  %v6349_v44 = vld [vmem:[%s12757_s2 + $0x4d0] sm:$0xff] }
 0x38b   : > { %v7004_v0 = vpack.c.bf16 %v6350_v39, %v6349_v44 }
 0x38c   : > { %6996 = vmatpush1.bf16.msra.mxu1 %v6995_v50  ;;  %v6362_v50 = vld [vmem:[%s12757_s2 + $0x538] sm:$0xff] }
 0x38d   : > { %3615 = vmatmul.mubr.f32.gmra.mrb[88].mxu1 %v3032_v47  ;;  %6997 = vmatprep.subr.bf16.mxu1 %v12890_v25  ;;  %v6352_v47 = vld [vmem:[%s12757_s2 + $0x4e8] sm:$0xff]  ;;  %v7022_v54 = vpack.c.bf16 %v6362_v50, %v6361_v21 }
 0x38e   : > { %3619 = vmatprep.mubr.f32.mxu1 %v3037_v13  ;;  %v7007_v42 = vpack.c.bf16 %v6352_v47, %v6351_v20  ;;  %v6354_v13 = vld [vmem:[%s12757_s2 + $0x4f8] sm:$0xff]  ;;  %v6372_v47 = vld [vmem:[%s12757_s2 + $0x588] sm:$0xff] }
 0x38f   : > { %v7010_v53 = vpack.c.bf16 %v6354_v13, %v6353_v61  ;;  %v6365_v61 = vld [vmem:[%s12757_s2 + $0x550] sm:$0xff]  ;;  %v6366_v13 = vld [vmem:[%s12757_s2 + $0x558] sm:$0xff]  ;;  %v6368_v21 = vld [vmem:[%s12757_s2 + $0x568] sm:$0xff] }
 0x390   : > { %6999 = vmatpush1.bf16.msra.mxu1 %v6998_v58 }
 0x391   : > { %3620 = vmatmul.mubr.f32.gmra.mrb[90].mxu1 %v3033_v6  ;;  %7000 = vmatprep.subr.bf16.mxu1 %v12890_v25  ;;  %v7013_v6 = vpack.c.bf16 %v6356_v63, %v6355_v30 }
 0x392   : > { %3624 = vmatprep.mubr.f32.mxu1 %v3038_v24  ;;  %v6358_v24 = vld [vmem:[%s12757_s2 + $0x518] sm:$0xff] }
 0x393   : > { %v7016_v19 = vpack.c.bf16 %v6358_v24, %v6357_v15  ;;  %v8093_v15 = vld [vmem:[#allocation3] sm:$0xff] }
 0x394   : > { %7002 = vmatpush1.bf16.msra.mxu1 %v7001_v1  ;;  %v6364_v1 = vld [vmem:[%s12757_s2 + $0x548] sm:$0xff]  ;;  %v3988_v24 = vmul.f32 -1.0, %v8093_v15  ;;  %v8095_v15 = vld [vmem:[#allocation3 + $0x10] sm:$0xff] }
 0x395   : > { %3625 = vmatmul.mubr.f32.gmra.mrb[92].mxu1 %v3034_v7  ;;  %7003 = vmatprep.subr.bf16.mxu1 %v12890_v25 }
 0x396   : > { %3629 = vmatprep.mubr.f32.mxu1 %v3039_v26 }
 0x398   : > { %7005 = vmatpush1.bf16.msra.mxu1 %v7004_v0 }
 0x399   : > { %3630 = vmatmul.mubr.f32.gmra.mrb[94].mxu1 %v3035_v8  ;;  %7006 = vmatprep.subr.bf16.mxu1 %v12890_v25  ;;  %v11110_v8 = vld [vmem:[%s12758_s3 + $0x1] ss:$0 sm:$0xff] }
 0x39c   : > { %7008 = vmatpush1.bf16.msra.mxu1 %v7007_v42 }
 0x39d   : > { %7009 = vmatprep.subr.bf16.mxu1 %v12890_v25 }
 0x3a0   : > { %7011 = vmatpush1.bf16.msra.mxu1 %v7010_v53 }
 0x3a1   : > { %7012 = vmatprep.subr.bf16.mxu1 %v12890_v25 }
 0x3a4   : > { %7014 = vmatpush1.bf16.msra.mxu1 %v7013_v6  ;;  %v7028_v6 = vpack.c.bf16 %v6366_v13, %v6365_v61 }
 0x3a5   : > { %7015 = vmatprep.subr.bf16.mxu1 %v12890_v25 }
 0x3a8   : > { %7017 = vmatpush1.bf16.msra.mxu1 %v7016_v19 }
 0x3a9   : > { %7018 = vmatprep.subr.bf16.mxu1 %v12890_v25 }
 0x3ac   : > { %7020 = vmatpush1.bf16.msra.mxu1 %v7019_v3  ;;  %v6373_v3 = vld [vmem:[%s12757_s2 + $0x590] sm:$0xff] }
 0x3ad   : > { %7021 = vmatprep.subr.bf16.mxu1 %v12890_v25 }
 0x3b0   : > { %7023 = vmatpush1.bf16.msra.mxu1 %v7022_v54 }
 0x3b1   : > { %7024 = vmatprep.subr.bf16.mxu1 %v12890_v25 }
 0x3e8   : > { %v11103_v7 = vpop.f32.mrb[94].mxu0 }
 0x3e9   : > { %v11105_v26 = vpop.f32.mrb[95].mxu0 }
 0x3f0   : > { %v3476_v43 = vpop.f32.mrb[32].mxu1 }
 0x3f1   : > { %v7164_v2 = vadd.f32 %v11110_v8, %v3476_v43  ;;  %v3478_v32 = vpop.f32.mrb[33].mxu1  ;;  %v6374_v43 = vld [vmem:[%s12757_s2 + $0x598] sm:$0xff] }
 0x3f2   : > { %v11174_v50 = vpack.c.bf16 %v6374_v43, %v6373_v3  ;;  %v6378_v3 = vld [vmem:[%s12757_s2 + $0x5b8] sm:$0xff] }
 0x3f3   : > { %v3702_v51 = vadd.f32 %v7164_v2, %v10835_v36  ;;  %v6363_v36 = vld [vmem:[%s12757_s2 + $0x540] sm:$0xff] }
 0x3f4   : > { %v3481_v23 = vpop.f32.mrb[34].mxu1  ;;  %v7025_v39 = vpack.c.bf16 %v6364_v1, %v6363_v36 }
 0x3f5   : > { %3860 = vst.msk [vmem:[#allocation4] sm:$0xff] %vm196_vm0, %v3702_v51  ;;  %v7165_v58 = vadd.f32 %v11110_v8, %v3481_v23  ;;  %v3483_v55 = vpop.f32.mrb[35].mxu1  ;;  %v6367_v51 = vld [vmem:[%s12757_s2 + $0x560] sm:$0xff] }
 0x3f6   : > { %7026 = vmatpush1.bf16.msra.mxu1 %v7025_v39  ;;  %v11179_v23 = vld [vmem:[%s12756_s1 + $0x2] ss:$0 sm:$0xff]  ;;  %v8094_v55 = vld [vmem:[#allocation3 + $0x8] sm:$0xff] }
 0x3f7   : > { %v3707_v35 = vadd.f32 %v7165_v58, %v10832_v45  ;;  %v6371_v45 = vld [vmem:[%s12757_s2 + $0x580] sm:$0xff]  ;;  %7027 = vmatprep.subr.bf16.mxu1 %v12890_v25 }
 0x3f8   : > { %v3486_v44 = vpop.f32.mrb[36].mxu1  ;;  %v11153_v53 = vpack.c.bf16 %v6372_v47, %v6371_v45  ;;  %v6370_v45 = vld [vmem:[%s12757_s2 + $0x578] sm:$0xff]  ;;  %v6375_v47 = vld [vmem:[%s12757_s2 + $0x5a0] sm:$0xff] }
 0x3f9   : > { %3861 = vst.msk [vmem:[#allocation4 + $0x8] sm:$0xff] %vm196_vm0, %v3707_v35  ;;  %v7166_v0 = vadd.f32 %v11110_v8, %v3486_v44  ;;  %v3488_v20 = vpop.f32.mrb[37].mxu1  ;;  %v3989_v35 = vmul.f32 -1.0, %v8094_v55  ;;  %v4053_v44 = vld [vmem:[%s8400_s11 + $0x8] sm:$0xff] }
 0x3fa   : > { %7038 = vmatpush1.bf16.msra.mxu0 %v11153_v53  ;;  %7029 = vmatpush1.bf16.msra.mxu1 %v7028_v6  ;;  %v6369_v20 = vld [vmem:[%s12757_s2 + $0x570] sm:$0xff]  ;;  %v6376_v6 = vld [vmem:[%s12757_s2 + $0x5a8] sm:$0xff] }
 0x3fb   : > { %v3712_v42 = vadd.f32 %v7166_v0, %v10859_v4  ;;  %7039 = vmatprep.subr.bf16.mxu0 %v12890_v25  ;;  %7030 = vmatprep.subr.bf16.mxu1 %v12890_v25 }
 0x3fc   : > { %v3892_v30 = vld [vmem:[#allocation4] sm:$0xff]  ;;  %v3491_v63 = vpop.f32.mrb[38].mxu1 }
 0x3fd   : > { %v3924_v19 = vmul.f32 2.0, %v3892_v30  ;;  %3862 = vst.msk [vmem:[#allocation4 + $0x10] sm:$0xff] %vm196_vm0, %v3712_v42  ;;  %v7167_v4 = vadd.f32 %v11110_v8, %v3491_v63  ;;  %v3493_v17 = vpop.f32.mrb[39].mxu1  ;;  %v4252_v30 = vld [vmem:[#allocation2] sm:$0xff]  ;;  %v11197_v63 = vld [vmem:[#allocation2 + $0x8] sm:$0xff] }
 0x3fe   : > { %7041 = vmatpush1.bf16.msra.mxu0 %v11174_v50  ;;  %v7034_v17 = vpack.c.bf16 %v6370_v45, %v6369_v20 }
 0x3ff   : > { %v4020_v2 = vadd.f32 %v3988_v24, %v3924_v19  ;;  %v3717_v32 = vadd.f32 %v7167_v4, %v10853_v27  ;;  %v7031_v27 = vpack.c.bf16 %v6368_v21, %v6367_v51  ;;  %7042 = vmatprep.subr.bf16.mxu0 %v12890_v25  ;;  %v3990_v24 = vmul.f32 -1.0, %v8095_v15  ;;  %v6379_v15 = vld [vmem:[%s12757_s2 + $0x5c0] sm:$0xff] }
 0x400   : > { %v3893_v54 = vld [vmem:[#allocation4 + $0x8] sm:$0xff]  ;;  %v3496_v58 = vpop.f32.mrb[40].mxu1 }
 0x401   : > { %v4084_v36 = vadd.f32 %v4052_v10, %v4020_v2  ;;  %v3925_v1 = vmul.f32 2.0, %v3893_v54  ;;  %3863 = vst.msk [vmem:[#allocation4 + $0x18] sm:$0xff] %vm196_vm0, %v3717_v32  ;;  %v7168_v39 = vadd.f32 %v11110_v8, %v3496_v58  ;;  %v3498_v0 = vpop.f32.mrb[41].mxu1  ;;  %7032 = vmatpush1.bf16.msra.mxu1 %v7031_v27  ;;  %v11203_v10 = vpack.c.bf16 %v6376_v6, %v6375_v47  ;;  %v4054_v54 = vld [vmem:[%s8400_s11 + $0x10] sm:$0xff] }
 0x402   : > { %7033 = vmatprep.subr.bf16.mxu1 %v12890_v25  ;;  %v4354_v58 = vrot.slane %v4252_v30, 1  ;;  %v4355_v27 = vrot.slane %v11197_v63, 1 }
 0x403   : > { %vm4118_vm14 = vcmp.gt.f32.partialorder %v4084_v36, 0.0  ;;  %v4156_v42 = vmul.f32 %v11179_v23, %v4084_v36  ;;  %v4021_v61 = vadd.f32 %v3989_v35, %v3925_v1  ;;  %v3722_v13 = vadd.f32 %v7168_v39, %v10875_v22  ;;  %v6377_v22 = vld [vmem:[%s12757_s2 + $0x5b0] sm:$0xff]  ;;  %7044 = vmatpush1.bf16.msra.mxu0 %v11203_v10  ;;  %v8096_v39 = vld [vmem:[#allocation3 + $0x18] sm:$0xff] }
 0x404   : > { %v3894_v19 = vld [vmem:[#allocation4 + $0x10] sm:$0xff]  ;;  %v3501_v4 = vpop.f32.mrb[42].mxu1  ;;  %v11218_v55 = vpack.c.bf16 %v6378_v3, %v6377_v22  ;;  %7045 = vmatprep.subr.bf16.mxu0 %v12890_v25  ;;  %v3991_v0 = vmul.f32 -1.0, %v8096_v39  ;;  %v4356_v63 = vsel %vm522_vm2, %v4354_v58, %v4355_v27  ;;  %v8097_v22 = vld [vmem:[#allocation3 + $0x20] sm:$0xff] }
 0x405   : > { %v4188_v43 = vsel %vm4118_vm14, %v4084_v36, %v4156_v42  ;;  %v4085_v2 = vadd.f32 %v4053_v44, %v4021_v61  ;;  %v3926_v32 = vmul.f32 2.0, %v3894_v19  ;;  %3864 = vst.msk [vmem:[#allocation4 + $0x20] sm:$0xff] %vm196_vm0, %v3722_v13  ;;  %v7169_v51 = vadd.f32 %v11110_v8, %v3501_v4  ;;  %v3503_v21 = vpop.f32.mrb[43].mxu1  ;;  %7035 = vmatpush1.bf16.msra.mxu1 %v7034_v17  ;;  %v4254_v44 = vld [vmem:[#allocation2 + $0x10] sm:$0x3] }
 0x406   : > { %4220 = vst.msk [vmem:[#allocation2 + $0x19] sm:$0xff] %vm196_vm0, %v4188_v43  ;;  %7100 = vmatprep.subr.bf16.mxu1 %v12890_v25  ;;  %v4357_v6 = vrot.slane %v4254_v44, 1  ;;  %v3992_v3 = vmul.f32 -1.0, %v8097_v22  ;;  %v6382_v21 = vld [vmem:[%s12757_s2 + $0x5d8] sm:$0xff]  ;;  %v4056_v44 = vld [vmem:[%s8400_s11 + $0x20] sm:$0xff] }
 0x407   : > { %vm4119_vm15 = vcmp.gt.f32.partialorder %v4085_v2, 0.0  ;;  %v4157_v35 = vmul.f32 %v11179_v23, %v4085_v2  ;;  %v4022_v36 = vadd.f32 %v3990_v24, %v3926_v32  ;;  %v3727_v1 = vadd.f32 %v7169_v51, %v10868_v52  ;;  %v4055_v52 = vld [vmem:[%s8400_s11 + $0x18] sm:$0xff]  ;;  %7047 = vmatpush1.bf16.msra.mxu0 %v11218_v55  ;;  %v6380_v24 = vld [vmem:[%s12757_s2 + $0x5c8] sm:$0xff]  ;;  %v6381_v51 = vld [vmem:[%s12757_s2 + $0x5d0] sm:$0xff] }
 0x408   : > { %v3895_v20 = vld [vmem:[#allocation4 + $0x18] sm:$0xff]  ;;  %v3506_v45 = vpop.f32.mrb[44].mxu1  ;;  %7048 = vmatprep.subr.bf16.mxu0 %v12890_v25  ;;  %v11239_v32 = vpack.c.bf16 %v6380_v24, %v6379_v15 }
 0x409   : > { %v4189_v47 = vsel %vm4119_vm15, %v4085_v2, %v4157_v35  ;;  %v4086_v42 = vadd.f32 %v4054_v54, %v4022_v36  ;;  %v3927_v61 = vmul.f32 2.0, %v3895_v20  ;;  %3865 = vst.msk [vmem:[#allocation4 + $0x28] sm:$0xff] %vm196_vm0, %v3727_v1  ;;  %v7170_v13 = vadd.f32 %v11110_v8, %v3506_v45  ;;  %v3508_v30 = vpop.f32.mrb[45].mxu1 }
 0x40a   : > { %4221 = vst.msk [vmem:[#allocation2 + $0x21] sm:$0xff] %vm196_vm0, %v4189_v47  ;;  %v11256_v20 = vpack.c.bf16 %v6382_v21, %v6381_v51  ;;  %v8099_v21 = vld [vmem:[#allocation3 + $0x30] sm:$0xff] }
 0x40b   : > { %vm4120_vm1 = vcmp.gt.f32.partialorder %v4086_v42, 0.0  ;;  %v4158_v19 = vmul.f32 %v11179_v23, %v4086_v42  ;;  %v4023_v4 = vadd.f32 %v3991_v0, %v3927_v61  ;;  %v3732_v17 = vadd.f32 %v7170_v13, %v10893_v59  ;;  %7050 = vmatpush1.bf16.msra.mxu0 %v11239_v32  ;;  %v8098_v61 = vld [vmem:[#allocation3 + $0x28] sm:$0xff] }
 0x40c   : > { %v3896_v43 = vld [vmem:[#allocation4 + $0x20] sm:$0xff]  ;;  %v3511_v2 = vpop.f32.mrb[46].mxu1  ;;  %v4358_v0 = vsel %vm522_vm2, %v4355_v27, %v4357_v6  ;;  %12992 = vst [vmem:[#allocation8_spill] sm:$0xff] %v11256_v20  ;;  %7051 = vmatprep.subr.bf16.mxu0 %v12890_v25  ;;  %v3993_v13 = vmul.f32 -1.0, %v8098_v61  ;;  %v6384_v61 = vld [vmem:[%s12757_s2 + $0x5e8] sm:$0xff] }
 0x40d   : > { %v4190_v54 = vsel %vm4120_vm1, %v4086_v42, %v4158_v19  ;;  %v4087_v58 = vadd.f32 %v4055_v52, %v4023_v4  ;;  %v3928_v59 = vmul.f32 2.0, %v3896_v43  ;;  %3866 = vst.msk [vmem:[#allocation4 + $0x30] sm:$0xff] %vm196_vm0, %v3732_v17  ;;  %v7171_v35 = vadd.f32 %v11110_v8, %v3511_v2  ;;  %v3513_v36 = vpop.f32.mrb[47].mxu1  ;;  %v11249_v1 = vld [vmem:[#allocation2 + $0x18] sm:$0xff]  ;;  %v4057_v4 = vld [vmem:[%s8400_s11 + $0x28] sm:$0xff] }
 0x40e   : > { %4222 = vst.msk [vmem:[#allocation2 + $0x31] sm:$0xff] %vm196_vm0, %v4190_v54  ;;  %v7806_v39 = vpack.i.bf16 %v4356_v63, %v11249_v1  ;;  %v4359_v22 = vrot.slane %v11249_v1, 1  ;;  %v3994_v54 = vmul.f32 -1.0, %v8099_v21 }
 0x40f   : > { %vm4121_vm3 = vcmp.gt.f32.partialorder %v4087_v58, 0.0  ;;  %v4159_v45 = vmul.f32 %v11179_v23, %v4087_v58  ;;  %v4024_v47 = vadd.f32 %v3992_v3, %v3928_v59  ;;  %v3737_v42 = vadd.f32 %v7171_v35, %v10890_v41  ;;  %7053 = vmatpush1.bf16.msra.mxu0 %v11256_v20 }
 0x410   : > { %v3897_v30 = vld [vmem:[#allocation4 + $0x28] sm:$0xff]  ;;  %v3516_v52 = vpop.f32.mrb[48].mxu1  ;;  %7807 = vrot.lane.b32.xlu0 %v7806_v39, %s8218_s20  ;;  %7054 = vmatprep.subr.bf16.mxu0 %v12890_v25 }
 0x411   : > { %v4191_v27 = vsel %vm4121_vm3, %v4087_v58, %v4159_v45  ;;  %v4088_v63 = vadd.f32 %v4056_v44, %v4024_v47  ;;  %v3929_v6 = vmul.f32 2.0, %v3897_v30  ;;  %3867 = vst.msk [vmem:[#allocation4 + $0x38] sm:$0xff] %vm196_vm0, %v3737_v42  ;;  %v7172_v15 = vadd.f32 %v11110_v8, %v3516_v52  ;;  %v3518_v24 = vpop.f32.mrb[49].mxu1  ;;  %v11264_v19 = vld [vmem:[#allocation2 + $0x20] sm:$0xff]  ;;  %v11266_v41 = vld [vmem:[#allocation2 + $0x28] sm:$0x3] }
 0x412   : > { %4223 = vst.msk [vmem:[#allocation2 + $0x39] sm:$0xff] %vm196_vm0, %v4191_v27  ;;  %v7811_v17 = vpack.i.bf16 %v4358_v0, %v11264_v19  ;;  %v4360_v3 = vrot.slane %v11264_v19, 1  ;;  %v4362_v36 = vrot.slane %v11266_v41, 1  ;;  %v6383_v42 = vld [vmem:[%s12757_s2 + $0x5e0] sm:$0xff]  ;;  %v8100_v24 = vld [vmem:[#allocation3 + $0x38] sm:$0xff] }
 0x413   : > { %vm4122_vm4 = vcmp.gt.f32.partialorder %v4088_v63, 0.0  ;;  %v4160_v43 = vmul.f32 %v11179_v23, %v4088_v63  ;;  %v4025_v2 = vadd.f32 %v3993_v13, %v3929_v6  ;;  %v3742_v51 = vadd.f32 %v7172_v15, %v10903_v37  ;;  %v4058_v13 = vld [vmem:[%s8400_s11 + $0x30] sm:$0xff]  ;;  %v6386_v15 = vld [vmem:[%s12757_s2 + $0x5f8] sm:$0xff] }
 0x414   : > { %v3898_v58 = vld [vmem:[#allocation4 + $0x30] sm:$0xff]  ;;  %v3521_v59 = vpop.f32.mrb[50].mxu1  ;;  %7812 = vrot.lane.b32.xlu1 %v7811_v17, %s8218_s20  ;;  %v11279_v35 = vsel %vm522_vm2, %v4359_v22, %v4360_v3  ;;  %v6385_v6 = vld [vmem:[%s12757_s2 + $0x5f0] sm:$0xff] }
 0x415   : > { %12993 = vst [vmem:[#allocation9_spill] sm:$0xff] %v11279_v35  ;;  %v4192_v44 = vsel %vm4122_vm4, %v4088_v63, %v4160_v43  ;;  %v4089_v39 = vadd.f32 %v4057_v4, %v4025_v2  ;;  %v3930_v0 = vmul.f32 2.0, %v3898_v58  ;;  %3868 = vst.msk [vmem:[#allocation4 + $0x40] sm:$0xff] %vm196_vm0, %v3742_v51  ;;  %v7173_v37 = vadd.f32 %v11110_v8, %v3521_v59  ;;  %v3523_v45 = vpop.f32.mrb[51].mxu1  ;;  %v11284_v47 = vld [vmem:[#allocation2 + $0x30] sm:$0xff] }
 0x416   : > { %4224 = vst.msk [vmem:[#allocation2 + $0x49] sm:$0xff] %vm196_vm0, %v4192_v44  ;;  %v7816_v30 = vpack.i.bf16 %v11279_v35, %v11284_v47  ;;  %v3995_v4 = vmul.f32 -1.0, %v8100_v24  ;;  %v11306_v43 = vsel %vm522_vm2, %v4360_v3, %v4362_v36  ;;  %v11308_v2 = vpack.c.bf16 %v6384_v61, %v6383_v42 }
 0x417   : > { %vm4123_vm5 = vcmp.gt.f32.partialorder %v4089_v39, 0.0  ;;  %v4161_v52 = vmul.f32 %v11179_v23, %v4089_v39  ;;  %v4026_v27 = vadd.f32 %v3994_v54, %v3930_v0  ;;  %v3747_v63 = vadd.f32 %v7173_v37, %v10901_v60  ;;  %12994 = vst [vmem:[#allocation10_spill] sm:$0xff] %v11306_v43  ;;  %v4059_v0 = vld [vmem:[%s8400_s11 + $0x38] sm:$0xff] }
 0x418   : > { %v3899_v17 = vld [vmem:[#allocation4 + $0x38] sm:$0xff]  ;;  %v3526_v22 = vpop.f32.mrb[52].mxu1  ;;  %7817 = vrot.lane.b32.xlu0 %v7816_v30, %s8218_s20  ;;  %12995 = vst [vmem:[#allocation11_spill] sm:$0xff] %v11308_v2  ;;  %v4364_v36 = vrot.slane %v11284_v47, 1  ;;  %7056 = vmatpush1.bf16.msra.mxu0 %v11308_v2  ;;  %v11323_v37 = vpack.c.bf16 %v6386_v15, %v6385_v6 }
 0x419   : > { %v4193_v60 = vsel %vm4123_vm5, %v4089_v39, %v4161_v52  ;;  %v4090_v51 = vadd.f32 %v4058_v13, %v4026_v27  ;;  %v3931_v21 = vmul.f32 2.0, %v3899_v17  ;;  %3869 = vst.msk [vmem:[#allocation4 + $0x48] sm:$0xff] %vm196_vm0, %v3747_v63  ;;  %v7174_v54 = vadd.f32 %v11110_v8, %v3526_v22  ;;  %v3528_v58 = vpop.f32.mrb[53].mxu1  ;;  %v11312_v59 = vld [vmem:[#allocation2 + $0x38] sm:$0xff]  ;;  %v11314_v44 = vld [vmem:[#allocation2 + $0x40] sm:$0x3]  ;;  %7057 = vmatprep.subr.bf16.mxu0 %v12890_v25 }
 0x41a   : > { %4225 = vst.msk [vmem:[#allocation2 + $0x51] sm:$0xff] %vm196_vm0, %v4193_v60  ;;  %v7821_v3 = vpack.i.bf16 %v11306_v43, %v11312_v59  ;;  %v4365_v39 = vrot.slane %v11312_v59, 1  ;;  %12996 = vst [vmem:[#allocation12_spill] sm:$0xff] %v11323_v37  ;;  %v8101_v13 = vld [vmem:[#allocation3 + $0x40] sm:$0xff]  ;;  %v4367_v6 = vrot.slane %v11314_v44, 1  ;;  %v6387_v60 = vld [vmem:[%s12757_s2 + $0x600] sm:$0xff] }
 0x41b   : > { %vm4124_vm6 = vcmp.gt.f32.partialorder %v4090_v51, 0.0  ;;  %v4162_v45 = vmul.f32 %v11179_v23, %v4090_v51  ;;  %v4027_v42 = vadd.f32 %v3995_v4, %v3931_v21  ;;  %v3752_v61 = vadd.f32 %v7174_v54, %v10913_v16  ;;  %v6388_v21 = vld [vmem:[%s12757_s2 + $0x608] sm:$0xff] }
 0x41c   : > { %v3996_v30 = vmul.f32 -1.0, %v8101_v13  ;;  %v3900_v52 = vld [vmem:[#allocation4 + $0x40] sm:$0xff]  ;;  %v3531_v27 = vpop.f32.mrb[54].mxu1  ;;  %7822 = vrot.lane.b32.xlu1 %v7821_v3, %s8218_s20  ;;  %v11330_v63 = vsel %vm522_vm2, %v4364_v36, %v4365_v39  ;;  %7059 = vmatpush1.bf16.msra.mxu0 %v11323_v37 }
 0x41d   : > { %12997 = vst [vmem:[#allocation13_spill] sm:$0xff] %v11330_v63  ;;  %v4194_v15 = vsel %vm4124_vm6, %v4090_v51, %v4162_v45  ;;  %v4091_v24 = vadd.f32 %v4059_v0, %v4027_v42  ;;  %v3932_v17 = vmul.f32 2.0, %v3900_v52  ;;  %3870 = vst.msk [vmem:[#allocation4 + $0x50] sm:$0xff] %vm196_vm0, %v3752_v61  ;;  %v7175_v16 = vadd.f32 %v11110_v8, %v3531_v27  ;;  %v3533_v4 = vpop.f32.mrb[55].mxu1  ;;  %v11335_v22 = vld [vmem:[#allocation2 + $0x48] sm:$0xff]  ;;  %v4060_v51 = vld [vmem:[%s8400_s11 + $0x40] sm:$0xff] }
 0x41e   : > { %4226 = vst.msk [vmem:[#allocation2 + $0x61] sm:$0xff] %vm196_vm0, %v4194_v15  ;;  %v7826_v54 = vpack.i.bf16 %v11330_v63, %v11335_v22  ;;  %7060 = vmatprep.subr.bf16.mxu0 %v12890_v25  ;;  %v6389_v36 = vld [vmem:[%s12757_s2 + $0x610] sm:$0xff]  ;;  %v6390_v45 = vld [vmem:[%s12757_s2 + $0x618] sm:$0xff] }
 0x41f   : > { %vm4125_vm8 = vcmp.gt.f32.partialorder %v4091_v24, 0.0  ;;  %v4163_v58 = vmul.f32 %v11179_v23, %v4091_v24  ;;  %v4028_v0 = vadd.f32 %v3996_v30, %v3932_v17  ;;  %v3757_v3 = vadd.f32 %v7175_v16, %v10911_v34  ;;  %v8102_v42 = vld [vmem:[#allocation3 + $0x48] sm:$0xff] }
 0x420   : > { %v3997_v61 = vmul.f32 -1.0, %v8102_v42  ;;  %v3901_v13 = vld [vmem:[#allocation4 + $0x48] sm:$0xff]  ;;  %v3536_v52 = vpop.f32.mrb[56].mxu1  ;;  %7827 = vrot.lane.b32.xlu0 %v7826_v54, %s8218_s20  ;;  %v11359_v30 = vsel %vm522_vm2, %v4365_v39, %v4367_v6  ;;  %v11361_v34 = vpack.c.bf16 %v6388_v21, %v6387_v60  ;;  %v4061_v54 = vld [vmem:[%s8400_s11 + $0x48] sm:$0xff]  ;;  %v4369_v6 = vrot.slane %v11335_v22, 1 }
 0x421   : > { %12998 = vst [vmem:[#allocation14_spill] sm:$0xff] %v11359_v30  ;;  %v4195_v27 = vsel %vm4125_vm8, %v4091_v24, %v4163_v58  ;;  %v4092_v15 = vadd.f32 %v4060_v51, %v4028_v0  ;;  %v3933_v17 = vmul.f32 2.0, %v3901_v13  ;;  %3871 = vst.msk [vmem:[#allocation4 + $0x58] sm:$0xff] %vm196_vm0, %v3757_v3  ;;  %v7176_v16 = vadd.f32 %v11110_v8, %v3536_v52  ;;  %v3538_v4 = vpop.f32.mrb[57].mxu1  ;;  %v11365_v63 = vld [vmem:[#allocation2 + $0x50] sm:$0xff]  ;;  %v8103_v0 = vld [vmem:[#allocation3 + $0x50] sm:$0xff] }
 0x422   : > { %12999 = vst [vmem:[#allocation15_spill] sm:$0xff] %v11361_v34  ;;  %v11367_v42 = vld [vmem:[#allocation2 + $0x58] sm:$0x3]  ;;  %4227 = vst.msk [vmem:[#allocation2 + $0x69] sm:$0xff] %vm196_vm0, %v4195_v27  ;;  %v7831_v39 = vpack.i.bf16 %v11359_v30, %v11365_v63  ;;  %v4370_v24 = vrot.slane %v11365_v63, 1  ;;  %7062 = vmatpush1.bf16.msra.mxu0 %v11361_v34  ;;  %v11376_v60 = vpack.c.bf16 %v6390_v45, %v6389_v36  ;;  %v3998_v3 = vmul.f32 -1.0, %v8103_v0 }
 0x423   : > { %vm4126_vm9 = vcmp.gt.f32.partialorder %v4092_v15, 0.0  ;;  %v4164_v21 = vmul.f32 %v11179_v23, %v4092_v15  ;;  %v4029_v51 = vadd.f32 %v3997_v61, %v3933_v17  ;;  %v3762_v58 = vadd.f32 %v7176_v16, %v10923_v33  ;;  %7063 = vmatprep.subr.bf16.mxu0 %v12890_v25  ;;  %v6391_v16 = vld [vmem:[%s12757_s2 + $0x620] sm:$0xff]  ;;  %v6394_v0 = vld [vmem:[%s12757_s2 + $0x638] sm:$0xff] }
 0x424   : > { %13000 = vst [vmem:[#allocation16_spill] sm:$0xff] %v11376_v60  ;;  %v3902_v13 = vld [vmem:[#allocation4 + $0x50] sm:$0xff]  ;;  %v3541_v52 = vpop.f32.mrb[58].mxu1  ;;  %7832 = vrot.lane.b32.xlu1 %v7831_v39, %s8218_s20  ;;  %v11383_v27 = vsel %vm522_vm2, %v4369_v6, %v4370_v24  ;;  %v4372_v36 = vrot.slane %v11367_v42, 1  ;;  %v6392_v39 = vld [vmem:[%s12757_s2 + $0x628] sm:$0xff] }
 0x425   : > { %13001 = vst [vmem:[#allocation17_spill] sm:$0xff] %v11383_v27  ;;  %v4196_v45 = vsel %vm4126_vm9, %v4092_v15, %v4164_v21  ;;  %v4093_v4 = vadd.f32 %v4061_v54, %v4029_v51  ;;  %v3934_v30 = vmul.f32 2.0, %v3902_v13  ;;  %3872 = vst.msk [vmem:[#allocation4 + $0x60] sm:$0xff] %vm196_vm0, %v3762_v58  ;;  %v7177_v33 = vadd.f32 %v11110_v8, %v3541_v52  ;;  %v3543_v61 = vpop.f32.mrb[59].mxu1  ;;  %v11388_v17 = vld [vmem:[#allocation2 + $0x60] sm:$0xff]  ;;  %v4062_v15 = vld [vmem:[%s8400_s11 + $0x50] sm:$0xff] }
 0x426   : > { %4228 = vst.msk [vmem:[#allocation2 + $0x79] sm:$0xff] %vm196_vm0, %v4196_v45  ;;  %v7836_v54 = vpack.i.bf16 %v11383_v27, %v11388_v17  ;;  %7065 = vmatpush1.bf16.msra.mxu0 %v11376_v60  ;;  %v6393_v58 = vld [vmem:[%s12757_s2 + $0x630] sm:$0xff]  ;;  %v8104_v13 = vld [vmem:[#allocation3 + $0x58] sm:$0xff] }
 0x427   : > { %vm4127_vm10 = vcmp.gt.f32.partialorder %v4093_v4, 0.0  ;;  %v4165_v6 = vmul.f32 %v11179_v23, %v4093_v4  ;;  %v4030_v21 = vadd.f32 %v3998_v3, %v3934_v30  ;;  %v3767_v51 = vadd.f32 %v7177_v33, %v10920_v11  ;;  %7066 = vmatprep.subr.bf16.mxu0 %v12890_v25 }
 0x428   : > { %v3999_v52 = vmul.f32 -1.0, %v8104_v13  ;;  %v3903_v45 = vld [vmem:[#allocation4 + $0x58] sm:$0xff]  ;;  %v3546_v61 = vpop.f32.mrb[60].mxu1  ;;  %7837 = vrot.lane.b32.xlu0 %v7836_v54, %s8218_s20  ;;  %v11412_v30 = vsel %vm522_vm2, %v4370_v24, %v4372_v36  ;;  %v11414_v11 = vpack.c.bf16 %v6392_v39, %v6391_v16  ;;  %v4063_v54 = vld [vmem:[%s8400_s11 + $0x58] sm:$0xff]  ;;  %v4374_v36 = vrot.slane %v11388_v17, 1 }
 0x429   : > { %13002 = vst [vmem:[#allocation18_spill] sm:$0xff] %v11412_v30  ;;  %v4197_v3 = vsel %vm4127_vm10, %v4093_v4, %v4165_v6  ;;  %v4094_v33 = vadd.f32 %v4062_v15, %v4030_v21  ;;  %v3935_v27 = vmul.f32 2.0, %v3903_v45  ;;  %3873 = vst.msk [vmem:[#allocation4 + $0x68] sm:$0xff] %vm196_vm0, %v3767_v51  ;;  %v7178_v43 = vadd.f32 %v11110_v8, %v3546_v61  ;;  %v3548_v35 = vpop.f32.mrb[61].mxu1  ;;  %v11418_v60 = vld [vmem:[#allocation2 + $0x68] sm:$0xff]  ;;  %v8105_v6 = vld [vmem:[#allocation3 + $0x60] sm:$0xff] }
 0x42a   : > { %13003 = vst [vmem:[#allocation19_spill] sm:$0xff] %v11414_v11  ;;  %v11420_v13 = vld [vmem:[#allocation2 + $0x70] sm:$0x3]  ;;  %4229 = vst.msk [vmem:[#allocation2 + $0x81] sm:$0xff] %vm196_vm0, %v4197_v3  ;;  %v7841_v24 = vpack.i.bf16 %v11412_v30, %v11418_v60  ;;  %v4375_v4 = vrot.slane %v11418_v60, 1  ;;  %7068 = vmatpush1.bf16.msra.mxu0 %v11414_v11  ;;  %v11429_v16 = vpack.c.bf16 %v6394_v0, %v6393_v58  ;;  %v4000_v21 = vmul.f32 -1.0, %v8105_v6 }
 0x42b   : > { %vm4128_vm11 = vcmp.gt.f32.partialorder %v4094_v33, 0.0  ;;  %v4166_v35 = vmul.f32 %v11179_v23, %v4094_v33  ;;  %v4031_v39 = vadd.f32 %v3999_v52, %v3935_v27  ;;  %v3772_v15 = vadd.f32 %v7178_v43, %v10932_v29  ;;  %7069 = vmatprep.subr.bf16.mxu0 %v12890_v25  ;;  %v6395_v52 = vld [vmem:[%s12757_s2 + $0x640] sm:$0xff]  ;;  %v6398_v6 = vld [vmem:[%s12757_s2 + $0x658] sm:$0xff] }
 0x42c   : > { %13004 = vst [vmem:[#allocation20_spill] sm:$0xff] %v11429_v16  ;;  %v3904_v51 = vld [vmem:[#allocation4 + $0x60] sm:$0xff]  ;;  %v3551_v45 = vpop.f32.mrb[62].mxu1  ;;  %7842 = vrot.lane.b32.xlu1 %v7841_v24, %s8218_s20  ;;  %v11436_v61 = vsel %vm522_vm2, %v4374_v36, %v4375_v4  ;;  %v4377_v58 = vrot.slane %v11420_v13, 1  ;;  %v6396_v24 = vld [vmem:[%s12757_s2 + $0x648] sm:$0xff] }
 0x42d   : > { %13005 = vst [vmem:[#allocation21_spill] sm:$0xff] %v11436_v61  ;;  %v4198_v0 = vsel %vm4128_vm11, %v4094_v33, %v4166_v35  ;;  %v4095_v3 = vadd.f32 %v4063_v54, %v4031_v39  ;;  %v3936_v30 = vmul.f32 2.0, %v3904_v51  ;;  %3874 = vst.msk [vmem:[#allocation4 + $0x70] sm:$0xff] %vm196_vm0, %v3772_v15  ;;  %v7179_v29 = vadd.f32 %v11110_v8, %v3551_v45  ;;  %v3553_v43 = vpop.f32.mrb[63].mxu1  ;;  %v11441_v27 = vld [vmem:[#allocation2 + $0x78] sm:$0xff]  ;;  %v4064_v33 = vld [vmem:[%s8400_s11 + $0x60] sm:$0xff] }
 0x42e   : > { %4230 = vst.msk [vmem:[#allocation2 + $0x91] sm:$0xff] %vm196_vm0, %v4198_v0  ;;  %v7846_v54 = vpack.i.bf16 %v11436_v61, %v11441_v27  ;;  %7071 = vmatpush1.bf16.msra.mxu0 %v11429_v16  ;;  %v6397_v15 = vld [vmem:[%s12757_s2 + $0x650] sm:$0xff]  ;;  %v8106_v51 = vld [vmem:[#allocation3 + $0x68] sm:$0xff] }
 0x42f   : > { %vm4129_vm12 = vcmp.gt.f32.partialorder %v4095_v3, 0.0  ;;  %v4167_v36 = vmul.f32 %v11179_v23, %v4095_v3  ;;  %v4032_v35 = vadd.f32 %v4000_v21, %v3936_v30  ;;  %v3777_v39 = vadd.f32 %v7179_v29, %v10930_v28  ;;  %7072 = vmatprep.subr.bf16.mxu0 %v12890_v25 }
 0x430   : > { %v4001_v45 = vmul.f32 -1.0, %v8106_v51  ;;  %v3905_v0 = vld [vmem:[#allocation4 + $0x68] sm:$0xff]  ;;  %v3556_v43 = vpop.f32.mrb[64].mxu1  ;;  %7847 = vrot.lane.b32.xlu0 %v7846_v54, %s8218_s20  ;;  %v11465_v30 = vsel %vm522_vm2, %v4375_v4, %v4377_v58  ;;  %v11467_v28 = vpack.c.bf16 %v6396_v24, %v6395_v52  ;;  %v4065_v54 = vld [vmem:[%s8400_s11 + $0x68] sm:$0xff]  ;;  %v4379_v58 = vrot.slane %v11441_v27, 1 }
 0x431   : > { %13006 = vst [vmem:[#allocation22_spill] sm:$0xff] %v11465_v30  ;;  %v4199_v21 = vsel %vm4129_vm12, %v4095_v3, %v4167_v36  ;;  %v4096_v29 = vadd.f32 %v4064_v33, %v4032_v35  ;;  %v3937_v61 = vmul.f32 2.0, %v3905_v0  ;;  %3875 = vst.msk [vmem:[#allocation4 + $0x78] sm:$0xff] %vm196_vm0, %v3777_v39  ;;  %v7180_v16 = vadd.f32 %v11110_v8, %v3556_v43  ;;  %v3558_v11 = vpop.f32.mrb[65].mxu1  ;;  %v11471_v34 = vld [vmem:[#allocation2 + $0x80] sm:$0xff]  ;;  %v6400_v35 = vld [vmem:[%s12757_s2 + $0x668] sm:$0xff] }
 0x432   : > { %13007 = vst [vmem:[#allocation23_spill] sm:$0xff] %v11467_v28  ;;  %v11473_v51 = vld [vmem:[#allocation2 + $0x88] sm:$0x3]  ;;  %4231 = vst.msk [vmem:[#allocation2 + $0x99] sm:$0xff] %vm196_vm0, %v4199_v21  ;;  %v7851_v4 = vpack.i.bf16 %v11465_v30, %v11471_v34  ;;  %v4380_v3 = vrot.slane %v11471_v34, 1  ;;  %7074 = vmatpush1.bf16.msra.mxu0 %v11467_v28  ;;  %v11482_v52 = vpack.c.bf16 %v6398_v6, %v6397_v15  ;;  %v6399_v36 = vld [vmem:[%s12757_s2 + $0x660] sm:$0xff] }
 0x433   : > { %vm4130_vm13 = vcmp.gt.f32.partialorder %v4096_v29, 0.0  ;;  %v4168_v11 = vmul.f32 %v11179_v23, %v4096_v29  ;;  %v4033_v24 = vadd.f32 %v4001_v45, %v3937_v61  ;;  %v3782_v33 = vadd.f32 %v7180_v16, %v10943_v12  ;;  %7075 = vmatprep.subr.bf16.mxu0 %v12890_v25  ;;  %v8107_v39 = vld [vmem:[#allocation3 + $0x70] sm:$0xff] }
 0x434   : > { %13008 = vst [vmem:[#allocation24_spill] sm:$0xff] %v11482_v52  ;;  %v4002_v0 = vmul.f32 -1.0, %v8107_v39  ;;  %v3906_v15 = vld [vmem:[#allocation4 + $0x70] sm:$0xff]  ;;  %v3561_v6 = vpop.f32.mrb[66].mxu1  ;;  %7852 = vrot.lane.b32.xlu1 %v7851_v4, %s8218_s20  ;;  %v11495_v61 = vsel %vm522_vm2, %v4379_v58, %v4380_v3  ;;  %v4382_v12 = vrot.slane %v11473_v51, 1  ;;  %v6401_v39 = vld [vmem:[%s12757_s2 + $0x670] sm:$0xff] }
 0x435   : > { %13009 = vst [vmem:[#allocation25_spill] sm:$0xff] %v11495_v61  ;;  %v4200_v16 = vsel %vm4130_vm13, %v4096_v29, %v4168_v11  ;;  %v4097_v45 = vadd.f32 %v4065_v54, %v4033_v24  ;;  %v3938_v43 = vmul.f32 2.0, %v3906_v15  ;;  %3876 = vst.msk [vmem:[#allocation4 + $0x80] sm:$0xff] %vm196_vm0, %v3782_v33  ;;  %v7181_v21 = vadd.f32 %v11110_v8, %v3561_v6  ;;  %v3563_v30 = vpop.f32.mrb[67].mxu1  ;;  %v11500_v28 = vld [vmem:[#allocation2 + $0x90] sm:$0xff]  ;;  %v6402_v4 = vld [vmem:[%s12757_s2 + $0x678] sm:$0xff] }
 0x436   : > { %v8108_v58 = vld [vmem:[#allocation3 + $0x78] sm:$0xff]  ;;  %4232 = vst.msk [vmem:[#allocation2 + $0xa9] sm:$0xff] %vm196_vm0, %v4200_v16  ;;  %v4066_v29 = vld [vmem:[%s8400_s11 + $0x70] sm:$0xff]  ;;  %v7856_v54 = vpack.i.bf16 %v11495_v61, %v11500_v28  ;;  %7077 = vmatpush1.bf16.msra.mxu0 %v11482_v52  ;;  %v11514_v11 = vpack.c.bf16 %v6400_v35, %v6399_v36  ;;  %v6403_v6 = vld [vmem:[%s12757_s2 + $0x680] sm:$0xff]  ;;  %v11527_v35 = vsel %vm522_vm2, %v4380_v3, %v4382_v12 }
 0x437   : > { %v4003_v37 = vmul.f32 -1.0, %v8108_v58  ;;  %vm4131_vm14 = vcmp.gt.f32.partialorder %v4097_v45, 0.0  ;;  %v4169_v24 = vmul.f32 %v11179_v23, %v4097_v45  ;;  %v4034_v33 = vadd.f32 %v4002_v0, %v3938_v43  ;;  %7078 = vmatprep.subr.bf16.mxu0 %v12890_v25  ;;  %v6404_v16 = vld [vmem:[%s12757_s2 + $0x688] sm:$0xff]  ;;  %13010 = vst [vmem:[#allocation26_spill] sm:$0xff] %v11527_v35  ;;  %v4067_v3 = vld [vmem:[%s8400_s11 + $0x78] sm:$0xff] }
 0x438   : > { %v3787_v15 = vadd.f32 %v7181_v21, %v10941_v49  ;;  %v3907_v58 = vld [vmem:[#allocation4 + $0x78] sm:$0xff]  ;;  %v3566_v36 = vpop.f32.mrb[68].mxu1  ;;  %7857 = vrot.lane.b32.xlu0 %v7856_v54, %s8218_s20  ;;  %v4384_v49 = vrot.slane %v11500_v28, 1  ;;  %v4442_v0 = vrot.slane %v11266_v41, 2  ;;  %v11531_v43 = vpack.c.bf16 %v6402_v4, %v6401_v39 }
 0x439   : > { %v4201_v21 = vsel %vm4131_vm14, %v4097_v45, %v4169_v24  ;;  %v4098_v30 = vadd.f32 %v4066_v29, %v4034_v33  ;;  %v3939_v61 = vmul.f32 2.0, %v3907_v58  ;;  %v7182_v52 = vadd.f32 %v11110_v8, %v3566_v36  ;;  %v3568_v2 = vpop.f32.mrb[69].mxu1  ;;  %v11535_v20 = vld [vmem:[#allocation2 + $0x98] sm:$0xff]  ;;  %v11537_v54 = vld [vmem:[#allocation2 + $0xa0] sm:$0x3]  ;;  %v8109_v24 = vld [vmem:[#allocation3 + $0x80] sm:$0xff] }
 0x43a   : > { %3877 = vst.msk [vmem:[#allocation4 + $0x88] sm:$0xff] %vm196_vm0, %v3787_v15  ;;  %4233 = vst.msk [vmem:[#allocation2 + $0xb1] sm:$0xff] %vm196_vm0, %v4201_v21  ;;  %v7861_v41 = vpack.i.bf16 %v11527_v35, %v11535_v20  ;;  %v4385_v12 = vrot.slane %v11535_v20, 1  ;;  %v4387_v45 = vrot.slane %v11537_v54, 1  ;;  %7080 = vmatpush1.bf16.msra.mxu0 %v11514_v11  ;;  %v11546_v39 = vpack.c.bf16 %v6404_v16, %v6403_v6 }
 0x43b   : > { %vm4132_vm15 = vcmp.gt.f32.partialorder %v4098_v30, 0.0  ;;  %v4170_v2 = vmul.f32 %v11179_v23, %v4098_v30  ;;  %v4035_v4 = vadd.f32 %v4003_v37, %v3939_v61  ;;  %v3792_v29 = vadd.f32 %v7182_v52, %v10952_v56  ;;  %7081 = vmatprep.subr.bf16.mxu0 %v12890_v25 }
 0x43c   : > { %v4004_v33 = vmul.f32 -1.0, %v8109_v24  ;;  %v3908_v15 = vld [vmem:[#allocation4 + $0x80] sm:$0xff]  ;;  %v3571_v58 = vpop.f32.mrb[70].mxu1  ;;  %7862 = vrot.lane.b32.xlu1 %v7861_v41, %s8218_s20  ;;  %v11553_v36 = vsel %vm522_vm2, %v4384_v49, %v4385_v12  ;;  %v11556_v6 = vsel %vm522_vm2, %v4385_v12, %v4387_v45  ;;  %v8110_v24 = vld [vmem:[#allocation3 + $0x88] sm:$0xff]  ;;  %v4068_v41 = vld [vmem:[%s8400_s11 + $0x80] sm:$0xff]  ;;  %v4439_v12 = vrot.slane %v11249_v1, 2 }
 0x43d   : > { %13011 = vst [vmem:[#allocation27_spill] sm:$0xff] %v11553_v36  ;;  %13012 = vst [vmem:[#allocation28_spill] sm:$0xff] %v11556_v6  ;;  %v4202_v16 = vsel %vm4132_vm15, %v4098_v30, %v4170_v2  ;;  %v4099_v21 = vadd.f32 %v4067_v3, %v4035_v4  ;;  %v3940_v37 = vmul.f32 2.0, %v3908_v15  ;;  %v7183_v56 = vadd.f32 %v11110_v8, %v3571_v58  ;;  %v3573_v52 = vpop.f32.mrb[71].mxu1  ;;  %v11560_v61 = vld [vmem:[#allocation2 + $0xa8] sm:$0xff] }
 0x43e   : > { %3878 = vst.msk [vmem:[#allocation4 + $0x90] sm:$0xff] %vm196_vm0, %v3792_v29  ;;  %v4005_v35 = vmul.f32 -1.0, %v8110_v24  ;;  %4234 = vst.msk [vmem:[#allocation2 + $0xc1] sm:$0xff] %vm196_vm0, %v4202_v16  ;;  %v7866_v49 = vpack.i.bf16 %v11553_v36, %v11560_v61  ;;  %v13013_v30 = vrot.slane %v11264_v19, 2  ;;  %7083 = vmatpush1.bf16.msra.mxu0 %v11531_v43  ;;  %v4445_v16 = vrot.slane %v11312_v59, 2 }
 0x43f   : > { %vm4133_vm1 = vcmp.gt.f32.partialorder %v4099_v21, 0.0  ;;  %v4171_v45 = vmul.f32 %v11179_v23, %v4099_v21  ;;  %v4036_v2 = vadd.f32 %v4004_v33, %v3940_v37  ;;  %v3797_v4 = vadd.f32 %v7183_v56, %v10950_v5  ;;  %7085 = vmatprep.subr.bf16.mxu0 %v11546_v39 }
 0x440   : > { %v11570_v3 = vsel %vm603_vm7, %v13013_v30, %v4442_v0  ;;  %v3576_v15 = vpop.f32.mrb[72].mxu1  ;;  %7867 = vrot.lane.b32.xlu0 %v7866_v49, %s8218_s20  ;;  %v13014_v1 = vmov %v13013_v30  ;;  %v4447_v33 = vrot.slane %v11314_v44, 2  ;;  %v4389_v44 = vrot.slane %v11560_v61, 1 }
 0x441   : > { %v3909_v29 = vld [vmem:[#allocation4 + $0x88] sm:$0xff]  ;;  %v11580_v0 = vsel %vm603_vm7, %v4439_v12, %v13014_v1  ;;  %v7876_v58 = vpack.i.bf16 %v11570_v3, %v11556_v6  ;;  %v4203_v5 = vsel %vm4133_vm1, %v4099_v21, %v4171_v45  ;;  %v4100_v37 = vadd.f32 %v4068_v41, %v4036_v2  ;;  %3879 = vst.msk [vmem:[#allocation4 + $0x98] sm:$0xff] %vm196_vm0, %v3797_v4  ;;  %v3578_v24 = vpop.f32.mrb[73].mxu1  ;;  %v11588_v49 = vld [vmem:[#allocation2 + $0xb0] sm:$0xff]  ;;  %v4069_v12 = vld [vmem:[%s8400_s11 + $0x88] sm:$0xff] }
 0x442   : > { %v3941_v56 = vmul.f32 2.0, %v3909_v29  ;;  %v7184_v52 = vadd.f32 %v11110_v8, %v3576_v15  ;;  %v11590_v19 = vld [vmem:[#allocation2 + $0xb8] sm:$0x3]  ;;  %4235 = vst.msk [vmem:[#allocation2 + $0xc9] sm:$0xff] %vm196_vm0, %v4203_v5  ;;  %v7871_v59 = vpack.i.bf16 %v11588_v49, %v11580_v0  ;;  %v4390_v21 = vrot.slane %v11588_v49, 1  ;;  %v8111_v4 = vld [vmem:[#allocation3 + $0x90] sm:$0xff] }
 0x443   : > { %v4392_v41 = vrot.slane %v11590_v19, 1  ;;  %vm4134_vm3 = vcmp.gt.f32.partialorder %v4100_v37, 0.0  ;;  %v4172_v30 = vmul.f32 %v11179_v23, %v4100_v37  ;;  %v4006_v29 = vmul.f32 -1.0, %v8111_v4  ;;  %v8112_v4 = vld [vmem:[#allocation3 + $0x98] sm:$0xff] }
 0x444   : > { %v4037_v45 = vadd.f32 %v4005_v35, %v3941_v56  ;;  %v3802_v2 = vadd.f32 %v7184_v52, %v10963_v14  ;;  %v3581_v1 = vpop.f32.mrb[74].mxu1  ;;  %7872 = vrot.lane.b32.xlu1 %v7871_v59, %s8218_s20  ;;  %7877 = vrot.lane.b32.xlu0 %v7876_v58, %s8218_s20  ;;  %v11604_v5 = vsel %vm522_vm2, %v4389_v44, %v4390_v21  ;;  %v4007_v59 = vmul.f32 -1.0, %v8112_v4  ;;  %v4070_v58 = vld [vmem:[%s8400_s11 + $0x90] sm:$0xff] }
 0x445   : > { %v3910_v15 = vld [vmem:[#allocation4 + $0x90] sm:$0xff]  ;;  %13015 = vst [vmem:[#allocation29_spill] sm:$0xff] %v11604_v5  ;;  %v11607_v24 = vsel %vm522_vm2, %v4390_v21, %v4392_v41  ;;  %v4204_v6 = vsel %vm4134_vm3, %v4100_v37, %v4172_v30  ;;  %v7185_v14 = vadd.f32 %v11110_v8, %v3581_v1  ;;  %v3583_v56 = vpop.f32.mrb[75].mxu1  ;;  %v11618_v21 = vsel %vm603_vm7, %v4445_v16, %v4447_v33 }
 0x446   : > { %13016 = vst [vmem:[#allocation30_spill] sm:$0xff] %v11607_v24  ;;  %v4101_v36 = vadd.f32 %v4069_v12, %v4037_v45  ;;  %v3942_v35 = vmul.f32 2.0, %v3910_v15  ;;  %3880 = vst.msk [vmem:[#allocation4 + $0xa0] sm:$0xff] %vm196_vm0, %v3802_v2  ;;  %v11611_v52 = vld [vmem:[#allocation2 + $0xc0] sm:$0xff]  ;;  %v4444_v37 = vrot.slane %v11284_v47, 2  ;;  %v4450_v33 = vrot.slane %v11365_v63, 2 }
 0x447   : > { %4236 = vst.msk [vmem:[#allocation2 + $0xd9] sm:$0xff] %vm196_vm0, %v4204_v6  ;;  %v7881_v44 = vpack.i.bf16 %v11604_v5, %v11611_v52  ;;  %v3807_v41 = vadd.f32 %v7185_v14, %v10960_v9  ;;  %v7891_v6 = vpack.i.bf16 %v11618_v21, %v11607_v24  ;;  %v4452_v47 = vrot.slane %v11367_v42, 2  ;;  %v11635_v9 = vld [vmem:[%s12758_s3 + $0x1] ss:$0 sm:$0xff]  ;;  %v4071_v63 = vld [vmem:[%s8400_s11 + $0x98] sm:$0xff] }
 0x448   : > { %vm4135_vm4 = vcmp.gt.f32.partialorder %v4101_v36, 0.0  ;;  %v4173_v12 = vmul.f32 %v11179_v23, %v4101_v36  ;;  %v4038_v8 = vadd.f32 %v4006_v29, %v3942_v35  ;;  %v3911_v30 = vld [vmem:[#allocation4 + $0x98] sm:$0xff]  ;;  %v3586_v45 = vpop.f32.mrb[76].mxu1  ;;  %v11627_v2 = vsel %vm603_vm7, %v4444_v37, %v4445_v16 }
 0x449   : > { %7882 = vrot.lane.b32.xlu1 %v7881_v44, %s8218_s20  ;;  %v3943_v29 = vmul.f32 2.0, %v3911_v30  ;;  %3881 = vst.msk [vmem:[#allocation4 + $0xa8] sm:$0xff] %vm196_vm0, %v3807_v41  ;;  %v7186_v35 = vadd.f32 %v11635_v9, %v3586_v45  ;;  %v3588_v14 = vpop.f32.mrb[77].mxu1  ;;  %v11638_v56 = vld [vmem:[#allocation2 + $0xc8] sm:$0xff]  ;;  %v11640_v16 = vld [vmem:[#allocation2 + $0xd0] sm:$0x3] }
 0x44a   : > { %v4205_v15 = vsel %vm4135_vm4, %v4101_v36, %v4173_v12  ;;  %v4102_v1 = vadd.f32 %v4070_v58, %v4038_v8  ;;  %v7886_v42 = vpack.i.bf16 %v11638_v56, %v11627_v2  ;;  %v4394_v36 = vrot.slane %v11611_v52, 1  ;;  %v8114_v8 = vld [vmem:[#allocation3 + $0xa0] sm:$0xff] }
 0x44b   : > { %4237 = vst.msk [vmem:[#allocation2 + $0xe1] sm:$0xff] %vm196_vm0, %v4205_v15  ;;  %v4395_v4 = vrot.slane %v11638_v56, 1  ;;  %v4397_v58 = vrot.slane %v11640_v16, 1  ;;  %v4039_v37 = vadd.f32 %v4007_v59, %v3943_v29  ;;  %v3812_v12 = vadd.f32 %v7186_v35, %v10973_v62 }
 0x44c   : > { %vm4136_vm5 = vcmp.gt.f32.partialorder %v4102_v1, 0.0  ;;  %v4174_v44 = vmul.f32 %v11179_v23, %v4102_v1  ;;  %v4008_v41 = vmul.f32 -1.0, %v8114_v8  ;;  %v3591_v45 = vpop.f32.mrb[78].mxu1  ;;  %7887 = vrot.lane.b32.xlu0 %v7886_v42, %s8218_s20  ;;  %v8115_v8 = vld [vmem:[#allocation3 + $0xa8] sm:$0xff]  ;;  %v4072_v42 = vld [vmem:[%s8400_s11 + $0xa0] sm:$0xff] }
 0x44d   : > { %v3912_v30 = vld [vmem:[#allocation4 + $0xa0] sm:$0xff]  ;;  %7892 = vrot.lane.b32.xlu1 %v7891_v6, %s8218_s20  ;;  %v11654_v15 = vsel %vm522_vm2, %v4394_v36, %v4395_v4  ;;  %v11657_v14 = vsel %vm522_vm2, %v4395_v4, %v4397_v58  ;;  %v4103_v5 = vadd.f32 %v4071_v63, %v4039_v37  ;;  %3882 = vst.msk [vmem:[#allocation4 + $0xb0] sm:$0xff] %vm196_vm0, %v3812_v12  ;;  %v3593_v29 = vpop.f32.mrb[79].mxu1  ;;  %v4009_v6 = vmul.f32 -1.0, %v8115_v8 }
 0x44e   : > { %13017 = vst [vmem:[#allocation31_spill] sm:$0xff] %v11654_v15  ;;  %13018 = vst [vmem:[#allocation32_spill] sm:$0xff] %v11657_v14  ;;  %v4206_v24 = vsel %vm4136_vm5, %v4102_v1, %v4174_v44  ;;  %v3944_v59 = vmul.f32 2.0, %v3912_v30  ;;  %v7187_v62 = vadd.f32 %v11635_v9, %v3591_v45  ;;  %v11661_v35 = vld [vmem:[#allocation2 + $0xd8] sm:$0xff]  ;;  %v4449_v4 = vrot.slane %v11335_v22, 2 }
 0x44f   : > { %4238 = vst.msk [vmem:[#allocation2 + $0xf1] sm:$0xff] %vm196_vm0, %v4206_v24  ;;  %v7896_v36 = vpack.i.bf16 %v11654_v15, %v11661_v35  ;;  %v11669_v1 = vsel %vm603_vm7, %v4450_v33, %v4452_v47  ;;  %vm4137_vm6 = vcmp.gt.f32.partialorder %v4103_v5, 0.0  ;;  %v4175_v63 = vmul.f32 %v11179_v23, %v4103_v5 }
 0x450   : > { %v4040_v58 = vadd.f32 %v4008_v41, %v3944_v59  ;;  %v3817_v44 = vadd.f32 %v7187_v62, %v10971_v40  ;;  %v3913_v37 = vld [vmem:[#allocation4 + $0xa8] sm:$0xff]  ;;  %v3596_v12 = vpop.f32.mrb[80].mxu1  ;;  %v11675_v24 = vsel %vm603_vm7, %v4449_v4, %v4450_v33  ;;  %v7906_v22 = vpack.i.bf16 %v11669_v1, %v11657_v14  ;;  %v4073_v33 = vld [vmem:[%s8400_s11 + $0xa8] sm:$0xff] }
 0x451   : > { %7897 = vrot.lane.b32.xlu0 %v7896_v36, %s8218_s20  ;;  %v4455_v47 = vrot.slane %v11418_v60, 2  ;;  %v4457_v30 = vrot.slane %v11420_v13, 2  ;;  %v4207_v45 = vsel %vm4137_vm6, %v4103_v5, %v4175_v63  ;;  %v3945_v41 = vmul.f32 2.0, %v3913_v37  ;;  %v3598_v59 = vpop.f32.mrb[81].mxu1 }
 0x452   : > { %v4104_v23 = vadd.f32 %v4072_v42, %v4040_v58  ;;  %3883 = vst.msk [vmem:[#allocation4 + $0xb8] sm:$0xff] %vm196_vm0, %v3817_v44  ;;  %v7188_v40 = vadd.f32 %v11635_v9, %v3596_v12  ;;  %v11683_v62 = vld [vmem:[#allocation2 + $0xe0] sm:$0xff]  ;;  %v11685_v29 = vld [vmem:[#allocation2 + $0xe8] sm:$0x3]  ;;  %4239 = vst.msk [vmem:[#allocation2 + $0xf9] sm:$0xff] %vm196_vm0, %v4207_v45  ;;  %v4399_v13 = vrot.slane %v11661_v35, 1 }
 0x453   : > { %v7901_v60 = vpack.i.bf16 %v11683_v62, %v11675_v24  ;;  %v4400_v5 = vrot.slane %v11683_v62, 1  ;;  %v4402_v8 = vrot.slane %v11685_v29, 1  ;;  %v11697_v42 = vld [vmem:[%s12756_s1 + $0x2] ss:$0 sm:$0xff]  ;;  %v4041_v4 = vadd.f32 %v4009_v6, %v3945_v41 }
 0x454   : > { %vm4138_vm8 = vcmp.gt.f32.partialorder %v4104_v23, 0.0  ;;  %v4176_v36 = vmul.f32 %v11697_v42, %v4104_v23  ;;  %v3822_v63 = vadd.f32 %v7188_v40, %v10983_v38  ;;  %v8117_v58 = vld [vmem:[#allocation3 + $0xb0] sm:$0xff]  ;;  %v3601_v12 = vpop.f32.mrb[82].mxu1 }
 0x455   : > { %v4010_v44 = vmul.f32 -1.0, %v8117_v58  ;;  %v3914_v37 = vld [vmem:[#allocation4 + $0xb0] sm:$0xff]  ;;  %7902 = vrot.lane.b32.xlu1 %v7901_v60, %s8218_s20  ;;  %7907 = vrot.lane.b32.xlu0 %v7906_v22, %s8218_s20  ;;  %v11704_v45 = vsel %vm522_vm2, %v4399_v13, %v4400_v5  ;;  %v11707_v59 = vsel %vm522_vm2, %v4400_v5, %v4402_v8  ;;  %v4105_v15 = vadd.f32 %v4073_v33, %v4041_v4  ;;  %v3603_v41 = vpop.f32.mrb[83].mxu1  ;;  %v8118_v58 = vld [vmem:[#allocation3 + $0xb8] sm:$0xff]  ;;  %v4074_v22 = vld [vmem:[%s8400_s11 + $0xb0] sm:$0xff] }
 0x456   : > { %13019 = vst [vmem:[#allocation33_spill] sm:$0xff] %v11704_v45  ;;  %13020 = vst [vmem:[#allocation34_spill] sm:$0xff] %v11707_v59  ;;  %v4208_v14 = vsel %vm4138_vm8, %v4104_v23, %v4176_v36  ;;  %v3946_v6 = vmul.f32 2.0, %v3914_v37  ;;  %v7189_v38 = vadd.f32 %v11635_v9, %v3601_v12  ;;  %v11711_v40 = vld [vmem:[#allocation2 + $0xf0] sm:$0xff]  ;;  %v4011_v60 = vmul.f32 -1.0, %v8118_v58 }
 0x457   : > { %3884 = vst.msk [vmem:[#allocation4 + $0xc0] sm:$0xff] %vm196_vm0, %v3822_v63  ;;  %4240 = vst.msk [vmem:[#allocation2 + $0x109] sm:$0xff] %vm196_vm0, %v4208_v14  ;;  %v7911_v13 = vpack.i.bf16 %v11704_v45, %v11711_v40  ;;  %v11718_v5 = vsel %vm603_vm7, %v4455_v47, %v4457_v30  ;;  %v4454_v23 = vrot.slane %v11388_v17, 2  ;;  %vm4139_vm9 = vcmp.gt.f32.partialorder %v4105_v15, 0.0 }
 0x458   : > { %v4177_v33 = vmul.f32 %v11697_v42, %v4105_v15  ;;  %v4042_v8 = vadd.f32 %v4010_v44, %v3946_v6  ;;  %v3827_v36 = vadd.f32 %v7189_v38, %v10981_v18  ;;  %v3606_v63 = vpop.f32.mrb[84].mxu1  ;;  %v7921_v14 = vpack.i.bf16 %v11718_v5, %v11707_v59 }
 0x459   : > { %v3915_v4 = vld [vmem:[#allocation4 + $0xb8] sm:$0xff]  ;;  %7912 = vrot.lane.b32.xlu1 %v7911_v13, %s8218_s20  ;;  %v11727_v37 = vsel %vm603_vm7, %v4454_v23, %v4455_v47  ;;  %v4460_v30 = vrot.slane %v11471_v34, 2  ;;  %v4462_v17 = vrot.slane %v11473_v51, 2  ;;  %v7190_v18 = vadd.f32 %v11635_v9, %v3606_v63  ;;  %v3608_v6 = vpop.f32.mrb[85].mxu1  ;;  %v11733_v38 = vld [vmem:[#allocation2 + $0xf8] sm:$0xff] }
 0x45a   : > { %v4209_v12 = vsel %vm4139_vm9, %v4105_v15, %v4177_v33  ;;  %v4106_v41 = vadd.f32 %v4074_v22, %v4042_v8  ;;  %v3947_v44 = vmul.f32 2.0, %v3915_v4  ;;  %3885 = vst.msk [vmem:[#allocation4 + $0xc8] sm:$0xff] %vm196_vm0, %v3827_v36  ;;  %v11735_v58 = vld [vmem:[#allocation2 + $0x100] sm:$0x3]  ;;  %v4075_v47 = vld [vmem:[%s8400_s11 + $0xb8] sm:$0xff]  ;;  %v7916_v34 = vpack.i.bf16 %v11733_v38, %v11727_v37  ;;  %v8119_v8 = vld [vmem:[#allocation3 + $0xc0] sm:$0xff] }
 0x45b   : > { %4241 = vst.msk [vmem:[#allocation2 + $0x111] sm:$0xff] %vm196_vm0, %v4209_v12  ;;  %v4404_v51 = vrot.slane %v11711_v40, 1  ;;  %v4405_v15 = vrot.slane %v11733_v38, 1  ;;  %v4407_v22 = vrot.slane %v11735_v58, 1  ;;  %v3832_v33 = vadd.f32 %v7190_v18, %v10992_v57 }
 0x45c   : > { %vm4140_vm10 = vcmp.gt.f32.partialorder %v4106_v41, 0.0  ;;  %v4178_v13 = vmul.f32 %v11697_v42, %v4106_v41  ;;  %v4043_v23 = vadd.f32 %v4011_v60, %v3947_v44  ;;  %v4012_v36 = vmul.f32 -1.0, %v8119_v8  ;;  %v3611_v63 = vpop.f32.mrb[86].mxu1  ;;  %7917 = vrot.lane.b32.xlu0 %v7916_v34, %s8218_s20  ;;  %v8120_v8 = vld [vmem:[#allocation3 + $0xc8] sm:$0xff]  ;;  %v4076_v34 = vld [vmem:[%s8400_s11 + $0xc0] sm:$0xff] }
 0x45d   : > { %7922 = vrot.lane.b32.xlu1 %v7921_v14, %s8218_s20  ;;  %v11749_v12 = vsel %vm522_vm2, %v4404_v51, %v4405_v15  ;;  %v11752_v6 = vsel %vm522_vm2, %v4405_v15, %v4407_v22  ;;  %3886 = vst.msk [vmem:[#allocation4 + $0xd0] sm:$0xff] %vm196_vm0, %v3832_v33  ;;  %v7191_v57 = vadd.f32 %v11635_v9, %v3611_v63  ;;  %v3613_v44 = vpop.f32.mrb[87].mxu1  ;;  %v4013_v14 = vmul.f32 -1.0, %v8120_v8 }
 0x45e   : > { %v3916_v4 = vld [vmem:[#allocation4 + $0xc0] sm:$0xff]  ;;  %13021 = vst [vmem:[#allocation35_spill] sm:$0xff] %v11749_v12  ;;  %13022 = vst [vmem:[#allocation36_spill] sm:$0xff] %v11752_v6  ;;  %v4210_v59 = vsel %vm4140_vm10, %v4106_v41, %v4178_v13  ;;  %v4107_v45 = vadd.f32 %v4075_v47, %v4043_v23  ;;  %v11756_v18 = vld [vmem:[#allocation2 + $0x108] sm:$0xff]  ;;  %v4459_v15 = vrot.slane %v11441_v27, 2  ;;  %v11764_v41 = vsel %vm603_vm7, %v4460_v30, %v4462_v17 }
 0x45f   : > { %v3948_v60 = vmul.f32 2.0, %v3916_v4  ;;  %4242 = vst.msk [vmem:[#allocation2 + $0x121] sm:$0xff] %vm196_vm0, %v4210_v59  ;;  %v7926_v51 = vpack.i.bf16 %v11749_v12, %v11756_v18  ;;  %v3837_v13 = vadd.f32 %v7191_v57, %v10990_v46  ;;  %v7936_v27 = vpack.i.bf16 %v11764_v41, %v11752_v6 }
 0x460   : > { %vm4141_vm11 = vcmp.gt.f32.partialorder %v4107_v45, 0.0  ;;  %v4179_v47 = vmul.f32 %v11697_v42, %v4107_v45  ;;  %v3616_v33 = vpop.f32.mrb[88].mxu1  ;;  %v11770_v59 = vsel %vm603_vm7, %v4459_v15, %v4460_v30  ;;  %v4465_v17 = vrot.slane %v11535_v20, 2  ;;  %v4077_v30 = vld [vmem:[%s8400_s11 + $0xc8] sm:$0xff] }
 0x461   : > { %v4044_v22 = vadd.f32 %v4012_v36, %v3948_v60  ;;  %v3917_v23 = vld [vmem:[#allocation4 + $0xc8] sm:$0xff]  ;;  %7927 = vrot.lane.b32.xlu0 %v7926_v51, %s8218_s20  ;;  %v4467_v4 = vrot.slane %v11537_v54, 2  ;;  %3887 = vst.msk [vmem:[#allocation4 + $0xd8] sm:$0xff] %vm196_vm0, %v3837_v13  ;;  %v7192_v46 = vadd.f32 %v11635_v9, %v3616_v33  ;;  %v3618_v60 = vpop.f32.mrb[89].mxu1  ;;  %v4409_v54 = vrot.slane %v11756_v18, 1 }
 0x462   : > { %v4211_v63 = vsel %vm4141_vm11, %v4107_v45, %v4179_v47  ;;  %v3949_v36 = vmul.f32 2.0, %v3917_v23  ;;  %v11778_v57 = vld [vmem:[#allocation2 + $0x110] sm:$0xff]  ;;  %v11780_v8 = vld [vmem:[#allocation2 + $0x118] sm:$0x3] }
 0x463   : > { %v4108_v44 = vadd.f32 %v4076_v34, %v4044_v22  ;;  %4243 = vst.msk [vmem:[#allocation2 + $0x129] sm:$0xff] %vm196_vm0, %v4211_v63  ;;  %v7931_v20 = vpack.i.bf16 %v11778_v57, %v11770_v59  ;;  %v4410_v45 = vrot.slane %v11778_v57, 1  ;;  %v4412_v34 = vrot.slane %v11780_v8, 1  ;;  %v8121_v22 = vld [vmem:[#allocation3 + $0xd0] sm:$0xff] }
 0x464   : > { %v4045_v15 = vadd.f32 %v4013_v14, %v3949_v36  ;;  %v3842_v47 = vadd.f32 %v7192_v46, %v11002_v48  ;;  %v4014_v13 = vmul.f32 -1.0, %v8121_v22  ;;  %v3918_v23 = vld [vmem:[#allocation4 + $0xd0] sm:$0xff]  ;;  %v3621_v33 = vpop.f32.mrb[90].mxu1 }
 0x465   : > { %vm4142_vm12 = vcmp.gt.f32.partialorder %v4108_v44, 0.0  ;;  %v4180_v51 = vmul.f32 %v11697_v42, %v4108_v44  ;;  %7932 = vrot.lane.b32.xlu1 %v7931_v20, %s8218_s20  ;;  %7937 = vrot.lane.b32.xlu0 %v7936_v27, %s8218_s20  ;;  %v11794_v63 = vsel %vm522_vm2, %v4409_v54, %v4410_v45  ;;  %v11797_v60 = vsel %vm522_vm2, %v4410_v45, %v4412_v34  ;;  %v3623_v36 = vpop.f32.mrb[91].mxu1  ;;  %v4078_v20 = vld [vmem:[%s8400_s11 + $0xd0] sm:$0xff] }
 0x466   : > { %13023 = vst [vmem:[#allocation37_spill] sm:$0xff] %v11794_v63  ;;  %13024 = vst [vmem:[#allocation38_spill] sm:$0xff] %v11797_v60  ;;  %v4109_v12 = vadd.f32 %v4077_v30, %v4045_v15  ;;  %v3950_v14 = vmul.f32 2.0, %v3918_v23  ;;  %v7193_v48 = vadd.f32 %v11635_v9, %v3621_v33  ;;  %v11801_v46 = vld [vmem:[#allocation2 + $0x120] sm:$0xff]  ;;  %v11808_v54 = vsel %vm603_vm7, %v4465_v17, %v4467_v4  ;;  %v4079_v36 = vld [vmem:[%s8400_s11 + $0xd8] sm:$0xff] }
 0x467   : > { %v4212_v6 = vsel %vm4142_vm12, %v4108_v44, %v4180_v51  ;;  %3888 = vst.msk [vmem:[#allocation4 + $0xe0] sm:$0xff] %vm196_vm0, %v3842_v47  ;;  %v7941_v27 = vpack.i.bf16 %v11794_v63, %v11801_v46  ;;  %v4464_v44 = vrot.slane %v11500_v28, 2  ;;  %v8122_v51 = vld [vmem:[#allocation3 + $0xd8] sm:$0xff]  ;;  %v7951_v22 = vpack.i.bf16 %v11808_v54, %v11797_v60 }
 0x468   : > { %4244 = vst.msk [vmem:[#allocation2 + $0x139] sm:$0xff] %vm196_vm0, %v4212_v6  ;;  %vm4143_vm13 = vcmp.gt.f32.partialorder %v4109_v12, 0.0  ;;  %v4181_v30 = vmul.f32 %v11697_v42, %v4109_v12  ;;  %v4046_v45 = vadd.f32 %v4014_v13, %v3950_v14  ;;  %v3847_v34 = vadd.f32 %v7193_v48, %v11000_v31  ;;  %v3919_v47 = vld [vmem:[#allocation4 + $0xd8] sm:$0xff]  ;;  %v3626_v6 = vpop.f32.mrb[92].mxu1 }
 0x469   : > { %v4015_v15 = vmul.f32 -1.0, %v8122_v51  ;;  %7942 = vrot.lane.b32.xlu1 %v7941_v27, %s8218_s20  ;;  %v11817_v4 = vsel %vm603_vm7, %v4464_v44, %v4465_v17  ;;  %v3951_v33 = vmul.f32 2.0, %v3919_v47  ;;  %v7194_v31 = vadd.f32 %v11635_v9, %v3626_v6  ;;  %v3628_v13 = vpop.f32.mrb[93].mxu1 }
 0x46a   : > { %v4213_v28 = vsel %vm4143_vm13, %v4109_v12, %v4181_v30  ;;  %v4110_v23 = vadd.f32 %v4078_v20, %v4046_v45  ;;  %3889 = vst.msk [vmem:[#allocation4 + $0xe8] sm:$0xff] %vm196_vm0, %v3847_v34  ;;  %v11821_v14 = vld [vmem:[#allocation2 + $0x128] sm:$0xff]  ;;  %v11823_v48 = vld [vmem:[#allocation2 + $0x130] sm:$0x3]  ;;  %v4414_v17 = vrot.slane %v11801_v46, 1  ;;  %v4470_v13 = vrot.slane %v11588_v49, 2 }
 0x46b   : > { %4245 = vst.msk [vmem:[#allocation2 + $0x141] sm:$0xff] %vm196_vm0, %v4213_v28  ;;  %v7946_v27 = vpack.i.bf16 %v11821_v14, %v11817_v4  ;;  %v4415_v12 = vrot.slane %v11821_v14, 1  ;;  %v4417_v20 = vrot.slane %v11823_v48, 1  ;;  %v4047_v30 = vadd.f32 %v4015_v15, %v3951_v33  ;;  %v8123_v34 = vld [vmem:[#allocation3 + $0xe0] sm:$0xff] }
 0x46c   : > { %vm4144_vm14 = vcmp.gt.f32.partialorder %v4110_v23, 0.0  ;;  %v4182_v44 = vmul.f32 %v11697_v42, %v4110_v23  ;;  %v3852_v45 = vadd.f32 %v7194_v31, %v11105_v26  ;;  %v4016_v51 = vmul.f32 -1.0, %v8123_v34  ;;  %v3631_v6 = vpop.f32.mrb[94].mxu1 }
 0x46d   : > { %7952 = vrot.lane.b32.xlu1 %v7951_v22, %s8218_s20  ;;  %7947 = vrot.lane.b32.xlu0 %v7946_v27, %s8218_s20  ;;  %v11837_v28 = vsel %vm522_vm2, %v4414_v17, %v4415_v12  ;;  %v4472_v60 = vrot.slane %v11590_v19, 2  ;;  %v4111_v15 = vadd.f32 %v4079_v36, %v4047_v30  ;;  %v7195_v26 = vadd.f32 %v11635_v9, %v3631_v6  ;;  %v3633_v31 = vpop.f32.mrb[95].mxu1  ;;  %v4080_v22 = vld [vmem:[%s8400_s11 + $0xe0] sm:$0xff]  ;;  %v8124_v17 = vld [vmem:[#allocation3 + $0xe8] sm:$0xff] }
 0x46e   : > { %v3920_v47 = vld [vmem:[#allocation4 + $0xe0] sm:$0xff]  ;;  %13025 = vst [vmem:[#allocation39_spill] sm:$0xff] %v11837_v28  ;;  %v4214_v63 = vsel %vm4144_vm14, %v4110_v23, %v4182_v44  ;;  %3890 = vst.msk [vmem:[#allocation4 + $0xf0] sm:$0xff] %vm196_vm0, %v3852_v45  ;;  %v4469_v49 = vrot.slane %v11560_v61, 2  ;;  %v11851_v19 = vsel %vm522_vm2, %v4415_v12, %v4417_v20  ;;  %v4017_v44 = vmul.f32 -1.0, %v8124_v17 }
 0x46f   : > { %v3952_v33 = vmul.f32 2.0, %v3920_v47  ;;  %v11843_v34 = vld [vmem:[#allocation2 + $0x138] sm:$0xff]  ;;  %4246 = vst.msk [vmem:[#allocation2 + $0x151] sm:$0xff] %vm196_vm0, %v4214_v63  ;;  %13026 = vst [vmem:[#allocation40_spill] sm:$0xff] %v11851_v19  ;;  %vm4145_vm15 = vcmp.gt.f32.partialorder %v4111_v15, 0.0  ;;  %v4183_v23 = vmul.f32 %v11697_v42, %v4111_v15  ;;  %v3857_v9 = vadd.f32 %v7195_v26, %v11103_v7  ;;  %v4081_v7 = vld [vmem:[%s8400_s11 + $0xe8] sm:$0xff] }
 0x470   : > { %v7956_v27 = vpack.i.bf16 %v11837_v28, %v11843_v34  ;;  %v11857_v63 = vsel %vm603_vm7, %v4469_v49, %v4470_v13  ;;  %v11863_v20 = vsel %vm603_vm7, %v4470_v13, %v4472_v60  ;;  %v4480_v28 = vrot.slane %v11683_v62, 2 }
 0x471   : > { %v4048_v36 = vadd.f32 %v4016_v51, %v3952_v33  ;;  %v3921_v30 = vld [vmem:[#allocation4 + $0xe8] sm:$0xff]  ;;  %13027 = vst [vmem:[#allocation41_spill] sm:$0xff] %v11857_v63  ;;  %v4215_v45 = vsel %vm4145_vm15, %v4111_v15, %v4183_v23  ;;  %3891 = vst.msk [vmem:[#allocation4 + $0xf8] sm:$0xff] %vm196_vm0, %v3857_v9  ;;  %v7966_v15 = vpack.i.bf16 %v11863_v20, %v11851_v19  ;;  %v4419_v33 = vrot.slane %v11843_v34, 1 }
 0x472   : > { %7957 = vrot.lane.b32.xlu0 %v7956_v27, %s8218_s20  ;;  %v3953_v47 = vmul.f32 2.0, %v3921_v30  ;;  %v11860_v12 = vld [vmem:[#allocation2 + $0x140] sm:$0xff]  ;;  %v11865_v51 = vld [vmem:[#allocation2 + $0x148] sm:$0x3]  ;;  %4247 = vst.msk [vmem:[#allocation2 + $0x159] sm:$0xff] %vm196_vm0, %v4215_v45 }
 0x473   : > { %v4112_v61 = vadd.f32 %v4080_v22, %v4048_v36  ;;  %v7961_v6 = vpack.i.bf16 %v11860_v12, %v11857_v63  ;;  %v4420_v26 = vrot.slane %v11860_v12, 1  ;;  %v4422_v13 = vrot.slane %v11865_v51, 1  ;;  %v8125_v22 = vld [vmem:[#allocation3 + $0xf0] sm:$0xff] }
 0x474   : > { %v4049_v60 = vadd.f32 %v4017_v44, %v3953_v47  ;;  %v4018_v27 = vmul.f32 -1.0, %v8125_v22  ;;  %v4475_v36 = vrot.slane %v11638_v56, 2  ;;  %v4477_v44 = vrot.slane %v11640_v16, 2  ;;  %v4082_v47 = vld [vmem:[%s8400_s11 + $0xf0] sm:$0xff] }
 0x475   : > { %vm4146_vm1 = vcmp.gt.f32.partialorder %v4112_v61, 0.0  ;;  %v4184_v31 = vmul.f32 %v11697_v42, %v4112_v61  ;;  %v3922_v49 = vld [vmem:[#allocation4 + $0xf0] sm:$0xff]  ;;  %7962 = vrot.lane.b32.xlu1 %v7961_v6, %s8218_s20  ;;  %v11880_v23 = vsel %vm522_vm2, %v4419_v33, %v4420_v26 }
 0x476   : > { %7967 = vrot.lane.b32.xlu0 %v7966_v15, %s8218_s20  ;;  %13028 = vst [vmem:[#allocation42_spill] sm:$0xff] %v11880_v23  ;;  %v4113_v17 = vadd.f32 %v4081_v7, %v4049_v60  ;;  %v3954_v30 = vmul.f32 2.0, %v3922_v49  ;;  %v11883_v45 = vld [vmem:[#allocation2 + $0x150] sm:$0xff]  ;;  %v4474_v15 = vrot.slane %v11611_v52, 2  ;;  %v8126_v7 = vld [vmem:[#allocation3 + $0xf8] sm:$0xff]  ;;  %v11900_v52 = vsel %vm603_vm7, %v4475_v36, %v4477_v44 }
 0x477   : > { %v4216_v9 = vsel %vm4146_vm1, %v4112_v61, %v4184_v31  ;;  %v7971_v6 = vpack.i.bf16 %v11880_v23, %v11883_v45  ;;  %v11893_v61 = vsel %vm522_vm2, %v4420_v26, %v4422_v13  ;;  %v4019_v31 = vmul.f32 -1.0, %v8126_v7  ;;  %v4083_v26 = vld [vmem:[%s8400_s11 + $0xf8] sm:$0xff]  ;;  %v8128_v7 = vld [vmem:[#allocation2 + $0x8] sm:$0xff] }
 0x478   : > { %4248 = vst.msk [vmem:[#allocation2 + $0x169] sm:$0xff] %vm196_vm0, %v4216_v9  ;;  %vm4147_vm3 = vcmp.gt.f32.partialorder %v4113_v17, 0.0  ;;  %v4185_v33 = vmul.f32 %v11697_v42, %v4113_v17  ;;  %v4050_v56 = vadd.f32 %v4018_v27, %v3954_v30  ;;  %13029 = vst [vmem:[#allocation43_spill] sm:$0xff] %v11893_v61  ;;  %v3923_v60 = vld [vmem:[#allocation4 + $0xf8] sm:$0xff]  ;;  %v11897_v16 = vsel %vm603_vm7, %v4474_v15, %v4475_v36 }
 0x479   : > { %7972 = vrot.lane.b32.xlu1 %v7971_v6, %s8218_s20  ;;  %v3955_v9 = vmul.f32 2.0, %v3923_v60  ;;  %v11902_v23 = vld [vmem:[#allocation2 + $0x158] sm:$0xff]  ;;  %v11904_v27 = vld [vmem:[#allocation2 + $0x160] sm:$0x3]  ;;  %v7981_v13 = vpack.i.bf16 %v11900_v52, %v11893_v61  ;;  %v4435_v60 = vrot.slane %v8128_v7, 2 }
 0x47a   : > { %v4217_v22 = vsel %vm4147_vm3, %v4113_v17, %v4185_v33  ;;  %v4114_v49 = vadd.f32 %v4082_v47, %v4050_v56  ;;  %v7976_v30 = vpack.i.bf16 %v11902_v23, %v11897_v16  ;;  %v4424_v17 = vrot.slane %v11883_v45, 1  ;;  %v8127_v33 = vld [vmem:[#allocation2] sm:$0xff] }
 0x47b   : > { %4249 = vst.msk [vmem:[#allocation2 + $0x171] sm:$0xff] %vm196_vm0, %v4217_v22  ;;  %v4425_v47 = vrot.slane %v11902_v23, 1  ;;  %v4051_v44 = vadd.f32 %v4019_v31, %v3955_v9  ;;  %v4427_v6 = vrot.slane %v11904_v27, 1  ;;  %v4434_v56 = vrot.slane %v8127_v33, 2 }
 0x47c   : > { %vm4148_vm4 = vcmp.gt.f32.partialorder %v4114_v49, 0.0  ;;  %v4186_v36 = vmul.f32 %v11697_v42, %v4114_v49  ;;  %7977 = vrot.lane.b32.xlu0 %v7976_v30, %s8218_s20  ;;  %v4482_v31 = vrot.slane %v11685_v29, 2  ;;  %v4479_v30 = vrot.slane %v11661_v35, 2 }
 0x47d   : > { %7982 = vrot.lane.b32.xlu1 %v7981_v13, %s8218_s20  ;;  %v11919_v15 = vsel %vm522_vm2, %v4424_v17, %v4425_v47  ;;  %v4115_v61 = vadd.f32 %v4083_v26, %v4051_v44  ;;  %v11931_v17 = vsel %vm522_vm2, %v4425_v47, %v4427_v6  ;;  %v8129_v44 = vld [vmem:[#allocation2 + $0x10] sm:$0x3] }
 0x47e   : > { %13030 = vst [vmem:[#allocation44_spill] sm:$0xff] %v11919_v15  ;;  %v4218_v22 = vsel %vm4148_vm4, %v4114_v49, %v4186_v36  ;;  %13031 = vst [vmem:[#allocation45_spill] sm:$0xff] %v11931_v17  ;;  %v4436_v49 = vsel %vm603_vm7, %v4434_v56, %v4435_v60  ;;  %v11938_v29 = vsel %vm603_vm7, %v4479_v30, %v4480_v28 }
 0x47f   : > { %v11921_v19 = vld [vmem:[#allocation2 + $0x168] sm:$0xff]  ;;  %4250 = vst.msk [vmem:[#allocation2 + $0x181] sm:$0xff] %vm196_vm0, %v4218_v22  ;;  %vm4149_vm5 = vcmp.gt.f32.partialorder %v4115_v61, 0.0  ;;  %v4187_v13 = vmul.f32 %v11697_v42, %v4115_v61  ;;  %v11941_v36 = vsel %vm603_vm7, %v4480_v28, %v4482_v31  ;;  %v4437_v42 = vrot.slane %v8129_v44, 2 }
 0x480   : > { %v7986_v9 = vpack.i.bf16 %v11919_v15, %v11921_v19  ;;  %v7996_v6 = vpack.i.bf16 %v11941_v36, %v11931_v17 }
 0x481   : > { %v4219_v62 = vsel %vm4149_vm5, %v4115_v61, %v4187_v13  ;;  %v4429_v61 = vrot.slane %v11921_v19, 1 }
 0x482   : > { %7987 = vrot.lane.b32.xlu0 %v7986_v9, %s8218_s20  ;;  %v11935_v26 = vld [vmem:[#allocation2 + $0x170] sm:$0xff]  ;;  %4251 = vst.msk [vmem:[#allocation2 + $0x189] sm:$0xff] %vm196_vm0, %v4219_v62  ;;  %v7808_v35 = vpop.permute.xlu0 %7807  ;;  %v11950_v22 = vld [vmem:[#allocation2 + $0x178] sm:$0x3] }
 0x483   : > { %v7991_v47 = vpack.i.bf16 %v11935_v26, %v11938_v29  ;;  %v4430_v56 = vrot.slane %v11935_v26, 1  ;;  %v7810_v9 = vunpack.i.h.bf16 %v7808_v35  ;;  %v7809_v28 = vunpack.i.l.bf16 %v7808_v35 }
 0x484   : > { %v4432_v44 = vrot.slane %v11950_v22, 1 }
 0x485   : > { %7992 = vrot.lane.b32.xlu1 %v7991_v47, %s8218_s20  ;;  %v11955_v31 = vsel %vm522_vm2, %v4429_v61, %v4430_v56  ;;  %v4936_v13 = vsel %vm196_vm0, %v4436_v49, %v7809_v28  ;;  %v4904_v30 = vsel %vm196_vm0, %v8127_v33, %v7810_v9  ;;  %v4438_v47 = vsel %vm603_vm7, %v4435_v60, %v4437_v42 }
 0x486   : > { %7997 = vrot.lane.b32.xlu0 %v7996_v6, %s8218_s20  ;;  %13032 = vst [vmem:[#allocation46_spill] sm:$0xff] %v11955_v31  ;;  %v11959_v62 = vld [vmem:[#allocation2 + $0x180] sm:$0xff]  ;;  %v7813_v17 = vpop.permute.xlu1 %7812  ;;  %5213 = vmatprep.mubr.f32.mxu1 %v4936_v13  ;;  %v4485_v61 = vrot.slane %v11733_v38, 2  ;;  %v4484_v9 = vrot.slane %v11711_v40, 2  ;;  %v11974_v13 = vsel %vm522_vm2, %v4430_v56, %v4432_v44  ;;  %v4490_v40 = vrot.slane %v11778_v57, 2  ;;  %v8130_v56 = vld [vmem:[#allocation2 + $0x18] sm:$0xff] }
 0x487   : > { %13033 = vst [vmem:[#allocation47_spill] sm:$0xff] %v11959_v62  ;;  %v8001_v35 = vpack.i.bf16 %v11955_v31, %v11959_v62  ;;  %v7815_v15 = vunpack.i.h.bf16 %v7813_v17  ;;  %v7814_v6 = vunpack.i.l.bf16 %v7813_v17  ;;  %5214 = vmatmul.mubr.f32.vlgmr.msra.gmra.mrb[96].mxu1 %v4904_v30  ;;  %13035 = vst [vmem:[#allocation49_spill] sm:$0xff] %v11974_v13  ;;  %v4492_v57 = vrot.slane %v11780_v8, 2 }
 0x488   : > { %7116 = vmatpush1.bf16.msra.mxu1 %v11153_v53  ;;  %v4487_v53 = vrot.slane %v11735_v58, 2  ;;  %v4489_v58 = vrot.slane %v11756_v18, 2  ;;  %v8131_v18 = vld [vmem:[#allocation2 + $0x20] sm:$0xff] }
 0x489   : > { %8002 = vrot.lane.b32.xlu1 %v8001_v35, %s8218_s20  ;;  %v4937_v33 = vsel %vm196_vm0, %v4438_v47, %v7814_v6  ;;  %v4905_v49 = vsel %vm196_vm0, %v8128_v7, %v7815_v15  ;;  %v11971_v28 = vld [vmem:[#allocation2 + $0x188] sm:$0xff]  ;;  %7101 = vmatprep.subr.bf16.mxu1 %v12890_v25  ;;  %v11981_v15 = vsel %vm603_vm7, %v4484_v9, %v4485_v61 }
 0x48a   : > { %13034 = vst [vmem:[#allocation48_spill] sm:$0xff] %v11971_v28  ;;  %5218 = vmatprep.mubr.f32.mxu1 %v4937_v33  ;;  %v7818_v60 = vpop.permute.xlu0 %7817  ;;  %v8006_v38 = vpack.i.bf16 %v11974_v13, %v11971_v28  ;;  %v11993_v35 = vsel %vm603_vm7, %v4485_v61, %v4487_v53  ;;  %v4495_v33 = vrot.slane %v11821_v14, 2  ;;  %v4494_v61 = vrot.slane %v11801_v46, 2  ;;  %v13040_v13 = vld [vmem:[#allocation8_spill] sm:$0xff] }
 0x48b   : > { %v7820_v17 = vunpack.i.h.bf16 %v7818_v60  ;;  %v7819_v42 = vunpack.i.l.bf16 %v7818_v60  ;;  %5219 = vmatmul.mubr.f32.gmra.mrb[98].mxu1 %v4905_v49  ;;  %v12011_v9 = vsel %vm603_vm7, %v4490_v40, %v4492_v57  ;;  %v4497_v60 = vrot.slane %v11823_v48, 2 }
 0x48c   : > { %8007 = vrot.lane.b32.xlu0 %v8006_v38, %s8218_s20  ;;  %7117 = vmatpush1.bf16.msra.mxu1 %v11174_v50 }
 0x48d   : > { %4832 = vrot.lane.b32.xlu1 %v11981_v15, %s8218_s20  ;;  %v4938_v7 = vsel %vm196_vm0, %v11580_v0, %v7819_v42  ;;  %v4906_v30 = vsel %vm196_vm0, %v8130_v56, %v7820_v17  ;;  %7102 = vmatprep.subr.bf16.mxu1 %v12890_v25  ;;  %v11998_v0 = vsel %vm603_vm7, %v4489_v58, %v4490_v40  ;;  %v4500_v17 = vrot.slane %v11860_v12, 2  ;;  %v8132_v42 = vld [vmem:[#allocation2 + $0x30] sm:$0xff]  ;;  %v12029_v56 = vld [vmem:[#allocation2 + $0x198] sm:$0xff] }
 0x48e   : > { %v7823_v44 = vpop.permute.xlu1 %7822  ;;  %5223 = vmatprep.mubr.f32.mxu1 %v4938_v7  ;;  %v4499_v7 = vrot.slane %v11843_v34, 2  ;;  %13036 = vst [vmem:[#allocation50_spill] sm:$0xff] %v12029_v56 }
 0x48f   : > { %v7825_v47 = vunpack.i.h.bf16 %v7823_v44  ;;  %v7824_v6 = vunpack.i.l.bf16 %v7823_v44  ;;  %5224 = vmatmul.mubr.f32.gmra.mrb[100].mxu1 %v4906_v30  ;;  %v12031_v30 = vld [vmem:[#allocation2 + $0x1a0] sm:$0xff]  ;;  %v12034_v44 = vsel %vm603_vm7, %v4495_v33, %v4497_v60  ;;  %v8133_v60 = vld [vmem:[#allocation2 + $0x38] sm:$0xff] }
 0x490   : > { %4834 = vrot.lane.b32.xlu0 %v11993_v35, %s8218_s20  ;;  %7118 = vmatpush1.bf16.msra.mxu1 %v11203_v10  ;;  %v4502_v10 = vrot.slane %v11865_v51, 2  ;;  %13037 = vst [vmem:[#allocation51_spill] sm:$0xff] %v12031_v30  ;;  %v4505_v51 = vrot.slane %v11902_v23, 2 }
 0x491   : > { %4836 = vrot.lane.b32.xlu1 %v11998_v0, %s8218_s20  ;;  %v4939_v50 = vsel %vm196_vm0, %v11570_v3, %v7824_v6  ;;  %v4907_v8 = vsel %vm196_vm0, %v8131_v18, %v7825_v47  ;;  %7103 = vmatprep.subr.bf16.mxu1 %v12890_v25  ;;  %v12016_v3 = vsel %vm603_vm7, %v4494_v61, %v4495_v33  ;;  %v4504_v33 = vrot.slane %v11883_v45, 2  ;;  %v4302_v61 = vld [vmem:[#allocation2 + $0x190] sm:$0x3] }
 0x492   : > { %v7828_v49 = vpop.permute.xlu0 %7827  ;;  %5228 = vmatprep.mubr.f32.mxu1 %v4939_v50  ;;  %v12038_v6 = vsel %vm603_vm7, %v4499_v7, %v4500_v17  ;;  %v12048_v50 = vsel %vm603_vm7, %v4500_v17, %v4502_v10  ;;  %v4594_v18 = vrot.slane %v12029_v56, 1  ;;  %v4587_v7 = vrot.slane %v11971_v28, 2 }
 0x493   : > { %v7830_v38 = vunpack.i.h.bf16 %v7828_v49  ;;  %v7829_v53 = vunpack.i.l.bf16 %v7828_v49  ;;  %5229 = vmatmul.mubr.f32.gmra.mrb[102].mxu1 %v4907_v8  ;;  %v4595_v8 = vrot.slane %v12031_v30, 1  ;;  %v12061_v10 = vsel %vm603_vm7, %v4504_v33, %v4505_v51 }
 0x494   : > { %4838 = vrot.lane.b32.xlu0 %v12011_v9, %s8218_s20  ;;  %7119 = vmatpush1.bf16.msra.mxu1 %v11218_v55  ;;  %v4550_v55 = vrot.slane %v11971_v28, 1  ;;  %v4512_v33 = vrot.slane %v11950_v22, 2  ;;  %v4586_v56 = vrot.slane %v11959_v62, 2 }
 0x495   : > { %4840 = vrot.lane.b32.xlu1 %v12016_v3, %s8218_s20  ;;  %v4940_v48 = vsel %vm196_vm0, %v11627_v2, %v7829_v53  ;;  %v4908_v40 = vsel %vm196_vm0, %v8132_v42, %v7830_v38  ;;  %7104 = vmatprep.subr.bf16.mxu1 %v12890_v25  ;;  %v4510_v53 = vrot.slane %v11935_v26, 2  ;;  %v4509_v42 = vrot.slane %v11921_v19, 2 }
 0x496   : > { %v7833_v58 = vpop.permute.xlu1 %7832  ;;  %5233 = vmatprep.mubr.f32.mxu1 %v4940_v48  ;;  %5438 = vmatprep.mubr.f32.mxu0 %v4908_v40  ;;  %v4549_v48 = vrot.slane %v11959_v62, 1 }
 0x497   : > { %v7835_v57 = vunpack.i.h.bf16 %v7833_v58  ;;  %v7834_v47 = vunpack.i.l.bf16 %v7833_v58  ;;  %5234 = vmatmul.mubr.f32.gmra.mrb[104].mxu1 %v4908_v40  ;;  %v4507_v40 = vrot.slane %v11904_v27, 2  ;;  %v4596_v27 = vsel %vm522_vm2, %v4594_v18, %v4595_v8 }
 0x498   : > { %4842 = vrot.lane.b32.xlu0 %v12034_v44, %s8218_s20  ;;  %7120 = vmatpush1.bf16.msra.mxu1 %v11239_v32  ;;  %v4552_v32 = vrot.slane %v4302_v61, 1  ;;  %v12085_v30 = vsel %vm603_vm7, %v4509_v42, %v4510_v53 }
 0x499   : > { %4844 = vrot.lane.b32.xlu1 %v12038_v6, %s8218_s20  ;;  %v4941_v49 = vsel %vm196_vm0, %v11618_v21, %v7834_v47  ;;  %v12055_v38 = vsel %vm196_vm0, %v8133_v60, %v7835_v57  ;;  %7105 = vmatprep.subr.bf16.mxu1 %v12890_v25  ;;  %v12069_v47 = vsel %vm522_vm2, %v4549_v48, %v4550_v55 }
 0x49a   : > { %v7838_v17 = vpop.permute.xlu0 %7837  ;;  %5238 = vmatprep.mubr.f32.mxu1 %v4941_v49  ;;  %13038 = vst [vmem:[#allocation52_spill] sm:$0xff] %v12069_v47  ;;  %v12071_v49 = vld [vmem:[#allocation2 + $0x1a8] sm:$0x3]  ;;  %v8011_v18 = vpack.i.bf16 %v12085_v30, %v12069_v47  ;;  %v12092_v22 = vsel %vm603_vm7, %v4505_v51, %v4507_v40  ;;  %v8141_v47 = vld [vmem:[#allocation2 + $0x98] sm:$0xff] }
 0x49b   : > { %v7840_v58 = vunpack.i.h.bf16 %v7838_v17  ;;  %v7839_v57 = vunpack.i.l.bf16 %v7838_v17  ;;  %5239 = vmatmul.mubr.f32.gmra.mrb[106].mxu1 %v12055_v38  ;;  %13039 = vst [vmem:[#allocation53_spill] sm:$0xff] %v12071_v49  ;;  %v8134_v17 = vld [vmem:[#allocation2 + $0x48] sm:$0xff]  ;;  %v4597_v31 = vrot.slane %v12071_v49, 1  ;;  %v13050_v49 = vld [vmem:[#allocation9_spill] sm:$0xff] }
 0x49c   : > { %4846 = vrot.lane.b32.xlu0 %v12048_v50, %s8218_s20  ;;  %7121 = vmatpush1.bf16.msra.mxu1 %v13040_v13  ;;  %v12101_v13 = vsel %vm522_vm2, %v4550_v55, %v4552_v32 }
 0x49d   : > { %4848 = vrot.lane.b32.xlu1 %v12061_v10, %s8218_s20  ;;  %v4942_v60 = vsel %vm196_vm0, %v11675_v24, %v7839_v57  ;;  %v12082_v48 = vsel %vm196_vm0, %v8134_v17, %v7840_v58  ;;  %v4589_v57 = vrot.slane %v4302_v61, 2  ;;  %7106 = vmatprep.subr.bf16.mxu1 %v12890_v25  ;;  %v12098_v17 = vsel %vm603_vm7, %v4586_v56, %v4587_v7  ;;  %v8135_v61 = vld [vmem:[#allocation2 + $0x50] sm:$0xff]  ;;  %v13043_v56 = vld [vmem:[#allocation11_spill] sm:$0xff] }
 0x49e   : > { %v7843_v28 = vpop.permute.xlu1 %7842  ;;  %5243 = vmatprep.mubr.f32.mxu1 %v4942_v60  ;;  %13041 = vst [vmem:[#allocation8_spill] sm:$0xff] %v12098_v17  ;;  %13042 = vst [vmem:[#allocation54_spill] sm:$0xff] %v12101_v13  ;;  %v8021_v55 = vpack.i.bf16 %v12098_v17, %v4596_v27 }
 0x49f   : > { %v7845_v58 = vunpack.i.h.bf16 %v7843_v28  ;;  %v7844_v42 = vunpack.i.l.bf16 %v7843_v28  ;;  %5244 = vmatmul.mubr.f32.gmra.mrb[108].mxu1 %v12082_v48  ;;  %v12112_v28 = vsel %vm603_vm7, %v4510_v53, %v4512_v33  ;;  %v4598_v53 = vsel %vm522_vm2, %v4595_v8, %v4597_v31  ;;  %v8136_v33 = vld [vmem:[#allocation2 + $0x60] sm:$0xff] }
 0x4a0   : > { %4850 = vrot.lane.b32.xlu0 %v12092_v22, %s8218_s20  ;;  %7122 = vmatpush1.bf16.msra.mxu1 %v13043_v56  ;;  %v8016_v32 = vpack.i.bf16 %v12112_v28, %v12101_v13 }
 0x4a1   : > { %8012 = vrot.lane.b32.xlu1 %v8011_v18, %s8218_s20  ;;  %v4943_v51 = vsel %vm196_vm0, %v11669_v1, %v7844_v42  ;;  %v12109_v40 = vsel %vm196_vm0, %v8135_v61, %v7845_v58  ;;  %7107 = vmatprep.subr.bf16.mxu1 %v12890_v25  ;;  %v12121_v58 = vsel %vm603_vm7, %v4587_v7, %v4589_v57  ;;  %v13045_v61 = vld [vmem:[#allocation12_spill] sm:$0xff] }
 0x4a2   : > { %v7848_v60 = vpop.permute.xlu0 %7847  ;;  %5248 = vmatprep.mubr.f32.mxu1 %v4943_v51  ;;  %13044 = vst [vmem:[#allocation11_spill] sm:$0xff] %v12121_v58  ;;  %v8026_v7 = vpack.i.bf16 %v12121_v58, %v4598_v53 }
 0x4a3   : > { %v7850_v18 = vunpack.i.h.bf16 %v7848_v60  ;;  %v7849_v42 = vunpack.i.l.bf16 %v7848_v60  ;;  %5249 = vmatmul.mubr.f32.gmra.mrb[110].mxu1 %v12109_v40  ;;  %v8137_v60 = vld [vmem:[#allocation2 + $0x68] sm:$0xff] }
 0x4a4   : > { %8017 = vrot.lane.b32.xlu0 %v8016_v32, %s8218_s20  ;;  %7123 = vmatpush1.bf16.msra.mxu1 %v13045_v61  ;;  %v13046_v32 = vld [vmem:[#allocation15_spill] sm:$0xff] }
 0x4a5   : > { %8022 = vrot.lane.b32.xlu1 %v8021_v55, %s8218_s20  ;;  %v4944_v27 = vsel %vm196_vm0, %v11727_v37, %v7849_v42  ;;  %v12129_v51 = vsel %vm196_vm0, %v8136_v33, %v7850_v18  ;;  %7108 = vmatprep.subr.bf16.mxu1 %v12890_v25  ;;  %v8138_v33 = vld [vmem:[#allocation2 + $0x78] sm:$0xff] }
 0x4a6   : > { %v7853_v56 = vpop.permute.xlu1 %7852  ;;  %5253 = vmatprep.mubr.f32.mxu1 %v4944_v27 }
 0x4a7   : > { %v7855_v31 = vunpack.i.h.bf16 %v7853_v56  ;;  %v7854_v8 = vunpack.i.l.bf16 %v7853_v56  ;;  %5254 = vmatmul.mubr.f32.gmra.mrb[112].mxu1 %v12129_v51  ;;  %v13047_v56 = vld [vmem:[#allocation16_spill] sm:$0xff] }
 0x4a8   : > { %8027 = vrot.lane.b32.xlu0 %v8026_v7, %s8218_s20  ;;  %7124 = vmatpush1.bf16.msra.mxu1 %v13046_v32  ;;  %s12556_s20 = scalar_lea.vmem [#allocation5], %s12542_s5 }
 0x4a9   : > { %v4945_v57 = vsel %vm196_vm0, %v11718_v5, %v7854_v8  ;;  %v12139_v55 = vsel %vm196_vm0, %v8137_v60, %v7855_v31  ;;  %7109 = vmatprep.subr.bf16.mxu1 %v12890_v25  ;;  %v8139_v60 = vld [vmem:[#allocation2 + $0x80] sm:$0xff]  ;;  %s6126_s8 = sshll.u32 %s12556_s20, 4  ;;  %s12706_s8 = int_to_ptr.vmem [resolvable:$true] %s6126_s8 }
 0x4aa   : > { %v7858_v18 = vpop.permute.xlu0 %7857  ;;  %5258 = vmatprep.mubr.f32.mxu1 %v4945_v57  ;;  %p8159_p0 = scmp.lt.s32.totalorder %s12706_s8, %s8157_s13 }
 0x4ab   : > { %v7860_v42 = vunpack.i.h.bf16 %v7858_v18  ;;  %v7859_v53 = vunpack.i.l.bf16 %v7858_v18  ;;  %5259 = vmatmul.mubr.f32.gmra.mrb[114].mxu1 %v12139_v55  ;;  %v13048_v18 = vld [vmem:[#allocation19_spill] sm:$0xff] }
 0x4ac   : > { %7125 = vmatpush1.bf16.msra.mxu1 %v13047_v56  ;;  %v8140_v56 = vld [vmem:[#allocation2 + $0x90] sm:$0xff] }
 0x4ad   : > { %v4946_v27 = vsel %vm196_vm0, %v11770_v59, %v7859_v53  ;;  %v12147_v61 = vsel %vm196_vm0, %v8138_v33, %v7860_v42  ;;  %7110 = vmatprep.subr.bf16.mxu1 %v12890_v25 }
 0x4ae   : > { %v7863_v7 = vpop.permute.xlu1 %7862  ;;  %5263 = vmatprep.mubr.f32.mxu1 %v4946_v27 }
 0x4af   : > { %v7865_v31 = vunpack.i.h.bf16 %v7863_v7  ;;  %v7864_v8 = vunpack.i.l.bf16 %v7863_v7  ;;  %5264 = vmatmul.mubr.f32.gmra.mrb[116].mxu1 %v12147_v61 }
 0x4b0   : > { %7126 = vmatpush1.bf16.msra.mxu1 %v13048_v18 }
 0x4b1   : > { %v4947_v57 = vsel %vm196_vm0, %v11764_v41, %v7864_v8  ;;  %v12155_v32 = vsel %vm196_vm0, %v8139_v60, %v7865_v31  ;;  %7111 = vmatprep.subr.bf16.mxu1 %v12890_v25  ;;  %v6405_v31 = vld [vmem:[%s12757_s2 + $0x690] sm:$0xff]  ;;  %v6406_v8 = vld [vmem:[%s12757_s2 + $0x698] sm:$0xff] }
 0x4b2   : > { %v7868_v42 = vpop.permute.xlu0 %7867  ;;  %5268 = vmatprep.mubr.f32.mxu1 %v4947_v57  ;;  %v13049_v57 = vld [vmem:[#allocation20_spill] sm:$0xff] }
 0x4b3   : > { %v7870_v53 = vunpack.i.h.bf16 %v7868_v42  ;;  %v7869_v27 = vunpack.i.l.bf16 %v7868_v42  ;;  %5269 = vmatmul.mubr.f32.gmra.mrb[118].mxu1 %v12155_v32 }
 0x4b4   : > { %7127 = vmatpush1.bf16.msra.mxu1 %v13049_v57 }
 0x4b5   : > { %v4948_v33 = vsel %vm196_vm0, %v11817_v4, %v7869_v27  ;;  %v12163_v7 = vsel %vm196_vm0, %v8140_v56, %v7870_v53  ;;  %7112 = vmatprep.subr.bf16.mxu1 %v12890_v25  ;;  %v7088_v53 = vpack.c.bf16 %v6406_v8, %v6405_v31  ;;  %v6407_v31 = vld [vmem:[%s12757_s2 + $0x6a0] sm:$0xff]  ;;  %v6408_v8 = vld [vmem:[%s12757_s2 + $0x6a8] sm:$0xff] }
 0x4b6   : > { %v7873_v60 = vpop.permute.xlu1 %7872  ;;  %v7878_v18 = vpop.permute.xlu0 %7877  ;;  %5273 = vmatprep.mubr.f32.mxu1 %v4948_v33  ;;  %v13051_v33 = vld [vmem:[#allocation23_spill] sm:$0xff] }
 0x4b7   : > { %v7875_v42 = vunpack.i.h.bf16 %v7873_v60  ;;  %v7874_v27 = vunpack.i.l.bf16 %v7873_v60  ;;  %v7879_v13 = vunpack.i.l.bf16 %v7878_v18  ;;  %5274 = vmatmul.mubr.f32.gmra.mrb[120].mxu1 %v12163_v7  ;;  %v7880_v56 = vunpack.i.h.bf16 %v7878_v18 }
 0x4b8   : > { %7128 = vmatpush1.bf16.msra.mxu1 %v13051_v33 }
 0x4b9   : > { %v4949_v58 = vsel %vm196_vm0, %v11808_v54, %v7875_v42  ;;  %v4968_v17 = vsel %vm196_vm0, %v13050_v49, %v7874_v27  ;;  %v12179_v57 = vsel %vm196_vm0, %v8141_v47, %v7879_v13  ;;  %v13052_v49 = vld [vmem:[#allocation10_spill] sm:$0xff]  ;;  %v8142_v13 = vld [vmem:[#allocation2 + $0xa8] sm:$0xff]  ;;  %v7092_v42 = vpack.c.bf16 %v6408_v8, %v6407_v31  ;;  %7113 = vmatprep.subr.bf16.mxu1 %v12890_v25  ;;  %v13053_v8 = vld [vmem:[#allocation24_spill] sm:$0xff] }
 0x4ba   : > { %5278 = vmatprep.mubr.f32.mxu1 %v4949_v58  ;;  %5439 = vmatmul.mubr.f32.vlgmr.msra.gmra.mrb[96].mxu0 %v4968_v17  ;;  %v4969_v17 = vsel %vm196_vm0, %v13052_v49, %v7880_v56 }
 0x4bb   : > { %v7883_v62 = vpop.permute.xlu1 %7882  ;;  %7087 = vmatpush3.bf16.msra.mxu0 %v11546_v39  ;;  %5279 = vmatmul.mubr.f32.gmra.mrb[122].mxu1 %v12179_v57  ;;  %v6409_v39 = vld [vmem:[%s12757_s2 + $0x6b0] sm:$0xff] }
 0x4bc   : > { %v7885_v60 = vunpack.i.h.bf16 %v7883_v62  ;;  %v7884_v18 = vunpack.i.l.bf16 %v7883_v62  ;;  %5443 = vmatprep.mubr.f32.mxu0 %v12055_v38  ;;  %7089 = vmatprep.subr.bf16.mxu0 %v7088_v53  ;;  %v6410_v62 = vld [vmem:[%s12757_s2 + $0x6b8] sm:$0xff] }
 0x4bd   : > { %v7096_v31 = vpack.c.bf16 %v6410_v62, %v6409_v39  ;;  %7129 = vmatpush1.bf16.msra.mxu1 %v13053_v8  ;;  %v13055_v62 = vld [vmem:[#allocation14_spill] sm:$0xff] }
 0x4be   : > { %v4950_v47 = vsel %vm196_vm0, %v11857_v63, %v7884_v18  ;;  %v12196_v58 = vsel %vm196_vm0, %v8142_v13, %v7885_v60  ;;  %v7888_v27 = vpop.permute.xlu0 %7887  ;;  %5444 = vmatmul.mubr.f32.gmra.mrb[98].mxu0 %v4969_v17  ;;  %v13054_v13 = vld [vmem:[#allocation13_spill] sm:$0xff]  ;;  %7114 = vmatprep.subr.bf16.mxu1 %v12890_v25 }
 0x4bf   : > { %v7893_v38 = vpop.permute.xlu1 %7892  ;;  %5283 = vmatprep.mubr.f32.mxu1 %v4950_v47  ;;  %v7890_v33 = vunpack.i.h.bf16 %v7888_v27  ;;  %v7889_v18 = vunpack.i.l.bf16 %v7888_v27  ;;  %5448 = vmatprep.mubr.f32.mxu0 %v12082_v48  ;;  %v8143_v47 = vld [vmem:[#allocation2 + $0xb0] sm:$0xff] }
 0x4c0   : > { %v7894_v56 = vunpack.i.l.bf16 %v7893_v38  ;;  %5284 = vmatmul.mubr.f32.gmra.mrb[124].mxu1 %v12196_v58  ;;  %7091 = vmatpush3.bf16.msra.mxu0 %v7088_v53  ;;  %v7895_v60 = vunpack.i.h.bf16 %v7893_v38 }
 0x4c1   : > { %v4951_v49 = vsel %vm196_vm0, %v11863_v20, %v7890_v33  ;;  %v4970_v63 = vsel %vm196_vm0, %v13054_v13, %v7889_v18  ;;  %7093 = vmatprep.subr.bf16.mxu0 %v7092_v42  ;;  %7130 = vmatpush1.bf16.msra.mxu1 %v11514_v11  ;;  %v13056_v13 = vld [vmem:[#allocation17_spill] sm:$0xff] }
 0x4c2   : > { %v12213_v17 = vsel %vm196_vm0, %v8143_v47, %v7894_v56  ;;  %5288 = vmatprep.mubr.f32.mxu1 %v4951_v49  ;;  %5449 = vmatmul.mubr.f32.gmra.mrb[100].mxu0 %v4970_v63  ;;  %v4971_v38 = vsel %vm196_vm0, %v13055_v62, %v7895_v60  ;;  %v8144_v56 = vld [vmem:[#allocation2 + $0xc0] sm:$0xff]  ;;  %v8145_v47 = vld [vmem:[#allocation2 + $0xc8] sm:$0xff]  ;;  %v8146_v62 = vld [vmem:[#allocation2 + $0xd8] sm:$0xff] }
 0x4c3   : > { %v7898_v27 = vpop.permute.xlu0 %7897  ;;  %5453 = vmatprep.mubr.f32.mxu0 %v12109_v40  ;;  %7115 = vmatprep.subr.bf16.mxu1 %v12890_v25 }
 0x4c4   : > { %v7900_v48 = vunpack.i.h.bf16 %v7898_v27  ;;  %v7899_v53 = vunpack.i.l.bf16 %v7898_v27  ;;  %5289 = vmatmul.mubr.f32.gmra.mrb[126].mxu1 %v12213_v17  ;;  %7095 = vmatpush3.bf16.msra.mxu0 %v7092_v42 }
 0x4c5   : > { %7097 = vmatprep.subr.bf16.mxu0 %v7096_v31  ;;  %7131 = vmatpush1.bf16.msra.mxu1 %v11531_v43 }
 0x4c6   : > { %v4952_v39 = vsel %vm196_vm0, %v11897_v16, %v7899_v53  ;;  %v12223_v33 = vsel %vm196_vm0, %v8144_v56, %v7900_v48  ;;  %5454 = vmatmul.mubr.f32.gmra.mrb[102].mxu0 %v4971_v38  ;;  %v13057_v53 = vld [vmem:[#allocation18_spill] sm:$0xff] }
 0x4c7   : > { %v7903_v63 = vpop.permute.xlu1 %7902  ;;  %v7908_v18 = vpop.permute.xlu0 %7907  ;;  %5293 = vmatprep.mubr.f32.mxu1 %v4952_v39  ;;  %5458 = vmatprep.mubr.f32.mxu0 %v12129_v51 }
 0x4c8   : > { %v7905_v40 = vunpack.i.h.bf16 %v7903_v63  ;;  %v7904_v42 = vunpack.i.l.bf16 %v7903_v63  ;;  %v7909_v8 = vunpack.i.l.bf16 %v7908_v18  ;;  %5294 = vmatmul.mubr.f32.gmra.mrb[128].mxu1 %v12223_v33  ;;  %7099 = vmatpush3.bf16.msra.mxu0 %v7096_v31  ;;  %v7910_v60 = vunpack.i.h.bf16 %v7908_v18 }
 0x4ca   : > { %v4953_v49 = vsel %vm196_vm0, %v11900_v52, %v7905_v40  ;;  %v4972_v11 = vsel %vm196_vm0, %v13056_v13, %v7904_v42  ;;  %v12234_v27 = vsel %vm196_vm0, %v8145_v47, %v7909_v8  ;;  %v4973_v39 = vsel %vm196_vm0, %v13057_v53, %v7910_v60  ;;  %v13058_v8 = vld [vmem:[#allocation21_spill] sm:$0xff] }
 0x4cb   : > { %v7913_v48 = vpop.permute.xlu1 %7912  ;;  %5298 = vmatprep.mubr.f32.mxu1 %v4953_v49  ;;  %5459 = vmatmul.mubr.f32.gmra.mrb[104].mxu0 %v4972_v11  ;;  %v8147_v49 = vld [vmem:[#allocation2 + $0xe0] sm:$0xff] }
 0x4cc   : > { %v7915_v51 = vunpack.i.h.bf16 %v7913_v48  ;;  %v7914_v31 = vunpack.i.l.bf16 %v7913_v48  ;;  %5299 = vmatmul.mubr.f32.gmra.mrb[130].mxu1 %v12234_v27  ;;  %5463 = vmatprep.mubr.f32.mxu0 %v12139_v55 }
 0x4ce   : > { %v4954_v25 = vsel %vm196_vm0, %v11938_v29, %v7914_v31  ;;  %v12244_v38 = vsel %vm196_vm0, %v8146_v62, %v7915_v51  ;;  %v7918_v56 = vpop.permute.xlu0 %7917  ;;  %v13059_v51 = vld [vmem:[#allocation22_spill] sm:$0xff] }
 0x4cf   : > { %v7923_v43 = vpop.permute.xlu1 %7922  ;;  %5303 = vmatprep.mubr.f32.mxu1 %v4954_v25  ;;  %5464 = vmatmul.mubr.f32.gmra.mrb[106].mxu0 %v4973_v39  ;;  %v7920_v18 = vunpack.i.h.bf16 %v7918_v56  ;;  %v7919_v40 = vunpack.i.l.bf16 %v7918_v56  ;;  %v8148_v25 = vld [vmem:[#allocation2 + $0xf0] sm:$0xff] }
 0x4d0   : > { %v7924_v63 = vunpack.i.l.bf16 %v7923_v43  ;;  %5304 = vmatmul.mubr.f32.gmra.mrb[132].mxu1 %v12244_v38  ;;  %5468 = vmatprep.mubr.f32.mxu0 %v12147_v61  ;;  %v7925_v55 = vunpack.i.h.bf16 %v7923_v43 }
 0x4d1   : > { %v4955_v42 = vsel %vm196_vm0, %v11941_v36, %v7920_v18  ;;  %v4974_v60 = vsel %vm196_vm0, %v13058_v8, %v7919_v40  ;;  %v13060_v40 = vld [vmem:[#allocation25_spill] sm:$0xff] }
 0x4d2   : > { %v12253_v13 = vsel %vm196_vm0, %v8147_v49, %v7924_v63  ;;  %5308 = vmatprep.mubr.f32.mxu1 %v4955_v42  ;;  %v4975_v31 = vsel %vm196_vm0, %v13059_v51, %v7925_v55  ;;  %v8149_v42 = vld [vmem:[#allocation2 + $0xf8] sm:$0xff] }
 0x4d3   : > { %v7928_v11 = vpop.permute.xlu0 %7927  ;;  %5469 = vmatmul.mubr.f32.gmra.mrb[108].mxu0 %v4974_v60 }
 0x4d4   : > { %v7930_v47 = vunpack.i.h.bf16 %v7928_v11  ;;  %v7929_v48 = vunpack.i.l.bf16 %v7928_v11  ;;  %5309 = vmatmul.mubr.f32.gmra.mrb[134].mxu1 %v12253_v13  ;;  %5473 = vmatprep.mubr.f32.mxu0 %v12155_v32 }
 0x4d6   : > { %v4956_v61 = vsel %vm196_vm0, %v11981_v15, %v7929_v48  ;;  %v12262_v53 = vsel %vm196_vm0, %v8148_v25, %v7930_v47  ;;  %v13061_v47 = vld [vmem:[#allocation26_spill] sm:$0xff] }
 0x4d7   : > { %v7933_v39 = vpop.permute.xlu1 %7932  ;;  %v7938_v62 = vpop.permute.xlu0 %7937  ;;  %5313 = vmatprep.mubr.f32.mxu1 %v4956_v61  ;;  %5474 = vmatmul.mubr.f32.gmra.mrb[110].mxu0 %v4975_v31  ;;  %v8150_v61 = vld [vmem:[#allocation2 + $0x108] sm:$0xff] }
 0x4d8   : > { %v7935_v43 = vunpack.i.h.bf16 %v7933_v39  ;;  %v7934_v56 = vunpack.i.l.bf16 %v7933_v39  ;;  %v7939_v63 = vunpack.i.l.bf16 %v7938_v62  ;;  %5314 = vmatmul.mubr.f32.gmra.mrb[136].mxu1 %v12262_v53  ;;  %5478 = vmatprep.mubr.f32.mxu0 %v12163_v7  ;;  %v7940_v32 = vunpack.i.h.bf16 %v7938_v62 }
 0x4da   : > { %v4957_v18 = vsel %vm196_vm0, %v11993_v35, %v7935_v43  ;;  %v4976_v55 = vsel %vm196_vm0, %v13060_v40, %v7934_v56  ;;  %v12271_v8 = vsel %vm196_vm0, %v8149_v42, %v7939_v63  ;;  %v4977_v48 = vsel %vm196_vm0, %v13061_v47, %v7940_v32  ;;  %v13062_v63 = vld [vmem:[#allocation27_spill] sm:$0xff] }
 0x4db   : > { %v7943_v60 = vpop.permute.xlu1 %7942  ;;  %5318 = vmatprep.mubr.f32.mxu1 %v4957_v18  ;;  %5479 = vmatmul.mubr.f32.gmra.mrb[112].mxu0 %v4976_v55  ;;  %v8151_v18 = vld [vmem:[#allocation2 + $0x110] sm:$0xff] }
 0x4dc   : > { %v7945_v49 = vunpack.i.h.bf16 %v7943_v60  ;;  %v7944_v11 = vunpack.i.l.bf16 %v7943_v60  ;;  %5319 = vmatmul.mubr.f32.gmra.mrb[138].mxu1 %v12271_v8  ;;  %5483 = vmatprep.mubr.f32.mxu0 %v12179_v57 }
 0x4de   : > { %v4958_v7 = vsel %vm196_vm0, %v11998_v0, %v7944_v11  ;;  %v12280_v51 = vsel %vm196_vm0, %v8150_v61, %v7945_v49  ;;  %v13063_v49 = vld [vmem:[#allocation28_spill] sm:$0xff] }
 0x4df   : > { %v7953_v31 = vpop.permute.xlu1 %7952  ;;  %v7948_v25 = vpop.permute.xlu0 %7947  ;;  %5323 = vmatprep.mubr.f32.mxu1 %v4958_v7  ;;  %5484 = vmatmul.mubr.f32.gmra.mrb[114].mxu0 %v4977_v48 }
 0x4e0   : > { %v7954_v39 = vunpack.i.l.bf16 %v7953_v31  ;;  %v7950_v62 = vunpack.i.h.bf16 %v7948_v25  ;;  %v7949_v43 = vunpack.i.l.bf16 %v7948_v25  ;;  %5324 = vmatmul.mubr.f32.gmra.mrb[140].mxu1 %v12280_v51  ;;  %5488 = vmatprep.mubr.f32.mxu0 %v12196_v58  ;;  %v7955_v57 = vunpack.i.h.bf16 %v7953_v31 }
 0x4e2   : > { %v4959_v56 = vsel %vm196_vm0, %v12011_v9, %v7950_v62  ;;  %v4978_v32 = vsel %vm196_vm0, %v13062_v63, %v7949_v43  ;;  %v12289_v40 = vsel %vm196_vm0, %v8151_v18, %v7954_v39  ;;  %v4979_v11 = vsel %vm196_vm0, %v13063_v49, %v7955_v57  ;;  %v13064_v62 = vld [vmem:[#allocation29_spill] sm:$0xff] }
 0x4e3   : > { %5328 = vmatprep.mubr.f32.mxu1 %v4959_v56  ;;  %5489 = vmatmul.mubr.f32.gmra.mrb[116].mxu0 %v4978_v32  ;;  %v13065_v32 = vld [vmem:[#allocation30_spill] sm:$0xff] }
 0x4e4   : > { %v7958_v55 = vpop.permute.xlu0 %7957  ;;  %5329 = vmatmul.mubr.f32.gmra.mrb[142].mxu1 %v12289_v40  ;;  %5493 = vmatprep.mubr.f32.mxu0 %v12213_v17 }
 0x4e5   : > { %v7960_v42 = vunpack.i.h.bf16 %v7958_v55  ;;  %v7959_v60 = vunpack.i.l.bf16 %v7958_v55 }
 0x4e7   : > { %v4960_v58 = vsel %vm196_vm0, %v12016_v3, %v7959_v60  ;;  %v12299_v7 = vsel %vm196_vm0, %v11801_v46, %v7960_v42  ;;  %v7963_v47 = vpop.permute.xlu1 %7962  ;;  %5494 = vmatmul.mubr.f32.gmra.mrb[118].mxu0 %v4979_v11 }
 0x4e8   : > { %v7968_v48 = vpop.permute.xlu0 %7967  ;;  %5333 = vmatprep.mubr.f32.mxu1 %v4960_v58  ;;  %v7965_v61 = vunpack.i.h.bf16 %v7963_v47  ;;  %v7964_v31 = vunpack.i.l.bf16 %v7963_v47  ;;  %5498 = vmatprep.mubr.f32.mxu0 %v12223_v33  ;;  %v13066_v47 = vld [vmem:[#allocation31_spill] sm:$0xff] }
 0x4e9   : > { %v7969_v25 = vunpack.i.l.bf16 %v7968_v48  ;;  %5334 = vmatmul.mubr.f32.gmra.mrb[144].mxu1 %v12299_v7  ;;  %v7970_v17 = vunpack.i.h.bf16 %v7968_v48 }
 0x4ea   : > { %v4961_v39 = vsel %vm196_vm0, %v12034_v44, %v7965_v61  ;;  %v4980_v43 = vsel %vm196_vm0, %v13064_v62, %v7964_v31 }
 0x4eb   : > { %v12309_v46 = vsel %vm196_vm0, %v11821_v14, %v7969_v25  ;;  %v7973_v57 = vpop.permute.xlu1 %7972  ;;  %5338 = vmatprep.mubr.f32.mxu1 %v4961_v39  ;;  %5499 = vmatmul.mubr.f32.gmra.mrb[120].mxu0 %v4980_v43  ;;  %v4981_v18 = vsel %vm196_vm0, %v13065_v32, %v7970_v17  ;;  %v13067_v17 = vld [vmem:[#allocation32_spill] sm:$0xff]  ;;  %v13068_v32 = vld [vmem:[#allocation33_spill] sm:$0xff] }
 0x4ec   : > { %v7975_v56 = vunpack.i.h.bf16 %v7973_v57  ;;  %v7974_v63 = vunpack.i.l.bf16 %v7973_v57  ;;  %5503 = vmatprep.mubr.f32.mxu0 %v12234_v27 }
 0x4ed   : > { %5339 = vmatmul.mubr.f32.gmra.mrb[146].mxu1 %v12309_v46 }
 0x4ee   : > { %v4962_v33 = vsel %vm196_vm0, %v12038_v6, %v7974_v63  ;;  %v12319_v55 = vsel %vm196_vm0, %v11843_v34, %v7975_v56  ;;  %v7978_v42 = vpop.permute.xlu0 %7977 }
 0x4ef   : > { %v7983_v14 = vpop.permute.xlu1 %7982  ;;  %5343 = vmatprep.mubr.f32.mxu1 %v4962_v33  ;;  %5504 = vmatmul.mubr.f32.gmra.mrb[122].mxu0 %v4981_v18  ;;  %v7980_v58 = vunpack.i.h.bf16 %v7978_v42  ;;  %v7979_v49 = vunpack.i.l.bf16 %v7978_v42 }
 0x4f0   : > { %v7984_v60 = vunpack.i.l.bf16 %v7983_v14  ;;  %5508 = vmatprep.mubr.f32.mxu0 %v12244_v38  ;;  %v7985_v27 = vunpack.i.h.bf16 %v7983_v14 }
 0x4f1   : > { %5344 = vmatmul.mubr.f32.gmra.mrb[148].mxu1 %v12319_v55  ;;  %v4963_v11 = vsel %vm196_vm0, %v12048_v50, %v7980_v58  ;;  %v4982_v48 = vsel %vm196_vm0, %v13066_v47, %v7979_v49  ;;  %v13069_v58 = vld [vmem:[#allocation34_spill] sm:$0xff] }
 0x4f2   : > { %v12329_v34 = vsel %vm196_vm0, %v11860_v12, %v7984_v60  ;;  %5348 = vmatprep.mubr.f32.mxu1 %v4963_v11  ;;  %v4983_v39 = vsel %vm196_vm0, %v13067_v17, %v7985_v27 }
 0x4f3   : > { %5509 = vmatmul.mubr.f32.gmra.mrb[124].mxu0 %v4982_v48 }
 0x4f4   : > { %v7988_v61 = vpop.permute.xlu0 %7987  ;;  %5513 = vmatprep.mubr.f32.mxu0 %v12253_v13 }
 0x4f5   : > { %v7990_v31 = vunpack.i.h.bf16 %v7988_v61  ;;  %v7989_v25 = vunpack.i.l.bf16 %v7988_v61  ;;  %5349 = vmatmul.mubr.f32.gmra.mrb[150].mxu1 %v12329_v34  ;;  %v13070_v61 = vld [vmem:[#allocation35_spill] sm:$0xff] }
 0x4f7   : > { %v4964_v38 = vsel %vm196_vm0, %v12061_v10, %v7989_v25  ;;  %v12339_v62 = vsel %vm196_vm0, %v11883_v45, %v7990_v31  ;;  %v7993_v12 = vpop.permute.xlu1 %7992  ;;  %5514 = vmatmul.mubr.f32.gmra.mrb[126].mxu0 %v4983_v39  ;;  %v13076_v25 = vld [vmem:[#allocation40_spill] sm:$0xff] }
 0x4f8   : > { %v7998_v43 = vpop.permute.xlu0 %7997  ;;  %5353 = vmatprep.mubr.f32.mxu1 %v4964_v38  ;;  %v7995_v57 = vunpack.i.h.bf16 %v7993_v12  ;;  %v7994_v56 = vunpack.i.l.bf16 %v7993_v12  ;;  %5518 = vmatprep.mubr.f32.mxu0 %v12262_v53 }
 0x4f9   : > { %v7999_v63 = vunpack.i.l.bf16 %v7998_v43  ;;  %5354 = vmatmul.mubr.f32.gmra.mrb[152].mxu1 %v12339_v62  ;;  %v8000_v13 = vunpack.i.h.bf16 %v7998_v43 }
 0x4fa   : > { %v4965_v33 = vsel %vm196_vm0, %v12092_v22, %v7995_v57  ;;  %v4984_v18 = vsel %vm196_vm0, %v13068_v32, %v7994_v56  ;;  %v13083_v32 = vld [vmem:[#allocation48_spill] sm:$0xff] }
 0x4fb   : > { %v12349_v45 = vsel %vm196_vm0, %v11902_v23, %v7999_v63  ;;  %v8003_v14 = vpop.permute.xlu1 %8002  ;;  %5358 = vmatprep.mubr.f32.mxu1 %v4965_v33  ;;  %5519 = vmatmul.mubr.f32.gmra.mrb[128].mxu0 %v4984_v18  ;;  %v4985_v49 = vsel %vm196_vm0, %v13069_v58, %v8000_v13  ;;  %v13082_v13 = vld [vmem:[#allocation46_spill] sm:$0xff]  ;;  %v13086_v58 = vld [vmem:[#allocation51_spill] sm:$0xff] }
 0x4fc   : > { %v8005_v42 = vunpack.i.h.bf16 %v8003_v14  ;;  %v8004_v60 = vunpack.i.l.bf16 %v8003_v14  ;;  %5523 = vmatprep.mubr.f32.mxu0 %v12271_v8  ;;  %v13084_v14 = vld [vmem:[#allocation49_spill] sm:$0xff] }
 0x4fd   : > { %5359 = vmatmul.mubr.f32.gmra.mrb[154].mxu1 %v12349_v45 }
 0x4fe   : > { %v4966_v53 = vsel %vm196_vm0, %v12085_v30, %v8004_v60  ;;  %v12359_v27 = vsel %vm196_vm0, %v11921_v19, %v8005_v42  ;;  %v8008_v23 = vpop.permute.xlu0 %8007  ;;  %v13085_v60 = vld [vmem:[#allocation50_spill] sm:$0xff] }
 0x4ff   : > { %5363 = vmatprep.mubr.f32.mxu1 %v4966_v53  ;;  %5524 = vmatmul.mubr.f32.gmra.mrb[130].mxu0 %v4985_v49  ;;  %v8010_v11 = vunpack.i.h.bf16 %v8008_v23  ;;  %v8009_v47 = vunpack.i.l.bf16 %v8008_v23  ;;  %v4833_v19 = vpop.permute.xlu1 %4832  ;;  %v4599_v53 = vrot.slane %v13085_v60, 2  ;;  %v4600_v49 = vrot.slane %v13086_v58, 2 }
 0x500   : > { %6716 = vmatprep.mubr.msk.f32.mxu0 %vm196_vm0, %v11627_v2  ;;  %v4986_v2 = vsel %vm196_vm0, %v13070_v61, %v4833_v19  ;;  %v13090_v19 = vld [vmem:[#allocation11_spill] sm:$0xff]  ;;  %v13091_v61 = vld [vmem:[#allocation54_spill] sm:$0xff] }
 0x501   : > { %5364 = vmatmul.mubr.f32.gmra.mrb[156].mxu1 %v12359_v27  ;;  %v4967_v8 = vsel %vm196_vm0, %v12112_v28, %v8009_v47  ;;  %v4935_v48 = vsel %vm196_vm0, %v11935_v26, %v8010_v11  ;;  %v13088_v11 = vld [vmem:[#allocation8_spill] sm:$0xff]  ;;  %v13089_v47 = vld [vmem:[#allocation53_spill] sm:$0xff] }
 0x502   : > { %5368 = vmatprep.mubr.f32.mxu1 %v4967_v8  ;;  %v4835_v31 = vpop.permute.xlu0 %4834  ;;  %v4602_v8 = vrot.slane %v13089_v47, 2 }
 0x503   : > { %6717 = vmatmul.mubr.msk.f32.vlgmr.msra.gmra.mrb[132].mxu0 %vm196_vm0, %v11618_v21  ;;  %v13071_v21 = vld [vmem:[#allocation36_spill] sm:$0xff]  ;;  %v4837_v26 = vpop.permute.xlu1 %4836 }
 0x504   : > { %6719 = vmatprep.mubr.msk.f32.mxu0 %vm196_vm0, %v11675_v24  ;;  %v4987_v24 = vsel %vm196_vm0, %v13071_v21, %v4835_v31 }
 0x505   : > { %5369 = vmatmul.mubr.f32.gmra.mrb[158].mxu1 %v4935_v48 }
 0x506   : > { %5528 = vmatprep.mubr.f32.mxu1 %v12280_v51  ;;  %v4839_v51 = vpop.permute.xlu0 %4838 }
 0x507   : > { %6720 = vmatmul.mubr.msk.f32.gmra.mrb[134].mxu0 %vm196_vm0, %v11669_v1  ;;  %v13072_v1 = vld [vmem:[#allocation37_spill] sm:$0xff] }
 0x508   : > { %6722 = vmatprep.mubr.msk.f32.mxu0 %vm196_vm0, %v11727_v37  ;;  %v4988_v37 = vsel %vm196_vm0, %v13072_v1, %v4837_v26 }
 0x509   : > { %5529 = vmatmul.mubr.f32.vlgmr.msra.gmra.mrb[132].mxu1 %v4986_v2  ;;  %v4603_v2 = vsel %vm603_vm7, %v4600_v49, %v4602_v8 }
 0x50a   : > { %5533 = vmatprep.mubr.f32.mxu1 %v12289_v40 }
 0x50b   : > { %6723 = vmatmul.mubr.msk.f32.gmra.mrb[136].mxu0 %vm196_vm0, %v11718_v5  ;;  %v4841_v5 = vpop.permute.xlu1 %4840 }
 0x50c   : > { %6725 = vmatprep.mubr.msk.f32.mxu0 %vm196_vm0, %v11770_v59  ;;  %v13073_v59 = vld [vmem:[#allocation38_spill] sm:$0xff] }
 0x50d   : > { %5534 = vmatmul.mubr.f32.gmra.mrb[134].mxu1 %v4987_v24  ;;  %v4989_v40 = vsel %vm196_vm0, %v13073_v59, %v4839_v51 }
 0x50e   : > { %5538 = vmatprep.mubr.f32.mxu1 %v12299_v7  ;;  %v13074_v7 = vld [vmem:[#allocation41_spill] sm:$0xff] }
 0x50f   : > { %6726 = vmatmul.mubr.msk.f32.gmra.mrb[138].mxu0 %vm196_vm0, %v11764_v41  ;;  %v4843_v41 = vpop.permute.xlu0 %4842 }
 0x510   : > { %6728 = vmatprep.mubr.msk.f32.mxu0 %vm196_vm0, %v11817_v4  ;;  %v13075_v4 = vld [vmem:[#allocation39_spill] sm:$0xff] }
 0x511   : > { %5539 = vmatmul.mubr.f32.gmra.mrb[136].mxu1 %v4988_v37 }
 0x512   : > { %5543 = vmatprep.mubr.f32.mxu1 %v12309_v46  ;;  %v4990_v46 = vsel %vm196_vm0, %v13075_v4, %v4841_v5 }
 0x513   : > { %6729 = vmatmul.mubr.msk.f32.gmra.mrb[140].mxu0 %vm196_vm0, %v11808_v54  ;;  %v4845_v54 = vpop.permute.xlu1 %4844 }
 0x514   : > { %6731 = vmatprep.mubr.msk.f32.mxu0 %vm196_vm0, %v13074_v7 }
 0x515   : > { %5544 = vmatmul.mubr.f32.gmra.mrb[138].mxu1 %v4989_v40 }
 0x516   : > { %5548 = vmatprep.mubr.f32.mxu1 %v12319_v55  ;;  %v4991_v55 = vsel %vm196_vm0, %v13076_v25, %v4843_v41 }
 0x517   : > { %6732 = vmatmul.mubr.msk.f32.gmra.mrb[142].mxu0 %vm196_vm0, %v11863_v20  ;;  %v4847_v20 = vpop.permute.xlu0 %4846  ;;  %v4849_v38 = vpop.permute.xlu1 %4848 }
 0x518   : > { %6734 = vmatprep.mubr.msk.f32.mxu0 %vm196_vm0, %v11897_v16  ;;  %v13077_v16 = vld [vmem:[#allocation42_spill] sm:$0xff] }
 0x519   : > { %5549 = vmatmul.mubr.f32.gmra.mrb[140].mxu1 %v4990_v46 }
 0x51a   : > { %5553 = vmatprep.mubr.f32.mxu1 %v12329_v34  ;;  %v4992_v34 = vsel %vm196_vm0, %v13077_v16, %v4845_v54 }
 0x51b   : > { %6735 = vmatmul.mubr.msk.f32.gmra.mrb[144].mxu0 %vm196_vm0, %v11900_v52  ;;  %v4851_v52 = vpop.permute.xlu0 %4850 }
 0x51c   : > { %6737 = vmatprep.mubr.msk.f32.mxu0 %vm196_vm0, %v11938_v29  ;;  %v13078_v29 = vld [vmem:[#allocation43_spill] sm:$0xff] }
 0x51d   : > { %5554 = vmatmul.mubr.f32.gmra.mrb[142].mxu1 %v4991_v55  ;;  %v4993_v17 = vsel %vm196_vm0, %v13078_v29, %v4847_v20 }
 0x51e   : > { %5558 = vmatprep.mubr.f32.mxu1 %v12339_v62 }
 0x51f   : > { %6738 = vmatmul.mubr.msk.f32.gmra.mrb[146].mxu0 %vm196_vm0, %v11941_v36  ;;  %v8013_v36 = vpop.permute.xlu1 %8012 }
 0x520   : > { %6740 = vmatprep.mubr.msk.f32.mxu0 %vm196_vm0, %v11981_v15  ;;  %v13079_v15 = vld [vmem:[#allocation44_spill] sm:$0xff]  ;;  %v8014_v62 = vunpack.i.l.bf16 %v8013_v36  ;;  %v8015_v12 = vunpack.i.h.bf16 %v8013_v36  ;;  %v12481_v36 = vld [vmem:[%s12758_s3 + $0x2] ss:$0 sm:$0xff] }
 0x521   : > { %5559 = vmatmul.mubr.f32.gmra.mrb[144].mxu1 %v4992_v34  ;;  %v4994_v39 = vsel %vm196_vm0, %v13079_v15, %v4849_v38 }
 0x522   : > { %5563 = vmatprep.mubr.f32.mxu1 %v12349_v45 }
 0x523   : > { %6741 = vmatmul.mubr.msk.f32.gmra.mrb[148].mxu0 %vm196_vm0, %v11993_v35  ;;  %v8018_v35 = vpop.permute.xlu0 %8017  ;;  %v8023_v63 = vpop.permute.xlu1 %8022 }
 0x524   : > { %6743 = vmatprep.mubr.msk.f32.mxu0 %vm196_vm0, %v11998_v0  ;;  %v13080_v0 = vld [vmem:[#allocation45_spill] sm:$0xff]  ;;  %v8019_v57 = vunpack.i.l.bf16 %v8018_v35  ;;  %v8024_v33 = vunpack.i.l.bf16 %v8023_v63  ;;  %v8025_v45 = vunpack.i.h.bf16 %v8023_v63 }
 0x525   : > { %5564 = vmatmul.mubr.f32.gmra.mrb[146].mxu1 %v4993_v17  ;;  %v4995_v43 = vsel %vm196_vm0, %v13080_v0, %v4851_v52 }
 0x526   : > { %5568 = vmatprep.mubr.f32.mxu1 %v12359_v27 }
 0x527   : > { %6744 = vmatmul.mubr.msk.f32.gmra.mrb[150].mxu0 %vm196_vm0, %v12011_v9  ;;  %v13081_v9 = vld [vmem:[#allocation47_spill] sm:$0xff]  ;;  %v8028_v18 = vpop.permute.xlu0 %8027 }
 0x528   : > { %6746 = vmatprep.mubr.msk.f32.mxu0 %vm196_vm0, %v12016_v3  ;;  %v5000_v56 = vsel %vm196_vm0, %v13081_v9, %v8014_v62  ;;  %v8020_v3 = vunpack.i.h.bf16 %v8018_v35  ;;  %v8029_v42 = vunpack.i.l.bf16 %v8028_v18  ;;  %v8030_v27 = vunpack.i.h.bf16 %v8028_v18 }
 0x529   : > { %5569 = vmatmul.mubr.f32.gmra.mrb[148].mxu1 %v4994_v39 }
 0x52a   : > { %5573 = vmatprep.mubr.f32.mxu1 %v4935_v48  ;;  %v4601_v48 = vsel %vm603_vm7, %v4599_v53, %v4600_v49 }
 0x52b   : > { %6747 = vmatmul.mubr.msk.f32.gmra.mrb[152].mxu0 %vm196_vm0, %v12034_v44  ;;  %v4996_v44 = vsel %vm196_vm0, %v13082_v13, %v8015_v12 }
 0x52c   : > { %6749 = vmatprep.mubr.msk.f32.mxu0 %vm196_vm0, %v12038_v6  ;;  %v5001_v6 = vsel %vm196_vm0, %v13083_v32, %v8019_v57 }
 0x52d   : > { %5574 = vmatmul.mubr.f32.gmra.mrb[150].mxu1 %v4995_v43 }
 0x52e   : > { %5578 = vmatprep.mubr.f32.mxu1 %v5000_v56 }
 0x52f   : > { %6750 = vmatmul.mubr.msk.f32.gmra.mrb[154].mxu0 %vm196_vm0, %v12048_v50  ;;  %v4997_v50 = vsel %vm196_vm0, %v13084_v14, %v8020_v3 }
 0x530   : > { %6752 = vmatprep.mubr.msk.f32.mxu0 %vm196_vm0, %v12061_v10  ;;  %v5002_v10 = vsel %vm196_vm0, %v13085_v60, %v8024_v33 }
 0x531   : > { %5579 = vmatmul.mubr.f32.gmra.mrb[152].mxu1 %v4996_v44 }
 0x532   : > { %5583 = vmatprep.mubr.f32.mxu1 %v5001_v6 }
 0x533   : > { %6753 = vmatmul.mubr.msk.f32.gmra.mrb[156].mxu0 %vm196_vm0, %v12092_v22  ;;  %v13087_v22 = vld [vmem:[#allocation52_spill] sm:$0xff] }
 0x534   : > { %6755 = vmatprep.mubr.msk.f32.mxu0 %vm196_vm0, %v12085_v30  ;;  %v4998_v23 = vsel %vm196_vm0, %v13087_v22, %v8025_v45  ;;  %v5003_v30 = vsel %vm196_vm0, %v13086_v58, %v8029_v42 }
 0x535   : > { %5584 = vmatmul.mubr.f32.gmra.mrb[154].mxu1 %v4997_v50 }
 0x536   : > { %5588 = vmatprep.mubr.f32.mxu1 %v5002_v10 }
 0x537   : > { %6756 = vmatmul.mubr.msk.f32.gmra.mrb[158].mxu0 %vm196_vm0, %v12112_v28  ;;  %v4999_v28 = vsel %vm196_vm0, %v13091_v61, %v8030_v27 }
 0x538   : > { %6758 = vmatprep.mubr.msk.f32.mxu0 %vm196_vm0, %v13088_v11 }
 0x539   : > { %5589 = vmatmul.mubr.f32.gmra.mrb[156].mxu1 %v4998_v23 }
 0x53a   : > { %5593 = vmatprep.mubr.f32.mxu1 %v5003_v30 }
 0x53b   : > { %6759 = vmatmul.mubr.msk.f32.gmra.mrb[160].mxu0 %vm196_vm0, %v13090_v19 }
 0x53c   : > { %6761 = vmatprep.mubr.msk.f32.mxu0 %vm196_vm0, %v4601_v48 }
 0x53d   : > { %5594 = vmatmul.mubr.f32.gmra.mrb[158].mxu1 %v4999_v28 }
 0x53f   : > { %6762 = vmatmul.mubr.msk.f32.gmra.mrb[162].mxu0 %vm196_vm0, %v4603_v2 }
 0x55a   : > { %v5215_v31 = vpop.f32.mrb[96].mxu1 }
 0x55b   : > { %v5217_v21 = vpop.f32.mrb[97].mxu1  ;;  %v5216_v62 = vadd.f32 %v12481_v36, %v5215_v31 }
 0x55e   : > { %v5220_v24 = vpop.f32.mrb[98].mxu1 }
 0x55f   : > { %v5222_v26 = vpop.f32.mrb[99].mxu1  ;;  %v5221_v9 = vadd.f32 %v12481_v36, %v5220_v24 }
 0x562   : > { %v5225_v1 = vpop.f32.mrb[100].mxu1 }
 0x563   : > { %v5227_v37 = vpop.f32.mrb[101].mxu1  ;;  %v5226_v33 = vadd.f32 %v12481_v36, %v5225_v1 }
 0x566   : > { %v5230_v51 = vpop.f32.mrb[102].mxu1 }
 0x567   : > { %v5232_v5 = vpop.f32.mrb[103].mxu1  ;;  %v5231_v50 = vadd.f32 %v12481_v36, %v5230_v51 }
 0x56a   : > { %v5235_v59 = vpop.f32.mrb[104].mxu1 }
 0x56b   : > { %v5237_v40 = vpop.f32.mrb[105].mxu1  ;;  %v5236_v49 = vadd.f32 %v12481_v36, %v5235_v59 }
 0x56e   : > { %v5240_v7 = vpop.f32.mrb[106].mxu1 }
 0x56f   : > { %v5242_v41 = vpop.f32.mrb[107].mxu1  ;;  %v5241_v47 = vadd.f32 %v12481_v36, %v5240_v7 }
 0x572   : > { %v5245_v4 = vpop.f32.mrb[108].mxu1 }
 0x573   : > { %v5247_v46 = vpop.f32.mrb[109].mxu1  ;;  %v5246_v61 = vadd.f32 %v12481_v36, %v5245_v4 }
 0x576   : > { %v5250_v54 = vpop.f32.mrb[110].mxu1 }
 0x577   : > { %v5252_v25 = vpop.f32.mrb[111].mxu1  ;;  %v5251_v21 = vadd.f32 %v12481_v36, %v5250_v54 }
 0x57a   : > { %v5255_v55 = vpop.f32.mrb[112].mxu1 }
 0x57b   : > { %v5257_v20 = vpop.f32.mrb[113].mxu1  ;;  %v5256_v37 = vadd.f32 %v12481_v36, %v5255_v55 }
 0x57e   : > { %v5260_v38 = vpop.f32.mrb[114].mxu1 }
 0x57f   : > { %v5262_v16 = vpop.f32.mrb[115].mxu1  ;;  %v5261_v40 = vadd.f32 %v12481_v36, %v5260_v38 }
 0x582   : > { %v5265_v34 = vpop.f32.mrb[116].mxu1 }
 0x583   : > { %v5267_v52 = vpop.f32.mrb[117].mxu1  ;;  %v5266_v46 = vadd.f32 %v12481_v36, %v5265_v34 }
 0x586   : > { %v5270_v29 = vpop.f32.mrb[118].mxu1 }
 0x587   : > { %v5272_v17 = vpop.f32.mrb[119].mxu1  ;;  %v5271_v16 = vadd.f32 %v12481_v36, %v5270_v29 }
 0x58a   : > { %v5275_v15 = vpop.f32.mrb[120].mxu1 }
 0x58b   : > { %v5277_v39 = vpop.f32.mrb[121].mxu1 }
 0x58c   : > { %v5276_v39 = vadd.f32 %v12481_v36, %v5275_v15 }
 0x58d   : > { %v5440_v35 = vpop.f32.mrb[96].mxu0 }
 0x58e   : > { %v12484_v12 = vadd.f32 %v5440_v35, %v5216_v62  ;;  %v5280_v0 = vpop.f32.mrb[122].mxu1  ;;  %v5442_v43 = vpop.f32.mrb[97].mxu0 }
 0x58f   : > { %v5282_v57 = vpop.f32.mrb[123].mxu1  ;;  %v5281_v43 = vadd.f32 %v12481_v36, %v5280_v0 }
 0x591   : > { %v5445_v56 = vpop.f32.mrb[98].mxu0 }
 0x592   : > { %v12487_v63 = vadd.f32 %v5445_v56, %v5221_v9  ;;  %v5447_v13 = vpop.f32.mrb[99].mxu0 }
 0x593   : > { %v5285_v3 = vpop.f32.mrb[124].mxu1 }
 0x594   : > { %v5287_v44 = vpop.f32.mrb[125].mxu1  ;;  %v5286_v56 = vadd.f32 %v12481_v36, %v5285_v3 }
 0x595   : > { %v5450_v32 = vpop.f32.mrb[100].mxu0 }
 0x596   : > { %v12490_v6 = vadd.f32 %v5450_v32, %v5226_v33  ;;  %v5452_v45 = vpop.f32.mrb[101].mxu0 }
 0x597   : > { %v5290_v18 = vpop.f32.mrb[126].mxu1 }
 0x598   : > { %v5292_v14 = vpop.f32.mrb[127].mxu1  ;;  %v5291_v33 = vadd.f32 %v12481_v36, %v5290_v18 }
 0x599   : > { %v5455_v42 = vpop.f32.mrb[102].mxu0 }
 0x59a   : > { %v12493_v60 = vadd.f32 %v5455_v42, %v5231_v50  ;;  %v5457_v53 = vpop.f32.mrb[103].mxu0 }
 0x59b   : > { %v5295_v10 = vpop.f32.mrb[128].mxu1 }
 0x59c   : > { %v5297_v58 = vpop.f32.mrb[129].mxu1  ;;  %v5296_v14 = vadd.f32 %v12481_v36, %v5295_v10  ;;  %v5889_v10 = vld [vmem:[#allocation3 + $0x8] sm:$0xff] }
 0x59e   : > { %v5460_v27 = vpop.f32.mrb[104].mxu0 }
 0x59f   : > { %v12496_v22 = vadd.f32 %v5460_v27, %v5236_v49  ;;  %v5300_v23 = vpop.f32.mrb[130].mxu1  ;;  %v5462_v11 = vpop.f32.mrb[105].mxu0 }
 0x5a0   : > { %v5302_v30 = vpop.f32.mrb[131].mxu1  ;;  %v5301_v53 = vadd.f32 %v12481_v36, %v5300_v23  ;;  %v5825_v11 = vld [vmem:[#allocation4 + $0x8] sm:$0xff] }
 0x5a2   : > { %v5465_v8 = vpop.f32.mrb[106].mxu0 }
 0x5a3   : > { %v12499_v48 = vadd.f32 %v5465_v8, %v5241_v47  ;;  %v5467_v19 = vpop.f32.mrb[107].mxu0  ;;  %v5824_v47 = vld [vmem:[#allocation4] sm:$0xff] }
 0x5a4   : > { %v5856_v23 = vmul.f32 0.6666667, %v5824_v47 }
 0x5a6   : > { %v5470_v28 = vpop.f32.mrb[108].mxu0 }
 0x5a7   : > { %v12502_v2 = vadd.f32 %v5470_v28, %v5246_v61  ;;  %v5472_v31 = vpop.f32.mrb[109].mxu0  ;;  %v5888_v61 = vld [vmem:[#allocation3] sm:$0xff]  ;;  %v5857_v28 = vmul.f32 0.6666667, %v5825_v11 }
 0x5aa   : > { %v5475_v24 = vpop.f32.mrb[110].mxu0 }
 0x5ab   : > { %v12505_v26 = vadd.f32 %v5475_v24, %v5251_v21  ;;  %v5477_v1 = vpop.f32.mrb[111].mxu0 }
 0x5ae   : > { %v5480_v51 = vpop.f32.mrb[112].mxu0 }
 0x5af   : > { %v12508_v5 = vadd.f32 %v5480_v51, %v5256_v37  ;;  %v5482_v59 = vpop.f32.mrb[113].mxu0  ;;  %v5826_v51 = vld [vmem:[#allocation4 + $0x10] sm:$0xff] }
 0x5b0   : > { %v6017_v59 = vld [vmem:[%s8400_s11 + $0x8] sm:$0xff] }
 0x5b2   : > { %v5485_v7 = vpop.f32.mrb[114].mxu0 }
 0x5b3   : > { %v12511_v41 = vadd.f32 %v5485_v7, %v5261_v40  ;;  %v5487_v4 = vpop.f32.mrb[115].mxu0  ;;  %v5891_v7 = vld [vmem:[#allocation3 + $0x18] sm:$0xff] }
 0x5b6   : > { %v5490_v25 = vpop.f32.mrb[116].mxu0 }
 0x5b7   : > { %v12514_v54 = vadd.f32 %v5490_v25, %v5266_v46  ;;  %v5492_v20 = vpop.f32.mrb[117].mxu0 }
 0x5b8   : > { %v6016_v20 = vld [vmem:[%s8400_s11] sm:$0xff] }
 0x5ba   : > { %v5495_v52 = vpop.f32.mrb[118].mxu0 }
 0x5bb   : > { %v12517_v55 = vadd.f32 %v5495_v52, %v5271_v16  ;;  %v5497_v17 = vpop.f32.mrb[119].mxu0  ;;  %v5890_v52 = vld [vmem:[#allocation3 + $0x10] sm:$0xff] }
 0x5be   : > { %v5500_v62 = vpop.f32.mrb[120].mxu0 }
 0x5bf   : > { %v12520_v38 = vadd.f32 %v5500_v62, %v5276_v39  ;;  %v5502_v35 = vpop.f32.mrb[121].mxu0  ;;  %v5858_v39 = vmul.f32 0.6666667, %v5826_v51 }
 0x5c2   : > { %v5505_v57 = vpop.f32.mrb[122].mxu0 }
 0x5c3   : > { %v12523_v34 = vadd.f32 %v5505_v57, %v5281_v43  ;;  %v5507_v9 = vpop.f32.mrb[123].mxu0 }
 0x5c6   : > { %v5510_v13 = vpop.f32.mrb[124].mxu0 }
 0x5c7   : > { %v12526_v29 = vadd.f32 %v5510_v13, %v5286_v56  ;;  %v5512_v44 = vpop.f32.mrb[125].mxu0 }
 0x5c8   : > { %v6019_v44 = vld [vmem:[%s8400_s11 + $0x18] sm:$0xff] }
 0x5ca   : > { %v5515_v32 = vpop.f32.mrb[126].mxu0 }
 0x5cb   : > { %v12529_v15 = vadd.f32 %v5515_v32, %v5291_v33  ;;  %v5517_v45 = vpop.f32.mrb[127].mxu0  ;;  %v5829_v32 = vld [vmem:[#allocation4 + $0x28] sm:$0xff] }
 0x5cc   : > { %v5893_v45 = vld [vmem:[#allocation3 + $0x28] sm:$0xff] }
 0x5ce   : > { %v5520_v0 = vpop.f32.mrb[128].mxu0 }
 0x5cf   : > { %v12532_v50 = vadd.f32 %v5520_v0, %v5296_v14  ;;  %v5522_v42 = vpop.f32.mrb[129].mxu0 }
 0x5d2   : > { %v5525_v3 = vpop.f32.mrb[130].mxu0 }
 0x5d3   : > { %v12535_v58 = vadd.f32 %v5525_v3, %v5301_v53  ;;  %v5527_v49 = vpop.f32.mrb[131].mxu0  ;;  %v6018_v53 = vld [vmem:[%s8400_s11 + $0x10] sm:$0xff] }
 0x5d4   : > { %v5828_v3 = vld [vmem:[#allocation4 + $0x20] sm:$0xff] }
 0x5d5   : > { %v5892_v49 = vld [vmem:[#allocation3 + $0x20] sm:$0xff] }
 0x5d6   : > { %v6718_v27 = vpop.f32.mrb[132].mxu0 }
 0x5d7   : > { %v5671_v18 = vadd.f32 %v6718_v27, %v12487_v63  ;;  %v5665_v30 = vpop.f32.mrb[133].mxu0 }
 0x5d8   : > { %v5666_v8 = vadd.f32 %v5665_v30, %v12484_v12  ;;  %v5827_v12 = vld [vmem:[#allocation4 + $0x18] sm:$0xff] }
 0x5d9   : > { %v5921_v19 = vadd.f32 %v5889_v10, %v5671_v18  ;;  %v5859_v43 = vmul.f32 0.6666667, %v5827_v12  ;;  %v5895_v30 = vld [vmem:[#allocation3 + $0x38] sm:$0xff]  ;;  %v5861_v10 = vmul.f32 0.6666667, %v5829_v32  ;;  %v5830_v12 = vld [vmem:[#allocation4 + $0x30] sm:$0xff] }
 0x5da   : > { %v5920_v31 = vadd.f32 %v5888_v61, %v5666_v8  ;;  %v6721_v21 = vpop.f32.mrb[134].mxu0  ;;  %v5832_v32 = vld [vmem:[#allocation4 + $0x40] sm:$0xff] }
 0x5db   : > { %v5953_v24 = vmul.f32 0.16666667, %v5921_v19  ;;  %v5681_v63 = vadd.f32 %v6721_v21, %v12493_v60  ;;  %v5675_v37 = vpop.f32.mrb[135].mxu0  ;;  %v5860_v21 = vmul.f32 0.6666667, %v5828_v3 }
 0x5dc   : > { %v12545_v1 = vpop.f32.mrb[132].mxu1  ;;  %v5952_v40 = vmul.f32 0.16666667, %v5920_v31  ;;  %v5676_v4 = vadd.f32 %v5675_v37, %v12490_v6  ;;  %v6021_v31 = vld [vmem:[%s8400_s11 + $0x28] sm:$0xff] }
 0x5dd   : > { %v5532_v46 = vpop.f32.mrb[133].mxu1  ;;  %v5985_v25 = vadd.f32 %v5953_v24, %v5857_v28  ;;  %v5923_v16 = vadd.f32 %v5891_v7, %v5681_v63  ;;  %v5894_v7 = vld [vmem:[#allocation3 + $0x30] sm:$0xff] }
 0x5de   : > { %v5984_v17 = vadd.f32 %v5952_v40, %v5856_v23  ;;  %v5922_v60 = vadd.f32 %v5890_v52, %v5676_v4  ;;  %v6724_v62 = vpop.f32.mrb[136].mxu0 }
 0x5df   : > { %v6049_v35 = vadd.f32 %v6017_v59, %v5985_v25  ;;  %v5955_v57 = vmul.f32 0.16666667, %v5923_v16  ;;  %v5691_v9 = vadd.f32 %v6724_v62, %v12499_v48  ;;  %v5685_v6 = vpop.f32.mrb[137].mxu0  ;;  %v6020_v59 = vld [vmem:[%s8400_s11 + $0x20] sm:$0xff]  ;;  %v5833_v25 = vld [vmem:[#allocation4 + $0x48] sm:$0xff] }
 0x5e0   : > { %v12551_v56 = vpop.f32.mrb[134].mxu1  ;;  %v6048_v13 = vadd.f32 %v6016_v20, %v5984_v17  ;;  %v5954_v33 = vmul.f32 0.16666667, %v5922_v60  ;;  %v5686_v14 = vadd.f32 %v5685_v6, %v12496_v22  ;;  %v5831_v22 = vld [vmem:[#allocation4 + $0x38] sm:$0xff]  ;;  %v5897_v20 = vld [vmem:[#allocation3 + $0x48] sm:$0xff] }
 0x5e1   : > { %v5537_v0 = vpop.f32.mrb[135].mxu1  ;;  %6081 = vst.msk [vmem:[%s12556_s20 + $0x8] sm:$0xff] %vm196_vm0, %v6049_v35  ;;  %v5987_v42 = vadd.f32 %v5955_v57, %v5859_v43  ;;  %v5925_v48 = vadd.f32 %v5893_v45, %v5691_v9  ;;  %v6023_v35 = vld [vmem:[%s8400_s11 + $0x38] sm:$0xff]  ;;  %v5862_v43 = vmul.f32 0.6666667, %v5830_v12  ;;  %v5896_v45 = vld [vmem:[#allocation3 + $0x40] sm:$0xff] }
 0x5e2   : > { %6080 = vst.msk [vmem:[%s12556_s20] sm:$0xff] %vm196_vm0, %v6048_v13  ;;  %v5986_v27 = vadd.f32 %v5954_v33, %v5858_v39  ;;  %v5924_v18 = vadd.f32 %v5892_v49, %v5686_v14  ;;  %v6727_v11 = vpop.f32.mrb[138].mxu0 }
 0x5e3   : > { %v6051_v47 = vadd.f32 %v6019_v44, %v5987_v42  ;;  %v5957_v8 = vmul.f32 0.16666667, %v5925_v48  ;;  %v5701_v19 = vadd.f32 %v6727_v11, %v12505_v26  ;;  %v5695_v28 = vpop.f32.mrb[139].mxu0  ;;  %v6022_v44 = vld [vmem:[%s8400_s11 + $0x30] sm:$0xff]  ;;  %v5835_v42 = vld [vmem:[#allocation4 + $0x58] sm:$0xff] }
 0x5e4   : > { %v12564_v61 = vpop.f32.mrb[136].mxu1  ;;  %v6050_v23 = vadd.f32 %v6018_v53, %v5986_v27  ;;  %v5956_v24 = vmul.f32 0.16666667, %v5924_v18  ;;  %v5696_v63 = vadd.f32 %v5695_v28, %v12502_v2  ;;  %v5863_v2 = vmul.f32 0.6666667, %v5831_v22  ;;  %v5899_v53 = vld [vmem:[#allocation3 + $0x58] sm:$0xff] }
 0x5e5   : > { %v5542_v37 = vpop.f32.mrb[137].mxu1  ;;  %6083 = vst.msk [vmem:[%s12556_s20 + $0x18] sm:$0xff] %vm196_vm0, %v6051_v47  ;;  %v5989_v51 = vadd.f32 %v5957_v8, %v5861_v10  ;;  %v5927_v40 = vadd.f32 %v5895_v30, %v5701_v19  ;;  %v6025_v22 = vld [vmem:[%s8400_s11 + $0x48] sm:$0xff]  ;;  %v5864_v30 = vmul.f32 0.6666667, %v5832_v32  ;;  %v6024_v28 = vld [vmem:[%s8400_s11 + $0x40] sm:$0xff] }
 0x5e6   : > { %6082 = vst.msk [vmem:[%s12556_s20 + $0x10] sm:$0xff] %vm196_vm0, %v6050_v23  ;;  %v5988_v26 = vadd.f32 %v5956_v24, %v5860_v21  ;;  %v5926_v4 = vadd.f32 %v5894_v7, %v5696_v63  ;;  %v6730_v46 = vpop.f32.mrb[140].mxu0  ;;  %v5898_v21 = vld [vmem:[#allocation3 + $0x50] sm:$0xff]  ;;  %v5837_v37 = vld [vmem:[#allocation4 + $0x68] sm:$0xff] }
 0x5e7   : > { %v6053_v16 = vadd.f32 %v6021_v31, %v5989_v51  ;;  %v5959_v52 = vmul.f32 0.16666667, %v5927_v40  ;;  %v5711_v17 = vadd.f32 %v6730_v46, %v12511_v41  ;;  %v5705_v60 = vpop.f32.mrb[141].mxu0  ;;  %v5834_v31 = vld [vmem:[#allocation4 + $0x50] sm:$0xff]  ;;  %v5901_v51 = vld [vmem:[#allocation3 + $0x68] sm:$0xff] }
 0x5e8   : > { %v12574_v39 = vpop.f32.mrb[138].mxu1  ;;  %v6052_v62 = vadd.f32 %v6020_v59, %v5988_v26  ;;  %v5958_v57 = vmul.f32 0.16666667, %v5926_v4  ;;  %v5706_v9 = vadd.f32 %v5705_v60, %v12508_v5  ;;  %v5865_v5 = vmul.f32 0.6666667, %v5833_v25  ;;  %v6027_v46 = vld [vmem:[%s8400_s11 + $0x58] sm:$0xff] }
 0x5e9   : > { %v5547_v6 = vpop.f32.mrb[139].mxu1  ;;  %6085 = vst.msk [vmem:[%s12556_s20 + $0x28] sm:$0xff] %vm196_vm0, %v6053_v16  ;;  %v5991_v13 = vadd.f32 %v5959_v52, %v5863_v2  ;;  %v5929_v33 = vadd.f32 %v5897_v20, %v5711_v17  ;;  %v5866_v25 = vmul.f32 0.6666667, %v5834_v31  ;;  %v6026_v17 = vld [vmem:[%s8400_s11 + $0x50] sm:$0xff] }
 0x5ea   : > { %6084 = vst.msk [vmem:[%s12556_s20 + $0x20] sm:$0xff] %vm196_vm0, %v6052_v62  ;;  %v5990_v41 = vadd.f32 %v5958_v57, %v5862_v43  ;;  %v5928_v14 = vadd.f32 %v5896_v45, %v5706_v9  ;;  %v6733_v0 = vpop.f32.mrb[142].mxu0  ;;  %v5836_v62 = vld [vmem:[#allocation4 + $0x60] sm:$0xff]  ;;  %v5839_v9 = vld [vmem:[#allocation4 + $0x78] sm:$0xff] }
 0x5eb   : > { %v6055_v48 = vadd.f32 %v6023_v35, %v5991_v13  ;;  %v5961_v3 = vmul.f32 0.16666667, %v5929_v33  ;;  %v5721_v49 = vadd.f32 %v6733_v0, %v12517_v55  ;;  %v5715_v18 = vpop.f32.mrb[143].mxu0  ;;  %v5900_v35 = vld [vmem:[#allocation3 + $0x60] sm:$0xff]  ;;  %v5903_v6 = vld [vmem:[#allocation3 + $0x78] sm:$0xff] }
 0x5ec   : > { %v12584_v27 = vpop.f32.mrb[140].mxu1  ;;  %v6054_v11 = vadd.f32 %v6022_v44, %v5990_v41  ;;  %v5960_v47 = vmul.f32 0.16666667, %v5928_v14  ;;  %v5716_v10 = vadd.f32 %v5715_v18, %v12514_v54  ;;  %v5867_v54 = vmul.f32 0.6666667, %v5835_v42  ;;  %v6029_v14 = vld [vmem:[%s8400_s11 + $0x68] sm:$0xff] }
 0x5ed   : > { %v5552_v8 = vpop.f32.mrb[141].mxu1  ;;  %6087 = vst.msk [vmem:[%s12556_s20 + $0x38] sm:$0xff] %vm196_vm0, %v6055_v48  ;;  %v5993_v19 = vadd.f32 %v5961_v3, %v5865_v5  ;;  %v5931_v23 = vadd.f32 %v5899_v53, %v5721_v49  ;;  %v5868_v0 = vmul.f32 0.6666667, %v5836_v62  ;;  %v6028_v3 = vld [vmem:[%s8400_s11 + $0x60] sm:$0xff] }
 0x5ee   : > { %6086 = vst.msk [vmem:[%s12556_s20 + $0x30] sm:$0xff] %vm196_vm0, %v6054_v11  ;;  %v5992_v55 = vadd.f32 %v5960_v47, %v5864_v30  ;;  %v5930_v24 = vadd.f32 %v5898_v21, %v5716_v10  ;;  %v6736_v63 = vpop.f32.mrb[144].mxu0  ;;  %v5838_v18 = vld [vmem:[#allocation4 + $0x70] sm:$0xff]  ;;  %v5841_v47 = vld [vmem:[#allocation4 + $0x88] sm:$0xff] }
 0x5ef   : > { %v6057_v59 = vadd.f32 %v6025_v22, %v5993_v19  ;;  %v5963_v40 = vmul.f32 0.16666667, %v5931_v23  ;;  %v5731_v12 = vadd.f32 %v6736_v63, %v12523_v34  ;;  %v5725_v26 = vpop.f32.mrb[145].mxu0  ;;  %v5902_v11 = vld [vmem:[#allocation3 + $0x70] sm:$0xff]  ;;  %v5905_v10 = vld [vmem:[#allocation3 + $0x88] sm:$0xff] }
 0x5f0   : > { %v12594_v7 = vpop.f32.mrb[142].mxu1  ;;  %v6056_v4 = vadd.f32 %v6024_v28, %v5992_v55  ;;  %v5962_v20 = vmul.f32 0.16666667, %v5930_v24  ;;  %v5726_v16 = vadd.f32 %v5725_v26, %v12520_v38  ;;  %v5869_v38 = vmul.f32 0.6666667, %v5837_v37  ;;  %v6031_v55 = vld [vmem:[%s8400_s11 + $0x78] sm:$0xff] }
 0x5f1   : > { %v5557_v2 = vpop.f32.mrb[143].mxu1  ;;  %6089 = vst.msk [vmem:[%s12556_s20 + $0x48] sm:$0xff] %vm196_vm0, %v6057_v59  ;;  %v5995_v52 = vadd.f32 %v5963_v40, %v5867_v54  ;;  %v5933_v60 = vadd.f32 %v5901_v51, %v5731_v12  ;;  %v5870_v24 = vmul.f32 0.6666667, %v5838_v18  ;;  %v7233_v59 = vadd.f32 %v12481_v36, %v12551_v56  ;;  %v6030_v40 = vld [vmem:[%s8400_s11 + $0x70] sm:$0xff] }
 0x5f2   : > { %6088 = vst.msk [vmem:[%s12556_s20 + $0x40] sm:$0xff] %vm196_vm0, %v6056_v4  ;;  %v5994_v34 = vadd.f32 %v5962_v20, %v5866_v25  ;;  %v5932_v43 = vadd.f32 %v5900_v35, %v5726_v16  ;;  %v6739_v57 = vpop.f32.mrb[146].mxu0  ;;  %v5904_v26 = vld [vmem:[#allocation3 + $0x80] sm:$0xff]  ;;  %v7232_v4 = vadd.f32 %v12481_v36, %v12545_v1  ;;  %v5843_v20 = vld [vmem:[#allocation4 + $0x98] sm:$0xff]  ;;  %v5873_v2 = vmul.f32 0.6666667, %v5841_v47 }
 0x5f3   : > { %v6059_v13 = vadd.f32 %v6027_v46, %v5995_v52  ;;  %v5965_v44 = vmul.f32 0.16666667, %v5933_v60  ;;  %v5741_v33 = vadd.f32 %v6739_v57, %v12529_v15  ;;  %v5735_v45 = vpop.f32.mrb[147].mxu0  ;;  %v5907_v16 = vld [vmem:[#allocation3 + $0x98] sm:$0xff] }
 0x5f4   : > { %v12604_v32 = vpop.f32.mrb[144].mxu1  ;;  %v6058_v41 = vadd.f32 %v6026_v17, %v5994_v34  ;;  %v5964_v42 = vmul.f32 0.16666667, %v5932_v43  ;;  %v5736_v53 = vadd.f32 %v5735_v45, %v12526_v29  ;;  %v5871_v29 = vmul.f32 0.6666667, %v5839_v9  ;;  %v6033_v34 = vld [vmem:[%s8400_s11 + $0x88] sm:$0xff] }
 0x5f5   : > { %v5562_v48 = vpop.f32.mrb[145].mxu1  ;;  %6091 = vst.msk [vmem:[%s12556_s20 + $0x58] sm:$0xff] %vm196_vm0, %v6059_v13  ;;  %v5997_v5 = vadd.f32 %v5965_v44, %v5869_v38  ;;  %v5935_v49 = vadd.f32 %v5903_v6, %v5741_v33  ;;  %v7235_v6 = vadd.f32 %v12481_v36, %v12574_v39  ;;  %v6032_v38 = vld [vmem:[%s8400_s11 + $0x80] sm:$0xff] }
 0x5f6   : > { %6090 = vst.msk [vmem:[%s12556_s20 + $0x50] sm:$0xff] %vm196_vm0, %v6058_v41  ;;  %v5996_v15 = vadd.f32 %v5964_v42, %v5868_v0  ;;  %v5934_v22 = vadd.f32 %v5902_v11, %v5736_v53  ;;  %v6742_v30 = vpop.f32.mrb[148].mxu0  ;;  %v5842_v33 = vld [vmem:[#allocation4 + $0x90] sm:$0xff]  ;;  %v7234_v41 = vadd.f32 %v12481_v36, %v12564_v61  ;;  %v5845_v53 = vld [vmem:[#allocation4 + $0xa8] sm:$0xff] }
 0x5f7   : > { %v6061_v8 = vadd.f32 %v6029_v14, %v5997_v5  ;;  %v5967_v19 = vmul.f32 0.16666667, %v5935_v49  ;;  %v5751_v28 = vadd.f32 %v6742_v30, %v12535_v58  ;;  %v5745_v31 = vpop.f32.mrb[149].mxu0  ;;  %v5840_v58 = vld [vmem:[#allocation4 + $0x80] sm:$0xff]  ;;  %v5906_v45 = vld [vmem:[#allocation3 + $0x90] sm:$0xff]  ;;  %v5909_v48 = vld [vmem:[#allocation3 + $0xa8] sm:$0xff] }
 0x5f8   : > { %v12614_v23 = vpop.f32.mrb[146].mxu1  ;;  %v6060_v21 = vadd.f32 %v6028_v3, %v5996_v15  ;;  %v5966_v63 = vmul.f32 0.16666667, %v5934_v22  ;;  %v5746_v37 = vadd.f32 %v5745_v31, %v12532_v50  ;;  %v5872_v1 = vmul.f32 0.6666667, %v5840_v58  ;;  %v6035_v22 = vld [vmem:[%s8400_s11 + $0x98] sm:$0xff] }
 0x5f9   : > { %v5567_v51 = vpop.f32.mrb[147].mxu1  ;;  %6093 = vst.msk [vmem:[%s12556_s20 + $0x68] sm:$0xff] %vm196_vm0, %v6061_v8  ;;  %v5999_v54 = vadd.f32 %v5967_v19, %v5871_v29  ;;  %v5937_v12 = vadd.f32 %v5905_v10, %v5751_v28  ;;  %v5875_v5 = vmul.f32 0.6666667, %v5843_v20  ;;  %v5874_v30 = vmul.f32 0.6666667, %v5842_v33 }
 0x5fa   : > { %6092 = vst.msk [vmem:[%s12556_s20 + $0x60] sm:$0xff] %vm196_vm0, %v6060_v21  ;;  %v5998_v46 = vadd.f32 %v5966_v63, %v5870_v24  ;;  %v5936_v25 = vadd.f32 %v5904_v26, %v5746_v37  ;;  %v6745_v50 = vpop.f32.mrb[150].mxu0  ;;  %v7237_v8 = vadd.f32 %v12481_v36, %v12594_v7  ;;  %v6034_v19 = vld [vmem:[%s8400_s11 + $0x90] sm:$0xff]  ;;  %v5847_v51 = vld [vmem:[#allocation4 + $0xb8] sm:$0xff] }
 0x5fb   : > { %v6063_v56 = vadd.f32 %v6031_v55, %v5999_v54  ;;  %v5969_v52 = vmul.f32 0.16666667, %v5937_v12  ;;  %v5761_v17 = vadd.f32 %v7233_v59, %v6745_v50  ;;  %v5755_v62 = vpop.f32.mrb[151].mxu0  ;;  %v5844_v31 = vld [vmem:[#allocation4 + $0xa0] sm:$0xff]  ;;  %v7236_v55 = vadd.f32 %v12481_v36, %v12584_v27  ;;  %v5911_v59 = vld [vmem:[#allocation3 + $0xb8] sm:$0xff] }
 0x5fc   : > { %v12627_v60 = vpop.f32.mrb[148].mxu1  ;;  %v6062_v35 = vadd.f32 %v6030_v40, %v5998_v46  ;;  %v5968_v43 = vmul.f32 0.16666667, %v5936_v25  ;;  %v5756_v57 = vadd.f32 %v7232_v4, %v5755_v62  ;;  %v5908_v21 = vld [vmem:[#allocation3 + $0xa0] sm:$0xff]  ;;  %v5877_v54 = vmul.f32 0.6666667, %v5845_v53 }
 0x5fd   : > { %v5572_v9 = vpop.f32.mrb[149].mxu1  ;;  %6095 = vst.msk [vmem:[%s12556_s20 + $0x78] sm:$0xff] %vm196_vm0, %v6063_v56  ;;  %v6001_v13 = vadd.f32 %v5969_v52, %v5873_v2  ;;  %v5939_v44 = vadd.f32 %v5907_v16, %v5761_v17  ;;  %v6037_v46 = vld [vmem:[%s8400_s11 + $0xa8] sm:$0xff]  ;;  %v5876_v27 = vmul.f32 0.6666667, %v5844_v31  ;;  %v7239_v16 = vadd.f32 %v12481_v36, %v12614_v23  ;;  %v6036_v2 = vld [vmem:[%s8400_s11 + $0xa0] sm:$0xff] }
 0x5fe   : > { %6094 = vst.msk [vmem:[%s12556_s20 + $0x70] sm:$0xff] %vm196_vm0, %v6062_v35  ;;  %v6000_v14 = vadd.f32 %v5968_v43, %v5872_v1  ;;  %v5938_v0 = vadd.f32 %v5906_v45, %v5756_v57  ;;  %v6748_v42 = vpop.f32.mrb[152].mxu0  ;;  %v5846_v17 = vld [vmem:[#allocation4 + $0xb0] sm:$0xff]  ;;  %v7238_v35 = vadd.f32 %v12481_v36, %v12604_v32  ;;  %v5849_v57 = vld [vmem:[#allocation4 + $0xc8] sm:$0xff] }
 0x5ff   : > { %v6065_v39 = vadd.f32 %v6033_v34, %v6001_v13  ;;  %v5971_v3 = vmul.f32 0.16666667, %v5939_v44  ;;  %v5771_v49 = vadd.f32 %v7235_v6, %v6748_v42  ;;  %v5765_v11 = vpop.f32.mrb[153].mxu0  ;;  %v5910_v62 = vld [vmem:[#allocation3 + $0xb0] sm:$0xff]  ;;  %v5913_v9 = vld [vmem:[#allocation3 + $0xc8] sm:$0xff] }
 0x600   : > { %v5575_v18 = vpop.f32.mrb[150].mxu1  ;;  %v6064_v15 = vadd.f32 %v6032_v38, %v6000_v14  ;;  %v5970_v61 = vmul.f32 0.16666667, %v5938_v0  ;;  %v5766_v47 = vadd.f32 %v7234_v41, %v5765_v11  ;;  %v5879_v6 = vmul.f32 0.6666667, %v5847_v51  ;;  %v6039_v41 = vld [vmem:[%s8400_s11 + $0xb8] sm:$0xff] }
 0x601   : > { %v5577_v10 = vpop.f32.mrb[151].mxu1  ;;  %6097 = vst.msk [vmem:[%s12556_s20 + $0x88] sm:$0xff] %vm196_vm0, %v6065_v39  ;;  %v6003_v29 = vadd.f32 %v5971_v3, %v5875_v5  ;;  %v5941_v28 = vadd.f32 %v5909_v48, %v5771_v49  ;;  %v5878_v14 = vmul.f32 0.6666667, %v5846_v17  ;;  %v7241_v53 = vadd.f32 %v12481_v36, %v5575_v18  ;;  %v6038_v39 = vld [vmem:[%s8400_s11 + $0xb0] sm:$0xff]  ;;  %v6043_v17 = vld [vmem:[%s8400_s11 + $0xd8] sm:$0xff] }
 0x602   : > { %6096 = vst.msk [vmem:[%s12556_s20 + $0x80] sm:$0xff] %vm196_vm0, %v6064_v15  ;;  %v6002_v24 = vadd.f32 %v5970_v61, %v5874_v30  ;;  %v5940_v63 = vadd.f32 %v5908_v21, %v5766_v47  ;;  %v6751_v37 = vpop.f32.mrb[154].mxu0  ;;  %v5848_v3 = vld [vmem:[#allocation4 + $0xc0] sm:$0xff]  ;;  %v7240_v11 = vadd.f32 %v12481_v36, %v12627_v60  ;;  %v5851_v61 = vld [vmem:[#allocation4 + $0xd8] sm:$0xff]  ;;  %v5850_v10 = vld [vmem:[#allocation4 + $0xd0] sm:$0xff] }
 0x603   : > { %v6067_v7 = vadd.f32 %v6035_v22, %v6003_v29  ;;  %v5973_v40 = vmul.f32 0.16666667, %v5941_v28  ;;  %v5781_v12 = vadd.f32 %v7237_v8, %v6751_v37  ;;  %v5775_v26 = vpop.f32.mrb[155].mxu0  ;;  %v5912_v49 = vld [vmem:[#allocation3 + $0xc0] sm:$0xff]  ;;  %v5915_v47 = vld [vmem:[#allocation3 + $0xd8] sm:$0xff] }
 0x604   : > { %v12649_v58 = vpop.f32.mrb[152].mxu1  ;;  %v6066_v4 = vadd.f32 %v6034_v19, %v6002_v24  ;;  %v5972_v25 = vmul.f32 0.16666667, %v5940_v63  ;;  %v5776_v50 = vadd.f32 %v7236_v55, %v5775_v26  ;;  %v5881_v8 = vmul.f32 0.6666667, %v5849_v57  ;;  %v6041_v55 = vld [vmem:[%s8400_s11 + $0xc8] sm:$0xff] }
 0x605   : > { %v5582_v20 = vpop.f32.mrb[153].mxu1  ;;  %6099 = vst.msk [vmem:[%s12556_s20 + $0x98] sm:$0xff] %vm196_vm0, %v6067_v7  ;;  %v6005_v56 = vadd.f32 %v5973_v40, %v5877_v54  ;;  %v5943_v52 = vadd.f32 %v5911_v59, %v5781_v12  ;;  %v5880_v60 = vmul.f32 0.6666667, %v5848_v3  ;;  %v6040_v7 = vld [vmem:[%s8400_s11 + $0xc0] sm:$0xff]  ;;  %v7242_v12 = vadd.f32 %v12481_v36, %v12649_v58  ;;  %v5917_v58 = vld [vmem:[#allocation3 + $0xe8] sm:$0xff] }
 0x606   : > { %6098 = vst.msk [vmem:[%s12556_s20 + $0x90] sm:$0xff] %vm196_vm0, %v6066_v4  ;;  %v6004_v34 = vadd.f32 %v5972_v25, %v5876_v27  ;;  %v5942_v1 = vadd.f32 %v5910_v62, %v5776_v50  ;;  %v6754_v43 = vpop.f32.mrb[156].mxu0  ;;  %v5914_v40 = vld [vmem:[#allocation3 + $0xd0] sm:$0xff]  ;;  %v5883_v4 = vmul.f32 0.6666667, %v5851_v61 }
 0x607   : > { %v6069_v23 = vadd.f32 %v6037_v46, %v6005_v56  ;;  %v5975_v13 = vmul.f32 0.16666667, %v5943_v52  ;;  %v5791_v38 = vadd.f32 %v7239_v16, %v6754_v43  ;;  %v5785_v33 = vpop.f32.mrb[157].mxu0  ;;  %v5882_v20 = vmul.f32 0.6666667, %v5850_v10  ;;  %v5918_v61 = vld [vmem:[#allocation3 + $0xf0] sm:$0xff] }
 0x608   : > { %v5585_v44 = vpop.f32.mrb[154].mxu1  ;;  %v6068_v45 = vadd.f32 %v6036_v2, %v6004_v34  ;;  %v5974_v32 = vmul.f32 0.16666667, %v5942_v1  ;;  %v5786_v0 = vadd.f32 %v7238_v35, %v5785_v33  ;;  %v5853_v35 = vld [vmem:[#allocation4 + $0xe8] sm:$0xff] }
 0x609   : > { %v5587_v42 = vpop.f32.mrb[155].mxu1  ;;  %6101 = vst.msk [vmem:[%s12556_s20 + $0xa8] sm:$0xff] %vm196_vm0, %v6069_v23  ;;  %v6007_v48 = vadd.f32 %v5975_v13, %v5879_v6  ;;  %v5945_v5 = vadd.f32 %v5913_v9, %v5791_v38  ;;  %v7243_v59 = vadd.f32 %v12481_v36, %v5585_v44  ;;  %v6042_v9 = vld [vmem:[%s8400_s11 + $0xd0] sm:$0xff] }
 0x60a   : > { %6100 = vst.msk [vmem:[%s12556_s20 + $0xa0] sm:$0xff] %vm196_vm0, %v6068_v45  ;;  %v6006_v15 = vadd.f32 %v5974_v32, %v5878_v14  ;;  %v5944_v22 = vadd.f32 %v5912_v49, %v5786_v0  ;;  %v6757_v30 = vpop.f32.mrb[158].mxu0  ;;  %v5852_v6 = vld [vmem:[#allocation4 + $0xe0] sm:$0xff]  ;;  %v5885_v32 = vmul.f32 0.6666667, %v5853_v35 }
 0x60b   : > { %v6071_v18 = vadd.f32 %v6039_v41, %v6007_v48  ;;  %v5977_v29 = vmul.f32 0.16666667, %v5945_v5  ;;  %v5801_v19 = vadd.f32 %v7241_v53, %v6757_v30  ;;  %v5795_v31 = vpop.f32.mrb[159].mxu0  ;;  %v5916_v13 = vld [vmem:[#allocation3 + $0xe0] sm:$0xff]  ;;  %v5919_v41 = vld [vmem:[#allocation3 + $0xf8] sm:$0xff]  ;;  %v5854_v48 = vld [vmem:[#allocation4 + $0xf0] sm:$0xff] }
 0x60c   : > { %v5590_v28 = vpop.f32.mrb[156].mxu1  ;;  %v6070_v21 = vadd.f32 %v6038_v39, %v6006_v15  ;;  %v5976_v24 = vmul.f32 0.16666667, %v5944_v22  ;;  %v5796_v63 = vadd.f32 %v7240_v11, %v5795_v31  ;;  %v6045_v5 = vld [vmem:[%s8400_s11 + $0xe8] sm:$0xff]  ;;  %v5884_v3 = vmul.f32 0.6666667, %v5852_v6 }
 0x60d   : > { %v5592_v37 = vpop.f32.mrb[157].mxu1  ;;  %6103 = vst.msk [vmem:[%s12556_s20 + $0xb8] sm:$0xff] %vm196_vm0, %v6071_v18  ;;  %v6009_v51 = vadd.f32 %v5977_v29, %v5881_v8  ;;  %v5947_v54 = vadd.f32 %v5915_v47, %v5801_v19  ;;  %v7244_v38 = vadd.f32 %v12481_v36, %v5590_v28  ;;  %v5855_v11 = vld [vmem:[#allocation4 + $0xf8] sm:$0xff]  ;;  %v6044_v22 = vld [vmem:[%s8400_s11 + $0xe0] sm:$0xff]  ;;  %v5886_v19 = vmul.f32 0.6666667, %v5854_v48 }
 0x60e   : > { %6102 = vst.msk [vmem:[%s12556_s20 + $0xb0] sm:$0xff] %vm196_vm0, %v6070_v21  ;;  %v6008_v26 = vadd.f32 %v5976_v24, %v5880_v60  ;;  %v5946_v46 = vadd.f32 %v5914_v40, %v5796_v63  ;;  %v6760_v27 = vpop.f32.mrb[160].mxu0  ;;  %v5887_v8 = vmul.f32 0.6666667, %v5855_v11  ;;  %v6047_v31 = vld [vmem:[%s8400_s11 + $0xf8] sm:$0xff]  ;;  %v6046_v60 = vld [vmem:[%s8400_s11 + $0xf0] sm:$0xff] }
 0x60f   : > { %v6073_v25 = vadd.f32 %v6041_v55, %v6009_v51  ;;  %v5979_v50 = vmul.f32 0.16666667, %v5947_v54  ;;  %v5811_v16 = vadd.f32 %v7243_v59, %v6760_v27  ;;  %v5805_v2 = vpop.f32.mrb[161].mxu0  ;;  %s8152_s11 = scalar_lea.vmem %s12706_s8, 4096 }
 0x610   : > { %v5595_v56 = vpop.f32.mrb[158].mxu1  ;;  %v6072_v52 = vadd.f32 %v6040_v7, %v6008_v26  ;;  %v5978_v62 = vmul.f32 0.16666667, %v5946_v46  ;;  %v5806_v1 = vadd.f32 %v7242_v12, %v5805_v2  ;;  %p8153_p11 = scmp.ne.s32.totalorder %s12706_s8, %s8152_s11  ;;  %p8160_p1 = scmp.lt.s32.totalorder %s8158_s14, %s8152_s11 }
 0x611   : > { %v7245_v34 = vadd.f32 %v12481_v36, %v5595_v56  ;;  %v5597_v43 = vpop.f32.mrb[159].mxu1  ;;  %6105 = vst.msk [vmem:[%s12556_s20 + $0xc8] sm:$0xff] %vm196_vm0, %v6073_v25  ;;  %v6011_v57 = vadd.f32 %v5979_v50, %v5883_v4  ;;  %v5949_v23 = vadd.f32 %v5917_v58, %v5811_v16 }
 0x612   : > { %6104 = vst.msk [vmem:[%s12556_s20 + $0xc0] sm:$0xff] %vm196_vm0, %v6072_v52  ;;  %v6010_v44 = vadd.f32 %v5978_v62, %v5882_v20  ;;  %v5948_v33 = vadd.f32 %v5916_v13, %v5806_v1  ;;  %v6763_v45 = vpop.f32.mrb[162].mxu0  ;;  %p8154_p12 = pnand %p8153_p11, %p8285_p5  ;;  %p8161_p2 = por %p8160_p1, %p8159_p0 }
 0x613   : > { %v6075_v14 = vadd.f32 %v6043_v17, %v6011_v57  ;;  %v5981_v0 = vmul.f32 0.16666667, %v5949_v23  ;;  %v5821_v42 = vadd.f32 %v7245_v34, %v6763_v45  ;;  %v5815_v53 = vpop.f32.mrb[163].mxu0 }
 0x614   : > { %v6074_v39 = vadd.f32 %v6042_v9, %v6010_v44  ;;  %v5980_v49 = vmul.f32 0.16666667, %v5948_v33  ;;  %v5816_v36 = vadd.f32 %v7244_v38, %v5815_v53  ;;  %p8155_p13 = pneg %p8154_p12 }
 0x615   : > { %6107 = vst.msk [vmem:[%s12556_s20 + $0xd8] sm:$0xff] %vm196_vm0, %v6075_v14  ;;  %v6013_v15 = vadd.f32 %v5981_v0, %v5885_v32  ;;  %v5951_v30 = vadd.f32 %v5919_v41, %v5821_v42 }
 0x616   : > { %6106 = vst.msk [vmem:[%s12556_s20 + $0xd0] sm:$0xff] %vm196_vm0, %v6074_v39  ;;  %v6012_v47 = vadd.f32 %v5980_v49, %v5884_v3  ;;  %v5950_v10 = vadd.f32 %v5918_v61, %v5816_v36  ;;  %p8162_p3 = pnand %p8161_p2, %p8155_p13 }
 0x617   : > { %v6077_v18 = vadd.f32 %v6045_v5, %v6013_v15  ;;  %v5983_v29 = vmul.f32 0.16666667, %v5951_v30 }
 0x618   : > { %v6076_v28 = vadd.f32 %v6044_v22, %v6012_v47  ;;  %v5982_v21 = vmul.f32 0.16666667, %v5950_v10 }
 0x619   : > { %6109 = vst.msk [vmem:[%s12556_s20 + $0xe8] sm:$0xff] %vm196_vm0, %v6077_v18  ;;  %v6015_v55 = vadd.f32 %v5983_v29, %v5887_v8 }
 0x61a   : > { %6108 = vst.msk [vmem:[%s12556_s20 + $0xe0] sm:$0xff] %vm196_vm0, %v6076_v28  ;;  %v6014_v24 = vadd.f32 %v5982_v21, %v5886_v19 }
 0x61b   : > { %v6079_v63 = vadd.f32 %v6047_v31, %v6015_v55 }
 0x61c   : > { %v6078_v37 = vadd.f32 %v6046_v60, %v6014_v24 }
 0x61d   : > { %6111 = vst.msk [vmem:[%s12556_s20 + $0xf8] sm:$0xff] %vm196_vm0, %v6079_v63 }
 0x61e   : > { %6110 = vst.msk [vmem:[%s12556_s20 + $0xf0] sm:$0xff] %vm196_vm0, %v6078_v37 }
 0x61f   : > { %8165 = shalt.err (!%p8162_p3)
}
 0x620   : > { %s8166_s22 = scalar_lea.hbm %s12704_s7, 4096  ;;  %s8170_s28 = scalar_lea.hbm %s12759_s4, 8192 }
 0x621   : > { %p8167_p4 = scmp.ne.s32.totalorder %s12704_s7, %s8166_s22  ;;  %p8171_p9 = scmp.lt.u32.totalorder %s12704_s7, %s12759_s4 }
 0x622   : > { %p8172_p10 = scmp.lt.u32.totalorder %s8170_s28, %s8166_s22  ;;  %p8174_p12 = scmp.lt.u32.totalorder %s8166_s22, %s12704_s7 }
 0x623   : > { %p8168_p7 = pnand %p8167_p4, %p8285_p5 }
 0x624   : > { %p8173_p11 = por %p8172_p10, %p8171_p9 }
 0x625   : > { %p8169_p8 = pneg %p8168_p7 }
 0x626   : > { %p8175_p13 = por %p8174_p12, %p8173_p11 }
 0x628   : > { %p8176_p0 = pnand %p8175_p13, %p8169_p8 }
 0x62a   : > { %8179 = shalt.err (!%p8176_p0)
}
 0x62b   : > { %s8220_s5 = smov 128   ;;  %s8221_s20 = smov 8  }
 0x62c   : > { %7402 = dma.vmem_to_hbm [thread:$0]  (%p8285_p5), %s12706_s8, 4096, %s12704_s7, %s12714_s19, %s8220_s5, %s8220_s5, %s8221_s20  }
 0x62d PF: > { %p7408_p1 = scmp.ge.s32.totalorder %s8214_s18, 2  ;;  %s6141_s6 = sand.u32 1, %s8202_s15  }
 0x62e   : > { %s6142_s9 = scalar_lea.sflag [#allocation6], %s6141_s6 }
 0x62f   : > { %p7405_p2 = pnand %p7408_p1, %p8289_p6 }
 0x631   : > { %8197 = dma.done.wait (!%p7405_p2), %s6142_s9, 4096  }
 0x632   : > { %8199 = vsyncadd (!%p7405_p2), %s6142_s9, 4294963200  ;;  %p14_p3 = scmp.ge.s32.totalorder %s8272_s21, 4   ;;  %s13092_s15 = smov %s8206_s16 }
 0x633   : > { %s13093_s16 = smov %s8210_s17  ;;  %s13094_s17 = smov %s8283_s24 }
 0x634   : > { %s13095_s18 = smov %s8272_s21  ;;  %16 = sbr.rel (!%p14_p3) target bundleno = 3 (0x3), region = 78 }
 0x63b   :  { %6147 = vsyncpa [#allocation6], 1 }
 0x63c   :  { %6149 = vsyncpa [#allocation6 + $0x1], 1 }

</bundles_post_ra>
